<compile_context>
chip_gen: v7x
topology: tpu7x:2x2x1
jax: 0.10.0
libtpu: 0.0.40
codegen_flags: <defaults>
</compile_context>

<pallas_src>
import jax
import jax.numpy as jnp
from jax.experimental import pallas as pl
from jax.experimental.pallas import tpu as pltpu

NEG_SLOPE = 0.01  # torch.nn.functional.leaky_relu default
LANE = 128


def _leaky(x):
    return jnp.where(x >= 0.0, x, NEG_SLOPE * x)


# ---------------------------------------------------------------------------
# The single fused kernel
# ---------------------------------------------------------------------------
def _convnet_kernel(p1_ref, c1w_ref, c1b_ref, c2w_ref, c2b_ref,
                    f1w_ref, f1b_ref, f2w_ref, f2b_ref,
                    o_ref, y1_ref, a2_ref):
    f32 = jnp.float32
    B = y1_ref.shape[0]
    m = B * 12 * 16                       # rows per conv1-pool quadrant block

    # ---- conv1: im2col matmul + bias + leaky_relu + 2x2 max-pool ----------
    # p1 rows are grouped as 4 quadrant blocks of m rows, so pooling is a max
    # over aligned, static row blocks (bias/leaky commute with the max).
    pooled = None
    for q in range(4):
        a = jnp.dot(p1_ref[q * m:(q + 1) * m, :], c1w_ref[...],
                    preferred_element_type=f32)
        pooled = a if pooled is None else jnp.maximum(pooled, a)
    y1 = _leaky(pooled + c1b_ref[...])                        # (B*12*16, 128)
    # Store into the (B, 12, 16, 128) scratch with tile-aligned 16-row stores.
    for b in range(B):
        for h in range(12):
            r = (b * 12 + h) * 16
            y1_ref[b, h, :, :] = y1[r:r + 16, :]

    # ---- conv2: 25-tap accumulation over VMEM-resident conv1 windows ------
    # acc2 rows are ordered (b, oh, ow); each tap window is a contiguous
    # rectangular slice of the y1 scratch, flattened tile-exactly.
    acc2 = jnp.zeros((B * 64, LANE), f32)
    for t in range(25):
        ki, kj = t // 5, t % 5
        win = y1_ref[:, ki:ki + 8, kj:kj + 8, :]              # (B, 8, 8, 128)
        acc2 = acc2 + jnp.dot(win.reshape(B * 64, LANE), c2w_ref[t],
                              preferred_element_type=f32)
    acc2 = _leaky(acc2 + c2b_ref[...])
    a2_ref[...] = acc2.reshape(B, 8, 8, LANE)

    # ---- 2x2 max-pool fused into the fc1 block accumulation ---------------
    h1 = jnp.zeros((B, 256), f32)
    for s in range(16):
        ph, pw = s // 4, s % 4
        lhs = jnp.maximum(
            jnp.maximum(a2_ref[:, 2 * ph, 2 * pw, :],
                        a2_ref[:, 2 * ph, 2 * pw + 1, :]),
            jnp.maximum(a2_ref[:, 2 * ph + 1, 2 * pw, :],
                        a2_ref[:, 2 * ph + 1, 2 * pw + 1, :]))    # (B, 128)
        h1 = h1 + jnp.dot(lhs, f1w_ref[s], preferred_element_type=f32)
    h1 = _leaky(h1 + f1b_ref[...])

    # ---- fc2 ---------------------------------------------------------------
    o_ref[...] = (jnp.dot(h1, f2w_ref[...], preferred_element_type=f32)
                  + f2b_ref[...]).astype(o_ref.dtype)


# ---------------------------------------------------------------------------
# Plain-JAX glue: conv1 im2col, grouped by 2x2-pool quadrant, W padded 12->16
# ---------------------------------------------------------------------------
def build_conv1_patches(x):
    """x: (B, 28, 28, 3) NHWC -> (4*B*12*16, 75).

    Rows ordered (pool_quadrant, b, ph, pw_padded); pw padded 12 -> 16 with
    zero patches so the pooled conv1 map stores tile-aligned into VMEM.
    Feature order (ki, kj, c) matches the conv1 weight layout.
    """
    B = x.shape[0]
    cols = [x[:, i:i + 24, j:j + 24, :] for i in range(5) for j in range(5)]
    p = jnp.stack(cols, axis=-2)                       # (B, 24, 24, 25, 3)
    p = p.reshape(B, 12, 2, 12, 2, 75)                 # (B, ph, i2, pw, j2, K)
    p = p.transpose(2, 4, 0, 1, 3, 5)                  # (i2, j2, B, ph, pw, K)
    p = jnp.pad(p, ((0, 0),) * 4 + ((0, 4), (0, 0)))   # pw: 12 -> 16 (zeros)
    return p.reshape(4 * B * 12 * 16, 75)


# ---------------------------------------------------------------------------
# Forward pass
# ---------------------------------------------------------------------------
def convnet_forward(x, ep):
    B = x.shape[0]
    xh = x.transpose(0, 2, 3, 1).astype(jnp.float32)   # NHWC (B, 28, 28, 3)
    p1 = build_conv1_patches(xh)                       # (4*B*192, 75)

    vmem = pl.BlockSpec(memory_space=pltpu.MemorySpace.VMEM)
    out = pl.pallas_call(
        _convnet_kernel,
        out_shape=jax.ShapeDtypeStruct((B, LANE), jnp.float32),
        in_specs=[vmem] * 9,
        out_specs=vmem,
        scratch_shapes=[
            pltpu.VMEM((B, 12, 16, LANE), jnp.float32),   # pooled conv1 map
            pltpu.VMEM((B, 8, 8, LANE), jnp.float32),     # conv2 activations
        ],
    )(p1, ep["c1_w"], ep["c1_b"], ep["c2_w"], ep["c2_b"],
      ep["fc1_w"], ep["fc1_b"], ep["fc2_w"], ep["fc2_b"])
    return out[:, :2]                                   # drop padded columns


# ---------------------------------------------------------------------------
# Parameters: torch-layout init + one-time padded/permuted effective weights
# ---------------------------------------------------------------------------
def init_params(key):
    ks = jax.random.split(key, 8)

    def u(k, shape, fan_in):
        bound = 1.0 / jnp.sqrt(fan_in)
        return jax.random.uniform(k, shape, jnp.float32, -bound, bound)

    return {
        "conv1_w": u(ks[0], (20, 3, 5, 5), 3 * 5 * 5),
        "conv1_b": u(ks[1], (20,), 3 * 5 * 5),
        "conv2_w": u(ks[2], (50, 20, 5, 5), 20 * 5 * 5),
        "conv2_b": u(ks[3], (50,), 20 * 5 * 5),
        "fc1_w": u(ks[4], (256, 800), 800),   # torch Linear: (out, in)
        "fc1_b": u(ks[5], (256,), 800),
        "fc2_w": u(ks[6], (2, 256), 256),
        "fc2_b": u(ks[7], (2,), 256),
    }


def prepare_params(p):
    f32 = jnp.float32
    # conv1: (20,3,5,5) -> (KH,KW,IC,OC) -> (75,20) -> pad OC to 128 lanes
    c1 = p["conv1_w"].astype(f32).transpose(2, 3, 1, 0).reshape(75, 20)
    c1 = jnp.pad(c1, ((0, 0), (0, LANE - 20)))
    c1b = jnp.pad(p["conv1_b"].astype(f32), (0, LANE - 20)).reshape(1, LANE)
    # conv2: (50,20,5,5) -> (KH,KW,IC,OC) -> pad channels -> (25,128,128)
    c2 = p["conv2_w"].astype(f32).transpose(2, 3, 1, 0)          # (5,5,20,50)
    c2 = jnp.pad(c2, ((0, 0), (0, 0), (0, LANE - 20), (0, LANE - 50)))
    c2 = c2.reshape(25, LANE, LANE)
    c2b = jnp.pad(p["conv2_b"].astype(f32), (0, LANE - 50)).reshape(1, LANE)
    # fc1: torch columns ordered (c,h,w); kernel consumes per-(h,w) blocks of
    # padded channels -> (16, 128, 256)
    f1 = p["fc1_w"].astype(f32).reshape(256, 50, 4, 4).transpose(2, 3, 1, 0)
    f1 = jnp.pad(f1, ((0, 0), (0, 0), (0, LANE - 50), (0, 0)))   # (4,4,128,256)
    f1 = f1.reshape(16, LANE, 256)
    f1b = p["fc1_b"].astype(f32).reshape(1, 256)
    # fc2: (2,256) -> (256,2) -> pad N to 128 (zero cols, sliced off later)
    f2 = jnp.pad(p["fc2_w"].astype(f32).T, ((0, 0), (0, LANE - 2)))
    f2b = jnp.pad(p["fc2_b"].astype(f32), (0, LANE - 2)).reshape(1, LANE)
    return {"c1_w": c1, "c1_b": c1b, "c2_w": c2, "c2_b": c2b,
            "fc1_w": f1, "fc1_b": f1b, "fc2_w": f2, "fc2_b": f2b}


if __name__ == "__main__":
    root = jax.random.PRNGKey(0)
    k_x, k_p = jax.random.split(root)
    # 28x28 input is required by fc1's 4*4*50 = 800 features; batch = 2.
    x = jax.random.normal(k_x, (2, 3, 28, 28), jnp.float32)
    params = init_params(k_p)
    eparams = prepare_params(params)

    logits = jax.jit(convnet_forward)(x, eparams)
    jax.block_until_ready(logits)
    assert logits.shape == (2, 2), logits.shape
    assert logits.dtype == jnp.float32
    print("KERNEL_OK")
</pallas_src>

<mosaic_0001>
module attributes {stable_mosaic.version = 11 : i64} {
  func.func @_convnet_kernel(%arg0: memref<1536x75xf32, #tpu.memory_space<vmem>>, %arg1: memref<75x128xf32, #tpu.memory_space<vmem>>, %arg2: memref<1x128xf32, #tpu.memory_space<vmem>>, %arg3: memref<25x128x128xf32, #tpu.memory_space<vmem>>, %arg4: memref<1x128xf32, #tpu.memory_space<vmem>>, %arg5: memref<16x128x256xf32, #tpu.memory_space<vmem>>, %arg6: memref<1x256xf32, #tpu.memory_space<vmem>>, %arg7: memref<256x128xf32, #tpu.memory_space<vmem>>, %arg8: memref<1x128xf32, #tpu.memory_space<vmem>>, %arg9: memref<2x128xf32, #tpu.memory_space<vmem>>, %arg10: memref<2x12x16x128xf32, #tpu.memory_space<vmem>>, %arg11: memref<2x8x8x128xf32, #tpu.memory_space<vmem>>) attributes {dimension_semantics = [], scalar_prefetch = 0 : i64, scratch_operands = 2 : i64, tpu.core_type = #tpu.core_type<tc>} {
    %c0 = arith.constant 0 : index
    %c0_0 = arith.constant 0 : index
    %0 = vector.load %arg0[%c0, %c0_0] : memref<1536x75xf32, #tpu.memory_space<vmem>>, vector<384x75xf32>
    %c0_1 = arith.constant 0 : index
    %c0_2 = arith.constant 0 : index
    %1 = vector.load %arg1[%c0_1, %c0_2] : memref<75x128xf32, #tpu.memory_space<vmem>>, vector<75x128xf32>
    %cst = arith.constant dense<0.000000e+00> : vector<384x128xf32>
    %2 = tpu.matmul %0, %1, %cst {dimension_numbers = #tpu.dot_dimension_numbers<[1], [0], [0], [1], [0, 0, 1, 1], [], []>} : vector<384x75xf32>, vector<75x128xf32>, vector<384x128xf32> -> vector<384x128xf32>
    %c384 = arith.constant 384 : index
    %c0_3 = arith.constant 0 : index
    %3 = vector.load %arg0[%c384, %c0_3] : memref<1536x75xf32, #tpu.memory_space<vmem>>, vector<384x75xf32>
    %c0_4 = arith.constant 0 : index
    %c0_5 = arith.constant 0 : index
    %4 = vector.load %arg1[%c0_4, %c0_5] : memref<75x128xf32, #tpu.memory_space<vmem>>, vector<75x128xf32>
    %cst_6 = arith.constant dense<0.000000e+00> : vector<384x128xf32>
    %5 = tpu.matmul %3, %4, %cst_6 {dimension_numbers = #tpu.dot_dimension_numbers<[1], [0], [0], [1], [0, 0, 1, 1], [], []>} : vector<384x75xf32>, vector<75x128xf32>, vector<384x128xf32> -> vector<384x128xf32>
    %6 = arith.maximumf %2, %5 : vector<384x128xf32>
    %c768 = arith.constant 768 : index
    %c0_7 = arith.constant 0 : index
    %7 = vector.load %arg0[%c768, %c0_7] : memref<1536x75xf32, #tpu.memory_space<vmem>>, vector<384x75xf32>
    %c0_8 = arith.constant 0 : index
    %c0_9 = arith.constant 0 : index
    %8 = vector.load %arg1[%c0_8, %c0_9] : memref<75x128xf32, #tpu.memory_space<vmem>>, vector<75x128xf32>
    %cst_10 = arith.constant dense<0.000000e+00> : vector<384x128xf32>
    %9 = tpu.matmul %7, %8, %cst_10 {dimension_numbers = #tpu.dot_dimension_numbers<[1], [0], [0], [1], [0, 0, 1, 1], [], []>} : vector<384x75xf32>, vector<75x128xf32>, vector<384x128xf32> -> vector<384x128xf32>
    %10 = arith.maximumf %6, %9 : vector<384x128xf32>
    %c1152 = arith.constant 1152 : index
    %c0_11 = arith.constant 0 : index
    %11 = vector.load %arg0[%c1152, %c0_11] : memref<1536x75xf32, #tpu.memory_space<vmem>>, vector<384x75xf32>
    %c0_12 = arith.constant 0 : index
    %c0_13 = arith.constant 0 : index
    %12 = vector.load %arg1[%c0_12, %c0_13] : memref<75x128xf32, #tpu.memory_space<vmem>>, vector<75x128xf32>
    %cst_14 = arith.constant dense<0.000000e+00> : vector<384x128xf32>
    %13 = tpu.matmul %11, %12, %cst_14 {dimension_numbers = #tpu.dot_dimension_numbers<[1], [0], [0], [1], [0, 0, 1, 1], [], []>} : vector<384x75xf32>, vector<75x128xf32>, vector<384x128xf32> -> vector<384x128xf32>
    %14 = arith.maximumf %10, %13 : vector<384x128xf32>
    %c0_15 = arith.constant 0 : index
    %c0_16 = arith.constant 0 : index
    %15 = vector.load %arg2[%c0_15, %c0_16] : memref<1x128xf32, #tpu.memory_space<vmem>>, vector<1x128xf32>
    %16 = vector.broadcast %15 : vector<1x128xf32> to vector<384x128xf32>
    %17 = arith.addf %14, %16 : vector<384x128xf32>
    %cst_17 = arith.constant 0.000000e+00 : f32
    %18 = vector.broadcast %cst_17 : f32 to vector<384x128xf32>
    %19 = arith.cmpf oge, %17, %18 : vector<384x128xf32>
    %cst_18 = arith.constant 0.00999999977 : f32
    %20 = vector.broadcast %cst_18 : f32 to vector<384x128xf32>
    %21 = arith.mulf %20, %17 : vector<384x128xf32>
    %22 = arith.select %19, %17, %21 : vector<384x128xi1>, vector<384x128xf32>
    %23 = vector.extract_strided_slice %22 {offsets = [0, 0], sizes = [16, 128], strides = [1, 1]} : vector<384x128xf32> to vector<16x128xf32>
    %c0_19 = arith.constant 0 : index
    %c0_20 = arith.constant 0 : index
    %c0_21 = arith.constant 0 : index
    %c0_22 = arith.constant 0 : index
    %24 = vector.load %arg10[%c0_19, %c0_20, %c0_21, %c0_22] : memref<2x12x16x128xf32, #tpu.memory_space<vmem>>, vector<1x1x16x128xf32>
    %25 = vector.shape_cast %24 : vector<1x1x16x128xf32> to vector<16x128xf32>
    %26 = vector.shape_cast %23 : vector<16x128xf32> to vector<1x1x16x128xf32>
    tpu.vector_store %arg10[%c0_19, %c0_20, %c0_21, %c0_22], %26 {strides = array<i32>} : memref<2x12x16x128xf32, #tpu.memory_space<vmem>>, vector<1x1x16x128xf32>,
    %27 = vector.extract_strided_slice %22 {offsets = [16, 0], sizes = [16, 128], strides = [1, 1]} : vector<384x128xf32> to vector<16x128xf32>
    %c0_23 = arith.constant 0 : index
    %c1 = arith.constant 1 : index
    %c0_24 = arith.constant 0 : index
    %c0_25 = arith.constant 0 : index
    %28 = vector.load %arg10[%c0_23, %c1, %c0_24, %c0_25] : memref<2x12x16x128xf32, #tpu.memory_space<vmem>>, vector<1x1x16x128xf32>
    %29 = vector.shape_cast %28 : vector<1x1x16x128xf32> to vector<16x128xf32>
    %30 = vector.shape_cast %27 : vector<16x128xf32> to vector<1x1x16x128xf32>
    tpu.vector_store %arg10[%c0_23, %c1, %c0_24, %c0_25], %30 {strides = array<i32>} : memref<2x12x16x128xf32, #tpu.memory_space<vmem>>, vector<1x1x16x128xf32>,
    %31 = vector.extract_strided_slice %22 {offsets = [32, 0], sizes = [16, 128], strides = [1, 1]} : vector<384x128xf32> to vector<16x128xf32>
    %c0_26 = arith.constant 0 : index
    %c2 = arith.constant 2 : index
    %c0_27 = arith.constant 0 : index
    %c0_28 = arith.constant 0 : index
    %32 = vector.load %arg10[%c0_26, %c2, %c0_27, %c0_28] : memref<2x12x16x128xf32, #tpu.memory_space<vmem>>, vector<1x1x16x128xf32>
    %33 = vector.shape_cast %32 : vector<1x1x16x128xf32> to vector<16x128xf32>
    %34 = vector.shape_cast %31 : vector<16x128xf32> to vector<1x1x16x128xf32>
    tpu.vector_store %arg10[%c0_26, %c2, %c0_27, %c0_28], %34 {strides = array<i32>} : memref<2x12x16x128xf32, #tpu.memory_space<vmem>>, vector<1x1x16x128xf32>,
    %35 = vector.extract_strided_slice %22 {offsets = [48, 0], sizes = [16, 128], strides = [1, 1]} : vector<384x128xf32> to vector<16x128xf32>
    %c0_29 = arith.constant 0 : index
    %c3 = arith.constant 3 : index
    %c0_30 = arith.constant 0 : index
    %c0_31 = arith.constant 0 : index
    %36 = vector.load %arg10[%c0_29, %c3, %c0_30, %c0_31] : memref<2x12x16x128xf32, #tpu.memory_space<vmem>>, vector<1x1x16x128xf32>
    %37 = vector.shape_cast %36 : vector<1x1x16x128xf32> to vector<16x128xf32>
    %38 = vector.shape_cast %35 : vector<16x128xf32> to vector<1x1x16x128xf32>
    tpu.vector_store %arg10[%c0_29, %c3, %c0_30, %c0_31], %38 {strides = array<i32>} : memref<2x12x16x128xf32, #tpu.memory_space<vmem>>, vector<1x1x16x128xf32>,
    %39 = vector.extract_strided_slice %22 {offsets = [64, 0], sizes = [16, 128], strides = [1, 1]} : vector<384x128xf32> to vector<16x128xf32>
    %c0_32 = arith.constant 0 : index
    %c4 = arith.constant 4 : index
    %c0_33 = arith.constant 0 : index
    %c0_34 = arith.constant 0 : index
    %40 = vector.load %arg10[%c0_32, %c4, %c0_33, %c0_34] : memref<2x12x16x128xf32, #tpu.memory_space<vmem>>, vector<1x1x16x128xf32>
    %41 = vector.shape_cast %40 : vector<1x1x16x128xf32> to vector<16x128xf32>
    %42 = vector.shape_cast %39 : vector<16x128xf32> to vector<1x1x16x128xf32>
    tpu.vector_store %arg10[%c0_32, %c4, %c0_33, %c0_34], %42 {strides = array<i32>} : memref<2x12x16x128xf32, #tpu.memory_space<vmem>>, vector<1x1x16x128xf32>,
    %43 = vector.extract_strided_slice %22 {offsets = [80, 0], sizes = [16, 128], strides = [1, 1]} : vector<384x128xf32> to vector<16x128xf32>
    %c0_35 = arith.constant 0 : index
    %c5 = arith.constant 5 : index
    %c0_36 = arith.constant 0 : index
    %c0_37 = arith.constant 0 : index
    %44 = vector.load %arg10[%c0_35, %c5, %c0_36, %c0_37] : memref<2x12x16x128xf32, #tpu.memory_space<vmem>>, vector<1x1x16x128xf32>
    %45 = vector.shape_cast %44 : vector<1x1x16x128xf32> to vector<16x128xf32>
    %46 = vector.shape_cast %43 : vector<16x128xf32> to vector<1x1x16x128xf32>
    tpu.vector_store %arg10[%c0_35, %c5, %c0_36, %c0_37], %46 {strides = array<i32>} : memref<2x12x16x128xf32, #tpu.memory_space<vmem>>, vector<1x1x16x128xf32>,
    %47 = vector.extract_strided_slice %22 {offsets = [96, 0], sizes = [16, 128], strides = [1, 1]} : vector<384x128xf32> to vector<16x128xf32>
    %c0_38 = arith.constant 0 : index
    %c6 = arith.constant 6 : index
    %c0_39 = arith.constant 0 : index
    %c0_40 = arith.constant 0 : index
    %48 = vector.load %arg10[%c0_38, %c6, %c0_39, %c0_40] : memref<2x12x16x128xf32, #tpu.memory_space<vmem>>, vector<1x1x16x128xf32>
    %49 = vector.shape_cast %48 : vector<1x1x16x128xf32> to vector<16x128xf32>
    %50 = vector.shape_cast %47 : vector<16x128xf32> to vector<1x1x16x128xf32>
    tpu.vector_store %arg10[%c0_38, %c6, %c0_39, %c0_40], %50 {strides = array<i32>} : memref<2x12x16x128xf32, #tpu.memory_space<vmem>>, vector<1x1x16x128xf32>,
    %51 = vector.extract_strided_slice %22 {offsets = [112, 0], sizes = [16, 128], strides = [1, 1]} : vector<384x128xf32> to vector<16x128xf32>
    %c0_41 = arith.constant 0 : index
    %c7 = arith.constant 7 : index
    %c0_42 = arith.constant 0 : index
    %c0_43 = arith.constant 0 : index
    %52 = vector.load %arg10[%c0_41, %c7, %c0_42, %c0_43] : memref<2x12x16x128xf32, #tpu.memory_space<vmem>>, vector<1x1x16x128xf32>
    %53 = vector.shape_cast %52 : vector<1x1x16x128xf32> to vector<16x128xf32>
    %54 = vector.shape_cast %51 : vector<16x128xf32> to vector<1x1x16x128xf32>
    tpu.vector_store %arg10[%c0_41, %c7, %c0_42, %c0_43], %54 {strides = array<i32>} : memref<2x12x16x128xf32, #tpu.memory_space<vmem>>, vector<1x1x16x128xf32>,
    %55 = vector.extract_strided_slice %22 {offsets = [128, 0], sizes = [16, 128], strides = [1, 1]} : vector<384x128xf32> to vector<16x128xf32>
    %c0_44 = arith.constant 0 : index
    %c8 = arith.constant 8 : index
    %c0_45 = arith.constant 0 : index
    %c0_46 = arith.constant 0 : index
    %56 = vector.load %arg10[%c0_44, %c8, %c0_45, %c0_46] : memref<2x12x16x128xf32, #tpu.memory_space<vmem>>, vector<1x1x16x128xf32>
    %57 = vector.shape_cast %56 : vector<1x1x16x128xf32> to vector<16x128xf32>
    %58 = vector.shape_cast %55 : vector<16x128xf32> to vector<1x1x16x128xf32>
    tpu.vector_store %arg10[%c0_44, %c8, %c0_45, %c0_46], %58 {strides = array<i32>} : memref<2x12x16x128xf32, #tpu.memory_space<vmem>>, vector<1x1x16x128xf32>,
    %59 = vector.extract_strided_slice %22 {offsets = [144, 0], sizes = [16, 128], strides = [1, 1]} : vector<384x128xf32> to vector<16x128xf32>
    %c0_47 = arith.constant 0 : index
    %c9 = arith.constant 9 : index
    %c0_48 = arith.constant 0 : index
    %c0_49 = arith.constant 0 : index
    %60 = vector.load %arg10[%c0_47, %c9, %c0_48, %c0_49] : memref<2x12x16x128xf32, #tpu.memory_space<vmem>>, vector<1x1x16x128xf32>
    %61 = vector.shape_cast %60 : vector<1x1x16x128xf32> to vector<16x128xf32>
    %62 = vector.shape_cast %59 : vector<16x128xf32> to vector<1x1x16x128xf32>
    tpu.vector_store %arg10[%c0_47, %c9, %c0_48, %c0_49], %62 {strides = array<i32>} : memref<2x12x16x128xf32, #tpu.memory_space<vmem>>, vector<1x1x16x128xf32>,
    %63 = vector.extract_strided_slice %22 {offsets = [160, 0], sizes = [16, 128], strides = [1, 1]} : vector<384x128xf32> to vector<16x128xf32>
    %c0_50 = arith.constant 0 : index
    %c10 = arith.constant 10 : index
    %c0_51 = arith.constant 0 : index
    %c0_52 = arith.constant 0 : index
    %64 = vector.load %arg10[%c0_50, %c10, %c0_51, %c0_52] : memref<2x12x16x128xf32, #tpu.memory_space<vmem>>, vector<1x1x16x128xf32>
    %65 = vector.shape_cast %64 : vector<1x1x16x128xf32> to vector<16x128xf32>
    %66 = vector.shape_cast %63 : vector<16x128xf32> to vector<1x1x16x128xf32>
    tpu.vector_store %arg10[%c0_50, %c10, %c0_51, %c0_52], %66 {strides = array<i32>} : memref<2x12x16x128xf32, #tpu.memory_space<vmem>>, vector<1x1x16x128xf32>,
    %67 = vector.extract_strided_slice %22 {offsets = [176, 0], sizes = [16, 128], strides = [1, 1]} : vector<384x128xf32> to vector<16x128xf32>
    %c0_53 = arith.constant 0 : index
    %c11 = arith.constant 11 : index
    %c0_54 = arith.constant 0 : index
    %c0_55 = arith.constant 0 : index
    %68 = vector.load %arg10[%c0_53, %c11, %c0_54, %c0_55] : memref<2x12x16x128xf32, #tpu.memory_space<vmem>>, vector<1x1x16x128xf32>
    %69 = vector.shape_cast %68 : vector<1x1x16x128xf32> to vector<16x128xf32>
    %70 = vector.shape_cast %67 : vector<16x128xf32> to vector<1x1x16x128xf32>
    tpu.vector_store %arg10[%c0_53, %c11, %c0_54, %c0_55], %70 {strides = array<i32>} : memref<2x12x16x128xf32, #tpu.memory_space<vmem>>, vector<1x1x16x128xf32>,
    %71 = vector.extract_strided_slice %22 {offsets = [192, 0], sizes = [16, 128], strides = [1, 1]} : vector<384x128xf32> to vector<16x128xf32>
    %c1_56 = arith.constant 1 : index
    %c0_57 = arith.constant 0 : index
    %c0_58 = arith.constant 0 : index
    %c0_59 = arith.constant 0 : index
    %72 = vector.load %arg10[%c1_56, %c0_57, %c0_58, %c0_59] : memref<2x12x16x128xf32, #tpu.memory_space<vmem>>, vector<1x1x16x128xf32>
    %73 = vector.shape_cast %72 : vector<1x1x16x128xf32> to vector<16x128xf32>
    %74 = vector.shape_cast %71 : vector<16x128xf32> to vector<1x1x16x128xf32>
    tpu.vector_store %arg10[%c1_56, %c0_57, %c0_58, %c0_59], %74 {strides = array<i32>} : memref<2x12x16x128xf32, #tpu.memory_space<vmem>>, vector<1x1x16x128xf32>,
    %75 = vector.extract_strided_slice %22 {offsets = [208, 0], sizes = [16, 128], strides = [1, 1]} : vector<384x128xf32> to vector<16x128xf32>
    %c1_60 = arith.constant 1 : index
    %c1_61 = arith.constant 1 : index
    %c0_62 = arith.constant 0 : index
    %c0_63 = arith.constant 0 : index
    %76 = vector.load %arg10[%c1_60, %c1_61, %c0_62, %c0_63] : memref<2x12x16x128xf32, #tpu.memory_space<vmem>>, vector<1x1x16x128xf32>
    %77 = vector.shape_cast %76 : vector<1x1x16x128xf32> to vector<16x128xf32>
    %78 = vector.shape_cast %75 : vector<16x128xf32> to vector<1x1x16x128xf32>
    tpu.vector_store %arg10[%c1_60, %c1_61, %c0_62, %c0_63], %78 {strides = array<i32>} : memref<2x12x16x128xf32, #tpu.memory_space<vmem>>, vector<1x1x16x128xf32>,
    %79 = vector.extract_strided_slice %22 {offsets = [224, 0], sizes = [16, 128], strides = [1, 1]} : vector<384x128xf32> to vector<16x128xf32>
    %c1_64 = arith.constant 1 : index
    %c2_65 = arith.constant 2 : index
    %c0_66 = arith.constant 0 : index
    %c0_67 = arith.constant 0 : index
    %80 = vector.load %arg10[%c1_64, %c2_65, %c0_66, %c0_67] : memref<2x12x16x128xf32, #tpu.memory_space<vmem>>, vector<1x1x16x128xf32>
    %81 = vector.shape_cast %80 : vector<1x1x16x128xf32> to vector<16x128xf32>
    %82 = vector.shape_cast %79 : vector<16x128xf32> to vector<1x1x16x128xf32>
    tpu.vector_store %arg10[%c1_64, %c2_65, %c0_66, %c0_67], %82 {strides = array<i32>} : memref<2x12x16x128xf32, #tpu.memory_space<vmem>>, vector<1x1x16x128xf32>,
    %83 = vector.extract_strided_slice %22 {offsets = [240, 0], sizes = [16, 128], strides = [1, 1]} : vector<384x128xf32> to vector<16x128xf32>
    %c1_68 = arith.constant 1 : index
    %c3_69 = arith.constant 3 : index
    %c0_70 = arith.constant 0 : index
    %c0_71 = arith.constant 0 : index
    %84 = vector.load %arg10[%c1_68, %c3_69, %c0_70, %c0_71] : memref<2x12x16x128xf32, #tpu.memory_space<vmem>>, vector<1x1x16x128xf32>
    %85 = vector.shape_cast %84 : vector<1x1x16x128xf32> to vector<16x128xf32>
    %86 = vector.shape_cast %83 : vector<16x128xf32> to vector<1x1x16x128xf32>
    tpu.vector_store %arg10[%c1_68, %c3_69, %c0_70, %c0_71], %86 {strides = array<i32>} : memref<2x12x16x128xf32, #tpu.memory_space<vmem>>, vector<1x1x16x128xf32>,
    %87 = vector.extract_strided_slice %22 {offsets = [256, 0], sizes = [16, 128], strides = [1, 1]} : vector<384x128xf32> to vector<16x128xf32>
    %c1_72 = arith.constant 1 : index
    %c4_73 = arith.constant 4 : index
    %c0_74 = arith.constant 0 : index
    %c0_75 = arith.constant 0 : index
    %88 = vector.load %arg10[%c1_72, %c4_73, %c0_74, %c0_75] : memref<2x12x16x128xf32, #tpu.memory_space<vmem>>, vector<1x1x16x128xf32>
    %89 = vector.shape_cast %88 : vector<1x1x16x128xf32> to vector<16x128xf32>
    %90 = vector.shape_cast %87 : vector<16x128xf32> to vector<1x1x16x128xf32>
    tpu.vector_store %arg10[%c1_72, %c4_73, %c0_74, %c0_75], %90 {strides = array<i32>} : memref<2x12x16x128xf32, #tpu.memory_space<vmem>>, vector<1x1x16x128xf32>,
    %91 = vector.extract_strided_slice %22 {offsets = [272, 0], sizes = [16, 128], strides = [1, 1]} : vector<384x128xf32> to vector<16x128xf32>
    %c1_76 = arith.constant 1 : index
    %c5_77 = arith.constant 5 : index
    %c0_78 = arith.constant 0 : index
    %c0_79 = arith.constant 0 : index
    %92 = vector.load %arg10[%c1_76, %c5_77, %c0_78, %c0_79] : memref<2x12x16x128xf32, #tpu.memory_space<vmem>>, vector<1x1x16x128xf32>
    %93 = vector.shape_cast %92 : vector<1x1x16x128xf32> to vector<16x128xf32>
    %94 = vector.shape_cast %91 : vector<16x128xf32> to vector<1x1x16x128xf32>
    tpu.vector_store %arg10[%c1_76, %c5_77, %c0_78, %c0_79], %94 {strides = array<i32>} : memref<2x12x16x128xf32, #tpu.memory_space<vmem>>, vector<1x1x16x128xf32>,
    %95 = vector.extract_strided_slice %22 {offsets = [288, 0], sizes = [16, 128], strides = [1, 1]} : vector<384x128xf32> to vector<16x128xf32>
    %c1_80 = arith.constant 1 : index
    %c6_81 = arith.constant 6 : index
    %c0_82 = arith.constant 0 : index
    %c0_83 = arith.constant 0 : index
    %96 = vector.load %arg10[%c1_80, %c6_81, %c0_82, %c0_83] : memref<2x12x16x128xf32, #tpu.memory_space<vmem>>, vector<1x1x16x128xf32>
    %97 = vector.shape_cast %96 : vector<1x1x16x128xf32> to vector<16x128xf32>
    %98 = vector.shape_cast %95 : vector<16x128xf32> to vector<1x1x16x128xf32>
    tpu.vector_store %arg10[%c1_80, %c6_81, %c0_82, %c0_83], %98 {strides = array<i32>} : memref<2x12x16x128xf32, #tpu.memory_space<vmem>>, vector<1x1x16x128xf32>,
    %99 = vector.extract_strided_slice %22 {offsets = [304, 0], sizes = [16, 128], strides = [1, 1]} : vector<384x128xf32> to vector<16x128xf32>
    %c1_84 = arith.constant 1 : index
    %c7_85 = arith.constant 7 : index
    %c0_86 = arith.constant 0 : index
    %c0_87 = arith.constant 0 : index
    %100 = vector.load %arg10[%c1_84, %c7_85, %c0_86, %c0_87] : memref<2x12x16x128xf32, #tpu.memory_space<vmem>>, vector<1x1x16x128xf32>
    %101 = vector.shape_cast %100 : vector<1x1x16x128xf32> to vector<16x128xf32>
    %102 = vector.shape_cast %99 : vector<16x128xf32> to vector<1x1x16x128xf32>
    tpu.vector_store %arg10[%c1_84, %c7_85, %c0_86, %c0_87], %102 {strides = array<i32>} : memref<2x12x16x128xf32, #tpu.memory_space<vmem>>, vector<1x1x16x128xf32>,
    %103 = vector.extract_strided_slice %22 {offsets = [320, 0], sizes = [16, 128], strides = [1, 1]} : vector<384x128xf32> to vector<16x128xf32>
    %c1_88 = arith.constant 1 : index
    %c8_89 = arith.constant 8 : index
    %c0_90 = arith.constant 0 : index
    %c0_91 = arith.constant 0 : index
    %104 = vector.load %arg10[%c1_88, %c8_89, %c0_90, %c0_91] : memref<2x12x16x128xf32, #tpu.memory_space<vmem>>, vector<1x1x16x128xf32>
    %105 = vector.shape_cast %104 : vector<1x1x16x128xf32> to vector<16x128xf32>
    %106 = vector.shape_cast %103 : vector<16x128xf32> to vector<1x1x16x128xf32>
    tpu.vector_store %arg10[%c1_88, %c8_89, %c0_90, %c0_91], %106 {strides = array<i32>} : memref<2x12x16x128xf32, #tpu.memory_space<vmem>>, vector<1x1x16x128xf32>,
    %107 = vector.extract_strided_slice %22 {offsets = [336, 0], sizes = [16, 128], strides = [1, 1]} : vector<384x128xf32> to vector<16x128xf32>
    %c1_92 = arith.constant 1 : index
    %c9_93 = arith.constant 9 : index
    %c0_94 = arith.constant 0 : index
    %c0_95 = arith.constant 0 : index
    %108 = vector.load %arg10[%c1_92, %c9_93, %c0_94, %c0_95] : memref<2x12x16x128xf32, #tpu.memory_space<vmem>>, vector<1x1x16x128xf32>
    %109 = vector.shape_cast %108 : vector<1x1x16x128xf32> to vector<16x128xf32>
    %110 = vector.shape_cast %107 : vector<16x128xf32> to vector<1x1x16x128xf32>
    tpu.vector_store %arg10[%c1_92, %c9_93, %c0_94, %c0_95], %110 {strides = array<i32>} : memref<2x12x16x128xf32, #tpu.memory_space<vmem>>, vector<1x1x16x128xf32>,
    %111 = vector.extract_strided_slice %22 {offsets = [352, 0], sizes = [16, 128], strides = [1, 1]} : vector<384x128xf32> to vector<16x128xf32>
    %c1_96 = arith.constant 1 : index
    %c10_97 = arith.constant 10 : index
    %c0_98 = arith.constant 0 : index
    %c0_99 = arith.constant 0 : index
    %112 = vector.load %arg10[%c1_96, %c10_97, %c0_98, %c0_99] : memref<2x12x16x128xf32, #tpu.memory_space<vmem>>, vector<1x1x16x128xf32>
    %113 = vector.shape_cast %112 : vector<1x1x16x128xf32> to vector<16x128xf32>
    %114 = vector.shape_cast %111 : vector<16x128xf32> to vector<1x1x16x128xf32>
    tpu.vector_store %arg10[%c1_96, %c10_97, %c0_98, %c0_99], %114 {strides = array<i32>} : memref<2x12x16x128xf32, #tpu.memory_space<vmem>>, vector<1x1x16x128xf32>,
    %115 = vector.extract_strided_slice %22 {offsets = [368, 0], sizes = [16, 128], strides = [1, 1]} : vector<384x128xf32> to vector<16x128xf32>
    %c1_100 = arith.constant 1 : index
    %c11_101 = arith.constant 11 : index
    %c0_102 = arith.constant 0 : index
    %c0_103 = arith.constant 0 : index
    %116 = vector.load %arg10[%c1_100, %c11_101, %c0_102, %c0_103] : memref<2x12x16x128xf32, #tpu.memory_space<vmem>>, vector<1x1x16x128xf32>
    %117 = vector.shape_cast %116 : vector<1x1x16x128xf32> to vector<16x128xf32>
    %118 = vector.shape_cast %115 : vector<16x128xf32> to vector<1x1x16x128xf32>
    tpu.vector_store %arg10[%c1_100, %c11_101, %c0_102, %c0_103], %118 {strides = array<i32>} : memref<2x12x16x128xf32, #tpu.memory_space<vmem>>, vector<1x1x16x128xf32>,
    %cst_104 = arith.constant 0.000000e+00 : f32
    %119 = vector.broadcast %cst_104 : f32 to vector<128x128xf32>
    %c0_105 = arith.constant 0 : index
    %c0_106 = arith.constant 0 : index
    %c0_107 = arith.constant 0 : index
    %c0_108 = arith.constant 0 : index
    %120 = vector.load %arg10[%c0_105, %c0_106, %c0_107, %c0_108] : memref<2x12x16x128xf32, #tpu.memory_space<vmem>>, vector<2x8x8x128xf32>
    %121 = vector.shape_cast %120 : vector<2x8x8x128xf32> to vector<128x128xf32>
    %c0_109 = arith.constant 0 : index
    %c0_110 = arith.constant 0 : index
    %c0_111 = arith.constant 0 : index
    %122 = vector.load %arg3[%c0_109, %c0_110, %c0_111] : memref<25x128x128xf32, #tpu.memory_space<vmem>>, vector<1x128x128xf32>
    %123 = vector.shape_cast %122 : vector<1x128x128xf32> to vector<128x128xf32>
    %cst_112 = arith.constant dense<0.000000e+00> : vector<128x128xf32>
    %124 = tpu.matmul %121, %123, %cst_112 {dimension_numbers = #tpu.dot_dimension_numbers<[1], [0], [0], [1], [0, 0, 1, 1], [], []>} : vector<128x128xf32>, vector<128x128xf32>, vector<128x128xf32> -> vector<128x128xf32>
    %125 = arith.addf %119, %124 : vector<128x128xf32>
    %c0_113 = arith.constant 0 : index
    %c0_114 = arith.constant 0 : index
    %c1_115 = arith.constant 1 : index
    %c0_116 = arith.constant 0 : index
    %126 = vector.load %arg10[%c0_113, %c0_114, %c1_115, %c0_116] : memref<2x12x16x128xf32, #tpu.memory_space<vmem>>, vector<2x8x8x128xf32>
    %127 = vector.shape_cast %126 : vector<2x8x8x128xf32> to vector<128x128xf32>
    %c1_117 = arith.constant 1 : index
    %c0_118 = arith.constant 0 : index
    %c0_119 = arith.constant 0 : index
    %128 = vector.load %arg3[%c1_117, %c0_118, %c0_119] : memref<25x128x128xf32, #tpu.memory_space<vmem>>, vector<1x128x128xf32>
    %129 = vector.shape_cast %128 : vector<1x128x128xf32> to vector<128x128xf32>
    %cst_120 = arith.constant dense<0.000000e+00> : vector<128x128xf32>
    %130 = tpu.matmul %127, %129, %cst_120 {dimension_numbers = #tpu.dot_dimension_numbers<[1], [0], [0], [1], [0, 0, 1, 1], [], []>} : vector<128x128xf32>, vector<128x128xf32>, vector<128x128xf32> -> vector<128x128xf32>
    %131 = arith.addf %125, %130 : vector<128x128xf32>
    %c0_121 = arith.constant 0 : index
    %c0_122 = arith.constant 0 : index
    %c2_123 = arith.constant 2 : index
    %c0_124 = arith.constant 0 : index
    %132 = vector.load %arg10[%c0_121, %c0_122, %c2_123, %c0_124] : memref<2x12x16x128xf32, #tpu.memory_space<vmem>>, vector<2x8x8x128xf32>
    %133 = vector.shape_cast %132 : vector<2x8x8x128xf32> to vector<128x128xf32>
    %c2_125 = arith.constant 2 : index
    %c0_126 = arith.constant 0 : index
    %c0_127 = arith.constant 0 : index
    %134 = vector.load %arg3[%c2_125, %c0_126, %c0_127] : memref<25x128x128xf32, #tpu.memory_space<vmem>>, vector<1x128x128xf32>
    %135 = vector.shape_cast %134 : vector<1x128x128xf32> to vector<128x128xf32>
    %cst_128 = arith.constant dense<0.000000e+00> : vector<128x128xf32>
    %136 = tpu.matmul %133, %135, %cst_128 {dimension_numbers = #tpu.dot_dimension_numbers<[1], [0], [0], [1], [0, 0, 1, 1], [], []>} : vector<128x128xf32>, vector<128x128xf32>, vector<128x128xf32> -> vector<128x128xf32>
    %137 = arith.addf %131, %136 : vector<128x128xf32>
    %c0_129 = arith.constant 0 : index
    %c0_130 = arith.constant 0 : index
    %c3_131 = arith.constant 3 : index
    %c0_132 = arith.constant 0 : index
    %138 = vector.load %arg10[%c0_129, %c0_130, %c3_131, %c0_132] : memref<2x12x16x128xf32, #tpu.memory_space<vmem>>, vector<2x8x8x128xf32>
    %139 = vector.shape_cast %138 : vector<2x8x8x128xf32> to vector<128x128xf32>
    %c3_133 = arith.constant 3 : index
    %c0_134 = arith.constant 0 : index
    %c0_135 = arith.constant 0 : index
    %140 = vector.load %arg3[%c3_133, %c0_134, %c0_135] : memref<25x128x128xf32, #tpu.memory_space<vmem>>, vector<1x128x128xf32>
    %141 = vector.shape_cast %140 : vector<1x128x128xf32> to vector<128x128xf32>
    %cst_136 = arith.constant dense<0.000000e+00> : vector<128x128xf32>
    %142 = tpu.matmul %139, %141, %cst_136 {dimension_numbers = #tpu.dot_dimension_numbers<[1], [0], [0], [1], [0, 0, 1, 1], [], []>} : vector<128x128xf32>, vector<128x128xf32>, vector<128x128xf32> -> vector<128x128xf32>
    %143 = arith.addf %137, %142 : vector<128x128xf32>
    %c0_137 = arith.constant 0 : index
    %c0_138 = arith.constant 0 : index
    %c4_139 = arith.constant 4 : index
    %c0_140 = arith.constant 0 : index
    %144 = vector.load %arg10[%c0_137, %c0_138, %c4_139, %c0_140] : memref<2x12x16x128xf32, #tpu.memory_space<vmem>>, vector<2x8x8x128xf32>
    %145 = vector.shape_cast %144 : vector<2x8x8x128xf32> to vector<128x128xf32>
    %c4_141 = arith.constant 4 : index
    %c0_142 = arith.constant 0 : index
    %c0_143 = arith.constant 0 : index
    %146 = vector.load %arg3[%c4_141, %c0_142, %c0_143] : memref<25x128x128xf32, #tpu.memory_space<vmem>>, vector<1x128x128xf32>
    %147 = vector.shape_cast %146 : vector<1x128x128xf32> to vector<128x128xf32>
    %cst_144 = arith.constant dense<0.000000e+00> : vector<128x128xf32>
    %148 = tpu.matmul %145, %147, %cst_144 {dimension_numbers = #tpu.dot_dimension_numbers<[1], [0], [0], [1], [0, 0, 1, 1], [], []>} : vector<128x128xf32>, vector<128x128xf32>, vector<128x128xf32> -> vector<128x128xf32>
    %149 = arith.addf %143, %148 : vector<128x128xf32>
    %c0_145 = arith.constant 0 : index
    %c1_146 = arith.constant 1 : index
    %c0_147 = arith.constant 0 : index
    %c0_148 = arith.constant 0 : index
    %150 = vector.load %arg10[%c0_145, %c1_146, %c0_147, %c0_148] : memref<2x12x16x128xf32, #tpu.memory_space<vmem>>, vector<2x8x8x128xf32>
    %151 = vector.shape_cast %150 : vector<2x8x8x128xf32> to vector<128x128xf32>
    %c5_149 = arith.constant 5 : index
    %c0_150 = arith.constant 0 : index
    %c0_151 = arith.constant 0 : index
    %152 = vector.load %arg3[%c5_149, %c0_150, %c0_151] : memref<25x128x128xf32, #tpu.memory_space<vmem>>, vector<1x128x128xf32>
    %153 = vector.shape_cast %152 : vector<1x128x128xf32> to vector<128x128xf32>
    %cst_152 = arith.constant dense<0.000000e+00> : vector<128x128xf32>
    %154 = tpu.matmul %151, %153, %cst_152 {dimension_numbers = #tpu.dot_dimension_numbers<[1], [0], [0], [1], [0, 0, 1, 1], [], []>} : vector<128x128xf32>, vector<128x128xf32>, vector<128x128xf32> -> vector<128x128xf32>
    %155 = arith.addf %149, %154 : vector<128x128xf32>
    %c0_153 = arith.constant 0 : index
    %c1_154 = arith.constant 1 : index
    %c1_155 = arith.constant 1 : index
    %c0_156 = arith.constant 0 : index
    %156 = vector.load %arg10[%c0_153, %c1_154, %c1_155, %c0_156] : memref<2x12x16x128xf32, #tpu.memory_space<vmem>>, vector<2x8x8x128xf32>
    %157 = vector.shape_cast %156 : vector<2x8x8x128xf32> to vector<128x128xf32>
    %c6_157 = arith.constant 6 : index
    %c0_158 = arith.constant 0 : index
    %c0_159 = arith.constant 0 : index
    %158 = vector.load %arg3[%c6_157, %c0_158, %c0_159] : memref<25x128x128xf32, #tpu.memory_space<vmem>>, vector<1x128x128xf32>
    %159 = vector.shape_cast %158 : vector<1x128x128xf32> to vector<128x128xf32>
    %cst_160 = arith.constant dense<0.000000e+00> : vector<128x128xf32>
    %160 = tpu.matmul %157, %159, %cst_160 {dimension_numbers = #tpu.dot_dimension_numbers<[1], [0], [0], [1], [0, 0, 1, 1], [], []>} : vector<128x128xf32>, vector<128x128xf32>, vector<128x128xf32> -> vector<128x128xf32>
    %161 = arith.addf %155, %160 : vector<128x128xf32>
    %c0_161 = arith.constant 0 : index
    %c1_162 = arith.constant 1 : index
    %c2_163 = arith.constant 2 : index
    %c0_164 = arith.constant 0 : index
    %162 = vector.load %arg10[%c0_161, %c1_162, %c2_163, %c0_164] : memref<2x12x16x128xf32, #tpu.memory_space<vmem>>, vector<2x8x8x128xf32>
    %163 = vector.shape_cast %162 : vector<2x8x8x128xf32> to vector<128x128xf32>
    %c7_165 = arith.constant 7 : index
    %c0_166 = arith.constant 0 : index
    %c0_167 = arith.constant 0 : index
    %164 = vector.load %arg3[%c7_165, %c0_166, %c0_167] : memref<25x128x128xf32, #tpu.memory_space<vmem>>, vector<1x128x128xf32>
    %165 = vector.shape_cast %164 : vector<1x128x128xf32> to vector<128x128xf32>
    %cst_168 = arith.constant dense<0.000000e+00> : vector<128x128xf32>
    %166 = tpu.matmul %163, %165, %cst_168 {dimension_numbers = #tpu.dot_dimension_numbers<[1], [0], [0], [1], [0, 0, 1, 1], [], []>} : vector<128x128xf32>, vector<128x128xf32>, vector<128x128xf32> -> vector<128x128xf32>
    %167 = arith.addf %161, %166 : vector<128x128xf32>
    %c0_169 = arith.constant 0 : index
    %c1_170 = arith.constant 1 : index
    %c3_171 = arith.constant 3 : index
    %c0_172 = arith.constant 0 : index
    %168 = vector.load %arg10[%c0_169, %c1_170, %c3_171, %c0_172] : memref<2x12x16x128xf32, #tpu.memory_space<vmem>>, vector<2x8x8x128xf32>
    %169 = vector.shape_cast %168 : vector<2x8x8x128xf32> to vector<128x128xf32>
    %c8_173 = arith.constant 8 : index
    %c0_174 = arith.constant 0 : index
    %c0_175 = arith.constant 0 : index
    %170 = vector.load %arg3[%c8_173, %c0_174, %c0_175] : memref<25x128x128xf32, #tpu.memory_space<vmem>>, vector<1x128x128xf32>
    %171 = vector.shape_cast %170 : vector<1x128x128xf32> to vector<128x128xf32>
    %cst_176 = arith.constant dense<0.000000e+00> : vector<128x128xf32>
    %172 = tpu.matmul %169, %171, %cst_176 {dimension_numbers = #tpu.dot_dimension_numbers<[1], [0], [0], [1], [0, 0, 1, 1], [], []>} : vector<128x128xf32>, vector<128x128xf32>, vector<128x128xf32> -> vector<128x128xf32>
    %173 = arith.addf %167, %172 : vector<128x128xf32>
    %c0_177 = arith.constant 0 : index
    %c1_178 = arith.constant 1 : index
    %c4_179 = arith.constant 4 : index
    %c0_180 = arith.constant 0 : index
    %174 = vector.load %arg10[%c0_177, %c1_178, %c4_179, %c0_180] : memref<2x12x16x128xf32, #tpu.memory_space<vmem>>, vector<2x8x8x128xf32>
    %175 = vector.shape_cast %174 : vector<2x8x8x128xf32> to vector<128x128xf32>
    %c9_181 = arith.constant 9 : index
    %c0_182 = arith.constant 0 : index
    %c0_183 = arith.constant 0 : index
    %176 = vector.load %arg3[%c9_181, %c0_182, %c0_183] : memref<25x128x128xf32, #tpu.memory_space<vmem>>, vector<1x128x128xf32>
    %177 = vector.shape_cast %176 : vector<1x128x128xf32> to vector<128x128xf32>
    %cst_184 = arith.constant dense<0.000000e+00> : vector<128x128xf32>
    %178 = tpu.matmul %175, %177, %cst_184 {dimension_numbers = #tpu.dot_dimension_numbers<[1], [0], [0], [1], [0, 0, 1, 1], [], []>} : vector<128x128xf32>, vector<128x128xf32>, vector<128x128xf32> -> vector<128x128xf32>
    %179 = arith.addf %173, %178 : vector<128x128xf32>
    %c0_185 = arith.constant 0 : index
    %c2_186 = arith.constant 2 : index
    %c0_187 = arith.constant 0 : index
    %c0_188 = arith.constant 0 : index
    %180 = vector.load %arg10[%c0_185, %c2_186, %c0_187, %c0_188] : memref<2x12x16x128xf32, #tpu.memory_space<vmem>>, vector<2x8x8x128xf32>
    %181 = vector.shape_cast %180 : vector<2x8x8x128xf32> to vector<128x128xf32>
    %c10_189 = arith.constant 10 : index
    %c0_190 = arith.constant 0 : index
    %c0_191 = arith.constant 0 : index
    %182 = vector.load %arg3[%c10_189, %c0_190, %c0_191] : memref<25x128x128xf32, #tpu.memory_space<vmem>>, vector<1x128x128xf32>
    %183 = vector.shape_cast %182 : vector<1x128x128xf32> to vector<128x128xf32>
    %cst_192 = arith.constant dense<0.000000e+00> : vector<128x128xf32>
    %184 = tpu.matmul %181, %183, %cst_192 {dimension_numbers = #tpu.dot_dimension_numbers<[1], [0], [0], [1], [0, 0, 1, 1], [], []>} : vector<128x128xf32>, vector<128x128xf32>, vector<128x128xf32> -> vector<128x128xf32>
    %185 = arith.addf %179, %184 : vector<128x128xf32>
    %c0_193 = arith.constant 0 : index
    %c2_194 = arith.constant 2 : index
    %c1_195 = arith.constant 1 : index
    %c0_196 = arith.constant 0 : index
    %186 = vector.load %arg10[%c0_193, %c2_194, %c1_195, %c0_196] : memref<2x12x16x128xf32, #tpu.memory_space<vmem>>, vector<2x8x8x128xf32>
    %187 = vector.shape_cast %186 : vector<2x8x8x128xf32> to vector<128x128xf32>
    %c11_197 = arith.constant 11 : index
    %c0_198 = arith.constant 0 : index
    %c0_199 = arith.constant 0 : index
    %188 = vector.load %arg3[%c11_197, %c0_198, %c0_199] : memref<25x128x128xf32, #tpu.memory_space<vmem>>, vector<1x128x128xf32>
    %189 = vector.shape_cast %188 : vector<1x128x128xf32> to vector<128x128xf32>
    %cst_200 = arith.constant dense<0.000000e+00> : vector<128x128xf32>
    %190 = tpu.matmul %187, %189, %cst_200 {dimension_numbers = #tpu.dot_dimension_numbers<[1], [0], [0], [1], [0, 0, 1, 1], [], []>} : vector<128x128xf32>, vector<128x128xf32>, vector<128x128xf32> -> vector<128x128xf32>
    %191 = arith.addf %185, %190 : vector<128x128xf32>
    %c0_201 = arith.constant 0 : index
    %c2_202 = arith.constant 2 : index
    %c2_203 = arith.constant 2 : index
    %c0_204 = arith.constant 0 : index
    %192 = vector.load %arg10[%c0_201, %c2_202, %c2_203, %c0_204] : memref<2x12x16x128xf32, #tpu.memory_space<vmem>>, vector<2x8x8x128xf32>
    %193 = vector.shape_cast %192 : vector<2x8x8x128xf32> to vector<128x128xf32>
    %c12 = arith.constant 12 : index
    %c0_205 = arith.constant 0 : index
    %c0_206 = arith.constant 0 : index
    %194 = vector.load %arg3[%c12, %c0_205, %c0_206] : memref<25x128x128xf32, #tpu.memory_space<vmem>>, vector<1x128x128xf32>
    %195 = vector.shape_cast %194 : vector<1x128x128xf32> to vector<128x128xf32>
    %cst_207 = arith.constant dense<0.000000e+00> : vector<128x128xf32>
    %196 = tpu.matmul %193, %195, %cst_207 {dimension_numbers = #tpu.dot_dimension_numbers<[1], [0], [0], [1], [0, 0, 1, 1], [], []>} : vector<128x128xf32>, vector<128x128xf32>, vector<128x128xf32> -> vector<128x128xf32>
    %197 = arith.addf %191, %196 : vector<128x128xf32>
    %c0_208 = arith.constant 0 : index
    %c2_209 = arith.constant 2 : index
    %c3_210 = arith.constant 3 : index
    %c0_211 = arith.constant 0 : index
    %198 = vector.load %arg10[%c0_208, %c2_209, %c3_210, %c0_211] : memref<2x12x16x128xf32, #tpu.memory_space<vmem>>, vector<2x8x8x128xf32>
    %199 = vector.shape_cast %198 : vector<2x8x8x128xf32> to vector<128x128xf32>
    %c13 = arith.constant 13 : index
    %c0_212 = arith.constant 0 : index
    %c0_213 = arith.constant 0 : index
    %200 = vector.load %arg3[%c13, %c0_212, %c0_213] : memref<25x128x128xf32, #tpu.memory_space<vmem>>, vector<1x128x128xf32>
    %201 = vector.shape_cast %200 : vector<1x128x128xf32> to vector<128x128xf32>
    %cst_214 = arith.constant dense<0.000000e+00> : vector<128x128xf32>
    %202 = tpu.matmul %199, %201, %cst_214 {dimension_numbers = #tpu.dot_dimension_numbers<[1], [0], [0], [1], [0, 0, 1, 1], [], []>} : vector<128x128xf32>, vector<128x128xf32>, vector<128x128xf32> -> vector<128x128xf32>
    %203 = arith.addf %197, %202 : vector<128x128xf32>
    %c0_215 = arith.constant 0 : index
    %c2_216 = arith.constant 2 : index
    %c4_217 = arith.constant 4 : index
    %c0_218 = arith.constant 0 : index
    %204 = vector.load %arg10[%c0_215, %c2_216, %c4_217, %c0_218] : memref<2x12x16x128xf32, #tpu.memory_space<vmem>>, vector<2x8x8x128xf32>
    %205 = vector.shape_cast %204 : vector<2x8x8x128xf32> to vector<128x128xf32>
    %c14 = arith.constant 14 : index
    %c0_219 = arith.constant 0 : index
    %c0_220 = arith.constant 0 : index
    %206 = vector.load %arg3[%c14, %c0_219, %c0_220] : memref<25x128x128xf32, #tpu.memory_space<vmem>>, vector<1x128x128xf32>
    %207 = vector.shape_cast %206 : vector<1x128x128xf32> to vector<128x128xf32>
    %cst_221 = arith.constant dense<0.000000e+00> : vector<128x128xf32>
    %208 = tpu.matmul %205, %207, %cst_221 {dimension_numbers = #tpu.dot_dimension_numbers<[1], [0], [0], [1], [0, 0, 1, 1], [], []>} : vector<128x128xf32>, vector<128x128xf32>, vector<128x128xf32> -> vector<128x128xf32>
    %209 = arith.addf %203, %208 : vector<128x128xf32>
    %c0_222 = arith.constant 0 : index
    %c3_223 = arith.constant 3 : index
    %c0_224 = arith.constant 0 : index
    %c0_225 = arith.constant 0 : index
    %210 = vector.load %arg10[%c0_222, %c3_223, %c0_224, %c0_225] : memref<2x12x16x128xf32, #tpu.memory_space<vmem>>, vector<2x8x8x128xf32>
    %211 = vector.shape_cast %210 : vector<2x8x8x128xf32> to vector<128x128xf32>
    %c15 = arith.constant 15 : index
    %c0_226 = arith.constant 0 : index
    %c0_227 = arith.constant 0 : index
    %212 = vector.load %arg3[%c15, %c0_226, %c0_227] : memref<25x128x128xf32, #tpu.memory_space<vmem>>, vector<1x128x128xf32>
    %213 = vector.shape_cast %212 : vector<1x128x128xf32> to vector<128x128xf32>
    %cst_228 = arith.constant dense<0.000000e+00> : vector<128x128xf32>
    %214 = tpu.matmul %211, %213, %cst_228 {dimension_numbers = #tpu.dot_dimension_numbers<[1], [0], [0], [1], [0, 0, 1, 1], [], []>} : vector<128x128xf32>, vector<128x128xf32>, vector<128x128xf32> -> vector<128x128xf32>
    %215 = arith.addf %209, %214 : vector<128x128xf32>
    %c0_229 = arith.constant 0 : index
    %c3_230 = arith.constant 3 : index
    %c1_231 = arith.constant 1 : index
    %c0_232 = arith.constant 0 : index
    %216 = vector.load %arg10[%c0_229, %c3_230, %c1_231, %c0_232] : memref<2x12x16x128xf32, #tpu.memory_space<vmem>>, vector<2x8x8x128xf32>
    %217 = vector.shape_cast %216 : vector<2x8x8x128xf32> to vector<128x128xf32>
    %c16 = arith.constant 16 : index
    %c0_233 = arith.constant 0 : index
    %c0_234 = arith.constant 0 : index
    %218 = vector.load %arg3[%c16, %c0_233, %c0_234] : memref<25x128x128xf32, #tpu.memory_space<vmem>>, vector<1x128x128xf32>
    %219 = vector.shape_cast %218 : vector<1x128x128xf32> to vector<128x128xf32>
    %cst_235 = arith.constant dense<0.000000e+00> : vector<128x128xf32>
    %220 = tpu.matmul %217, %219, %cst_235 {dimension_numbers = #tpu.dot_dimension_numbers<[1], [0], [0], [1], [0, 0, 1, 1], [], []>} : vector<128x128xf32>, vector<128x128xf32>, vector<128x128xf32> -> vector<128x128xf32>
    %221 = arith.addf %215, %220 : vector<128x128xf32>
    %c0_236 = arith.constant 0 : index
    %c3_237 = arith.constant 3 : index
    %c2_238 = arith.constant 2 : index
    %c0_239 = arith.constant 0 : index
    %222 = vector.load %arg10[%c0_236, %c3_237, %c2_238, %c0_239] : memref<2x12x16x128xf32, #tpu.memory_space<vmem>>, vector<2x8x8x128xf32>
    %223 = vector.shape_cast %222 : vector<2x8x8x128xf32> to vector<128x128xf32>
    %c17 = arith.constant 17 : index
    %c0_240 = arith.constant 0 : index
    %c0_241 = arith.constant 0 : index
    %224 = vector.load %arg3[%c17, %c0_240, %c0_241] : memref<25x128x128xf32, #tpu.memory_space<vmem>>, vector<1x128x128xf32>
    %225 = vector.shape_cast %224 : vector<1x128x128xf32> to vector<128x128xf32>
    %cst_242 = arith.constant dense<0.000000e+00> : vector<128x128xf32>
    %226 = tpu.matmul %223, %225, %cst_242 {dimension_numbers = #tpu.dot_dimension_numbers<[1], [0], [0], [1], [0, 0, 1, 1], [], []>} : vector<128x128xf32>, vector<128x128xf32>, vector<128x128xf32> -> vector<128x128xf32>
    %227 = arith.addf %221, %226 : vector<128x128xf32>
    %c0_243 = arith.constant 0 : index
    %c3_244 = arith.constant 3 : index
    %c3_245 = arith.constant 3 : index
    %c0_246 = arith.constant 0 : index
    %228 = vector.load %arg10[%c0_243, %c3_244, %c3_245, %c0_246] : memref<2x12x16x128xf32, #tpu.memory_space<vmem>>, vector<2x8x8x128xf32>
    %229 = vector.shape_cast %228 : vector<2x8x8x128xf32> to vector<128x128xf32>
    %c18 = arith.constant 18 : index
    %c0_247 = arith.constant 0 : index
    %c0_248 = arith.constant 0 : index
    %230 = vector.load %arg3[%c18, %c0_247, %c0_248] : memref<25x128x128xf32, #tpu.memory_space<vmem>>, vector<1x128x128xf32>
    %231 = vector.shape_cast %230 : vector<1x128x128xf32> to vector<128x128xf32>
    %cst_249 = arith.constant dense<0.000000e+00> : vector<128x128xf32>
    %232 = tpu.matmul %229, %231, %cst_249 {dimension_numbers = #tpu.dot_dimension_numbers<[1], [0], [0], [1], [0, 0, 1, 1], [], []>} : vector<128x128xf32>, vector<128x128xf32>, vector<128x128xf32> -> vector<128x128xf32>
    %233 = arith.addf %227, %232 : vector<128x128xf32>
    %c0_250 = arith.constant 0 : index
    %c3_251 = arith.constant 3 : index
    %c4_252 = arith.constant 4 : index
    %c0_253 = arith.constant 0 : index
    %234 = vector.load %arg10[%c0_250, %c3_251, %c4_252, %c0_253] : memref<2x12x16x128xf32, #tpu.memory_space<vmem>>, vector<2x8x8x128xf32>
    %235 = vector.shape_cast %234 : vector<2x8x8x128xf32> to vector<128x128xf32>
    %c19 = arith.constant 19 : index
    %c0_254 = arith.constant 0 : index
    %c0_255 = arith.constant 0 : index
    %236 = vector.load %arg3[%c19, %c0_254, %c0_255] : memref<25x128x128xf32, #tpu.memory_space<vmem>>, vector<1x128x128xf32>
    %237 = vector.shape_cast %236 : vector<1x128x128xf32> to vector<128x128xf32>
    %cst_256 = arith.constant dense<0.000000e+00> : vector<128x128xf32>
    %238 = tpu.matmul %235, %237, %cst_256 {dimension_numbers = #tpu.dot_dimension_numbers<[1], [0], [0], [1], [0, 0, 1, 1], [], []>} : vector<128x128xf32>, vector<128x128xf32>, vector<128x128xf32> -> vector<128x128xf32>
    %239 = arith.addf %233, %238 : vector<128x128xf32>
    %c0_257 = arith.constant 0 : index
    %c4_258 = arith.constant 4 : index
    %c0_259 = arith.constant 0 : index
    %c0_260 = arith.constant 0 : index
    %240 = vector.load %arg10[%c0_257, %c4_258, %c0_259, %c0_260] : memref<2x12x16x128xf32, #tpu.memory_space<vmem>>, vector<2x8x8x128xf32>
    %241 = vector.shape_cast %240 : vector<2x8x8x128xf32> to vector<128x128xf32>
    %c20 = arith.constant 20 : index
    %c0_261 = arith.constant 0 : index
    %c0_262 = arith.constant 0 : index
    %242 = vector.load %arg3[%c20, %c0_261, %c0_262] : memref<25x128x128xf32, #tpu.memory_space<vmem>>, vector<1x128x128xf32>
    %243 = vector.shape_cast %242 : vector<1x128x128xf32> to vector<128x128xf32>
    %cst_263 = arith.constant dense<0.000000e+00> : vector<128x128xf32>
    %244 = tpu.matmul %241, %243, %cst_263 {dimension_numbers = #tpu.dot_dimension_numbers<[1], [0], [0], [1], [0, 0, 1, 1], [], []>} : vector<128x128xf32>, vector<128x128xf32>, vector<128x128xf32> -> vector<128x128xf32>
    %245 = arith.addf %239, %244 : vector<128x128xf32>
    %c0_264 = arith.constant 0 : index
    %c4_265 = arith.constant 4 : index
    %c1_266 = arith.constant 1 : index
    %c0_267 = arith.constant 0 : index
    %246 = vector.load %arg10[%c0_264, %c4_265, %c1_266, %c0_267] : memref<2x12x16x128xf32, #tpu.memory_space<vmem>>, vector<2x8x8x128xf32>
    %247 = vector.shape_cast %246 : vector<2x8x8x128xf32> to vector<128x128xf32>
    %c21 = arith.constant 21 : index
    %c0_268 = arith.constant 0 : index
    %c0_269 = arith.constant 0 : index
    %248 = vector.load %arg3[%c21, %c0_268, %c0_269] : memref<25x128x128xf32, #tpu.memory_space<vmem>>, vector<1x128x128xf32>
    %249 = vector.shape_cast %248 : vector<1x128x128xf32> to vector<128x128xf32>
    %cst_270 = arith.constant dense<0.000000e+00> : vector<128x128xf32>
    %250 = tpu.matmul %247, %249, %cst_270 {dimension_numbers = #tpu.dot_dimension_numbers<[1], [0], [0], [1], [0, 0, 1, 1], [], []>} : vector<128x128xf32>, vector<128x128xf32>, vector<128x128xf32> -> vector<128x128xf32>
    %251 = arith.addf %245, %250 : vector<128x128xf32>
    %c0_271 = arith.constant 0 : index
    %c4_272 = arith.constant 4 : index
    %c2_273 = arith.constant 2 : index
    %c0_274 = arith.constant 0 : index
    %252 = vector.load %arg10[%c0_271, %c4_272, %c2_273, %c0_274] : memref<2x12x16x128xf32, #tpu.memory_space<vmem>>, vector<2x8x8x128xf32>
    %253 = vector.shape_cast %252 : vector<2x8x8x128xf32> to vector<128x128xf32>
    %c22 = arith.constant 22 : index
    %c0_275 = arith.constant 0 : index
    %c0_276 = arith.constant 0 : index
    %254 = vector.load %arg3[%c22, %c0_275, %c0_276] : memref<25x128x128xf32, #tpu.memory_space<vmem>>, vector<1x128x128xf32>
    %255 = vector.shape_cast %254 : vector<1x128x128xf32> to vector<128x128xf32>
    %cst_277 = arith.constant dense<0.000000e+00> : vector<128x128xf32>
    %256 = tpu.matmul %253, %255, %cst_277 {dimension_numbers = #tpu.dot_dimension_numbers<[1], [0], [0], [1], [0, 0, 1, 1], [], []>} : vector<128x128xf32>, vector<128x128xf32>, vector<128x128xf32> -> vector<128x128xf32>
    %257 = arith.addf %251, %256 : vector<128x128xf32>
    %c0_278 = arith.constant 0 : index
    %c4_279 = arith.constant 4 : index
    %c3_280 = arith.constant 3 : index
    %c0_281 = arith.constant 0 : index
    %258 = vector.load %arg10[%c0_278, %c4_279, %c3_280, %c0_281] : memref<2x12x16x128xf32, #tpu.memory_space<vmem>>, vector<2x8x8x128xf32>
    %259 = vector.shape_cast %258 : vector<2x8x8x128xf32> to vector<128x128xf32>
    %c23 = arith.constant 23 : index
    %c0_282 = arith.constant 0 : index
    %c0_283 = arith.constant 0 : index
    %260 = vector.load %arg3[%c23, %c0_282, %c0_283] : memref<25x128x128xf32, #tpu.memory_space<vmem>>, vector<1x128x128xf32>
    %261 = vector.shape_cast %260 : vector<1x128x128xf32> to vector<128x128xf32>
    %cst_284 = arith.constant dense<0.000000e+00> : vector<128x128xf32>
    %262 = tpu.matmul %259, %261, %cst_284 {dimension_numbers = #tpu.dot_dimension_numbers<[1], [0], [0], [1], [0, 0, 1, 1], [], []>} : vector<128x128xf32>, vector<128x128xf32>, vector<128x128xf32> -> vector<128x128xf32>
    %263 = arith.addf %257, %262 : vector<128x128xf32>
    %c0_285 = arith.constant 0 : index
    %c4_286 = arith.constant 4 : index
    %c4_287 = arith.constant 4 : index
    %c0_288 = arith.constant 0 : index
    %264 = vector.load %arg10[%c0_285, %c4_286, %c4_287, %c0_288] : memref<2x12x16x128xf32, #tpu.memory_space<vmem>>, vector<2x8x8x128xf32>
    %265 = vector.shape_cast %264 : vector<2x8x8x128xf32> to vector<128x128xf32>
    %c24 = arith.constant 24 : index
    %c0_289 = arith.constant 0 : index
    %c0_290 = arith.constant 0 : index
    %266 = vector.load %arg3[%c24, %c0_289, %c0_290] : memref<25x128x128xf32, #tpu.memory_space<vmem>>, vector<1x128x128xf32>
    %267 = vector.shape_cast %266 : vector<1x128x128xf32> to vector<128x128xf32>
    %cst_291 = arith.constant dense<0.000000e+00> : vector<128x128xf32>
    %268 = tpu.matmul %265, %267, %cst_291 {dimension_numbers = #tpu.dot_dimension_numbers<[1], [0], [0], [1], [0, 0, 1, 1], [], []>} : vector<128x128xf32>, vector<128x128xf32>, vector<128x128xf32> -> vector<128x128xf32>
    %269 = arith.addf %263, %268 : vector<128x128xf32>
    %c0_292 = arith.constant 0 : index
    %c0_293 = arith.constant 0 : index
    %270 = vector.load %arg4[%c0_292, %c0_293] : memref<1x128xf32, #tpu.memory_space<vmem>>, vector<1x128xf32>
    %271 = vector.broadcast %270 : vector<1x128xf32> to vector<128x128xf32>
    %272 = arith.addf %269, %271 : vector<128x128xf32>
    %cst_294 = arith.constant 0.000000e+00 : f32
    %273 = vector.broadcast %cst_294 : f32 to vector<128x128xf32>
    %274 = arith.cmpf oge, %272, %273 : vector<128x128xf32>
    %cst_295 = arith.constant 0.00999999977 : f32
    %275 = vector.broadcast %cst_295 : f32 to vector<128x128xf32>
    %276 = arith.mulf %275, %272 : vector<128x128xf32>
    %277 = arith.select %274, %272, %276 : vector<128x128xi1>, vector<128x128xf32>
    %278 = vector.shape_cast %277 : vector<128x128xf32> to vector<2x8x8x128xf32>
    %c0_296 = arith.constant 0 : index
    %c0_297 = arith.constant 0 : index
    %c0_298 = arith.constant 0 : index
    %c0_299 = arith.constant 0 : index
    %279 = vector.load %arg11[%c0_296, %c0_297, %c0_298, %c0_299] : memref<2x8x8x128xf32, #tpu.memory_space<vmem>>, vector<2x8x8x128xf32>
    tpu.vector_store %arg11[%c0_296, %c0_297, %c0_298, %c0_299], %278 {strides = array<i32>} : memref<2x8x8x128xf32, #tpu.memory_space<vmem>>, vector<2x8x8x128xf32>,
    %cst_300 = arith.constant 0.000000e+00 : f32
    %280 = vector.broadcast %cst_300 : f32 to vector<2x256xf32>
    %c0_301 = arith.constant 0 : index
    %c0_302 = arith.constant 0 : index
    %c0_303 = arith.constant 0 : index
    %c0_304 = arith.constant 0 : index
    %281 = vector.load %arg11[%c0_301, %c0_302, %c0_303, %c0_304] : memref<2x8x8x128xf32, #tpu.memory_space<vmem>>, vector<2x1x1x128xf32>
    %282 = vector.shape_cast %281 : vector<2x1x1x128xf32> to vector<2x128xf32>
    %c0_305 = arith.constant 0 : index
    %c0_306 = arith.constant 0 : index
    %c1_307 = arith.constant 1 : index
    %c0_308 = arith.constant 0 : index
    %283 = vector.load %arg11[%c0_305, %c0_306, %c1_307, %c0_308] : memref<2x8x8x128xf32, #tpu.memory_space<vmem>>, vector<2x1x1x128xf32>
    %284 = vector.shape_cast %283 : vector<2x1x1x128xf32> to vector<2x128xf32>
    %285 = arith.maximumf %282, %284 : vector<2x128xf32>
    %c0_309 = arith.constant 0 : index
    %c1_310 = arith.constant 1 : index
    %c0_311 = arith.constant 0 : index
    %c0_312 = arith.constant 0 : index
    %286 = vector.load %arg11[%c0_309, %c1_310, %c0_311, %c0_312] : memref<2x8x8x128xf32, #tpu.memory_space<vmem>>, vector<2x1x1x128xf32>
    %287 = vector.shape_cast %286 : vector<2x1x1x128xf32> to vector<2x128xf32>
    %c0_313 = arith.constant 0 : index
    %c1_314 = arith.constant 1 : index
    %c1_315 = arith.constant 1 : index
    %c0_316 = arith.constant 0 : index
    %288 = vector.load %arg11[%c0_313, %c1_314, %c1_315, %c0_316] : memref<2x8x8x128xf32, #tpu.memory_space<vmem>>, vector<2x1x1x128xf32>
    %289 = vector.shape_cast %288 : vector<2x1x1x128xf32> to vector<2x128xf32>
    %290 = arith.maximumf %287, %289 : vector<2x128xf32>
    %291 = arith.maximumf %285, %290 : vector<2x128xf32>
    %c0_317 = arith.constant 0 : index
    %c0_318 = arith.constant 0 : index
    %c0_319 = arith.constant 0 : index
    %292 = vector.load %arg5[%c0_317, %c0_318, %c0_319] : memref<16x128x256xf32, #tpu.memory_space<vmem>>, vector<1x128x256xf32>
    %293 = vector.shape_cast %292 : vector<1x128x256xf32> to vector<128x256xf32>
    %cst_320 = arith.constant dense<0.000000e+00> : vector<2x256xf32>
    %294 = tpu.matmul %291, %293, %cst_320 {dimension_numbers = #tpu.dot_dimension_numbers<[1], [0], [0], [1], [0, 0, 1, 1], [], []>} : vector<2x128xf32>, vector<128x256xf32>, vector<2x256xf32> -> vector<2x256xf32>
    %295 = arith.addf %280, %294 : vector<2x256xf32>
    %c0_321 = arith.constant 0 : index
    %c0_322 = arith.constant 0 : index
    %c2_323 = arith.constant 2 : index
    %c0_324 = arith.constant 0 : index
    %296 = vector.load %arg11[%c0_321, %c0_322, %c2_323, %c0_324] : memref<2x8x8x128xf32, #tpu.memory_space<vmem>>, vector<2x1x1x128xf32>
    %297 = vector.shape_cast %296 : vector<2x1x1x128xf32> to vector<2x128xf32>
    %c0_325 = arith.constant 0 : index
    %c0_326 = arith.constant 0 : index
    %c3_327 = arith.constant 3 : index
    %c0_328 = arith.constant 0 : index
    %298 = vector.load %arg11[%c0_325, %c0_326, %c3_327, %c0_328] : memref<2x8x8x128xf32, #tpu.memory_space<vmem>>, vector<2x1x1x128xf32>
    %299 = vector.shape_cast %298 : vector<2x1x1x128xf32> to vector<2x128xf32>
    %300 = arith.maximumf %297, %299 : vector<2x128xf32>
    %c0_329 = arith.constant 0 : index
    %c1_330 = arith.constant 1 : index
    %c2_331 = arith.constant 2 : index
    %c0_332 = arith.constant 0 : index
    %301 = vector.load %arg11[%c0_329, %c1_330, %c2_331, %c0_332] : memref<2x8x8x128xf32, #tpu.memory_space<vmem>>, vector<2x1x1x128xf32>
    %302 = vector.shape_cast %301 : vector<2x1x1x128xf32> to vector<2x128xf32>
    %c0_333 = arith.constant 0 : index
    %c1_334 = arith.constant 1 : index
    %c3_335 = arith.constant 3 : index
    %c0_336 = arith.constant 0 : index
    %303 = vector.load %arg11[%c0_333, %c1_334, %c3_335, %c0_336] : memref<2x8x8x128xf32, #tpu.memory_space<vmem>>, vector<2x1x1x128xf32>
    %304 = vector.shape_cast %303 : vector<2x1x1x128xf32> to vector<2x128xf32>
    %305 = arith.maximumf %302, %304 : vector<2x128xf32>
    %306 = arith.maximumf %300, %305 : vector<2x128xf32>
    %c1_337 = arith.constant 1 : index
    %c0_338 = arith.constant 0 : index
    %c0_339 = arith.constant 0 : index
    %307 = vector.load %arg5[%c1_337, %c0_338, %c0_339] : memref<16x128x256xf32, #tpu.memory_space<vmem>>, vector<1x128x256xf32>
    %308 = vector.shape_cast %307 : vector<1x128x256xf32> to vector<128x256xf32>
    %cst_340 = arith.constant dense<0.000000e+00> : vector<2x256xf32>
    %309 = tpu.matmul %306, %308, %cst_340 {dimension_numbers = #tpu.dot_dimension_numbers<[1], [0], [0], [1], [0, 0, 1, 1], [], []>} : vector<2x128xf32>, vector<128x256xf32>, vector<2x256xf32> -> vector<2x256xf32>
    %310 = arith.addf %295, %309 : vector<2x256xf32>
    %c0_341 = arith.constant 0 : index
    %c0_342 = arith.constant 0 : index
    %c4_343 = arith.constant 4 : index
    %c0_344 = arith.constant 0 : index
    %311 = vector.load %arg11[%c0_341, %c0_342, %c4_343, %c0_344] : memref<2x8x8x128xf32, #tpu.memory_space<vmem>>, vector<2x1x1x128xf32>
    %312 = vector.shape_cast %311 : vector<2x1x1x128xf32> to vector<2x128xf32>
    %c0_345 = arith.constant 0 : index
    %c0_346 = arith.constant 0 : index
    %c5_347 = arith.constant 5 : index
    %c0_348 = arith.constant 0 : index
    %313 = vector.load %arg11[%c0_345, %c0_346, %c5_347, %c0_348] : memref<2x8x8x128xf32, #tpu.memory_space<vmem>>, vector<2x1x1x128xf32>
    %314 = vector.shape_cast %313 : vector<2x1x1x128xf32> to vector<2x128xf32>
    %315 = arith.maximumf %312, %314 : vector<2x128xf32>
    %c0_349 = arith.constant 0 : index
    %c1_350 = arith.constant 1 : index
    %c4_351 = arith.constant 4 : index
    %c0_352 = arith.constant 0 : index
    %316 = vector.load %arg11[%c0_349, %c1_350, %c4_351, %c0_352] : memref<2x8x8x128xf32, #tpu.memory_space<vmem>>, vector<2x1x1x128xf32>
    %317 = vector.shape_cast %316 : vector<2x1x1x128xf32> to vector<2x128xf32>
    %c0_353 = arith.constant 0 : index
    %c1_354 = arith.constant 1 : index
    %c5_355 = arith.constant 5 : index
    %c0_356 = arith.constant 0 : index
    %318 = vector.load %arg11[%c0_353, %c1_354, %c5_355, %c0_356] : memref<2x8x8x128xf32, #tpu.memory_space<vmem>>, vector<2x1x1x128xf32>
    %319 = vector.shape_cast %318 : vector<2x1x1x128xf32> to vector<2x128xf32>
    %320 = arith.maximumf %317, %319 : vector<2x128xf32>
    %321 = arith.maximumf %315, %320 : vector<2x128xf32>
    %c2_357 = arith.constant 2 : index
    %c0_358 = arith.constant 0 : index
    %c0_359 = arith.constant 0 : index
    %322 = vector.load %arg5[%c2_357, %c0_358, %c0_359] : memref<16x128x256xf32, #tpu.memory_space<vmem>>, vector<1x128x256xf32>
    %323 = vector.shape_cast %322 : vector<1x128x256xf32> to vector<128x256xf32>
    %cst_360 = arith.constant dense<0.000000e+00> : vector<2x256xf32>
    %324 = tpu.matmul %321, %323, %cst_360 {dimension_numbers = #tpu.dot_dimension_numbers<[1], [0], [0], [1], [0, 0, 1, 1], [], []>} : vector<2x128xf32>, vector<128x256xf32>, vector<2x256xf32> -> vector<2x256xf32>
    %325 = arith.addf %310, %324 : vector<2x256xf32>
    %c0_361 = arith.constant 0 : index
    %c0_362 = arith.constant 0 : index
    %c6_363 = arith.constant 6 : index
    %c0_364 = arith.constant 0 : index
    %326 = vector.load %arg11[%c0_361, %c0_362, %c6_363, %c0_364] : memref<2x8x8x128xf32, #tpu.memory_space<vmem>>, vector<2x1x1x128xf32>
    %327 = vector.shape_cast %326 : vector<2x1x1x128xf32> to vector<2x128xf32>
    %c0_365 = arith.constant 0 : index
    %c0_366 = arith.constant 0 : index
    %c7_367 = arith.constant 7 : index
    %c0_368 = arith.constant 0 : index
    %328 = vector.load %arg11[%c0_365, %c0_366, %c7_367, %c0_368] : memref<2x8x8x128xf32, #tpu.memory_space<vmem>>, vector<2x1x1x128xf32>
    %329 = vector.shape_cast %328 : vector<2x1x1x128xf32> to vector<2x128xf32>
    %330 = arith.maximumf %327, %329 : vector<2x128xf32>
    %c0_369 = arith.constant 0 : index
    %c1_370 = arith.constant 1 : index
    %c6_371 = arith.constant 6 : index
    %c0_372 = arith.constant 0 : index
    %331 = vector.load %arg11[%c0_369, %c1_370, %c6_371, %c0_372] : memref<2x8x8x128xf32, #tpu.memory_space<vmem>>, vector<2x1x1x128xf32>
    %332 = vector.shape_cast %331 : vector<2x1x1x128xf32> to vector<2x128xf32>
    %c0_373 = arith.constant 0 : index
    %c1_374 = arith.constant 1 : index
    %c7_375 = arith.constant 7 : index
    %c0_376 = arith.constant 0 : index
    %333 = vector.load %arg11[%c0_373, %c1_374, %c7_375, %c0_376] : memref<2x8x8x128xf32, #tpu.memory_space<vmem>>, vector<2x1x1x128xf32>
    %334 = vector.shape_cast %333 : vector<2x1x1x128xf32> to vector<2x128xf32>
    %335 = arith.maximumf %332, %334 : vector<2x128xf32>
    %336 = arith.maximumf %330, %335 : vector<2x128xf32>
    %c3_377 = arith.constant 3 : index
    %c0_378 = arith.constant 0 : index
    %c0_379 = arith.constant 0 : index
    %337 = vector.load %arg5[%c3_377, %c0_378, %c0_379] : memref<16x128x256xf32, #tpu.memory_space<vmem>>, vector<1x128x256xf32>
    %338 = vector.shape_cast %337 : vector<1x128x256xf32> to vector<128x256xf32>
    %cst_380 = arith.constant dense<0.000000e+00> : vector<2x256xf32>
    %339 = tpu.matmul %336, %338, %cst_380 {dimension_numbers = #tpu.dot_dimension_numbers<[1], [0], [0], [1], [0, 0, 1, 1], [], []>} : vector<2x128xf32>, vector<128x256xf32>, vector<2x256xf32> -> vector<2x256xf32>
    %340 = arith.addf %325, %339 : vector<2x256xf32>
    %c0_381 = arith.constant 0 : index
    %c2_382 = arith.constant 2 : index
    %c0_383 = arith.constant 0 : index
    %c0_384 = arith.constant 0 : index
    %341 = vector.load %arg11[%c0_381, %c2_382, %c0_383, %c0_384] : memref<2x8x8x128xf32, #tpu.memory_space<vmem>>, vector<2x1x1x128xf32>
    %342 = vector.shape_cast %341 : vector<2x1x1x128xf32> to vector<2x128xf32>
    %c0_385 = arith.constant 0 : index
    %c2_386 = arith.constant 2 : index
    %c1_387 = arith.constant 1 : index
    %c0_388 = arith.constant 0 : index
    %343 = vector.load %arg11[%c0_385, %c2_386, %c1_387, %c0_388] : memref<2x8x8x128xf32, #tpu.memory_space<vmem>>, vector<2x1x1x128xf32>
    %344 = vector.shape_cast %343 : vector<2x1x1x128xf32> to vector<2x128xf32>
    %345 = arith.maximumf %342, %344 : vector<2x128xf32>
    %c0_389 = arith.constant 0 : index
    %c3_390 = arith.constant 3 : index
    %c0_391 = arith.constant 0 : index
    %c0_392 = arith.constant 0 : index
    %346 = vector.load %arg11[%c0_389, %c3_390, %c0_391, %c0_392] : memref<2x8x8x128xf32, #tpu.memory_space<vmem>>, vector<2x1x1x128xf32>
    %347 = vector.shape_cast %346 : vector<2x1x1x128xf32> to vector<2x128xf32>
    %c0_393 = arith.constant 0 : index
    %c3_394 = arith.constant 3 : index
    %c1_395 = arith.constant 1 : index
    %c0_396 = arith.constant 0 : index
    %348 = vector.load %arg11[%c0_393, %c3_394, %c1_395, %c0_396] : memref<2x8x8x128xf32, #tpu.memory_space<vmem>>, vector<2x1x1x128xf32>
    %349 = vector.shape_cast %348 : vector<2x1x1x128xf32> to vector<2x128xf32>
    %350 = arith.maximumf %347, %349 : vector<2x128xf32>
    %351 = arith.maximumf %345, %350 : vector<2x128xf32>
    %c4_397 = arith.constant 4 : index
    %c0_398 = arith.constant 0 : index
    %c0_399 = arith.constant 0 : index
    %352 = vector.load %arg5[%c4_397, %c0_398, %c0_399] : memref<16x128x256xf32, #tpu.memory_space<vmem>>, vector<1x128x256xf32>
    %353 = vector.shape_cast %352 : vector<1x128x256xf32> to vector<128x256xf32>
    %cst_400 = arith.constant dense<0.000000e+00> : vector<2x256xf32>
    %354 = tpu.matmul %351, %353, %cst_400 {dimension_numbers = #tpu.dot_dimension_numbers<[1], [0], [0], [1], [0, 0, 1, 1], [], []>} : vector<2x128xf32>, vector<128x256xf32>, vector<2x256xf32> -> vector<2x256xf32>
    %355 = arith.addf %340, %354 : vector<2x256xf32>
    %c0_401 = arith.constant 0 : index
    %c2_402 = arith.constant 2 : index
    %c2_403 = arith.constant 2 : index
    %c0_404 = arith.constant 0 : index
    %356 = vector.load %arg11[%c0_401, %c2_402, %c2_403, %c0_404] : memref<2x8x8x128xf32, #tpu.memory_space<vmem>>, vector<2x1x1x128xf32>
    %357 = vector.shape_cast %356 : vector<2x1x1x128xf32> to vector<2x128xf32>
    %c0_405 = arith.constant 0 : index
    %c2_406 = arith.constant 2 : index
    %c3_407 = arith.constant 3 : index
    %c0_408 = arith.constant 0 : index
    %358 = vector.load %arg11[%c0_405, %c2_406, %c3_407, %c0_408] : memref<2x8x8x128xf32, #tpu.memory_space<vmem>>, vector<2x1x1x128xf32>
    %359 = vector.shape_cast %358 : vector<2x1x1x128xf32> to vector<2x128xf32>
    %360 = arith.maximumf %357, %359 : vector<2x128xf32>
    %c0_409 = arith.constant 0 : index
    %c3_410 = arith.constant 3 : index
    %c2_411 = arith.constant 2 : index
    %c0_412 = arith.constant 0 : index
    %361 = vector.load %arg11[%c0_409, %c3_410, %c2_411, %c0_412] : memref<2x8x8x128xf32, #tpu.memory_space<vmem>>, vector<2x1x1x128xf32>
    %362 = vector.shape_cast %361 : vector<2x1x1x128xf32> to vector<2x128xf32>
    %c0_413 = arith.constant 0 : index
    %c3_414 = arith.constant 3 : index
    %c3_415 = arith.constant 3 : index
    %c0_416 = arith.constant 0 : index
    %363 = vector.load %arg11[%c0_413, %c3_414, %c3_415, %c0_416] : memref<2x8x8x128xf32, #tpu.memory_space<vmem>>, vector<2x1x1x128xf32>
    %364 = vector.shape_cast %363 : vector<2x1x1x128xf32> to vector<2x128xf32>
    %365 = arith.maximumf %362, %364 : vector<2x128xf32>
    %366 = arith.maximumf %360, %365 : vector<2x128xf32>
    %c5_417 = arith.constant 5 : index
    %c0_418 = arith.constant 0 : index
    %c0_419 = arith.constant 0 : index
    %367 = vector.load %arg5[%c5_417, %c0_418, %c0_419] : memref<16x128x256xf32, #tpu.memory_space<vmem>>, vector<1x128x256xf32>
    %368 = vector.shape_cast %367 : vector<1x128x256xf32> to vector<128x256xf32>
    %cst_420 = arith.constant dense<0.000000e+00> : vector<2x256xf32>
    %369 = tpu.matmul %366, %368, %cst_420 {dimension_numbers = #tpu.dot_dimension_numbers<[1], [0], [0], [1], [0, 0, 1, 1], [], []>} : vector<2x128xf32>, vector<128x256xf32>, vector<2x256xf32> -> vector<2x256xf32>
    %370 = arith.addf %355, %369 : vector<2x256xf32>
    %c0_421 = arith.constant 0 : index
    %c2_422 = arith.constant 2 : index
    %c4_423 = arith.constant 4 : index
    %c0_424 = arith.constant 0 : index
    %371 = vector.load %arg11[%c0_421, %c2_422, %c4_423, %c0_424] : memref<2x8x8x128xf32, #tpu.memory_space<vmem>>, vector<2x1x1x128xf32>
    %372 = vector.shape_cast %371 : vector<2x1x1x128xf32> to vector<2x128xf32>
    %c0_425 = arith.constant 0 : index
    %c2_426 = arith.constant 2 : index
    %c5_427 = arith.constant 5 : index
    %c0_428 = arith.constant 0 : index
    %373 = vector.load %arg11[%c0_425, %c2_426, %c5_427, %c0_428] : memref<2x8x8x128xf32, #tpu.memory_space<vmem>>, vector<2x1x1x128xf32>
    %374 = vector.shape_cast %373 : vector<2x1x1x128xf32> to vector<2x128xf32>
    %375 = arith.maximumf %372, %374 : vector<2x128xf32>
    %c0_429 = arith.constant 0 : index
    %c3_430 = arith.constant 3 : index
    %c4_431 = arith.constant 4 : index
    %c0_432 = arith.constant 0 : index
    %376 = vector.load %arg11[%c0_429, %c3_430, %c4_431, %c0_432] : memref<2x8x8x128xf32, #tpu.memory_space<vmem>>, vector<2x1x1x128xf32>
    %377 = vector.shape_cast %376 : vector<2x1x1x128xf32> to vector<2x128xf32>
    %c0_433 = arith.constant 0 : index
    %c3_434 = arith.constant 3 : index
    %c5_435 = arith.constant 5 : index
    %c0_436 = arith.constant 0 : index
    %378 = vector.load %arg11[%c0_433, %c3_434, %c5_435, %c0_436] : memref<2x8x8x128xf32, #tpu.memory_space<vmem>>, vector<2x1x1x128xf32>
    %379 = vector.shape_cast %378 : vector<2x1x1x128xf32> to vector<2x128xf32>
    %380 = arith.maximumf %377, %379 : vector<2x128xf32>
    %381 = arith.maximumf %375, %380 : vector<2x128xf32>
    %c6_437 = arith.constant 6 : index
    %c0_438 = arith.constant 0 : index
    %c0_439 = arith.constant 0 : index
    %382 = vector.load %arg5[%c6_437, %c0_438, %c0_439] : memref<16x128x256xf32, #tpu.memory_space<vmem>>, vector<1x128x256xf32>
    %383 = vector.shape_cast %382 : vector<1x128x256xf32> to vector<128x256xf32>
    %cst_440 = arith.constant dense<0.000000e+00> : vector<2x256xf32>
    %384 = tpu.matmul %381, %383, %cst_440 {dimension_numbers = #tpu.dot_dimension_numbers<[1], [0], [0], [1], [0, 0, 1, 1], [], []>} : vector<2x128xf32>, vector<128x256xf32>, vector<2x256xf32> -> vector<2x256xf32>
    %385 = arith.addf %370, %384 : vector<2x256xf32>
    %c0_441 = arith.constant 0 : index
    %c2_442 = arith.constant 2 : index
    %c6_443 = arith.constant 6 : index
    %c0_444 = arith.constant 0 : index
    %386 = vector.load %arg11[%c0_441, %c2_442, %c6_443, %c0_444] : memref<2x8x8x128xf32, #tpu.memory_space<vmem>>, vector<2x1x1x128xf32>
    %387 = vector.shape_cast %386 : vector<2x1x1x128xf32> to vector<2x128xf32>
    %c0_445 = arith.constant 0 : index
    %c2_446 = arith.constant 2 : index
    %c7_447 = arith.constant 7 : index
    %c0_448 = arith.constant 0 : index
    %388 = vector.load %arg11[%c0_445, %c2_446, %c7_447, %c0_448] : memref<2x8x8x128xf32, #tpu.memory_space<vmem>>, vector<2x1x1x128xf32>
    %389 = vector.shape_cast %388 : vector<2x1x1x128xf32> to vector<2x128xf32>
    %390 = arith.maximumf %387, %389 : vector<2x128xf32>
    %c0_449 = arith.constant 0 : index
    %c3_450 = arith.constant 3 : index
    %c6_451 = arith.constant 6 : index
    %c0_452 = arith.constant 0 : index
    %391 = vector.load %arg11[%c0_449, %c3_450, %c6_451, %c0_452] : memref<2x8x8x128xf32, #tpu.memory_space<vmem>>, vector<2x1x1x128xf32>
    %392 = vector.shape_cast %391 : vector<2x1x1x128xf32> to vector<2x128xf32>
    %c0_453 = arith.constant 0 : index
    %c3_454 = arith.constant 3 : index
    %c7_455 = arith.constant 7 : index
    %c0_456 = arith.constant 0 : index
    %393 = vector.load %arg11[%c0_453, %c3_454, %c7_455, %c0_456] : memref<2x8x8x128xf32, #tpu.memory_space<vmem>>, vector<2x1x1x128xf32>
    %394 = vector.shape_cast %393 : vector<2x1x1x128xf32> to vector<2x128xf32>
    %395 = arith.maximumf %392, %394 : vector<2x128xf32>
    %396 = arith.maximumf %390, %395 : vector<2x128xf32>
    %c7_457 = arith.constant 7 : index
    %c0_458 = arith.constant 0 : index
    %c0_459 = arith.constant 0 : index
    %397 = vector.load %arg5[%c7_457, %c0_458, %c0_459] : memref<16x128x256xf32, #tpu.memory_space<vmem>>, vector<1x128x256xf32>
    %398 = vector.shape_cast %397 : vector<1x128x256xf32> to vector<128x256xf32>
    %cst_460 = arith.constant dense<0.000000e+00> : vector<2x256xf32>
    %399 = tpu.matmul %396, %398, %cst_460 {dimension_numbers = #tpu.dot_dimension_numbers<[1], [0], [0], [1], [0, 0, 1, 1], [], []>} : vector<2x128xf32>, vector<128x256xf32>, vector<2x256xf32> -> vector<2x256xf32>
    %400 = arith.addf %385, %399 : vector<2x256xf32>
    %c0_461 = arith.constant 0 : index
    %c4_462 = arith.constant 4 : index
    %c0_463 = arith.constant 0 : index
    %c0_464 = arith.constant 0 : index
    %401 = vector.load %arg11[%c0_461, %c4_462, %c0_463, %c0_464] : memref<2x8x8x128xf32, #tpu.memory_space<vmem>>, vector<2x1x1x128xf32>
    %402 = vector.shape_cast %401 : vector<2x1x1x128xf32> to vector<2x128xf32>
    %c0_465 = arith.constant 0 : index
    %c4_466 = arith.constant 4 : index
    %c1_467 = arith.constant 1 : index
    %c0_468 = arith.constant 0 : index
    %403 = vector.load %arg11[%c0_465, %c4_466, %c1_467, %c0_468] : memref<2x8x8x128xf32, #tpu.memory_space<vmem>>, vector<2x1x1x128xf32>
    %404 = vector.shape_cast %403 : vector<2x1x1x128xf32> to vector<2x128xf32>
    %405 = arith.maximumf %402, %404 : vector<2x128xf32>
    %c0_469 = arith.constant 0 : index
    %c5_470 = arith.constant 5 : index
    %c0_471 = arith.constant 0 : index
    %c0_472 = arith.constant 0 : index
    %406 = vector.load %arg11[%c0_469, %c5_470, %c0_471, %c0_472] : memref<2x8x8x128xf32, #tpu.memory_space<vmem>>, vector<2x1x1x128xf32>
    %407 = vector.shape_cast %406 : vector<2x1x1x128xf32> to vector<2x128xf32>
    %c0_473 = arith.constant 0 : index
    %c5_474 = arith.constant 5 : index
    %c1_475 = arith.constant 1 : index
    %c0_476 = arith.constant 0 : index
    %408 = vector.load %arg11[%c0_473, %c5_474, %c1_475, %c0_476] : memref<2x8x8x128xf32, #tpu.memory_space<vmem>>, vector<2x1x1x128xf32>
    %409 = vector.shape_cast %408 : vector<2x1x1x128xf32> to vector<2x128xf32>
    %410 = arith.maximumf %407, %409 : vector<2x128xf32>
    %411 = arith.maximumf %405, %410 : vector<2x128xf32>
    %c8_477 = arith.constant 8 : index
    %c0_478 = arith.constant 0 : index
    %c0_479 = arith.constant 0 : index
    %412 = vector.load %arg5[%c8_477, %c0_478, %c0_479] : memref<16x128x256xf32, #tpu.memory_space<vmem>>, vector<1x128x256xf32>
    %413 = vector.shape_cast %412 : vector<1x128x256xf32> to vector<128x256xf32>
    %cst_480 = arith.constant dense<0.000000e+00> : vector<2x256xf32>
    %414 = tpu.matmul %411, %413, %cst_480 {dimension_numbers = #tpu.dot_dimension_numbers<[1], [0], [0], [1], [0, 0, 1, 1], [], []>} : vector<2x128xf32>, vector<128x256xf32>, vector<2x256xf32> -> vector<2x256xf32>
    %415 = arith.addf %400, %414 : vector<2x256xf32>
    %c0_481 = arith.constant 0 : index
    %c4_482 = arith.constant 4 : index
    %c2_483 = arith.constant 2 : index
    %c0_484 = arith.constant 0 : index
    %416 = vector.load %arg11[%c0_481, %c4_482, %c2_483, %c0_484] : memref<2x8x8x128xf32, #tpu.memory_space<vmem>>, vector<2x1x1x128xf32>
    %417 = vector.shape_cast %416 : vector<2x1x1x128xf32> to vector<2x128xf32>
    %c0_485 = arith.constant 0 : index
    %c4_486 = arith.constant 4 : index
    %c3_487 = arith.constant 3 : index
    %c0_488 = arith.constant 0 : index
    %418 = vector.load %arg11[%c0_485, %c4_486, %c3_487, %c0_488] : memref<2x8x8x128xf32, #tpu.memory_space<vmem>>, vector<2x1x1x128xf32>
    %419 = vector.shape_cast %418 : vector<2x1x1x128xf32> to vector<2x128xf32>
    %420 = arith.maximumf %417, %419 : vector<2x128xf32>
    %c0_489 = arith.constant 0 : index
    %c5_490 = arith.constant 5 : index
    %c2_491 = arith.constant 2 : index
    %c0_492 = arith.constant 0 : index
    %421 = vector.load %arg11[%c0_489, %c5_490, %c2_491, %c0_492] : memref<2x8x8x128xf32, #tpu.memory_space<vmem>>, vector<2x1x1x128xf32>
    %422 = vector.shape_cast %421 : vector<2x1x1x128xf32> to vector<2x128xf32>
    %c0_493 = arith.constant 0 : index
    %c5_494 = arith.constant 5 : index
    %c3_495 = arith.constant 3 : index
    %c0_496 = arith.constant 0 : index
    %423 = vector.load %arg11[%c0_493, %c5_494, %c3_495, %c0_496] : memref<2x8x8x128xf32, #tpu.memory_space<vmem>>, vector<2x1x1x128xf32>
    %424 = vector.shape_cast %423 : vector<2x1x1x128xf32> to vector<2x128xf32>
    %425 = arith.maximumf %422, %424 : vector<2x128xf32>
    %426 = arith.maximumf %420, %425 : vector<2x128xf32>
    %c9_497 = arith.constant 9 : index
    %c0_498 = arith.constant 0 : index
    %c0_499 = arith.constant 0 : index
    %427 = vector.load %arg5[%c9_497, %c0_498, %c0_499] : memref<16x128x256xf32, #tpu.memory_space<vmem>>, vector<1x128x256xf32>
    %428 = vector.shape_cast %427 : vector<1x128x256xf32> to vector<128x256xf32>
    %cst_500 = arith.constant dense<0.000000e+00> : vector<2x256xf32>
    %429 = tpu.matmul %426, %428, %cst_500 {dimension_numbers = #tpu.dot_dimension_numbers<[1], [0], [0], [1], [0, 0, 1, 1], [], []>} : vector<2x128xf32>, vector<128x256xf32>, vector<2x256xf32> -> vector<2x256xf32>
    %430 = arith.addf %415, %429 : vector<2x256xf32>
    %c0_501 = arith.constant 0 : index
    %c4_502 = arith.constant 4 : index
    %c4_503 = arith.constant 4 : index
    %c0_504 = arith.constant 0 : index
    %431 = vector.load %arg11[%c0_501, %c4_502, %c4_503, %c0_504] : memref<2x8x8x128xf32, #tpu.memory_space<vmem>>, vector<2x1x1x128xf32>
    %432 = vector.shape_cast %431 : vector<2x1x1x128xf32> to vector<2x128xf32>
    %c0_505 = arith.constant 0 : index
    %c4_506 = arith.constant 4 : index
    %c5_507 = arith.constant 5 : index
    %c0_508 = arith.constant 0 : index
    %433 = vector.load %arg11[%c0_505, %c4_506, %c5_507, %c0_508] : memref<2x8x8x128xf32, #tpu.memory_space<vmem>>, vector<2x1x1x128xf32>
    %434 = vector.shape_cast %433 : vector<2x1x1x128xf32> to vector<2x128xf32>
    %435 = arith.maximumf %432, %434 : vector<2x128xf32>
    %c0_509 = arith.constant 0 : index
    %c5_510 = arith.constant 5 : index
    %c4_511 = arith.constant 4 : index
    %c0_512 = arith.constant 0 : index
    %436 = vector.load %arg11[%c0_509, %c5_510, %c4_511, %c0_512] : memref<2x8x8x128xf32, #tpu.memory_space<vmem>>, vector<2x1x1x128xf32>
    %437 = vector.shape_cast %436 : vector<2x1x1x128xf32> to vector<2x128xf32>
    %c0_513 = arith.constant 0 : index
    %c5_514 = arith.constant 5 : index
    %c5_515 = arith.constant 5 : index
    %c0_516 = arith.constant 0 : index
    %438 = vector.load %arg11[%c0_513, %c5_514, %c5_515, %c0_516] : memref<2x8x8x128xf32, #tpu.memory_space<vmem>>, vector<2x1x1x128xf32>
    %439 = vector.shape_cast %438 : vector<2x1x1x128xf32> to vector<2x128xf32>
    %440 = arith.maximumf %437, %439 : vector<2x128xf32>
    %441 = arith.maximumf %435, %440 : vector<2x128xf32>
    %c10_517 = arith.constant 10 : index
    %c0_518 = arith.constant 0 : index
    %c0_519 = arith.constant 0 : index
    %442 = vector.load %arg5[%c10_517, %c0_518, %c0_519] : memref<16x128x256xf32, #tpu.memory_space<vmem>>, vector<1x128x256xf32>
    %443 = vector.shape_cast %442 : vector<1x128x256xf32> to vector<128x256xf32>
    %cst_520 = arith.constant dense<0.000000e+00> : vector<2x256xf32>
    %444 = tpu.matmul %441, %443, %cst_520 {dimension_numbers = #tpu.dot_dimension_numbers<[1], [0], [0], [1], [0, 0, 1, 1], [], []>} : vector<2x128xf32>, vector<128x256xf32>, vector<2x256xf32> -> vector<2x256xf32>
    %445 = arith.addf %430, %444 : vector<2x256xf32>
    %c0_521 = arith.constant 0 : index
    %c4_522 = arith.constant 4 : index
    %c6_523 = arith.constant 6 : index
    %c0_524 = arith.constant 0 : index
    %446 = vector.load %arg11[%c0_521, %c4_522, %c6_523, %c0_524] : memref<2x8x8x128xf32, #tpu.memory_space<vmem>>, vector<2x1x1x128xf32>
    %447 = vector.shape_cast %446 : vector<2x1x1x128xf32> to vector<2x128xf32>
    %c0_525 = arith.constant 0 : index
    %c4_526 = arith.constant 4 : index
    %c7_527 = arith.constant 7 : index
    %c0_528 = arith.constant 0 : index
    %448 = vector.load %arg11[%c0_525, %c4_526, %c7_527, %c0_528] : memref<2x8x8x128xf32, #tpu.memory_space<vmem>>, vector<2x1x1x128xf32>
    %449 = vector.shape_cast %448 : vector<2x1x1x128xf32> to vector<2x128xf32>
    %450 = arith.maximumf %447, %449 : vector<2x128xf32>
    %c0_529 = arith.constant 0 : index
    %c5_530 = arith.constant 5 : index
    %c6_531 = arith.constant 6 : index
    %c0_532 = arith.constant 0 : index
    %451 = vector.load %arg11[%c0_529, %c5_530, %c6_531, %c0_532] : memref<2x8x8x128xf32, #tpu.memory_space<vmem>>, vector<2x1x1x128xf32>
    %452 = vector.shape_cast %451 : vector<2x1x1x128xf32> to vector<2x128xf32>
    %c0_533 = arith.constant 0 : index
    %c5_534 = arith.constant 5 : index
    %c7_535 = arith.constant 7 : index
    %c0_536 = arith.constant 0 : index
    %453 = vector.load %arg11[%c0_533, %c5_534, %c7_535, %c0_536] : memref<2x8x8x128xf32, #tpu.memory_space<vmem>>, vector<2x1x1x128xf32>
    %454 = vector.shape_cast %453 : vector<2x1x1x128xf32> to vector<2x128xf32>
    %455 = arith.maximumf %452, %454 : vector<2x128xf32>
    %456 = arith.maximumf %450, %455 : vector<2x128xf32>
    %c11_537 = arith.constant 11 : index
    %c0_538 = arith.constant 0 : index
    %c0_539 = arith.constant 0 : index
    %457 = vector.load %arg5[%c11_537, %c0_538, %c0_539] : memref<16x128x256xf32, #tpu.memory_space<vmem>>, vector<1x128x256xf32>
    %458 = vector.shape_cast %457 : vector<1x128x256xf32> to vector<128x256xf32>
    %cst_540 = arith.constant dense<0.000000e+00> : vector<2x256xf32>
    %459 = tpu.matmul %456, %458, %cst_540 {dimension_numbers = #tpu.dot_dimension_numbers<[1], [0], [0], [1], [0, 0, 1, 1], [], []>} : vector<2x128xf32>, vector<128x256xf32>, vector<2x256xf32> -> vector<2x256xf32>
    %460 = arith.addf %445, %459 : vector<2x256xf32>
    %c0_541 = arith.constant 0 : index
    %c6_542 = arith.constant 6 : index
    %c0_543 = arith.constant 0 : index
    %c0_544 = arith.constant 0 : index
    %461 = vector.load %arg11[%c0_541, %c6_542, %c0_543, %c0_544] : memref<2x8x8x128xf32, #tpu.memory_space<vmem>>, vector<2x1x1x128xf32>
    %462 = vector.shape_cast %461 : vector<2x1x1x128xf32> to vector<2x128xf32>
    %c0_545 = arith.constant 0 : index
    %c6_546 = arith.constant 6 : index
    %c1_547 = arith.constant 1 : index
    %c0_548 = arith.constant 0 : index
    %463 = vector.load %arg11[%c0_545, %c6_546, %c1_547, %c0_548] : memref<2x8x8x128xf32, #tpu.memory_space<vmem>>, vector<2x1x1x128xf32>
    %464 = vector.shape_cast %463 : vector<2x1x1x128xf32> to vector<2x128xf32>
    %465 = arith.maximumf %462, %464 : vector<2x128xf32>
    %c0_549 = arith.constant 0 : index
    %c7_550 = arith.constant 7 : index
    %c0_551 = arith.constant 0 : index
    %c0_552 = arith.constant 0 : index
    %466 = vector.load %arg11[%c0_549, %c7_550, %c0_551, %c0_552] : memref<2x8x8x128xf32, #tpu.memory_space<vmem>>, vector<2x1x1x128xf32>
    %467 = vector.shape_cast %466 : vector<2x1x1x128xf32> to vector<2x128xf32>
    %c0_553 = arith.constant 0 : index
    %c7_554 = arith.constant 7 : index
    %c1_555 = arith.constant 1 : index
    %c0_556 = arith.constant 0 : index
    %468 = vector.load %arg11[%c0_553, %c7_554, %c1_555, %c0_556] : memref<2x8x8x128xf32, #tpu.memory_space<vmem>>, vector<2x1x1x128xf32>
    %469 = vector.shape_cast %468 : vector<2x1x1x128xf32> to vector<2x128xf32>
    %470 = arith.maximumf %467, %469 : vector<2x128xf32>
    %471 = arith.maximumf %465, %470 : vector<2x128xf32>
    %c12_557 = arith.constant 12 : index
    %c0_558 = arith.constant 0 : index
    %c0_559 = arith.constant 0 : index
    %472 = vector.load %arg5[%c12_557, %c0_558, %c0_559] : memref<16x128x256xf32, #tpu.memory_space<vmem>>, vector<1x128x256xf32>
    %473 = vector.shape_cast %472 : vector<1x128x256xf32> to vector<128x256xf32>
    %cst_560 = arith.constant dense<0.000000e+00> : vector<2x256xf32>
    %474 = tpu.matmul %471, %473, %cst_560 {dimension_numbers = #tpu.dot_dimension_numbers<[1], [0], [0], [1], [0, 0, 1, 1], [], []>} : vector<2x128xf32>, vector<128x256xf32>, vector<2x256xf32> -> vector<2x256xf32>
    %475 = arith.addf %460, %474 : vector<2x256xf32>
    %c0_561 = arith.constant 0 : index
    %c6_562 = arith.constant 6 : index
    %c2_563 = arith.constant 2 : index
    %c0_564 = arith.constant 0 : index
    %476 = vector.load %arg11[%c0_561, %c6_562, %c2_563, %c0_564] : memref<2x8x8x128xf32, #tpu.memory_space<vmem>>, vector<2x1x1x128xf32>
    %477 = vector.shape_cast %476 : vector<2x1x1x128xf32> to vector<2x128xf32>
    %c0_565 = arith.constant 0 : index
    %c6_566 = arith.constant 6 : index
    %c3_567 = arith.constant 3 : index
    %c0_568 = arith.constant 0 : index
    %478 = vector.load %arg11[%c0_565, %c6_566, %c3_567, %c0_568] : memref<2x8x8x128xf32, #tpu.memory_space<vmem>>, vector<2x1x1x128xf32>
    %479 = vector.shape_cast %478 : vector<2x1x1x128xf32> to vector<2x128xf32>
    %480 = arith.maximumf %477, %479 : vector<2x128xf32>
    %c0_569 = arith.constant 0 : index
    %c7_570 = arith.constant 7 : index
    %c2_571 = arith.constant 2 : index
    %c0_572 = arith.constant 0 : index
    %481 = vector.load %arg11[%c0_569, %c7_570, %c2_571, %c0_572] : memref<2x8x8x128xf32, #tpu.memory_space<vmem>>, vector<2x1x1x128xf32>
    %482 = vector.shape_cast %481 : vector<2x1x1x128xf32> to vector<2x128xf32>
    %c0_573 = arith.constant 0 : index
    %c7_574 = arith.constant 7 : index
    %c3_575 = arith.constant 3 : index
    %c0_576 = arith.constant 0 : index
    %483 = vector.load %arg11[%c0_573, %c7_574, %c3_575, %c0_576] : memref<2x8x8x128xf32, #tpu.memory_space<vmem>>, vector<2x1x1x128xf32>
    %484 = vector.shape_cast %483 : vector<2x1x1x128xf32> to vector<2x128xf32>
    %485 = arith.maximumf %482, %484 : vector<2x128xf32>
    %486 = arith.maximumf %480, %485 : vector<2x128xf32>
    %c13_577 = arith.constant 13 : index
    %c0_578 = arith.constant 0 : index
    %c0_579 = arith.constant 0 : index
    %487 = vector.load %arg5[%c13_577, %c0_578, %c0_579] : memref<16x128x256xf32, #tpu.memory_space<vmem>>, vector<1x128x256xf32>
    %488 = vector.shape_cast %487 : vector<1x128x256xf32> to vector<128x256xf32>
    %cst_580 = arith.constant dense<0.000000e+00> : vector<2x256xf32>
    %489 = tpu.matmul %486, %488, %cst_580 {dimension_numbers = #tpu.dot_dimension_numbers<[1], [0], [0], [1], [0, 0, 1, 1], [], []>} : vector<2x128xf32>, vector<128x256xf32>, vector<2x256xf32> -> vector<2x256xf32>
    %490 = arith.addf %475, %489 : vector<2x256xf32>
    %c0_581 = arith.constant 0 : index
    %c6_582 = arith.constant 6 : index
    %c4_583 = arith.constant 4 : index
    %c0_584 = arith.constant 0 : index
    %491 = vector.load %arg11[%c0_581, %c6_582, %c4_583, %c0_584] : memref<2x8x8x128xf32, #tpu.memory_space<vmem>>, vector<2x1x1x128xf32>
    %492 = vector.shape_cast %491 : vector<2x1x1x128xf32> to vector<2x128xf32>
    %c0_585 = arith.constant 0 : index
    %c6_586 = arith.constant 6 : index
    %c5_587 = arith.constant 5 : index
    %c0_588 = arith.constant 0 : index
    %493 = vector.load %arg11[%c0_585, %c6_586, %c5_587, %c0_588] : memref<2x8x8x128xf32, #tpu.memory_space<vmem>>, vector<2x1x1x128xf32>
    %494 = vector.shape_cast %493 : vector<2x1x1x128xf32> to vector<2x128xf32>
    %495 = arith.maximumf %492, %494 : vector<2x128xf32>
    %c0_589 = arith.constant 0 : index
    %c7_590 = arith.constant 7 : index
    %c4_591 = arith.constant 4 : index
    %c0_592 = arith.constant 0 : index
    %496 = vector.load %arg11[%c0_589, %c7_590, %c4_591, %c0_592] : memref<2x8x8x128xf32, #tpu.memory_space<vmem>>, vector<2x1x1x128xf32>
    %497 = vector.shape_cast %496 : vector<2x1x1x128xf32> to vector<2x128xf32>
    %c0_593 = arith.constant 0 : index
    %c7_594 = arith.constant 7 : index
    %c5_595 = arith.constant 5 : index
    %c0_596 = arith.constant 0 : index
    %498 = vector.load %arg11[%c0_593, %c7_594, %c5_595, %c0_596] : memref<2x8x8x128xf32, #tpu.memory_space<vmem>>, vector<2x1x1x128xf32>
    %499 = vector.shape_cast %498 : vector<2x1x1x128xf32> to vector<2x128xf32>
    %500 = arith.maximumf %497, %499 : vector<2x128xf32>
    %501 = arith.maximumf %495, %500 : vector<2x128xf32>
    %c14_597 = arith.constant 14 : index
    %c0_598 = arith.constant 0 : index
    %c0_599 = arith.constant 0 : index
    %502 = vector.load %arg5[%c14_597, %c0_598, %c0_599] : memref<16x128x256xf32, #tpu.memory_space<vmem>>, vector<1x128x256xf32>
    %503 = vector.shape_cast %502 : vector<1x128x256xf32> to vector<128x256xf32>
    %cst_600 = arith.constant dense<0.000000e+00> : vector<2x256xf32>
    %504 = tpu.matmul %501, %503, %cst_600 {dimension_numbers = #tpu.dot_dimension_numbers<[1], [0], [0], [1], [0, 0, 1, 1], [], []>} : vector<2x128xf32>, vector<128x256xf32>, vector<2x256xf32> -> vector<2x256xf32>
    %505 = arith.addf %490, %504 : vector<2x256xf32>
    %c0_601 = arith.constant 0 : index
    %c6_602 = arith.constant 6 : index
    %c6_603 = arith.constant 6 : index
    %c0_604 = arith.constant 0 : index
    %506 = vector.load %arg11[%c0_601, %c6_602, %c6_603, %c0_604] : memref<2x8x8x128xf32, #tpu.memory_space<vmem>>, vector<2x1x1x128xf32>
    %507 = vector.shape_cast %506 : vector<2x1x1x128xf32> to vector<2x128xf32>
    %c0_605 = arith.constant 0 : index
    %c6_606 = arith.constant 6 : index
    %c7_607 = arith.constant 7 : index
    %c0_608 = arith.constant 0 : index
    %508 = vector.load %arg11[%c0_605, %c6_606, %c7_607, %c0_608] : memref<2x8x8x128xf32, #tpu.memory_space<vmem>>, vector<2x1x1x128xf32>
    %509 = vector.shape_cast %508 : vector<2x1x1x128xf32> to vector<2x128xf32>
    %510 = arith.maximumf %507, %509 : vector<2x128xf32>
    %c0_609 = arith.constant 0 : index
    %c7_610 = arith.constant 7 : index
    %c6_611 = arith.constant 6 : index
    %c0_612 = arith.constant 0 : index
    %511 = vector.load %arg11[%c0_609, %c7_610, %c6_611, %c0_612] : memref<2x8x8x128xf32, #tpu.memory_space<vmem>>, vector<2x1x1x128xf32>
    %512 = vector.shape_cast %511 : vector<2x1x1x128xf32> to vector<2x128xf32>
    %c0_613 = arith.constant 0 : index
    %c7_614 = arith.constant 7 : index
    %c7_615 = arith.constant 7 : index
    %c0_616 = arith.constant 0 : index
    %513 = vector.load %arg11[%c0_613, %c7_614, %c7_615, %c0_616] : memref<2x8x8x128xf32, #tpu.memory_space<vmem>>, vector<2x1x1x128xf32>
    %514 = vector.shape_cast %513 : vector<2x1x1x128xf32> to vector<2x128xf32>
    %515 = arith.maximumf %512, %514 : vector<2x128xf32>
    %516 = arith.maximumf %510, %515 : vector<2x128xf32>
    %c15_617 = arith.constant 15 : index
    %c0_618 = arith.constant 0 : index
    %c0_619 = arith.constant 0 : index
    %517 = vector.load %arg5[%c15_617, %c0_618, %c0_619] : memref<16x128x256xf32, #tpu.memory_space<vmem>>, vector<1x128x256xf32>
    %518 = vector.shape_cast %517 : vector<1x128x256xf32> to vector<128x256xf32>
    %cst_620 = arith.constant dense<0.000000e+00> : vector<2x256xf32>
    %519 = tpu.matmul %516, %518, %cst_620 {dimension_numbers = #tpu.dot_dimension_numbers<[1], [0], [0], [1], [0, 0, 1, 1], [], []>} : vector<2x128xf32>, vector<128x256xf32>, vector<2x256xf32> -> vector<2x256xf32>
    %520 = arith.addf %505, %519 : vector<2x256xf32>
    %c0_621 = arith.constant 0 : index
    %c0_622 = arith.constant 0 : index
    %521 = vector.load %arg6[%c0_621, %c0_622] : memref<1x256xf32, #tpu.memory_space<vmem>>, vector<1x256xf32>
    %522 = vector.broadcast %521 : vector<1x256xf32> to vector<2x256xf32>
    %523 = arith.addf %520, %522 : vector<2x256xf32>
    %cst_623 = arith.constant 0.000000e+00 : f32
    %524 = vector.broadcast %cst_623 : f32 to vector<2x256xf32>
    %525 = arith.cmpf oge, %523, %524 : vector<2x256xf32>
    %cst_624 = arith.constant 0.00999999977 : f32
    %526 = vector.broadcast %cst_624 : f32 to vector<2x256xf32>
    %527 = arith.mulf %526, %523 : vector<2x256xf32>
    %528 = arith.select %525, %523, %527 : vector<2x256xi1>, vector<2x256xf32>
    %c0_625 = arith.constant 0 : index
    %c0_626 = arith.constant 0 : index
    %529 = vector.load %arg7[%c0_625, %c0_626] : memref<256x128xf32, #tpu.memory_space<vmem>>, vector<256x128xf32>
    %cst_627 = arith.constant dense<0.000000e+00> : vector<2x128xf32>
    %530 = tpu.matmul %528, %529, %cst_627 {dimension_numbers = #tpu.dot_dimension_numbers<[1], [0], [0], [1], [0, 0, 1, 1], [], []>} : vector<2x256xf32>, vector<256x128xf32>, vector<2x128xf32> -> vector<2x128xf32>
    %c0_628 = arith.constant 0 : index
    %c0_629 = arith.constant 0 : index
    %531 = vector.load %arg8[%c0_628, %c0_629] : memref<1x128xf32, #tpu.memory_space<vmem>>, vector<1x128xf32>
    %532 = vector.broadcast %531 : vector<1x128xf32> to vector<2x128xf32>
    %533 = arith.addf %530, %532 : vector<2x128xf32>
    %c0_630 = arith.constant 0 : index
    %c0_631 = arith.constant 0 : index
    %534 = vector.load %arg9[%c0_630, %c0_631] : memref<2x128xf32, #tpu.memory_space<vmem>>, vector<2x128xf32>
    tpu.vector_store %arg9[%c0_630, %c0_631], %533 {strides = array<i32>} : memref<2x128xf32, #tpu.memory_space<vmem>>, vector<2x128xf32>,
    return
  }
}

</mosaic_0001>

<bundles_post_ra>
// kernel: convnet_forward.1
= control target key start
LH: loop header
LB: loop body
LE: loop exit
PB: predicated region body
PF: predicated region fallthrough
CT: control target
= control target key end

     0   :  { %vm91_vm0 = vcmask 613376   ;;  %vm236_vm1 = vcmask 1042432   ;;  %vm15282_vm2 = vmmov 1   ;;  %s20209_s0 = inlined_call_operand.vmem [shape: f32[1536,75], index: 0, kind: input, shape index: {}]   ;;  %s20210_s1 = inlined_call_operand.vmem [shape: f32[75,128], index: 1, kind: input, shape index: {}]   ;;  %s20211_s2 = inlined_call_operand.vmem [shape: f32[1,128], index: 2, kind: input, shape index: {}]   ;;  %s20212_s3 = inlined_call_operand.vmem [shape: f32[25,128,128], index: 3, kind: input, shape index: {}]   ;;  %s20213_s4 = inlined_call_operand.vmem [shape: f32[1,128], index: 4, kind: input, shape index: {}]   ;;  %s20214_s5 = inlined_call_operand.vmem [shape: f32[16,128,256], index: 5, kind: input, shape index: {}]   ;;  %s20215_s6 = inlined_call_operand.vmem [shape: f32[1,256], index: 6, kind: input, shape index: {}]   ;;  %s20216_s7 = inlined_call_operand.vmem [shape: f32[256,128], index: 7, kind: input, shape index: {}]   ;;  %s20217_s8 = inlined_call_operand.vmem [shape: f32[1,128], index: 8, kind: input, shape index: {}]   ;;  %s20218_s9 = inlined_call_operand.hbm [shape: f32[2,128], index: 9, kind: output, shape index: {}]  }
   0x1   :  { %v81_v0 = vld [vmem:[%s20210_s1] sm:$0xff]  ;;  %v82_v1 = vld [vmem:[%s20210_s1 + $0x8] sm:$0xff]  ;;  %v83_v2 = vld [vmem:[%s20210_s1 + $0x10] sm:$0xff] }
   0x2   :  { %v15344_v3 = vpack.c.bf16 %v82_v1, %v81_v0  ;;  %v84_v4 = vld [vmem:[%s20210_s1 + $0x18] sm:$0xff]  ;;  %v85_v6 = vld [vmem:[%s20210_s1 + $0x20] sm:$0xff]  ;;  %v86_v7 = vld [vmem:[%s20210_s1 + $0x28] sm:$0xff] }
   0x3   :  { %v15349_v5 = vpack.c.bf16 %v84_v4, %v83_v2  ;;  %v33_v8 = vld [vmem:[%s20209_s0] sm:$0xff]  ;;  %v15365_v9 = vpack.c.bf16 %v86_v7, %v85_v6  ;;  %v87_v10 = vld [vmem:[%s20210_s1 + $0x30] sm:$0xff]  ;;  %v88_v11 = vld [vmem:[%s20210_s1 + $0x38] sm:$0xff] }
   0x4   :  { %13400 = vmatprep.subr.bf16.mxu1 %v15344_v3  ;;  %13444 = vmatprep.subr.bf16.mxu0 %v15344_v3  ;;  %v15377_v12 = vpack.c.bf16 %v88_v11, %v87_v10  ;;  %v89_v13 = vld [vmem:[%s20210_s1 + $0x40] sm:$0xff]  ;;  %v90_v14 = vld [vmem:[%s20210_s1 + $0x48] sm:$0x7]  ;;  %vm15392_vm3 = vmpackc.low %vm236_vm1, %vm15282_vm2 }
   0x5   :  { %13402 = vmatpush3.bf16.msra.mxu1 %v15344_v3  ;;  %11651 = vmatprep.mubr.msk.f32.mxu1 %vm91_vm0, %v33_v8  ;;  %v15389_v15 = vpack.c.bf16 %v90_v14, %v89_v13  ;;  %v34_v17 = vld [vmem:[%s20209_s0 + $0x8] sm:$0xff]  ;;  %v1090_v18 = vld [vmem:[%s20209_s0 + $0x300] sm:$0xff]  ;;  %v35_v19 = vld [vmem:[%s20209_s0 + $0x10] sm:$0xff] }
   0x6   :  { %13404 = vmatprep.subr.bf16.mxu1 %v15349_v5  ;;  %13446 = vmatpush3.bf16.msra.mxu0 %v15344_v3  ;;  %v1091_v20 = vld [vmem:[%s20209_s0 + $0x308] sm:$0xff]  ;;  %v1092_v21 = vld [vmem:[%s20209_s0 + $0x310] sm:$0xff]  ;;  %v36_v22 = vld [vmem:[%s20209_s0 + $0x18] sm:$0xff] }
   0x7   :  { %13448 = vmatprep.subr.bf16.mxu0 %v15349_v5  ;;  %11835 = vmatprep.mubr.msk.f32.mxu0 %vm91_vm0, %v1090_v18  ;;  %v37_v23 = vld [vmem:[%s20209_s0 + $0x20] sm:$0xff]  ;;  %v1093_v24 = vld [vmem:[%s20209_s0 + $0x318] sm:$0xff]  ;;  %v38_v26 = vld [vmem:[%s20209_s0 + $0x28] sm:$0xff] }
   0x8   :  { %v1094_v25 = vld [vmem:[%s20209_s0 + $0x320] sm:$0xff]  ;;  %v39_v27 = vld [vmem:[%s20209_s0 + $0x30] sm:$0xff]  ;;  %v1095_v28 = vld [vmem:[%s20209_s0 + $0x328] sm:$0xff] }
   0x9   :  { %13406 = vmatpush3.bf16.msra.mxu1 %v15349_v5  ;;  %v1096_v29 = vld [vmem:[%s20209_s0 + $0x330] sm:$0xff]  ;;  %v40_v30 = vld [vmem:[%s20209_s0 + $0x38] sm:$0xff]  ;;  %v41_v31 = vld [vmem:[%s20209_s0 + $0x40] sm:$0xff] }
   0xa   :  { %13408 = vmatprep.subr.bf16.mxu1 %v15365_v9  ;;  %13450 = vmatpush3.bf16.msra.mxu0 %v15349_v5  ;;  %v1097_v32 = vld [vmem:[%s20209_s0 + $0x338] sm:$0xff]  ;;  %v1098_v33 = vld [vmem:[%s20209_s0 + $0x340] sm:$0xff]  ;;  %v42_v34 = vld [vmem:[%s20209_s0 + $0x48] sm:$0xff] }
   0xb   :  { %13452 = vmatprep.subr.bf16.mxu0 %v15365_v9 }
   0xd   :  { %13410 = vmatpush3.bf16.msra.mxu1 %v15365_v9 }
   0xe   :  { %13412 = vmatprep.subr.bf16.mxu1 %v15377_v12  ;;  %13454 = vmatpush3.bf16.msra.mxu0 %v15365_v9 }
   0xf   :  { %13456 = vmatprep.subr.bf16.mxu0 %v15377_v12 }
  0x11   :  { %13414 = vmatpush3.bf16.msra.mxu1 %v15377_v12 }
  0x12   :  { %13417 = vmatprep.subr.msk.bf16.mxu1 %vm15392_vm3, %v15389_v15  ;;  %13458 = vmatpush3.bf16.msra.mxu0 %v15377_v12 }
  0x13   :  { %13461 = vmatprep.subr.msk.bf16.mxu0 %vm15392_vm3, %v15389_v15 }
  0x15   :  { %13420 = vmatpush3.bf16.msk.msra.mxu1 %vm15392_vm3, %v15389_v15 }
  0x16   :  { %13422 = vmatprep.subr.bf16.mxu1 %v15344_v3  ;;  %13464 = vmatpush3.bf16.msk.msra.mxu0 %vm15392_vm3, %v15389_v15 }
  0x18   :  { %11652 = vmatmul.mubr.msk.f32.vlgmr.msra.gmra.mrb[0].mxu1 %vm91_vm0, %v34_v17 }
  0x19   :  { %13424 = vmatpush3.bf16.msra.mxu1 %v15344_v3  ;;  %11654 = vmatprep.mubr.msk.f32.mxu1 %vm91_vm0, %v35_v19 }
  0x1a   :  { %13426 = vmatprep.subr.bf16.mxu1 %v15349_v5  ;;  %11836 = vmatmul.mubr.msk.f32.vlgmr.msra.gmra.mrb[0].mxu0 %vm91_vm0, %v1091_v20 }
  0x1b   :  { %11838 = vmatprep.mubr.msk.f32.mxu0 %vm91_vm0, %v1092_v21 }
  0x1c   :  { %11655 = vmatmul.mubr.msk.f32.gmra.mrb[2].mxu1 %vm91_vm0, %v36_v22 }
  0x1d   :  { %11657 = vmatprep.mubr.msk.f32.mxu1 %vm91_vm0, %v37_v23  ;;  %13428 = vmatpush3.bf16.msra.mxu1 %v15349_v5 }
  0x1e   :  { %13430 = vmatprep.subr.bf16.mxu1 %v15365_v9  ;;  %11839 = vmatmul.mubr.msk.f32.gmra.mrb[2].mxu0 %vm91_vm0, %v1093_v24 }
  0x1f   :  { %11841 = vmatprep.mubr.msk.f32.mxu0 %vm91_vm0, %v1094_v25 }
  0x20   :  { %11658 = vmatmul.mubr.msk.f32.gmra.mrb[4].mxu1 %vm91_vm0, %v38_v26 }
  0x21   :  { %11660 = vmatprep.mubr.msk.f32.mxu1 %vm91_vm0, %v39_v27  ;;  %13432 = vmatpush3.bf16.msra.mxu1 %v15365_v9 }
  0x22   :  { %13434 = vmatprep.subr.bf16.mxu1 %v15377_v12  ;;  %11842 = vmatmul.mubr.msk.f32.gmra.mrb[4].mxu0 %vm91_vm0, %v1095_v28 }
  0x23   :  { %11844 = vmatprep.mubr.msk.f32.mxu0 %vm91_vm0, %v1096_v29 }
  0x24   :  { %11661 = vmatmul.mubr.msk.f32.gmra.mrb[6].mxu1 %vm91_vm0, %v40_v30 }
  0x25   :  { %11663 = vmatprep.mubr.msk.f32.mxu1 %vm91_vm0, %v41_v31  ;;  %13436 = vmatpush3.bf16.msra.mxu1 %v15377_v12 }
  0x26   :  { %14 = vsyncpa [#allocation5], 0  ;;  %v43_v35 = vld [vmem:[%s20209_s0 + $0x50] sm:$0xff]  ;;  %13439 = vmatprep.subr.msk.bf16.mxu1 %vm15392_vm3, %v15389_v15  ;;  %11845 = vmatmul.mubr.msk.f32.gmra.mrb[6].mxu0 %vm91_vm0, %v1097_v32  ;;  %v1099_v36 = vld [vmem:[%s20209_s0 + $0x348] sm:$0xff] }
  0x27   :  { %11847 = vmatprep.mubr.msk.f32.mxu0 %vm91_vm0, %v1098_v33  ;;  %v1100_v37 = vld [vmem:[%s20209_s0 + $0x350] sm:$0xff]  ;;  %v44_v38 = vld [vmem:[%s20209_s0 + $0x58] sm:$0xff]  ;;  %v45_v39 = vld [vmem:[%s20209_s0 + $0x60] sm:$0xff] }
  0x28   :  { %11664 = vmatmul.mubr.msk.f32.gmra.mrb[8].mxu1 %vm91_vm0, %v42_v34  ;;  %v1101_v40 = vld [vmem:[%s20209_s0 + $0x358] sm:$0xff]  ;;  %v1102_v41 = vld [vmem:[%s20209_s0 + $0x360] sm:$0xff]  ;;  %v46_v42 = vld [vmem:[%s20209_s0 + $0x68] sm:$0xff] }
  0x29   :  { %11666 = vmatprep.mubr.msk.f32.mxu1 %vm91_vm0, %v43_v35  ;;  %13442 = vmatpush3.bf16.msk.msra.mxu1 %vm15392_vm3, %v15389_v15  ;;  %v47_v43 = vld [vmem:[%s20209_s0 + $0x70] sm:$0xff]  ;;  %v1103_v44 = vld [vmem:[%s20209_s0 + $0x368] sm:$0xff]  ;;  %v48_v46 = vld [vmem:[%s20209_s0 + $0x78] sm:$0xff] }
  0x2a   :  { %14831 = vmatprep.subr.bf16.mxu1 %v15344_v3  ;;  %11848 = vmatmul.mubr.msk.f32.gmra.mrb[8].mxu0 %vm91_vm0, %v1099_v36  ;;  %v1104_v45 = vld [vmem:[%s20209_s0 + $0x370] sm:$0xff]  ;;  %v49_v47 = vld [vmem:[%s20209_s0 + $0x80] sm:$0xff]  ;;  %v1105_v48 = vld [vmem:[%s20209_s0 + $0x378] sm:$0xff] }
  0x2b   :  { %11850 = vmatprep.mubr.msk.f32.mxu0 %vm91_vm0, %v1100_v37  ;;  %v1106_v49 = vld [vmem:[%s20209_s0 + $0x380] sm:$0xff]  ;;  %v50_v50 = vld [vmem:[%s20209_s0 + $0x88] sm:$0xff]  ;;  %v51_v51 = vld [vmem:[%s20209_s0 + $0x90] sm:$0xff] }
  0x2c   :  { %11667 = vmatmul.mubr.msk.f32.gmra.mrb[10].mxu1 %vm91_vm0, %v44_v38  ;;  %v1107_v52 = vld [vmem:[%s20209_s0 + $0x388] sm:$0xff]  ;;  %v1108_v53 = vld [vmem:[%s20209_s0 + $0x390] sm:$0xff]  ;;  %v52_v54 = vld [vmem:[%s20209_s0 + $0x98] sm:$0xff] }
  0x2d   :  { %11669 = vmatprep.mubr.msk.f32.mxu1 %vm91_vm0, %v45_v39  ;;  %v53_v55 = vld [vmem:[%s20209_s0 + $0xa0] sm:$0xff]  ;;  %v1109_v56 = vld [vmem:[%s20209_s0 + $0x398] sm:$0xff]  ;;  %v54_v58 = vld [vmem:[%s20209_s0 + $0xa8] sm:$0xff] }
  0x2e   :  { %11851 = vmatmul.mubr.msk.f32.gmra.mrb[10].mxu0 %vm91_vm0, %v1101_v40  ;;  %v1110_v57 = vld [vmem:[%s20209_s0 + $0x3a0] sm:$0xff]  ;;  %v55_v59 = vld [vmem:[%s20209_s0 + $0xb0] sm:$0xff]  ;;  %v1111_v60 = vld [vmem:[%s20209_s0 + $0x3a8] sm:$0xff] }
  0x2f   :  { %11853 = vmatprep.mubr.msk.f32.mxu0 %vm91_vm0, %v1102_v41  ;;  %v1112_v61 = vld [vmem:[%s20209_s0 + $0x3b0] sm:$0xff]  ;;  %v56_v62 = vld [vmem:[%s20209_s0 + $0xb8] sm:$0xff]  ;;  %v57_v63 = vld [vmem:[%s20209_s0 + $0xc0] sm:$0xff] }
  0x30   :  { %11670 = vmatmul.mubr.msk.f32.gmra.mrb[12].mxu1 %vm91_vm0, %v46_v42  ;;  %v1113_v0 = vld [vmem:[%s20209_s0 + $0x3b8] sm:$0xff]  ;;  %v1114_v1 = vld [vmem:[%s20209_s0 + $0x3c0] sm:$0xff]  ;;  %v58_v2 = vld [vmem:[%s20209_s0 + $0xc8] sm:$0xff] }
  0x31   :  { %11672 = vmatprep.mubr.msk.f32.mxu1 %vm91_vm0, %v47_v43  ;;  %v59_v4 = vld [vmem:[%s20209_s0 + $0xd0] sm:$0xff]  ;;  %v1115_v6 = vld [vmem:[%s20209_s0 + $0x3c8] sm:$0xff]  ;;  %v60_v7 = vld [vmem:[%s20209_s0 + $0xd8] sm:$0xff] }
  0x32   :  { %11854 = vmatmul.mubr.msk.f32.gmra.mrb[12].mxu0 %vm91_vm0, %v1103_v44  ;;  %v61_v8 = vld [vmem:[%s20209_s0 + $0xe0] sm:$0xff]  ;;  %v62_v10 = vld [vmem:[%s20209_s0 + $0xe8] sm:$0xff]  ;;  %v63_v11 = vld [vmem:[%s20209_s0 + $0xf0] sm:$0xff] }
  0x33   :  { %11856 = vmatprep.mubr.msk.f32.mxu0 %vm91_vm0, %v1104_v45  ;;  %v64_v13 = vld [vmem:[%s20209_s0 + $0xf8] sm:$0xff]  ;;  %v65_v14 = vld [vmem:[%s20209_s0 + $0x100] sm:$0xff]  ;;  %v66_v17 = vld [vmem:[%s20209_s0 + $0x108] sm:$0xff] }
  0x34   :  { %11673 = vmatmul.mubr.msk.f32.gmra.mrb[14].mxu1 %vm91_vm0, %v48_v46  ;;  %v67_v18 = vld [vmem:[%s20209_s0 + $0x110] sm:$0xff]  ;;  %v68_v19 = vld [vmem:[%s20209_s0 + $0x118] sm:$0xff]  ;;  %v69_v20 = vld [vmem:[%s20209_s0 + $0x120] sm:$0xff] }
  0x35   :  { %11675 = vmatprep.mubr.msk.f32.mxu1 %vm91_vm0, %v49_v47  ;;  %v70_v21 = vld [vmem:[%s20209_s0 + $0x128] sm:$0xff]  ;;  %v71_v22 = vld [vmem:[%s20209_s0 + $0x130] sm:$0xff]  ;;  %v72_v23 = vld [vmem:[%s20209_s0 + $0x138] sm:$0xff] }
  0x36   :  { %11857 = vmatmul.mubr.msk.f32.gmra.mrb[14].mxu0 %vm91_vm0, %v1105_v48  ;;  %v73_v24 = vld [vmem:[%s20209_s0 + $0x140] sm:$0xff]  ;;  %v74_v25 = vld [vmem:[%s20209_s0 + $0x148] sm:$0xff]  ;;  %v75_v26 = vld [vmem:[%s20209_s0 + $0x150] sm:$0xff] }
  0x37   :  { %11859 = vmatprep.mubr.msk.f32.mxu0 %vm91_vm0, %v1106_v49  ;;  %v76_v27 = vld [vmem:[%s20209_s0 + $0x158] sm:$0xff]  ;;  %v77_v28 = vld [vmem:[%s20209_s0 + $0x160] sm:$0xff]  ;;  %v78_v29 = vld [vmem:[%s20209_s0 + $0x168] sm:$0xff] }
  0x38   :  { %11676 = vmatmul.mubr.msk.f32.gmra.mrb[16].mxu1 %vm91_vm0, %v50_v50  ;;  %v79_v30 = vld [vmem:[%s20209_s0 + $0x170] sm:$0xff]  ;;  %v80_v31 = vld [vmem:[%s20209_s0 + $0x178] sm:$0xff]  ;;  %v545_v32 = vld [vmem:[%s20209_s0 + $0x180] sm:$0xff] }
  0x39   :  { %11678 = vmatprep.mubr.msk.f32.mxu1 %vm91_vm0, %v51_v51  ;;  %v546_v33 = vld [vmem:[%s20209_s0 + $0x188] sm:$0xff]  ;;  %v547_v34 = vld [vmem:[%s20209_s0 + $0x190] sm:$0xff]  ;;  %v548_v35 = vld [vmem:[%s20209_s0 + $0x198] sm:$0xff] }
  0x3a   :  { %11860 = vmatmul.mubr.msk.f32.gmra.mrb[16].mxu0 %vm91_vm0, %v1107_v52  ;;  %v549_v36 = vld [vmem:[%s20209_s0 + $0x1a0] sm:$0xff]  ;;  %v550_v37 = vld [vmem:[%s20209_s0 + $0x1a8] sm:$0xff]  ;;  %v551_v38 = vld [vmem:[%s20209_s0 + $0x1b0] sm:$0xff] }
  0x3b   :  { %11862 = vmatprep.mubr.msk.f32.mxu0 %vm91_vm0, %v1108_v53  ;;  %v552_v39 = vld [vmem:[%s20209_s0 + $0x1b8] sm:$0xff]  ;;  %v553_v40 = vld [vmem:[%s20209_s0 + $0x1c0] sm:$0xff]  ;;  %v554_v41 = vld [vmem:[%s20209_s0 + $0x1c8] sm:$0xff] }
  0x3c   :  { %11679 = vmatmul.mubr.msk.f32.gmra.mrb[18].mxu1 %vm91_vm0, %v52_v54  ;;  %v555_v42 = vld [vmem:[%s20209_s0 + $0x1d0] sm:$0xff]  ;;  %v556_v43 = vld [vmem:[%s20209_s0 + $0x1d8] sm:$0xff]  ;;  %v557_v44 = vld [vmem:[%s20209_s0 + $0x1e0] sm:$0xff] }
  0x3d   :  { %11681 = vmatprep.mubr.msk.f32.mxu1 %vm91_vm0, %v53_v55  ;;  %v558_v45 = vld [vmem:[%s20209_s0 + $0x1e8] sm:$0xff]  ;;  %v559_v46 = vld [vmem:[%s20209_s0 + $0x1f0] sm:$0xff]  ;;  %v560_v47 = vld [vmem:[%s20209_s0 + $0x1f8] sm:$0xff] }
  0x3e   :  { %11863 = vmatmul.mubr.msk.f32.gmra.mrb[18].mxu0 %vm91_vm0, %v1109_v56  ;;  %v561_v48 = vld [vmem:[%s20209_s0 + $0x200] sm:$0xff]  ;;  %v562_v49 = vld [vmem:[%s20209_s0 + $0x208] sm:$0xff]  ;;  %v563_v50 = vld [vmem:[%s20209_s0 + $0x210] sm:$0xff] }
  0x3f   :  { %11865 = vmatprep.mubr.msk.f32.mxu0 %vm91_vm0, %v1110_v57  ;;  %v564_v51 = vld [vmem:[%s20209_s0 + $0x218] sm:$0xff]  ;;  %v565_v52 = vld [vmem:[%s20209_s0 + $0x220] sm:$0xff]  ;;  %v566_v53 = vld [vmem:[%s20209_s0 + $0x228] sm:$0xff] }
  0x40   :  { %11682 = vmatmul.mubr.msk.f32.gmra.mrb[20].mxu1 %vm91_vm0, %v54_v58  ;;  %v567_v54 = vld [vmem:[%s20209_s0 + $0x230] sm:$0xff]  ;;  %v568_v55 = vld [vmem:[%s20209_s0 + $0x238] sm:$0xff]  ;;  %v569_v56 = vld [vmem:[%s20209_s0 + $0x240] sm:$0xff] }
  0x41   :  { %11684 = vmatprep.mubr.msk.f32.mxu1 %vm91_vm0, %v55_v59  ;;  %v570_v57 = vld [vmem:[%s20209_s0 + $0x248] sm:$0xff]  ;;  %v571_v58 = vld [vmem:[%s20209_s0 + $0x250] sm:$0xff]  ;;  %v572_v59 = vld [vmem:[%s20209_s0 + $0x258] sm:$0xff] }
  0x42   :  { %11866 = vmatmul.mubr.msk.f32.gmra.mrb[20].mxu0 %vm91_vm0, %v1111_v60  ;;  %v573_v60 = vld [vmem:[%s20209_s0 + $0x260] sm:$0xff] }
  0x43   :  { %11868 = vmatprep.mubr.msk.f32.mxu0 %vm91_vm0, %v1112_v61  ;;  %v574_v61 = vld [vmem:[%s20209_s0 + $0x268] sm:$0xff] }
  0x44   :  { %11685 = vmatmul.mubr.msk.f32.gmra.mrb[22].mxu1 %vm91_vm0, %v56_v62  ;;  %v575_v62 = vld [vmem:[%s20209_s0 + $0x270] sm:$0xff] }
  0x45   :  { %11687 = vmatprep.mubr.msk.f32.mxu1 %vm91_vm0, %v57_v63  ;;  %v576_v63 = vld [vmem:[%s20209_s0 + $0x278] sm:$0xff] }
  0x46   :  { %11869 = vmatmul.mubr.msk.f32.gmra.mrb[22].mxu0 %vm91_vm0, %v1113_v0  ;;  %v577_v0 = vld [vmem:[%s20209_s0 + $0x280] sm:$0xff] }
  0x47   :  { %11871 = vmatprep.mubr.msk.f32.mxu0 %vm91_vm0, %v1114_v1  ;;  %v578_v1 = vld [vmem:[%s20209_s0 + $0x288] sm:$0xff] }
  0x48   :  { %11688 = vmatmul.mubr.msk.f32.gmra.mrb[24].mxu1 %vm91_vm0, %v58_v2  ;;  %v579_v2 = vld [vmem:[%s20209_s0 + $0x290] sm:$0xff] }
  0x49   :  { %11690 = vmatprep.mubr.msk.f32.mxu1 %vm91_vm0, %v59_v4  ;;  %v580_v4 = vld [vmem:[%s20209_s0 + $0x298] sm:$0xff] }
  0x4a   :  { %11872 = vmatmul.mubr.msk.f32.gmra.mrb[24].mxu0 %vm91_vm0, %v1115_v6  ;;  %v581_v6 = vld [vmem:[%s20209_s0 + $0x2a0] sm:$0xff] }
  0x4c   :  { %11691 = vmatmul.mubr.msk.f32.gmra.mrb[26].mxu1 %vm91_vm0, %v60_v7  ;;  %v582_v7 = vld [vmem:[%s20209_s0 + $0x2a8] sm:$0xff] }
  0x4d   :  { %11693 = vmatprep.mubr.msk.f32.mxu1 %vm91_vm0, %v61_v8  ;;  %v583_v8 = vld [vmem:[%s20209_s0 + $0x2b0] sm:$0xff] }
  0x50   :  { %11694 = vmatmul.mubr.msk.f32.gmra.mrb[28].mxu1 %vm91_vm0, %v62_v10  ;;  %v584_v10 = vld [vmem:[%s20209_s0 + $0x2b8] sm:$0xff] }
  0x51   :  { %11696 = vmatprep.mubr.msk.f32.mxu1 %vm91_vm0, %v63_v11  ;;  %v585_v11 = vld [vmem:[%s20209_s0 + $0x2c0] sm:$0xff] }
  0x54   :  { %11697 = vmatmul.mubr.msk.f32.gmra.mrb[30].mxu1 %vm91_vm0, %v64_v13  ;;  %v586_v13 = vld [vmem:[%s20209_s0 + $0x2c8] sm:$0xff] }
  0x55   :  { %11699 = vmatprep.mubr.msk.f32.mxu1 %vm91_vm0, %v65_v14  ;;  %v587_v14 = vld [vmem:[%s20209_s0 + $0x2d0] sm:$0xff] }
  0x58   :  { %11700 = vmatmul.mubr.msk.f32.gmra.mrb[32].mxu1 %vm91_vm0, %v66_v17  ;;  %v588_v17 = vld [vmem:[%s20209_s0 + $0x2d8] sm:$0xff] }
  0x59   :  { %11702 = vmatprep.mubr.msk.f32.mxu1 %vm91_vm0, %v67_v18  ;;  %v589_v18 = vld [vmem:[%s20209_s0 + $0x2e0] sm:$0xff] }
  0x5c   :  { %11703 = vmatmul.mubr.msk.f32.gmra.mrb[34].mxu1 %vm91_vm0, %v68_v19  ;;  %v590_v19 = vld [vmem:[%s20209_s0 + $0x2e8] sm:$0xff] }
  0x5d   :  { %11705 = vmatprep.mubr.msk.f32.mxu1 %vm91_vm0, %v69_v20  ;;  %v591_v20 = vld [vmem:[%s20209_s0 + $0x2f0] sm:$0xff] }
  0x60   :  { %11706 = vmatmul.mubr.msk.f32.gmra.mrb[36].mxu1 %vm91_vm0, %v70_v21  ;;  %v592_v21 = vld [vmem:[%s20209_s0 + $0x2f8] sm:$0xff] }
  0x61   :  { %11708 = vmatprep.mubr.msk.f32.mxu1 %vm91_vm0, %v71_v22  ;;  %v1116_v22 = vld [vmem:[%s20209_s0 + $0x3d0] sm:$0xff] }
  0x64   :  { %11709 = vmatmul.mubr.msk.f32.gmra.mrb[38].mxu1 %vm91_vm0, %v72_v23  ;;  %v1117_v23 = vld [vmem:[%s20209_s0 + $0x3d8] sm:$0xff] }
  0x65   :  { %11711 = vmatprep.mubr.msk.f32.mxu1 %vm91_vm0, %v73_v24  ;;  %v1118_v24 = vld [vmem:[%s20209_s0 + $0x3e0] sm:$0xff] }
  0x68   :  { %11712 = vmatmul.mubr.msk.f32.gmra.mrb[40].mxu1 %vm91_vm0, %v74_v25  ;;  %v1119_v25 = vld [vmem:[%s20209_s0 + $0x3e8] sm:$0xff] }
  0x69   :  { %11714 = vmatprep.mubr.msk.f32.mxu1 %vm91_vm0, %v75_v26  ;;  %v1120_v26 = vld [vmem:[%s20209_s0 + $0x3f0] sm:$0xff] }
  0x6c   :  { %11715 = vmatmul.mubr.msk.f32.gmra.mrb[42].mxu1 %vm91_vm0, %v76_v27  ;;  %v1122_v27 = vld [vmem:[%s20209_s0 + $0x400] sm:$0xff] }
  0x6d   :  { %11717 = vmatprep.mubr.msk.f32.mxu1 %vm91_vm0, %v77_v28  ;;  %v1123_v28 = vld [vmem:[%s20209_s0 + $0x408] sm:$0xff] }
  0x70   :  { %11718 = vmatmul.mubr.msk.f32.gmra.mrb[44].mxu1 %vm91_vm0, %v78_v29  ;;  %v1125_v29 = vld [vmem:[%s20209_s0 + $0x418] sm:$0xff] }
  0x71   :  { %11720 = vmatprep.mubr.msk.f32.mxu1 %vm91_vm0, %v79_v30  ;;  %v1127_v30 = vld [vmem:[%s20209_s0 + $0x428] sm:$0xff] }
  0x74   :  { %11721 = vmatmul.mubr.msk.f32.gmra.mrb[46].mxu1 %vm91_vm0, %v80_v31 }
  0x75   :  { %11743 = vmatprep.mubr.msk.f32.mxu1 %vm91_vm0, %v545_v32 }
  0x78   :  { %11744 = vmatmul.mubr.msk.f32.vlgmr.msra.gmra.mrb[48].mxu1 %vm91_vm0, %v546_v33  ;;  %v1129_v33 = vld [vmem:[%s20209_s0 + $0x438] sm:$0xff] }
  0x79   :  { %14836 = vmatpush3.bf16.msra.mxu1 %v15344_v3  ;;  %11746 = vmatprep.mubr.msk.f32.mxu1 %vm91_vm0, %v547_v34 }
  0x7a   :  { %14832 = vmatprep.subr.bf16.mxu1 %v15349_v5 }
  0x7c   :  { %11747 = vmatmul.mubr.msk.f32.gmra.mrb[50].mxu1 %vm91_vm0, %v548_v35 }
  0x7d   :  { %11749 = vmatprep.mubr.msk.f32.mxu1 %vm91_vm0, %v549_v36  ;;  %14837 = vmatpush3.bf16.msra.mxu1 %v15349_v5 }
  0x7e   :  { %14833 = vmatprep.subr.bf16.mxu1 %v15365_v9 }
  0x80   :  { %11750 = vmatmul.mubr.msk.f32.gmra.mrb[52].mxu1 %vm91_vm0, %v550_v37  ;;  %v1131_v37 = vld [vmem:[%s20209_s0 + $0x448] sm:$0xff] }
  0x81   :  { %11752 = vmatprep.mubr.msk.f32.mxu1 %vm91_vm0, %v551_v38  ;;  %14838 = vmatpush3.bf16.msra.mxu1 %v15365_v9 }
  0x82   :  { %14834 = vmatprep.subr.bf16.mxu1 %v15377_v12 }
  0x84   :  { %11753 = vmatmul.mubr.msk.f32.gmra.mrb[54].mxu1 %vm91_vm0, %v552_v39  ;;  %v1132_v39 = vld [vmem:[%s20209_s0 + $0x450] sm:$0xff] }
  0x85   :  { %11755 = vmatprep.mubr.msk.f32.mxu1 %vm91_vm0, %v553_v40  ;;  %14839 = vmatpush3.bf16.msra.mxu1 %v15377_v12 }
  0x86   :  { %14835 = vmatprep.subr.msk.bf16.mxu1 %vm15392_vm3, %v15389_v15 }
  0x88   :  { %11756 = vmatmul.mubr.msk.f32.gmra.mrb[56].mxu1 %vm91_vm0, %v554_v41 }
  0x89   :  { %11758 = vmatprep.mubr.msk.f32.mxu1 %vm91_vm0, %v555_v42  ;;  %14840 = vmatpush3.bf16.msk.msra.mxu1 %vm15392_vm3, %v15389_v15 }
  0x8a   :  { %13466 = vmatprep.subr.bf16.mxu1 %v15344_v3 }
  0x8c   :  { %11759 = vmatmul.mubr.msk.f32.gmra.mrb[58].mxu1 %vm91_vm0, %v556_v43  ;;  %v1133_v43 = vld [vmem:[%s20209_s0 + $0x458] sm:$0xff] }
  0x8d   :  { %11761 = vmatprep.mubr.msk.f32.mxu1 %vm91_vm0, %v557_v44 }
  0x90   :  { %11762 = vmatmul.mubr.msk.f32.gmra.mrb[60].mxu1 %vm91_vm0, %v558_v45  ;;  %v1134_v45 = vld [vmem:[%s20209_s0 + $0x460] sm:$0xff] }
  0x91   :  { %11764 = vmatprep.mubr.msk.f32.mxu1 %vm91_vm0, %v559_v46 }
  0x94   :  { %11765 = vmatmul.mubr.msk.f32.gmra.mrb[62].mxu1 %vm91_vm0, %v560_v47 }
  0x95   :  { %11767 = vmatprep.mubr.msk.f32.mxu1 %vm91_vm0, %v561_v48 }
  0x98   :  { %11768 = vmatmul.mubr.msk.f32.gmra.mrb[64].mxu1 %vm91_vm0, %v562_v49  ;;  %v1135_v49 = vld [vmem:[%s20209_s0 + $0x468] sm:$0xff] }
  0x99   :  { %11770 = vmatprep.mubr.msk.f32.mxu1 %vm91_vm0, %v563_v50 }
  0x9c   :  { %11771 = vmatmul.mubr.msk.f32.gmra.mrb[66].mxu1 %vm91_vm0, %v564_v51  ;;  %v1136_v51 = vld [vmem:[%s20209_s0 + $0x470] sm:$0xff] }
  0x9d   :  { %11773 = vmatprep.mubr.msk.f32.mxu1 %vm91_vm0, %v565_v52 }
  0xa0   :  { %11774 = vmatmul.mubr.msk.f32.gmra.mrb[68].mxu1 %vm91_vm0, %v566_v53 }
  0xa1   :  { %11776 = vmatprep.mubr.msk.f32.mxu1 %vm91_vm0, %v567_v54 }
  0xa4   :  { %11777 = vmatmul.mubr.msk.f32.gmra.mrb[70].mxu1 %vm91_vm0, %v568_v55  ;;  %v1137_v55 = vld [vmem:[%s20209_s0 + $0x478] sm:$0xff] }
  0xa5   :  { %11779 = vmatprep.mubr.msk.f32.mxu1 %vm91_vm0, %v569_v56 }
  0xa8   :  { %11780 = vmatmul.mubr.msk.f32.gmra.mrb[72].mxu1 %vm91_vm0, %v570_v57  ;;  %v1635_v57 = vld [vmem:[%s20209_s0 + $0x480] sm:$0xff] }
  0xa9   :  { %11782 = vmatprep.mubr.msk.f32.mxu1 %vm91_vm0, %v571_v58 }
  0xac   :  { %11783 = vmatmul.mubr.msk.f32.gmra.mrb[74].mxu1 %vm91_vm0, %v572_v59 }
  0xad   :  { %11785 = vmatprep.mubr.msk.f32.mxu1 %vm91_vm0, %v573_v60 }
  0xb0   :  { %11786 = vmatmul.mubr.msk.f32.gmra.mrb[76].mxu1 %vm91_vm0, %v574_v61  ;;  %v1636_v61 = vld [vmem:[%s20209_s0 + $0x488] sm:$0xff] }
  0xb1   :  { %11788 = vmatprep.mubr.msk.f32.mxu1 %vm91_vm0, %v575_v62 }
  0xb4   :  { %11789 = vmatmul.mubr.msk.f32.gmra.mrb[78].mxu1 %vm91_vm0, %v576_v63  ;;  %v1637_v63 = vld [vmem:[%s20209_s0 + $0x490] sm:$0xff] }
  0xb5   :  { %11791 = vmatprep.mubr.msk.f32.mxu1 %vm91_vm0, %v577_v0 }
  0xb8   :  { %11792 = vmatmul.mubr.msk.f32.gmra.mrb[80].mxu1 %vm91_vm0, %v578_v1 }
  0xb9   :  { %11794 = vmatprep.mubr.msk.f32.mxu1 %vm91_vm0, %v579_v2 }
  0xbc   :  { %11795 = vmatmul.mubr.msk.f32.gmra.mrb[82].mxu1 %vm91_vm0, %v580_v4  ;;  %v1638_v4 = vld [vmem:[%s20209_s0 + $0x498] sm:$0xff] }
  0xbd   :  { %11797 = vmatprep.mubr.msk.f32.mxu1 %vm91_vm0, %v581_v6 }
  0xc0   :  { %11798 = vmatmul.mubr.msk.f32.gmra.mrb[84].mxu1 %vm91_vm0, %v582_v7  ;;  %v1639_v7 = vld [vmem:[%s20209_s0 + $0x4a0] sm:$0xff] }
  0xc1   :  { %11800 = vmatprep.mubr.msk.f32.mxu1 %vm91_vm0, %v583_v8 }
  0xc4   :  { %11801 = vmatmul.mubr.msk.f32.gmra.mrb[86].mxu1 %vm91_vm0, %v584_v10 }
  0xc5   :  { %11803 = vmatprep.mubr.msk.f32.mxu1 %vm91_vm0, %v585_v11 }
  0xc8   :  { %11804 = vmatmul.mubr.msk.f32.gmra.mrb[88].mxu1 %vm91_vm0, %v586_v13  ;;  %v1640_v13 = vld [vmem:[%s20209_s0 + $0x4a8] sm:$0xff] }
  0xc9   :  { %11806 = vmatprep.mubr.msk.f32.mxu1 %vm91_vm0, %v587_v14 }
  0xcc   :  { %11807 = vmatmul.mubr.msk.f32.gmra.mrb[90].mxu1 %vm91_vm0, %v588_v17  ;;  %v1641_v17 = vld [vmem:[%s20209_s0 + $0x4b0] sm:$0xff] }
  0xcd   :  { %11809 = vmatprep.mubr.msk.f32.mxu1 %vm91_vm0, %v589_v18 }
  0xd0   :  { %11810 = vmatmul.mubr.msk.f32.gmra.mrb[92].mxu1 %vm91_vm0, %v590_v19 }
  0xd1   :  { %11812 = vmatprep.mubr.msk.f32.mxu1 %vm91_vm0, %v591_v20 }
  0xd4   :  { %11813 = vmatmul.mubr.msk.f32.gmra.mrb[94].mxu1 %vm91_vm0, %v592_v21  ;;  %v1642_v21 = vld [vmem:[%s20209_s0 + $0x4b8] sm:$0xff] }
  0xd5   :  { %11874 = vmatprep.mubr.msk.f32.mxu1 %vm91_vm0, %v1116_v22 }
  0xd8   :  { %11875 = vmatmul.mubr.msk.f32.vlgmr.msra.gmra.mrb[96].mxu1 %vm91_vm0, %v1117_v23  ;;  %v1643_v23 = vld [vmem:[%s20209_s0 + $0x4c0] sm:$0xff] }
  0xd9   :  { %13468 = vmatpush3.bf16.msra.mxu1 %v15344_v3  ;;  %11877 = vmatprep.mubr.msk.f32.mxu1 %vm91_vm0, %v1118_v24  ;;  %v1121_v3 = vld [vmem:[%s20209_s0 + $0x3f8] sm:$0xff] }
  0xda   :  { %13470 = vmatprep.subr.bf16.mxu1 %v15349_v5 }
  0xdc   :  { %11878 = vmatmul.mubr.msk.f32.gmra.mrb[98].mxu1 %vm91_vm0, %v1119_v25 }
  0xdd   :  { %11880 = vmatprep.mubr.msk.f32.mxu1 %vm91_vm0, %v1120_v26  ;;  %13472 = vmatpush3.bf16.msra.mxu1 %v15349_v5  ;;  %v1124_v5 = vld [vmem:[%s20209_s0 + $0x410] sm:$0xff] }
  0xde   :  { %13474 = vmatprep.subr.bf16.mxu1 %v15365_v9 }
  0xe0   :  { %11881 = vmatmul.mubr.msk.f32.gmra.mrb[100].mxu1 %vm91_vm0, %v1121_v3  ;;  %v1644_v3 = vld [vmem:[%s20209_s0 + $0x4c8] sm:$0xff] }
  0xe1   :  { %11883 = vmatprep.mubr.msk.f32.mxu1 %vm91_vm0, %v1122_v27  ;;  %13476 = vmatpush3.bf16.msra.mxu1 %v15365_v9  ;;  %v1126_v9 = vld [vmem:[%s20209_s0 + $0x420] sm:$0xff] }
  0xe2   :  { %13478 = vmatprep.subr.bf16.mxu1 %v15377_v12 }
  0xe4   :  { %11884 = vmatmul.mubr.msk.f32.gmra.mrb[102].mxu1 %vm91_vm0, %v1123_v28  ;;  %v1645_v28 = vld [vmem:[%s20209_s0 + $0x4d0] sm:$0xff] }
  0xe5   :  { %11886 = vmatprep.mubr.msk.f32.mxu1 %vm91_vm0, %v1124_v5  ;;  %13480 = vmatpush3.bf16.msra.mxu1 %v15377_v12  ;;  %v1128_v12 = vld [vmem:[%s20209_s0 + $0x430] sm:$0xff] }
  0xe6   :  { %13483 = vmatprep.subr.msk.bf16.mxu1 %vm15392_vm3, %v15389_v15 }
  0xe8   :  { %11887 = vmatmul.mubr.msk.f32.gmra.mrb[104].mxu1 %vm91_vm0, %v1125_v29 }
  0xe9   :  { %11889 = vmatprep.mubr.msk.f32.mxu1 %vm91_vm0, %v1126_v9  ;;  %13486 = vmatpush3.bf16.msk.msra.mxu1 %vm15392_vm3, %v15389_v15  ;;  %v1130_v15 = vld [vmem:[%s20209_s0 + $0x440] sm:$0xff] }
  0xeb   :  { %v15987_v31 = vpop.f32.mrb[0].mxu1 }
  0xec   :  { %v15989_v32 = vpop.f32.mrb[1].mxu1  ;;  %11890 = vmatmul.mubr.msk.f32.gmra.mrb[106].mxu1 %vm91_vm0, %v1127_v30  ;;  %v1646_v30 = vld [vmem:[%s20209_s0 + $0x4d8] sm:$0xff] }
  0xed   :  { %11892 = vmatprep.mubr.msk.f32.mxu1 %vm91_vm0, %v1128_v12  ;;  %v15996_v34 = vpop.f32.mrb[0].mxu0 }
  0xee   :  { %v16001_v16 = vpop.f32.mrb[1].mxu0 }
  0xef   :  { %v16003_v35 = vpop.f32.mrb[2].mxu1 }
  0xf0   :  { %v16005_v36 = vpop.f32.mrb[3].mxu1  ;;  %11893 = vmatmul.mubr.msk.f32.gmra.mrb[108].mxu1 %vm91_vm0, %v1129_v33  ;;  %v1647_v33 = vld [vmem:[%s20209_s0 + $0x4e0] sm:$0xff] }
  0xf1   :  { %11895 = vmatprep.mubr.msk.f32.mxu1 %vm91_vm0, %v1130_v15  ;;  %v16012_v38 = vpop.f32.mrb[2].mxu0 }
  0xf2   :  { %v16017_v40 = vpop.f32.mrb[3].mxu0 }
  0xf3   :  { %v16019_v41 = vpop.f32.mrb[4].mxu1 }
  0xf4   :  { %v16021_v42 = vpop.f32.mrb[5].mxu1  ;;  %11896 = vmatmul.mubr.msk.f32.gmra.mrb[110].mxu1 %vm91_vm0, %v1131_v37 }
  0xf5   :  { %11898 = vmatprep.mubr.msk.f32.mxu1 %vm91_vm0, %v1132_v39  ;;  %v16028_v44 = vpop.f32.mrb[4].mxu0 }
  0xf6   :  { %v16033_v46 = vpop.f32.mrb[5].mxu0 }
  0xf7   :  { %v16035_v47 = vpop.f32.mrb[6].mxu1 }
  0xf8   :  { %v16037_v48 = vpop.f32.mrb[7].mxu1  ;;  %11899 = vmatmul.mubr.msk.f32.gmra.mrb[112].mxu1 %vm91_vm0, %v1133_v43  ;;  %v1648_v43 = vld [vmem:[%s20209_s0 + $0x4e8] sm:$0xff] }
  0xf9   :  { %11901 = vmatprep.mubr.msk.f32.mxu1 %vm91_vm0, %v1134_v45  ;;  %v16044_v50 = vpop.f32.mrb[6].mxu0 }
  0xfa   :  { %v16049_v52 = vpop.f32.mrb[7].mxu0 }
  0xfb   :  { %v16051_v53 = vpop.f32.mrb[8].mxu1 }
  0xfc   :  { %v16053_v54 = vpop.f32.mrb[9].mxu1  ;;  %11902 = vmatmul.mubr.msk.f32.gmra.mrb[114].mxu1 %vm91_vm0, %v1135_v49  ;;  %v1649_v49 = vld [vmem:[%s20209_s0 + $0x4f0] sm:$0xff] }
  0xfd   :  { %11904 = vmatprep.mubr.msk.f32.mxu1 %vm91_vm0, %v1136_v51  ;;  %v16060_v56 = vpop.f32.mrb[8].mxu0 }
  0xfe   :  { %v16065_v58 = vpop.f32.mrb[9].mxu0 }
  0xff   :  { %v16067_v59 = vpop.f32.mrb[10].mxu1 }
 0x100   :  { %v16069_v60 = vpop.f32.mrb[11].mxu1  ;;  %11905 = vmatmul.mubr.msk.f32.gmra.mrb[116].mxu1 %vm91_vm0, %v1137_v55 }
 0x101   :  { %11927 = vmatprep.mubr.msk.f32.mxu1 %vm91_vm0, %v1635_v57  ;;  %v16076_v62 = vpop.f32.mrb[10].mxu0 }
 0x102   :  { %v16081_v0 = vpop.f32.mrb[11].mxu0 }
 0x103   :  { %v16083_v1 = vpop.f32.mrb[12].mxu1 }
 0x104   :  { %v16085_v2 = vpop.f32.mrb[13].mxu1  ;;  %11928 = vmatmul.mubr.msk.f32.vlgmr.msra.gmra.mrb[118].mxu1 %vm91_vm0, %v1636_v61  ;;  %v1650_v61 = vld [vmem:[%s20209_s0 + $0x4f8] sm:$0xff] }
 0x105   :  { %11930 = vmatprep.mubr.msk.f32.mxu1 %vm91_vm0, %v1637_v63  ;;  %v16092_v6 = vpop.f32.mrb[12].mxu0 }
 0x106   :  { %v16097_v8 = vpop.f32.mrb[13].mxu0 }
 0x107   :  { %v16099_v10 = vpop.f32.mrb[14].mxu1 }
 0x108   :  { %v16101_v11 = vpop.f32.mrb[15].mxu1  ;;  %11931 = vmatmul.mubr.msk.f32.gmra.mrb[120].mxu1 %vm91_vm0, %v1638_v4  ;;  %v1651_v4 = vld [vmem:[%s20209_s0 + $0x500] sm:$0xff] }
 0x109   :  { %11933 = vmatprep.mubr.msk.f32.mxu1 %vm91_vm0, %v1639_v7  ;;  %v16108_v14 = vpop.f32.mrb[14].mxu0 }
 0x10a   :  { %v16113_v18 = vpop.f32.mrb[15].mxu0 }
 0x10b   :  { %v16115_v19 = vpop.f32.mrb[16].mxu1 }
 0x10c   :  { %v16117_v20 = vpop.f32.mrb[17].mxu1  ;;  %11934 = vmatmul.mubr.msk.f32.gmra.mrb[122].mxu1 %vm91_vm0, %v1640_v13 }
 0x10d   :  { %11936 = vmatprep.mubr.msk.f32.mxu1 %vm91_vm0, %v1641_v17  ;;  %v16124_v22 = vpop.f32.mrb[16].mxu0 }
 0x10e   :  { %v16129_v24 = vpop.f32.mrb[17].mxu0 }
 0x10f   :  { %v16131_v25 = vpop.f32.mrb[18].mxu1 }
 0x110   :  { %v16133_v26 = vpop.f32.mrb[19].mxu1  ;;  %11937 = vmatmul.mubr.msk.f32.gmra.mrb[124].mxu1 %vm91_vm0, %v1642_v21  ;;  %v1652_v21 = vld [vmem:[%s20209_s0 + $0x508] sm:$0xff] }
 0x111   :  { %11939 = vmatprep.mubr.msk.f32.mxu1 %vm91_vm0, %v1643_v23  ;;  %v16140_v27 = vpop.f32.mrb[18].mxu0  ;;  %v1653_v23 = vld [vmem:[%s20209_s0 + $0x510] sm:$0xff] }
 0x112   :  { %v16145_v5 = vpop.f32.mrb[19].mxu0 }
 0x113   :  { %v16147_v29 = vpop.f32.mrb[20].mxu1 }
 0x114   :  { %v16149_v9 = vpop.f32.mrb[21].mxu1  ;;  %11940 = vmatmul.mubr.msk.f32.gmra.mrb[126].mxu1 %vm91_vm0, %v1644_v3 }
 0x115   :  { %11942 = vmatprep.mubr.msk.f32.mxu1 %vm91_vm0, %v1645_v28  ;;  %v16156_v12 = vpop.f32.mrb[20].mxu0 }
 0x116   :  { %v16161_v15 = vpop.f32.mrb[21].mxu0 }
 0x117   :  { %v16163_v37 = vpop.f32.mrb[22].mxu1 }
 0x118   :  { %v16165_v39 = vpop.f32.mrb[23].mxu1  ;;  %11943 = vmatmul.mubr.msk.f32.gmra.mrb[128].mxu1 %vm91_vm0, %v1646_v30  ;;  %v1654_v30 = vld [vmem:[%s20209_s0 + $0x518] sm:$0xff] }
 0x119   :  { %11945 = vmatprep.mubr.msk.f32.mxu1 %vm91_vm0, %v1647_v33  ;;  %v16172_v45 = vpop.f32.mrb[22].mxu0  ;;  %v1655_v33 = vld [vmem:[%s20209_s0 + $0x520] sm:$0xff] }
 0x11a   :  { %v16177_v51 = vpop.f32.mrb[23].mxu0 }
 0x11b   :  { %v16179_v55 = vpop.f32.mrb[24].mxu1 }
 0x11c   :  { %v16181_v57 = vpop.f32.mrb[25].mxu1  ;;  %11946 = vmatmul.mubr.msk.f32.gmra.mrb[130].mxu1 %vm91_vm0, %v1648_v43 }
 0x11d   :  { %11948 = vmatprep.mubr.msk.f32.mxu1 %vm91_vm0, %v1649_v49  ;;  %v16188_v63 = vpop.f32.mrb[24].mxu0 }
 0x11e   :  { %v16193_v7 = vpop.f32.mrb[25].mxu0 }
 0x11f   :  { %v16195_v13 = vpop.f32.mrb[26].mxu1 }
 0x120   :  { %v16197_v17 = vpop.f32.mrb[27].mxu1  ;;  %11949 = vmatmul.mubr.msk.f32.gmra.mrb[132].mxu1 %vm91_vm0, %v1650_v61  ;;  %v1656_v61 = vld [vmem:[%s20209_s0 + $0x528] sm:$0xff] }
 0x121   :  { %20228 = vst [vmem:[#allocation7_spill] sm:$0xff] %v16197_v17  ;;  %11951 = vmatprep.mubr.msk.f32.mxu1 %vm91_vm0, %v1651_v4  ;;  %v1657_v4 = vld [vmem:[%s20209_s0 + $0x530] sm:$0xff] }
 0x123   :  { %v16207_v3 = vpop.f32.mrb[28].mxu1 }
 0x124   :  { %20229 = vst [vmem:[#allocation8_spill] sm:$0xff] %v16207_v3  ;;  %v16209_v28 = vpop.f32.mrb[29].mxu1  ;;  %11952 = vmatmul.mubr.msk.f32.gmra.mrb[134].mxu1 %vm91_vm0, %v1652_v21  ;;  %v1674_v3 = vld [vmem:[%s20209_s0 + $0x5b8] sm:$0xff] }
 0x125   :  { %20230 = vst [vmem:[#allocation9_spill] sm:$0xff] %v16209_v28  ;;  %11954 = vmatprep.mubr.msk.f32.mxu1 %vm91_vm0, %v1653_v23 }
 0x127   :  { %v16219_v43 = vpop.f32.mrb[30].mxu1 }
 0x128   :  { %20231 = vst [vmem:[#allocation10_spill] sm:$0xff] %v16219_v43  ;;  %v16221_v49 = vpop.f32.mrb[31].mxu1  ;;  %11955 = vmatmul.mubr.msk.f32.gmra.mrb[136].mxu1 %vm91_vm0, %v1654_v30  ;;  %v1658_v30 = vld [vmem:[%s20209_s0 + $0x538] sm:$0xff] }
 0x129   :  { %20232 = vst [vmem:[#allocation11_spill] sm:$0xff] %v16221_v49  ;;  %11957 = vmatprep.mubr.msk.f32.mxu1 %vm91_vm0, %v1655_v33  ;;  %v1659_v33 = vld [vmem:[%s20209_s0 + $0x540] sm:$0xff] }
 0x12b   :  { %v16231_v21 = vpop.f32.mrb[32].mxu1 }
 0x12c   :  { %20233 = vst [vmem:[#allocation12_spill] sm:$0xff] %v16231_v21  ;;  %v16233_v23 = vpop.f32.mrb[33].mxu1  ;;  %11958 = vmatmul.mubr.msk.f32.gmra.mrb[138].mxu1 %vm91_vm0, %v1656_v61  ;;  %v1660_v61 = vld [vmem:[%s20209_s0 + $0x548] sm:$0xff] }
 0x12d   :  { %20234 = vst [vmem:[#allocation13_spill] sm:$0xff] %v16233_v23  ;;  %11960 = vmatprep.mubr.msk.f32.mxu1 %vm91_vm0, %v1657_v4  ;;  %v1661_v4 = vld [vmem:[%s20209_s0 + $0x550] sm:$0xff] }
 0x12f   :  { %v16243_v49 = vpop.f32.mrb[34].mxu1 }
 0x130   :  { %20235 = vst [vmem:[#allocation14_spill] sm:$0xff] %v16243_v49  ;;  %v16245_v43 = vpop.f32.mrb[35].mxu1  ;;  %11961 = vmatmul.mubr.msk.f32.gmra.mrb[140].mxu1 %vm91_vm0, %v1658_v30  ;;  %v1662_v30 = vld [vmem:[%s20209_s0 + $0x558] sm:$0xff] }
 0x131   :  { %20236 = vst [vmem:[#allocation15_spill] sm:$0xff] %v16245_v43  ;;  %11963 = vmatprep.mubr.msk.f32.mxu1 %vm91_vm0, %v1659_v33  ;;  %v1663_v33 = vld [vmem:[%s20209_s0 + $0x560] sm:$0xff] }
 0x133   :  { %v16255_v23 = vpop.f32.mrb[36].mxu1 }
 0x134   :  { %20237 = vst [vmem:[#allocation16_spill] sm:$0xff] %v16255_v23  ;;  %v16257_v21 = vpop.f32.mrb[37].mxu1  ;;  %11964 = vmatmul.mubr.msk.f32.gmra.mrb[142].mxu1 %vm91_vm0, %v1660_v61  ;;  %v1664_v61 = vld [vmem:[%s20209_s0 + $0x568] sm:$0xff] }
 0x135   :  { %20238 = vst [vmem:[#allocation17_spill] sm:$0xff] %v16257_v21  ;;  %11966 = vmatprep.mubr.msk.f32.mxu1 %vm91_vm0, %v1661_v4  ;;  %v1665_v4 = vld [vmem:[%s20209_s0 + $0x570] sm:$0xff] }
 0x137   :  { %v16267_v43 = vpop.f32.mrb[38].mxu1 }
 0x138   :  { %20239 = vst [vmem:[#allocation18_spill] sm:$0xff] %v16267_v43  ;;  %v16269_v49 = vpop.f32.mrb[39].mxu1  ;;  %11967 = vmatmul.mubr.msk.f32.gmra.mrb[144].mxu1 %vm91_vm0, %v1662_v30  ;;  %v1666_v30 = vld [vmem:[%s20209_s0 + $0x578] sm:$0xff] }
 0x139   :  { %20240 = vst [vmem:[#allocation19_spill] sm:$0xff] %v16269_v49  ;;  %11969 = vmatprep.mubr.msk.f32.mxu1 %vm91_vm0, %v1663_v33  ;;  %v1667_v33 = vld [vmem:[%s20209_s0 + $0x580] sm:$0xff] }
 0x13b   :  { %v16279_v21 = vpop.f32.mrb[40].mxu1 }
 0x13c   :  { %20241 = vst [vmem:[#allocation20_spill] sm:$0xff] %v16279_v21  ;;  %v16281_v23 = vpop.f32.mrb[41].mxu1  ;;  %11970 = vmatmul.mubr.msk.f32.gmra.mrb[146].mxu1 %vm91_vm0, %v1664_v61  ;;  %v1668_v61 = vld [vmem:[%s20209_s0 + $0x588] sm:$0xff] }
 0x13d   :  { %20242 = vst [vmem:[#allocation21_spill] sm:$0xff] %v16281_v23  ;;  %11972 = vmatprep.mubr.msk.f32.mxu1 %vm91_vm0, %v1665_v4  ;;  %v1669_v4 = vld [vmem:[%s20209_s0 + $0x590] sm:$0xff] }
 0x13f   :  { %v16291_v49 = vpop.f32.mrb[42].mxu1 }
 0x140   :  { %20243 = vst [vmem:[#allocation22_spill] sm:$0xff] %v16291_v49  ;;  %v16293_v43 = vpop.f32.mrb[43].mxu1  ;;  %11973 = vmatmul.mubr.msk.f32.gmra.mrb[148].mxu1 %vm91_vm0, %v1666_v30  ;;  %v1670_v30 = vld [vmem:[%s20209_s0 + $0x598] sm:$0xff] }
 0x141   :  { %20244 = vst [vmem:[#allocation23_spill] sm:$0xff] %v16293_v43  ;;  %11975 = vmatprep.mubr.msk.f32.mxu1 %vm91_vm0, %v1667_v33  ;;  %v1671_v33 = vld [vmem:[%s20209_s0 + $0x5a0] sm:$0xff] }
 0x143   :  { %v16303_v23 = vpop.f32.mrb[44].mxu1 }
 0x144   :  { %20245 = vst [vmem:[#allocation24_spill] sm:$0xff] %v16303_v23  ;;  %v16305_v21 = vpop.f32.mrb[45].mxu1  ;;  %11976 = vmatmul.mubr.msk.f32.gmra.mrb[150].mxu1 %vm91_vm0, %v1668_v61  ;;  %v1672_v61 = vld [vmem:[%s20209_s0 + $0x5a8] sm:$0xff] }
 0x145   :  { %20246 = vst [vmem:[#allocation25_spill] sm:$0xff] %v16305_v21  ;;  %11978 = vmatprep.mubr.msk.f32.mxu1 %vm91_vm0, %v1669_v4  ;;  %v9698_v4 = vld [vmem:[%s20212_s3 + $0x80] sm:$0xff]  ;;  %v9699_v21 = vld [vmem:[%s20212_s3 + $0x88] sm:$0xff] }
 0x147   :  { %v16315_v43 = vpop.f32.mrb[46].mxu1 }
 0x148   :  { %20247 = vst [vmem:[#allocation26_spill] sm:$0xff] %v16315_v43  ;;  %v16317_v49 = vpop.f32.mrb[47].mxu1  ;;  %11979 = vmatmul.mubr.msk.f32.gmra.mrb[152].mxu1 %vm91_vm0, %v1670_v30  ;;  %v13487_v43 = vpack.c.bf16 %v9699_v21, %v9698_v4  ;;  %v9700_v21 = vld [vmem:[%s20212_s3 + $0x90] sm:$0xff] }
 0x149   :  { %20248 = vst [vmem:[#allocation27_spill] sm:$0xff] %v16317_v49  ;;  %11981 = vmatprep.mubr.msk.f32.mxu1 %vm91_vm0, %v1671_v33  ;;  %v1673_v49 = vld [vmem:[%s20209_s0 + $0x5b0] sm:$0xff] }
 0x14a   :  { %13488 = vmatprep.subr.bf16.mxu0 %v13487_v43 }
 0x14b   :  { %v11745_v30 = vpop.f32.mrb[48].mxu1  ;;  %13490 = vmatpush3.bf16.msra.mxu0 %v13487_v43 }
 0x14c   :  { %v1043_v33 = vmax.f32 %v15987_v31, %v11745_v30  ;;  %v803_v23 = vpop.f32.mrb[49].mxu1  ;;  %11982 = vmatmul.mubr.msk.f32.gmra.mrb[154].mxu1 %vm91_vm0, %v1672_v61  ;;  %v9701_v31 = vld [vmem:[%s20212_s3 + $0x98] sm:$0xff] }
 0x14d   :  { %v1042_v28 = vmax.f32 %v15989_v32, %v803_v23  ;;  %11984 = vmatprep.mubr.msk.f32.mxu1 %vm91_vm0, %v1673_v49  ;;  %v1675_v32 = vld [vmem:[%s20209_s0 + $0x5c0] sm:$0xff]  ;;  %v13491_v49 = vpack.c.bf16 %v9701_v31, %v9700_v21 }
 0x14e   :  { %v16347_v61 = vmax.f32 %v1043_v33, %v15996_v34  ;;  %v1676_v34 = vld [vmem:[%s20209_s0 + $0x5c8] sm:$0xff] }
 0x14f   :  { %v16353_v23 = vmax.f32 %v1042_v28, %v16001_v16  ;;  %v11748_v43 = vpop.f32.mrb[50].mxu1  ;;  %13492 = vmatprep.subr.bf16.mxu0 %v13491_v49  ;;  %v9702_v16 = vld [vmem:[%s20212_s3 + $0xa0] sm:$0xff] }
 0x150   :  { %v1045_v4 = vmax.f32 %v16003_v35, %v11748_v43  ;;  %v813_v30 = vpop.f32.mrb[51].mxu1  ;;  %11985 = vmatmul.mubr.msk.f32.gmra.mrb[156].mxu1 %vm91_vm0, %v1674_v3  ;;  %13494 = vmatpush3.bf16.msra.mxu0 %v13491_v49  ;;  %v9703_v35 = vld [vmem:[%s20212_s3 + $0xa8] sm:$0xff] }
 0x151   :  { %v1044_v17 = vmax.f32 %v16005_v36, %v813_v30  ;;  %11987 = vmatprep.mubr.msk.f32.mxu1 %vm91_vm0, %v1675_v32  ;;  %v1677_v36 = vld [vmem:[%s20209_s0 + $0x5d0] sm:$0xff]  ;;  %v13495_v28 = vpack.c.bf16 %v9703_v35, %v9702_v16 }
 0x152   :  { %v16369_v3 = vmax.f32 %v1045_v4, %v16012_v38  ;;  %v1678_v38 = vld [vmem:[%s20209_s0 + $0x5d8] sm:$0xff] }
 0x153   :  { %v16375_v33 = vmax.f32 %v1044_v17, %v16017_v40  ;;  %v11751_v21 = vpop.f32.mrb[52].mxu1  ;;  %13496 = vmatprep.subr.bf16.mxu0 %v13495_v28  ;;  %v9704_v40 = vld [vmem:[%s20212_s3 + $0xb0] sm:$0xff] }
 0x154   :  { %v1047_v31 = vmax.f32 %v16019_v41, %v11751_v21  ;;  %v823_v32 = vpop.f32.mrb[53].mxu1  ;;  %11988 = vmatmul.mubr.msk.f32.gmra.mrb[158].mxu1 %vm91_vm0, %v1676_v34  ;;  %13498 = vmatpush3.bf16.msra.mxu0 %v13495_v28  ;;  %v9705_v41 = vld [vmem:[%s20212_s3 + $0xb8] sm:$0xff] }
 0x155   :  { %v1046_v49 = vmax.f32 %v16021_v42, %v823_v32  ;;  %11990 = vmatprep.mubr.msk.f32.mxu1 %vm91_vm0, %v1677_v36  ;;  %v1679_v42 = vld [vmem:[%s20209_s0 + $0x5e0] sm:$0xff]  ;;  %v13499_v43 = vpack.c.bf16 %v9705_v41, %v9704_v40 }
 0x156   :  { %v16391_v17 = vmax.f32 %v1047_v31, %v16028_v44  ;;  %v1680_v44 = vld [vmem:[%s20209_s0 + $0x5e8] sm:$0xff] }
 0x157   :  { %v16397_v4 = vmax.f32 %v1046_v49, %v16033_v46  ;;  %v11754_v30 = vpop.f32.mrb[54].mxu1  ;;  %13500 = vmatprep.subr.bf16.mxu0 %v13499_v43  ;;  %v9706_v46 = vld [vmem:[%s20212_s3 + $0xc0] sm:$0xff] }
 0x158   :  { %v1049_v34 = vmax.f32 %v16035_v47, %v11754_v30  ;;  %v833_v16 = vpop.f32.mrb[55].mxu1  ;;  %11991 = vmatmul.mubr.msk.f32.gmra.mrb[160].mxu1 %vm91_vm0, %v1678_v38  ;;  %13502 = vmatpush3.bf16.msra.mxu0 %v13499_v43  ;;  %v9707_v47 = vld [vmem:[%s20212_s3 + $0xc8] sm:$0xff] }
 0x159   :  { %v1048_v35 = vmax.f32 %v16037_v48, %v833_v16  ;;  %11993 = vmatprep.mubr.msk.f32.mxu1 %vm91_vm0, %v1679_v42  ;;  %v1681_v48 = vld [vmem:[%s20209_s0 + $0x5f0] sm:$0xff]  ;;  %v13503_v28 = vpack.c.bf16 %v9707_v47, %v9706_v46  ;;  %v9710_v16 = vld [vmem:[%s20212_s3 + $0xe0] sm:$0xff] }
 0x15a   :  { %v16413_v36 = vmax.f32 %v1049_v34, %v16044_v50  ;;  %v1682_v50 = vld [vmem:[%s20209_s0 + $0x5f8] sm:$0xff] }
 0x15b   :  { %v16419_v21 = vmax.f32 %v1048_v35, %v16049_v52  ;;  %v11757_v31 = vpop.f32.mrb[56].mxu1  ;;  %13504 = vmatprep.subr.bf16.mxu0 %v13503_v28  ;;  %v9708_v52 = vld [vmem:[%s20212_s3 + $0xd0] sm:$0xff] }
 0x15c   :  { %v1051_v32 = vmax.f32 %v16051_v53, %v11757_v31  ;;  %v843_v49 = vpop.f32.mrb[57].mxu1  ;;  %11994 = vmatmul.mubr.msk.f32.gmra.mrb[162].mxu1 %vm91_vm0, %v1680_v44  ;;  %13506 = vmatpush3.bf16.msra.mxu0 %v13503_v28  ;;  %v9709_v53 = vld [vmem:[%s20212_s3 + $0xd8] sm:$0xff] }
 0x15d   :  { %v1050_v38 = vmax.f32 %v16053_v54, %v843_v49  ;;  %11996 = vmatprep.mubr.msk.f32.mxu1 %vm91_vm0, %v1681_v48  ;;  %v13507_v41 = vpack.c.bf16 %v9709_v53, %v9708_v52  ;;  %v9712_v48 = vld [vmem:[%s20212_s3 + $0xf0] sm:$0xff] }
 0x15e   :  { %v16435_v40 = vmax.f32 %v1051_v32, %v16060_v56  ;;  %v9711_v56 = vld [vmem:[%s20212_s3 + $0xe8] sm:$0xff] }
 0x15f   :  { %v16438_v54 = vmax.f32 %v1050_v38, %v16065_v58  ;;  %v11760_v42 = vpop.f32.mrb[58].mxu1  ;;  %13508 = vmatprep.subr.bf16.mxu0 %v13507_v41  ;;  %v13511_v35 = vpack.c.bf16 %v9711_v56, %v9710_v16 }
 0x160   :  { %v1053_v43 = vmax.f32 %v16067_v59, %v11760_v42  ;;  %v853_v30 = vpop.f32.mrb[59].mxu1  ;;  %11997 = vmatmul.mubr.msk.f32.gmra.mrb[164].mxu1 %vm91_vm0, %v1682_v50  ;;  %13510 = vmatpush3.bf16.msra.mxu0 %v13507_v41 }
 0x161   :  { %v1052_v34 = vmax.f32 %v16069_v60, %v853_v30  ;;  %13512 = vmatprep.subr.bf16.mxu0 %v13511_v35 }
 0x162   :  { %v16450_v58 = vmax.f32 %v1053_v43, %v16076_v62  ;;  %v9713_v62 = vld [vmem:[%s20212_s3 + $0xf8] sm:$0xff] }
 0x163   :  { %v16453_v59 = vmax.f32 %v1052_v34, %v16081_v0  ;;  %v11763_v44 = vpop.f32.mrb[60].mxu1  ;;  %v13515_v0 = vpack.c.bf16 %v9713_v62, %v9712_v48  ;;  %v20250_v48 = vld [vmem:[#allocation8_spill] sm:$0xff] }
 0x164   :  { %v1055_v46 = vmax.f32 %v16083_v1, %v11763_v44  ;;  %v863_v60 = vpop.f32.mrb[61].mxu1  ;;  %13514 = vmatpush3.bf16.msra.mxu0 %v13511_v35 }
 0x165   :  { %v1054_v47 = vmax.f32 %v16085_v2, %v863_v60  ;;  %13516 = vmatprep.subr.bf16.mxu0 %v13515_v0  ;;  %v20249_v60 = vld [vmem:[#allocation7_spill] sm:$0xff] }
 0x166   :  { %v16464_v28 = vmax.f32 %v1055_v46, %v16092_v6 }
 0x167   :  { %v16467_v31 = vmax.f32 %v1054_v47, %v16097_v8  ;;  %v11766_v1 = vpop.f32.mrb[62].mxu1 }
 0x168   :  { %v1057_v32 = vmax.f32 %v16099_v10, %v11766_v1  ;;  %v873_v2 = vpop.f32.mrb[63].mxu1  ;;  %13518 = vmatpush3.bf16.msra.mxu0 %v13515_v0 }
 0x169   :  { %v1056_v49 = vmax.f32 %v16101_v11, %v873_v2 }
 0x16a   :  { %v16472_v38 = vmax.f32 %v1057_v32, %v16108_v14 }
 0x16b   :  { %v16475_v50 = vmax.f32 %v1056_v49, %v16113_v18  ;;  %v11769_v6 = vpop.f32.mrb[64].mxu1  ;;  %v20253_v49 = vld [vmem:[#allocation11_spill] sm:$0xff] }
 0x16c   :  { %v1059_v52 = vmax.f32 %v16115_v19, %v11769_v6  ;;  %v883_v53 = vpop.f32.mrb[65].mxu1 }
 0x16d   :  { %v1058_v8 = vmax.f32 %v16117_v20, %v883_v53 }
 0x16e   :  { %v16480_v41 = vmax.f32 %v1059_v52, %v16124_v22  ;;  %v20254_v52 = vld [vmem:[#allocation12_spill] sm:$0xff] }
 0x16f   :  { %v16483_v10 = vmax.f32 %v1058_v8, %v16129_v24  ;;  %v11772_v11 = vpop.f32.mrb[66].mxu1 }
 0x170   :  { %v1061_v42 = vmax.f32 %v16131_v25, %v11772_v11  ;;  %v893_v14 = vpop.f32.mrb[67].mxu1 }
 0x171   :  { %v1060_v43 = vmax.f32 %v16133_v26, %v893_v14  ;;  %v20256_v14 = vld [vmem:[#allocation14_spill] sm:$0xff] }
 0x172   :  { %v16488_v18 = vmax.f32 %v1061_v42, %v16140_v27 }
 0x173   :  { %v16491_v19 = vmax.f32 %v1060_v43, %v16145_v5  ;;  %v11775_v30 = vpop.f32.mrb[68].mxu1 }
 0x174   :  { %v1063_v20 = vmax.f32 %v16147_v29, %v11775_v30  ;;  %v903_v22 = vpop.f32.mrb[69].mxu1 }
 0x175   :  { %v1062_v34 = vmax.f32 %v16149_v9, %v903_v22 }
 0x176   :  { %v16496_v24 = vmax.f32 %v1063_v20, %v16156_v12  ;;  %v20257_v20 = vld [vmem:[#allocation15_spill] sm:$0xff] }
 0x177   :  { %v16499_v25 = vmax.f32 %v1062_v34, %v16161_v15  ;;  %v11778_v16 = vpop.f32.mrb[70].mxu1 }
 0x178   :  { %v1065_v26 = vmax.f32 %v16163_v37, %v11778_v16  ;;  %v913_v27 = vpop.f32.mrb[71].mxu1  ;;  %v20258_v16 = vld [vmem:[#allocation16_spill] sm:$0xff] }
 0x179   :  { %v1064_v56 = vmax.f32 %v16165_v39, %v913_v27 }
 0x17a   :  { %v16504_v5 = vmax.f32 %v1065_v26, %v16172_v45 }
 0x17b   :  { %v16507_v29 = vmax.f32 %v1064_v56, %v16177_v51  ;;  %v11781_v35 = vpop.f32.mrb[72].mxu1  ;;  %v20259_v56 = vld [vmem:[#allocation17_spill] sm:$0xff] }
 0x17c   :  { %v1067_v9 = vmax.f32 %v16179_v55, %v11781_v35  ;;  %v923_v12 = vpop.f32.mrb[73].mxu1  ;;  %v20251_v55 = vld [vmem:[#allocation9_spill] sm:$0xff] }
 0x17d   :  { %v1066_v44 = vmax.f32 %v16181_v57, %v923_v12  ;;  %v20252_v57 = vld [vmem:[#allocation10_spill] sm:$0xff]  ;;  %v2467_v12 = vld [vmem:[%s20212_s3 + $0x8] sm:$0xff] }
 0x17e   :  { %v16512_v15 = vmax.f32 %v1067_v9, %v16188_v63  ;;  %v2466_v9 = vld [vmem:[%s20212_s3] sm:$0xff] }
 0x17f   :  { %v16515_v37 = vmax.f32 %v1066_v44, %v16193_v7  ;;  %v11784_v46 = vpop.f32.mrb[74].mxu1  ;;  %v16535_v44 = vpack.c.bf16 %v2467_v12, %v2466_v9 }
 0x180   :  { %v1069_v39 = vmax.f32 %v16195_v13, %v11784_v46  ;;  %v933_v45 = vpop.f32.mrb[75].mxu1  ;;  %v20255_v13 = vld [vmem:[#allocation13_spill] sm:$0xff] }
 0x181   :  { %v1068_v47 = vmax.f32 %v20249_v60, %v933_v45  ;;  %v20260_v45 = vld [vmem:[#allocation18_spill] sm:$0xff]  ;;  %13520 = vmatprep.subr.bf16.mxu0 %v16535_v44 }
 0x183   :  { %v11787_v51 = vpop.f32.mrb[76].mxu1 }
 0x184   :  { %v1071_v62 = vmax.f32 %v20250_v48, %v11787_v51  ;;  %v943_v0 = vpop.f32.mrb[77].mxu1  ;;  %v20261_v48 = vld [vmem:[#allocation19_spill] sm:$0xff] }
 0x185   :  { %v1070_v1 = vmax.f32 %v20251_v55, %v943_v0 }
 0x187   :  { %v11790_v32 = vpop.f32.mrb[78].mxu1 }
 0x188   :  { %v1073_v2 = vmax.f32 %v20252_v57, %v11790_v32  ;;  %v953_v63 = vpop.f32.mrb[79].mxu1  ;;  %v20262_v32 = vld [vmem:[#allocation20_spill] sm:$0xff] }
 0x189   :  { %v1072_v6 = vmax.f32 %v20253_v49, %v953_v63  ;;  %v20263_v49 = vld [vmem:[#allocation21_spill] sm:$0xff] }
 0x18b   :  { %v11793_v7 = vpop.f32.mrb[80].mxu1 }
 0x18c   :  { %v1075_v53 = vmax.f32 %v20254_v52, %v11793_v7  ;;  %v963_v8 = vpop.f32.mrb[81].mxu1 }
 0x18d   :  { %v1074_v11 = vmax.f32 %v20255_v13, %v963_v8  ;;  %v20264_v8 = vld [vmem:[#allocation22_spill] sm:$0xff] }
 0x18f   :  { %v11796_v42 = vpop.f32.mrb[82].mxu1 }
 0x190   :  { %v1077_v43 = vmax.f32 %v20256_v14, %v11796_v42  ;;  %v973_v30 = vpop.f32.mrb[83].mxu1  ;;  %v20265_v14 = vld [vmem:[#allocation23_spill] sm:$0xff] }
 0x191   :  { %v1076_v22 = vmax.f32 %v20257_v20, %v973_v30 }
 0x193   :  { %v11799_v34 = vpop.f32.mrb[84].mxu1 }
 0x194   :  { %v1079_v26 = vmax.f32 %v20258_v16, %v11799_v34  ;;  %v983_v27 = vpop.f32.mrb[85].mxu1  ;;  %v20266_v34 = vld [vmem:[#allocation24_spill] sm:$0xff] }
 0x195   :  { %v1078_v35 = vmax.f32 %v20259_v56, %v983_v27  ;;  %v20267_v56 = vld [vmem:[#allocation25_spill] sm:$0xff] }
 0x197   :  { %v11802_v46 = vpop.f32.mrb[86].mxu1 }
 0x198   :  { %v1081_v60 = vmax.f32 %v20260_v45, %v11802_v46  ;;  %v993_v51 = vpop.f32.mrb[87].mxu1  ;;  %v20268_v46 = vld [vmem:[#allocation26_spill] sm:$0xff] }
 0x199   :  { %v1080_v0 = vmax.f32 %v20261_v48, %v993_v51  ;;  %v20269_v48 = vld [vmem:[#allocation27_spill] sm:$0xff] }
 0x19b   :  { %v11805_v55 = vpop.f32.mrb[88].mxu1 }
 0x19c   :  { %v1083_v57 = vmax.f32 %v20262_v32, %v11805_v55  ;;  %v1003_v63 = vpop.f32.mrb[89].mxu1 }
 0x19d   :  { %v1082_v7 = vmax.f32 %v20263_v49, %v1003_v63 }
 0x19f   :  { %v11808_v52 = vpop.f32.mrb[90].mxu1 }
 0x1a0   :  { %v1085_v13 = vmax.f32 %v20264_v8, %v11808_v52  ;;  %v1013_v42 = vpop.f32.mrb[91].mxu1 }
 0x1a1   :  { %v1084_v30 = vmax.f32 %v20265_v14, %v1013_v42 }
 0x1a3   :  { %v11811_v20 = vpop.f32.mrb[92].mxu1 }
 0x1a4   :  { %v1087_v16 = vmax.f32 %v20266_v34, %v11811_v20  ;;  %v1023_v27 = vpop.f32.mrb[93].mxu1 }
 0x1a5   :  { %v1086_v9 = vmax.f32 %v20267_v56, %v1023_v27 }
 0x1a7   :  { %v11814_v12 = vpop.f32.mrb[94].mxu1 }
 0x1a8   :  { %v1089_v45 = vmax.f32 %v20268_v46, %v11814_v12  ;;  %v1033_v51 = vpop.f32.mrb[95].mxu1 }
 0x1a9   :  { %v1088_v55 = vmax.f32 %v20269_v48, %v1033_v51 }
 0x1ab   :  { %v11876_v32 = vpop.f32.mrb[96].mxu1 }
 0x1ac   :  { %v16548_v63 = vmax.f32 %v1069_v39, %v11876_v32  ;;  %v1478_v49 = vpop.f32.mrb[97].mxu1 }
 0x1ad   :  { %v16550_v52 = vmax.f32 %v1068_v47, %v1478_v49 }
 0x1af   :  { %v11879_v8 = vpop.f32.mrb[98].mxu1 }
 0x1b0   :  { %v16552_v42 = vmax.f32 %v1071_v62, %v11879_v8  ;;  %v1488_v14 = vpop.f32.mrb[99].mxu1 }
 0x1b1   :  { %v16554_v20 = vmax.f32 %v1070_v1, %v1488_v14 }
 0x1b3   :  { %v11882_v34 = vpop.f32.mrb[100].mxu1 }
 0x1b4   :  { %v16556_v27 = vmax.f32 %v1073_v2, %v11882_v34  ;;  %v1498_v56 = vpop.f32.mrb[101].mxu1 }
 0x1b5   :  { %v16558_v12 = vmax.f32 %v1072_v6, %v1498_v56 }
 0x1b7   :  { %v11885_v46 = vpop.f32.mrb[102].mxu1 }
 0x1b8   :  { %v16560_v51 = vmax.f32 %v1075_v53, %v11885_v46  ;;  %v1508_v39 = vpop.f32.mrb[103].mxu1 }
 0x1b9   :  { %v16562_v48 = vmax.f32 %v1074_v11, %v1508_v39 }
 0x1bb   :  { %v11888_v47 = vpop.f32.mrb[104].mxu1 }
 0x1bc   :  { %v16564_v32 = vmax.f32 %v1077_v43, %v11888_v47  ;;  %v1518_v62 = vpop.f32.mrb[105].mxu1 }
 0x1bd   :  { %v16566_v49 = vmax.f32 %v1076_v22, %v1518_v62 }
 0x1bf   :  { %v11891_v1 = vpop.f32.mrb[106].mxu1 }
 0x1c0   :  { %v16568_v8 = vmax.f32 %v1079_v26, %v11891_v1  ;;  %v1528_v2 = vpop.f32.mrb[107].mxu1 }
 0x1c1   :  { %v16570_v14 = vmax.f32 %v1078_v35, %v1528_v2 }
 0x1c3   :  { %v11894_v6 = vpop.f32.mrb[108].mxu1 }
 0x1c4   :  { %v16572_v34 = vmax.f32 %v1081_v60, %v11894_v6  ;;  %v1538_v53 = vpop.f32.mrb[109].mxu1 }
 0x1c5   :  { %v16574_v56 = vmax.f32 %v1080_v0, %v1538_v53 }
 0x1c7   :  { %v11897_v11 = vpop.f32.mrb[110].mxu1 }
 0x1c8   :  { %v16576_v46 = vmax.f32 %v1083_v57, %v11897_v11  ;;  %v1548_v43 = vpop.f32.mrb[111].mxu1 }
 0x1c9   :  { %v16578_v39 = vmax.f32 %v1082_v7, %v1548_v43 }
 0x1cb   :  { %v11900_v22 = vpop.f32.mrb[112].mxu1 }
 0x1cc   :  { %v16580_v47 = vmax.f32 %v1085_v13, %v11900_v22  ;;  %v1558_v26 = vpop.f32.mrb[113].mxu1  ;;  %v16595_v13 = vld [vmem:[%s20211_s2] ss:$0 sm:$0xff] }
 0x1cd   :  { %v16582_v62 = vmax.f32 %v1084_v30, %v1558_v26 }
 0x1cf   :  { %v11903_v35 = vpop.f32.mrb[114].mxu1 }
 0x1d0   :  { %v16584_v1 = vmax.f32 %v1087_v16, %v11903_v35  ;;  %v1568_v60 = vpop.f32.mrb[115].mxu1 }
 0x1d1   :  { %v16586_v2 = vmax.f32 %v1086_v9, %v1568_v60 }
 0x1d3   :  { %v11906_v0 = vpop.f32.mrb[116].mxu1 }
 0x1d4   :  { %v16588_v6 = vmax.f32 %v1089_v45, %v11906_v0  ;;  %v1578_v57 = vpop.f32.mrb[117].mxu1 }
 0x1d5   :  { %v16590_v53 = vmax.f32 %v1088_v55, %v1578_v57 }
 0x1d7   :  { %v11929_v7 = vpop.f32.mrb[118].mxu1 }
 0x1d8   :  { %v2133_v30 = vmax.f32 %v16347_v61, %v11929_v7  ;;  %v1893_v11 = vpop.f32.mrb[119].mxu1 }
 0x1d9   :  { %v2132_v16 = vmax.f32 %v16353_v23, %v1893_v11 }
 0x1da   :  { %v2188_v9 = vadd.f32 %v16595_v13, %v2133_v30 }
 0x1db   :  { %v2187_v43 = vadd.f32 %v16595_v13, %v2132_v16  ;;  %v11932_v45 = vpop.f32.mrb[120].mxu1 }
 0x1dc   :  { %vm2236_vm4 = vcmp.ge.f32.partialorder %v2188_v9, 0.0  ;;  %v2284_v22 = vmul.f32 0.01, %v2188_v9  ;;  %v2135_v55 = vmax.f32 %v16369_v3, %v11932_v45  ;;  %v1903_v26 = vpop.f32.mrb[121].mxu1 }
 0x1dd   :  { %vm2235_vm5 = vcmp.ge.f32.partialorder %v2187_v43, 0.0  ;;  %v2283_v35 = vmul.f32 0.01, %v2187_v43  ;;  %v2134_v60 = vmax.f32 %v16375_v33, %v1903_v26 }
 0x1de   :  { %v2332_v0 = vsel %vm2236_vm4, %v2188_v9, %v2284_v22  ;;  %v2190_v61 = vadd.f32 %v16595_v13, %v2135_v55 }
 0x1df   :  { %2380 = vst [vmem:[#allocation2 + $0x8] sm:$0xff] %v2332_v0  ;;  %v16604_v57 = vsel %vm2235_vm5, %v2187_v43, %v2283_v35  ;;  %v2189_v23 = vadd.f32 %v16595_v13, %v2134_v60  ;;  %v11935_v7 = vpop.f32.mrb[122].mxu1 }
 0x1e0   :  { %2379 = vst [vmem:[#allocation2] sm:$0xff] %v16604_v57  ;;  %vm2238_vm6 = vcmp.ge.f32.partialorder %v2190_v61, 0.0  ;;  %v2286_v30 = vmul.f32 0.01, %v2190_v61  ;;  %v2137_v3 = vmax.f32 %v16391_v17, %v11935_v7  ;;  %v1913_v11 = vpop.f32.mrb[123].mxu1 }
 0x1e1   :  { %vm2237_vm7 = vcmp.ge.f32.partialorder %v2189_v23, 0.0  ;;  %v2285_v16 = vmul.f32 0.01, %v2189_v23  ;;  %v2136_v33 = vmax.f32 %v16397_v4, %v1913_v11  ;;  %v2468_v11 = vld [vmem:[%s20212_s3 + $0x10] sm:$0xff] }
 0x1e2   :  { %v2334_v9 = vsel %vm2238_vm6, %v2190_v61, %v2286_v30  ;;  %v2192_v45 = vadd.f32 %v16595_v13, %v2137_v3 }
 0x1e3   :  { %2383 = vst [vmem:[#allocation2 + $0x18] sm:$0xff] %v2334_v9  ;;  %v16611_v43 = vsel %vm2237_vm7, %v2189_v23, %v2285_v16  ;;  %v2191_v22 = vadd.f32 %v16595_v13, %v2136_v33  ;;  %v11938_v55 = vpop.f32.mrb[124].mxu1 }
 0x1e4   :  { %2382 = vst [vmem:[#allocation2 + $0x10] sm:$0xff] %v16611_v43  ;;  %vm2240_vm8 = vcmp.ge.f32.partialorder %v2192_v45, 0.0  ;;  %v2288_v26 = vmul.f32 0.01, %v2192_v45  ;;  %v2139_v17 = vmax.f32 %v16413_v36, %v11938_v55  ;;  %v1923_v35 = vpop.f32.mrb[125].mxu1  ;;  %v2469_v36 = vld [vmem:[%s20212_s3 + $0x18] sm:$0xff] }
 0x1e5   :  { %vm2239_vm9 = vcmp.ge.f32.partialorder %v2191_v22, 0.0  ;;  %v2287_v60 = vmul.f32 0.01, %v2191_v22  ;;  %v2138_v4 = vmax.f32 %v16419_v21, %v1923_v35 }
 0x1e6   :  { %v2336_v0 = vsel %vm2240_vm8, %v2192_v45, %v2288_v26  ;;  %v2194_v61 = vadd.f32 %v16595_v13, %v2139_v17  ;;  %v13523_v26 = vpack.c.bf16 %v2469_v36, %v2468_v11 }
 0x1e7   :  { %2386 = vst [vmem:[#allocation2 + $0x28] sm:$0xff] %v2336_v0  ;;  %v16618_v23 = vsel %vm2239_vm9, %v2191_v22, %v2287_v60  ;;  %v2193_v7 = vadd.f32 %v16595_v13, %v2138_v4  ;;  %v11941_v30 = vpop.f32.mrb[126].mxu1  ;;  %v2482_v3 = vld [vmem:[#allocation2 + $0x1] sm:$0xff] }
 0x1e8   :  { %2385 = vst [vmem:[#allocation2 + $0x20] sm:$0xff] %v16618_v23  ;;  %vm2242_vm10 = vcmp.ge.f32.partialorder %v2194_v61, 0.0  ;;  %v2290_v21 = vmul.f32 0.01, %v2194_v61  ;;  %v2141_v16 = vmax.f32 %v16435_v40, %v11941_v30  ;;  %v1933_v33 = vpop.f32.mrb[127].mxu1  ;;  %12031 = vmatprep.mubr.f32.mxu0 %v2482_v3  ;;  %v2470_v40 = vld [vmem:[%s20212_s3 + $0x20] sm:$0xff] }
 0x1e9   :  { %vm2241_vm11 = vcmp.ge.f32.partialorder %v2193_v7, 0.0  ;;  %v2289_v9 = vmul.f32 0.01, %v2193_v7  ;;  %v2140_v45 = vmax.f32 %v16438_v54, %v1933_v33  ;;  %v2471_v0 = vld [vmem:[%s20212_s3 + $0x28] sm:$0xff] }
 0x1ea   :  { %v2338_v22 = vsel %vm2242_vm10, %v2194_v61, %v2290_v21  ;;  %v2196_v55 = vadd.f32 %v16595_v13, %v2141_v16  ;;  %v13527_v21 = vpack.c.bf16 %v2471_v0, %v2470_v40 }
 0x1eb   :  { %2389 = vst [vmem:[#allocation2 + $0x38] sm:$0xff] %v2338_v22  ;;  %v16631_v17 = vsel %vm2241_vm11, %v2193_v7, %v2289_v9  ;;  %v2195_v35 = vadd.f32 %v16595_v13, %v2140_v45  ;;  %v11944_v60 = vpop.f32.mrb[128].mxu1  ;;  %v2483_v4 = vld [vmem:[#allocation2 + $0x11] sm:$0xff] }
 0x1ec   :  { %2388 = vst [vmem:[#allocation2 + $0x30] sm:$0xff] %v16631_v17  ;;  %vm2244_vm12 = vcmp.ge.f32.partialorder %v2196_v55, 0.0  ;;  %v2292_v54 = vmul.f32 0.01, %v2196_v55  ;;  %v2143_v61 = vmax.f32 %v16450_v58, %v11944_v60  ;;  %v1943_v7 = vpop.f32.mrb[129].mxu1  ;;  %12032 = vmatmul.mubr.f32.vlgmr.msra.gmra.mrb[26].mxu0 %v2483_v4  ;;  %v2472_v45 = vld [vmem:[%s20212_s3 + $0x30] sm:$0xff] }
 0x1ed   :  { %vm2243_vm13 = vcmp.ge.f32.partialorder %v2195_v35, 0.0  ;;  %v2291_v30 = vmul.f32 0.01, %v2195_v35  ;;  %v2142_v3 = vmax.f32 %v16453_v59, %v1943_v7  ;;  %13522 = vmatpush3.bf16.msra.mxu0 %v16535_v44  ;;  %v2473_v59 = vld [vmem:[%s20212_s3 + $0x38] sm:$0xff] }
 0x1ee   :  { %v2340_v11 = vsel %vm2244_vm12, %v2196_v55, %v2292_v54  ;;  %v2198_v36 = vadd.f32 %v16595_v13, %v2143_v61  ;;  %13524 = vmatprep.subr.bf16.mxu0 %v13523_v26  ;;  %v13531_v0 = vpack.c.bf16 %v2473_v59, %v2472_v45 }
 0x1ef   :  { %2392 = vst [vmem:[#allocation2 + $0x48] sm:$0xff] %v2340_v11  ;;  %v16645_v16 = vsel %vm2243_vm13, %v2195_v35, %v2291_v30  ;;  %v2197_v33 = vadd.f32 %v16595_v13, %v2142_v3  ;;  %v11947_v9 = vpop.f32.mrb[130].mxu1  ;;  %v2484_v58 = vld [vmem:[#allocation2 + $0x21] sm:$0xff] }
 0x1f0   :  { %2391 = vst [vmem:[#allocation2 + $0x40] sm:$0xff] %v16645_v16  ;;  %vm2246_vm14 = vcmp.ge.f32.partialorder %v2198_v36, 0.0  ;;  %v2294_v44 = vmul.f32 0.01, %v2198_v36  ;;  %v2145_v22 = vmax.f32 %v16464_v28, %v11947_v9  ;;  %v1953_v55 = vpop.f32.mrb[131].mxu1  ;;  %12034 = vmatprep.mubr.f32.mxu0 %v2484_v58  ;;  %v2474_v28 = vld [vmem:[%s20212_s3 + $0x40] sm:$0xff] }
 0x1f1   :  { %vm2245_vm15 = vcmp.ge.f32.partialorder %v2197_v33, 0.0  ;;  %v2293_v35 = vmul.f32 0.01, %v2197_v33  ;;  %v2144_v60 = vmax.f32 %v16467_v31, %v1953_v55  ;;  %13526 = vmatpush3.bf16.msra.mxu0 %v13523_v26  ;;  %v2475_v31 = vld [vmem:[%s20212_s3 + $0x48] sm:$0xff] }
 0x1f2   :  { %v2342_v4 = vsel %vm2246_vm14, %v2198_v36, %v2294_v44  ;;  %v2200_v40 = vadd.f32 %v16595_v13, %v2145_v22  ;;  %13528 = vmatprep.subr.bf16.mxu0 %v13527_v21  ;;  %v13535_v45 = vpack.c.bf16 %v2475_v31, %v2474_v28 }
 0x1f3   :  { %2395 = vst [vmem:[#allocation2 + $0x58] sm:$0xff] %v2342_v4  ;;  %v16658_v54 = vsel %vm2245_vm15, %v2197_v33, %v2293_v35  ;;  %v2199_v61 = vadd.f32 %v16595_v13, %v2144_v60  ;;  %v11950_v7 = vpop.f32.mrb[132].mxu1  ;;  %v2485_v30 = vld [vmem:[#allocation2 + $0x31] sm:$0xff] }
 0x1f4   :  { %2394 = vst [vmem:[#allocation2 + $0x50] sm:$0xff] %v16658_v54  ;;  %vm2248_vm0 = vcmp.ge.f32.partialorder %v2200_v40, 0.0  ;;  %v2296_v26 = vmul.f32 0.01, %v2200_v40  ;;  %v2147_v3 = vmax.f32 %v16472_v38, %v11950_v7  ;;  %v1963_v11 = vpop.f32.mrb[133].mxu1  ;;  %12035 = vmatmul.mubr.f32.gmra.mrb[28].mxu0 %v2485_v30  ;;  %v2476_v38 = vld [vmem:[%s20212_s3 + $0x50] sm:$0xff] }
 0x1f5   :  { %vm2247_vm1 = vcmp.ge.f32.partialorder %v2199_v61, 0.0  ;;  %v2295_v36 = vmul.f32 0.01, %v2199_v61  ;;  %v2146_v33 = vmax.f32 %v16475_v50, %v1963_v11  ;;  %13530 = vmatpush3.bf16.msra.mxu0 %v13527_v21  ;;  %v2477_v50 = vld [vmem:[%s20212_s3 + $0x58] sm:$0xff] }
 0x1f6   :  { %v2344_v9 = vsel %vm2248_vm0, %v2200_v40, %v2296_v26  ;;  %v2202_v58 = vadd.f32 %v16595_v13, %v2147_v3  ;;  %13532 = vmatprep.subr.bf16.mxu0 %v13531_v0  ;;  %v13539_v30 = vpack.c.bf16 %v2477_v50, %v2476_v38 }
 0x1f7   :  { %2398 = vst [vmem:[#allocation2 + $0x68] sm:$0xff] %v2344_v9  ;;  %v16671_v59 = vsel %vm2247_vm1, %v2199_v61, %v2295_v36  ;;  %v2201_v44 = vadd.f32 %v16595_v13, %v2146_v33  ;;  %v11953_v22 = vpop.f32.mrb[134].mxu1  ;;  %v2486_v55 = vld [vmem:[#allocation2 + $0x41] sm:$0xff] }
 0x1f8   :  { %2397 = vst [vmem:[#allocation2 + $0x60] sm:$0xff] %v16671_v59  ;;  %vm2250_vm2 = vcmp.ge.f32.partialorder %v2202_v58, 0.0  ;;  %v2298_v21 = vmul.f32 0.01, %v2202_v58  ;;  %v2149_v35 = vmax.f32 %v16480_v41, %v11953_v22  ;;  %v1973_v60 = vpop.f32.mrb[135].mxu1  ;;  %12037 = vmatprep.mubr.f32.mxu0 %v2486_v55  ;;  %v2478_v41 = vld [vmem:[%s20212_s3 + $0x60] sm:$0xff] }
 0x1f9   :  { %vm2249_vm3 = vcmp.ge.f32.partialorder %v2201_v44, 0.0  ;;  %v2297_v4 = vmul.f32 0.01, %v2201_v44  ;;  %v2148_v40 = vmax.f32 %v16483_v10, %v1973_v60  ;;  %13534 = vmatpush3.bf16.msra.mxu0 %v13531_v0  ;;  %v2479_v10 = vld [vmem:[%s20212_s3 + $0x68] sm:$0xff] }
 0x1fa   :  { %v2346_v61 = vsel %vm2250_vm2, %v2202_v58, %v2298_v21  ;;  %v2204_v7 = vadd.f32 %v16595_v13, %v2149_v35  ;;  %13536 = vmatprep.subr.bf16.mxu0 %v13535_v45  ;;  %v13543_v22 = vpack.c.bf16 %v2479_v10, %v2478_v41 }
 0x1fb   :  { %2401 = vst [vmem:[#allocation2 + $0x78] sm:$0xff] %v2346_v61  ;;  %v16684_v28 = vsel %vm2249_vm3, %v2201_v44, %v2297_v4  ;;  %v2203_v31 = vadd.f32 %v16595_v13, %v2148_v40  ;;  %v11956_v26 = vpop.f32.mrb[136].mxu1  ;;  %v2487_v3 = vld [vmem:[#allocation2 + $0x51] sm:$0xff] }
 0x1fc   :  { %2400 = vst [vmem:[#allocation2 + $0x70] sm:$0xff] %v16684_v28  ;;  %vm2252_vm4 = vcmp.ge.f32.partialorder %v2204_v7, 0.0  ;;  %v2300_v0 = vmul.f32 0.01, %v2204_v7  ;;  %v2151_v11 = vmax.f32 %v16488_v18, %v11956_v26  ;;  %v1983_v36 = vpop.f32.mrb[137].mxu1  ;;  %12038 = vmatmul.mubr.f32.gmra.mrb[30].mxu0 %v2487_v3  ;;  %v2480_v18 = vld [vmem:[%s20212_s3 + $0x70] sm:$0xff] }
 0x1fd   :  { %vm2251_vm5 = vcmp.ge.f32.partialorder %v2203_v31, 0.0  ;;  %v2299_v33 = vmul.f32 0.01, %v2203_v31  ;;  %v2150_v9 = vmax.f32 %v16491_v19, %v1983_v36  ;;  %13538 = vmatpush3.bf16.msra.mxu0 %v13535_v45  ;;  %v2481_v19 = vld [vmem:[%s20212_s3 + $0x78] sm:$0xff] }
 0x1fe   :  { %v2348_v58 = vsel %vm2252_vm4, %v2204_v7, %v2300_v0  ;;  %v2206_v44 = vadd.f32 %v16595_v13, %v2151_v11  ;;  %13540 = vmatprep.subr.bf16.mxu0 %v13539_v30 }
 0x1ff   :  { %2404 = vst [vmem:[#allocation2 + $0x88] sm:$0xff] %v2348_v58  ;;  %v2347_v55 = vsel %vm2251_vm5, %v2203_v31, %v2299_v33  ;;  %v2205_v38 = vadd.f32 %v16595_v13, %v2150_v9  ;;  %v11959_v50 = vpop.f32.mrb[138].mxu1  ;;  %v2488_v21 = vld [vmem:[#allocation2 + $0x61] sm:$0xff]  ;;  %v13547_v31 = vpack.c.bf16 %v2481_v19, %v2480_v18 }
 0x200   :  { %2403 = vst [vmem:[#allocation2 + $0x80] sm:$0xff] %v2347_v55  ;;  %vm2254_vm6 = vcmp.ge.f32.partialorder %v2206_v44, 0.0  ;;  %v2302_v45 = vmul.f32 0.01, %v2206_v44  ;;  %v2153_v35 = vmax.f32 %v16496_v24, %v11959_v50  ;;  %v1993_v60 = vpop.f32.mrb[139].mxu1  ;;  %12040 = vmatprep.mubr.f32.mxu0 %v2488_v21  ;;  %v9714_v24 = vld [vmem:[%s20212_s3 + $0x100] sm:$0xff] }
 0x201   :  { %vm2253_vm7 = vcmp.ge.f32.partialorder %v2205_v38, 0.0  ;;  %v2301_v4 = vmul.f32 0.01, %v2205_v38  ;;  %v2152_v40 = vmax.f32 %v16499_v25, %v1993_v60  ;;  %13542 = vmatpush3.bf16.msra.mxu0 %v13539_v30  ;;  %v9715_v25 = vld [vmem:[%s20212_s3 + $0x108] sm:$0xff] }
 0x202   :  { %v2350_v61 = vsel %vm2254_vm6, %v2206_v44, %v2302_v45  ;;  %v2208_v7 = vadd.f32 %v16595_v13, %v2153_v35  ;;  %13544 = vmatprep.subr.bf16.mxu0 %v13543_v22  ;;  %v16717_v44 = vpack.c.bf16 %v9715_v25, %v9714_v24 }
 0x203   :  { %2407 = vst [vmem:[#allocation2 + $0x98] sm:$0xff] %v2350_v61  ;;  %v2349_v26 = vsel %vm2253_vm7, %v2205_v38, %v2301_v4  ;;  %v2207_v3 = vadd.f32 %v16595_v13, %v2152_v40  ;;  %v11962_v41 = vpop.f32.mrb[140].mxu1  ;;  %v2489_v10 = vld [vmem:[#allocation2 + $0x71] sm:$0xff] }
 0x204   :  { %2406 = vst [vmem:[#allocation2 + $0x90] sm:$0xff] %v2349_v26  ;;  %vm2256_vm8 = vcmp.ge.f32.partialorder %v2208_v7, 0.0  ;;  %v2304_v30 = vmul.f32 0.01, %v2208_v7  ;;  %v2155_v0 = vmax.f32 %v16504_v5, %v11962_v41  ;;  %v2003_v11 = vpop.f32.mrb[141].mxu1  ;;  %12041 = vmatmul.mubr.f32.gmra.mrb[32].mxu0 %v2489_v10 }
 0x205   :  { %vm2255_vm9 = vcmp.ge.f32.partialorder %v2207_v3, 0.0  ;;  %v2303_v36 = vmul.f32 0.01, %v2207_v3  ;;  %v2154_v33 = vmax.f32 %v16507_v29, %v2003_v11  ;;  %13546 = vmatpush3.bf16.msra.mxu0 %v13543_v22 }
 0x206   :  { %v2352_v9 = vsel %vm2256_vm8, %v2208_v7, %v2304_v30  ;;  %v2210_v58 = vadd.f32 %v16595_v13, %v2155_v0  ;;  %13548 = vmatprep.subr.bf16.mxu0 %v13547_v31 }
 0x207   :  { %2410 = vst [vmem:[#allocation2 + $0xa8] sm:$0xff] %v2352_v9  ;;  %v2351_v55 = vsel %vm2255_vm9, %v2207_v3, %v2303_v36  ;;  %v2209_v38 = vadd.f32 %v16595_v13, %v2154_v33  ;;  %v11965_v50 = vpop.f32.mrb[142].mxu1 }
 0x208   :  { %2409 = vst [vmem:[#allocation2 + $0xa0] sm:$0xff] %v2351_v55  ;;  %vm2258_vm10 = vcmp.ge.f32.partialorder %v2210_v58, 0.0  ;;  %v2306_v5 = vmul.f32 0.01, %v2210_v58  ;;  %v2157_v21 = vmax.f32 %v16512_v15, %v11965_v50  ;;  %v2013_v18 = vpop.f32.mrb[143].mxu1 }
 0x209   :  { %vm2257_vm11 = vcmp.ge.f32.partialorder %v2209_v38, 0.0  ;;  %v2305_v29 = vmul.f32 0.01, %v2209_v38  ;;  %v2156_v22 = vmax.f32 %v16515_v37, %v2013_v18  ;;  %13550 = vmatpush3.bf16.msra.mxu0 %v13547_v31 }
 0x20a   :  { %v2354_v19 = vsel %vm2258_vm10, %v2210_v58, %v2306_v5  ;;  %v2212_v45 = vadd.f32 %v16595_v13, %v2157_v21  ;;  %13552 = vmatprep.subr.bf16.mxu0 %v16717_v44 }
 0x20b   :  { %2413 = vst [vmem:[#allocation2 + $0xb8] sm:$0xff] %v2354_v19  ;;  %v2353_v35 = vsel %vm2257_vm11, %v2209_v38, %v2305_v29  ;;  %v2211_v60 = vadd.f32 %v16595_v13, %v2156_v22  ;;  %v11968_v4 = vpop.f32.mrb[144].mxu1 }
 0x20c   :  { %2412 = vst [vmem:[#allocation2 + $0xb0] sm:$0xff] %v2353_v35  ;;  %vm2260_vm12 = vcmp.ge.f32.partialorder %v2212_v45, 0.0  ;;  %v2308_v40 = vmul.f32 0.01, %v2212_v45  ;;  %v2159_v15 = vmax.f32 %v16548_v63, %v11968_v4  ;;  %v2023_v61 = vpop.f32.mrb[145].mxu1 }
 0x20d   :  { %vm2259_vm13 = vcmp.ge.f32.partialorder %v2211_v60, 0.0  ;;  %v2307_v7 = vmul.f32 0.01, %v2211_v60  ;;  %v2158_v37 = vmax.f32 %v16550_v52, %v2023_v61 }
 0x20e   :  { %v2356_v31 = vsel %vm2260_vm12, %v2212_v45, %v2308_v40  ;;  %v2214_v26 = vadd.f32 %v16595_v13, %v2159_v15 }
 0x20f   :  { %2416 = vst [vmem:[#allocation2 + $0xc8] sm:$0xff] %v2356_v31  ;;  %v16728_v3 = vsel %vm2259_vm13, %v2211_v60, %v2307_v7  ;;  %v2213_v41 = vadd.f32 %v16595_v13, %v2158_v37  ;;  %v11971_v10 = vpop.f32.mrb[146].mxu1 }
 0x210   :  { %2415 = vst [vmem:[#allocation2 + $0xc0] sm:$0xff] %v16728_v3  ;;  %vm2262_vm14 = vcmp.ge.f32.partialorder %v2214_v26, 0.0  ;;  %v2310_v24 = vmul.f32 0.01, %v2214_v26  ;;  %v2161_v63 = vmax.f32 %v16552_v42, %v11971_v10  ;;  %v2033_v25 = vpop.f32.mrb[147].mxu1 }
 0x211   :  { %vm2261_vm15 = vcmp.ge.f32.partialorder %v2213_v41, 0.0  ;;  %v2309_v30 = vmul.f32 0.01, %v2213_v41  ;;  %v2160_v52 = vmax.f32 %v16554_v20, %v2033_v25 }
 0x212   :  { %v2358_v0 = vsel %vm2262_vm14, %v2214_v26, %v2310_v24  ;;  %v2216_v11 = vadd.f32 %v16595_v13, %v2161_v63 }
 0x213   :  { %2419 = vst [vmem:[#allocation2 + $0xd8] sm:$0xff] %v2358_v0  ;;  %v16735_v36 = vsel %vm2261_vm15, %v2213_v41, %v2309_v30  ;;  %v2215_v33 = vadd.f32 %v16595_v13, %v2160_v52  ;;  %v11974_v9 = vpop.f32.mrb[148].mxu1 }
 0x214   :  { %2418 = vst [vmem:[#allocation2 + $0xd0] sm:$0xff] %v16735_v36  ;;  %vm2264_vm0 = vcmp.ge.f32.partialorder %v2216_v11, 0.0  ;;  %v2312_v58 = vmul.f32 0.01, %v2216_v11  ;;  %v2163_v42 = vmax.f32 %v16556_v27, %v11974_v9  ;;  %v2043_v55 = vpop.f32.mrb[149].mxu1 }
 0x215   :  { %vm2263_vm1 = vcmp.ge.f32.partialorder %v2215_v33, 0.0  ;;  %v2311_v38 = vmul.f32 0.01, %v2215_v33  ;;  %v2162_v20 = vmax.f32 %v16558_v12, %v2043_v55 }
 0x216   :  { %v2360_v50 = vsel %vm2264_vm0, %v2216_v11, %v2312_v58  ;;  %v2218_v5 = vadd.f32 %v16595_v13, %v2163_v42 }
 0x217   :  { %2422 = vst [vmem:[#allocation2 + $0xe8] sm:$0xff] %v2360_v50  ;;  %v16742_v21 = vsel %vm2263_vm1, %v2215_v33, %v2311_v38  ;;  %v2217_v18 = vadd.f32 %v16595_v13, %v2162_v20  ;;  %v11977_v29 = vpop.f32.mrb[150].mxu1  ;;  %v2490_v22 = vld [vmem:[#allocation2 + $0xc1] sm:$0xff] }
 0x218   :  { %2421 = vst [vmem:[#allocation2 + $0xe0] sm:$0xff] %v16742_v21  ;;  %vm2266_vm2 = vcmp.ge.f32.partialorder %v2218_v5, 0.0  ;;  %v2314_v19 = vmul.f32 0.01, %v2218_v5  ;;  %v2165_v27 = vmax.f32 %v16560_v51, %v11977_v29  ;;  %v2053_v45 = vpop.f32.mrb[151].mxu1  ;;  %12043 = vmatprep.mubr.f32.mxu0 %v2490_v22 }
 0x219   :  { %vm2265_vm3 = vcmp.ge.f32.partialorder %v2217_v18, 0.0  ;;  %v2313_v12 = vmul.f32 0.01, %v2217_v18  ;;  %v2164_v35 = vmax.f32 %v16562_v48, %v2053_v45 }
 0x21a   :  { %v2362_v60 = vsel %vm2266_vm2, %v2218_v5, %v2314_v19  ;;  %v2220_v4 = vadd.f32 %v16595_v13, %v2165_v27 }
 0x21b   :  { %2425 = vst [vmem:[#allocation2 + $0xf8] sm:$0xff] %v2362_v60  ;;  %v16749_v40 = vsel %vm2265_vm3, %v2217_v18, %v2313_v12  ;;  %v2219_v15 = vadd.f32 %v16595_v13, %v2164_v35  ;;  %v11980_v61 = vpop.f32.mrb[152].mxu1  ;;  %v2491_v7 = vld [vmem:[#allocation2 + $0xd1] sm:$0xff] }
 0x21c   :  { %2424 = vst [vmem:[#allocation2 + $0xf0] sm:$0xff] %v16749_v40  ;;  %vm2268_vm4 = vcmp.ge.f32.partialorder %v2220_v4, 0.0  ;;  %v2316_v51 = vmul.f32 0.01, %v2220_v4  ;;  %v2167_v37 = vmax.f32 %v16564_v32, %v11980_v61  ;;  %v2063_v31 = vpop.f32.mrb[153].mxu1  ;;  %12044 = vmatmul.mubr.f32.gmra.mrb[34].mxu0 %v2491_v7 }
 0x21d   :  { %vm2267_vm5 = vcmp.ge.f32.partialorder %v2219_v15, 0.0  ;;  %v2315_v48 = vmul.f32 0.01, %v2219_v15  ;;  %v2166_v26 = vmax.f32 %v16566_v49, %v2063_v31 }
 0x21e   :  { %v2364_v41 = vsel %vm2268_vm4, %v2220_v4, %v2316_v51  ;;  %v2222_v10 = vadd.f32 %v16595_v13, %v2167_v37 }
 0x21f   :  { %2428 = vst [vmem:[#allocation2 + $0x108] sm:$0xff] %v2364_v41  ;;  %v16756_v24 = vsel %vm2267_vm5, %v2219_v15, %v2315_v48  ;;  %v2221_v63 = vadd.f32 %v16595_v13, %v2166_v26  ;;  %v11983_v25 = vpop.f32.mrb[154].mxu1  ;;  %v16759_v30 = vld [vmem:[#allocation2 + $0xe1] sm:$0xff] }
 0x220   :  { %2427 = vst [vmem:[#allocation2 + $0x100] sm:$0xff] %v16756_v24  ;;  %vm2270_vm6 = vcmp.ge.f32.partialorder %v2222_v10, 0.0  ;;  %v2318_v32 = vmul.f32 0.01, %v2222_v10  ;;  %v2169_v52 = vmax.f32 %v16568_v8, %v11983_v25  ;;  %v2073_v0 = vpop.f32.mrb[155].mxu1  ;;  %12046 = vmatprep.mubr.f32.mxu0 %v16759_v30 }
 0x221   :  { %vm2269_vm7 = vcmp.ge.f32.partialorder %v2221_v63, 0.0  ;;  %v2317_v49 = vmul.f32 0.01, %v2221_v63  ;;  %v2168_v11 = vmax.f32 %v16570_v14, %v2073_v0 }
 0x222   :  { %v2366_v33 = vsel %vm2270_vm6, %v2222_v10, %v2318_v32  ;;  %v2224_v9 = vadd.f32 %v16595_v13, %v2169_v52 }
 0x223   :  { %2431 = vst [vmem:[#allocation2 + $0x118] sm:$0xff] %v2366_v33  ;;  %v16766_v58 = vsel %vm2269_vm7, %v2221_v63, %v2317_v49  ;;  %v2223_v42 = vadd.f32 %v16595_v13, %v2168_v11  ;;  %v11986_v55 = vpop.f32.mrb[156].mxu1  ;;  %v16769_v38 = vld [vmem:[#allocation2 + $0xf1] sm:$0xff] }
 0x224   :  { %2430 = vst [vmem:[#allocation2 + $0x110] sm:$0xff] %v16766_v58  ;;  %vm2272_vm8 = vcmp.ge.f32.partialorder %v2224_v9, 0.0  ;;  %v2320_v8 = vmul.f32 0.01, %v2224_v9  ;;  %v2171_v20 = vmax.f32 %v16572_v34, %v11986_v55  ;;  %v2083_v50 = vpop.f32.mrb[157].mxu1  ;;  %12047 = vmatmul.mubr.f32.gmra.mrb[36].mxu0 %v16769_v38 }
 0x225   :  { %vm2271_vm9 = vcmp.ge.f32.partialorder %v2223_v42, 0.0  ;;  %v2319_v14 = vmul.f32 0.01, %v2223_v42  ;;  %v2170_v5 = vmax.f32 %v16574_v56, %v2083_v50  ;;  %v9717_v50 = vld [vmem:[%s20212_s3 + $0x118] sm:$0xff] }
 0x226   :  { %v2368_v18 = vsel %vm2272_vm8, %v2224_v9, %v2320_v8  ;;  %v2226_v29 = vadd.f32 %v16595_v13, %v2171_v20 }
 0x227   :  { %2434 = vst [vmem:[#allocation2 + $0x128] sm:$0xff] %v2368_v18  ;;  %v16776_v22 = vsel %vm2271_vm9, %v2223_v42, %v2319_v14  ;;  %v2225_v19 = vadd.f32 %v16595_v13, %v2170_v5  ;;  %v11989_v27 = vpop.f32.mrb[158].mxu1  ;;  %v16779_v45 = vld [vmem:[#allocation2 + $0x101] sm:$0xff] }
 0x228   :  { %2433 = vst [vmem:[#allocation2 + $0x120] sm:$0xff] %v16776_v22  ;;  %vm2274_vm10 = vcmp.ge.f32.partialorder %v2226_v29, 0.0  ;;  %v2322_v34 = vmul.f32 0.01, %v2226_v29  ;;  %v2173_v12 = vmax.f32 %v16576_v46, %v11989_v27  ;;  %v2093_v35 = vpop.f32.mrb[159].mxu1  ;;  %12049 = vmatprep.mubr.f32.mxu0 %v16779_v45 }
 0x229   :  { %vm2273_vm11 = vcmp.ge.f32.partialorder %v2225_v19, 0.0  ;;  %v2321_v56 = vmul.f32 0.01, %v2225_v19  ;;  %v2172_v60 = vmax.f32 %v16578_v39, %v2093_v35 }
 0x22a   :  { %v2370_v4 = vsel %vm2274_vm10, %v2226_v29, %v2322_v34  ;;  %v2228_v15 = vadd.f32 %v16595_v13, %v2173_v12 }
 0x22b   :  { %2437 = vst [vmem:[#allocation2 + $0x138] sm:$0xff] %v2370_v4  ;;  %v16786_v61 = vsel %vm2273_vm11, %v2225_v19, %v2321_v56  ;;  %v2227_v7 = vadd.f32 %v16595_v13, %v2172_v60  ;;  %v11992_v51 = vpop.f32.mrb[160].mxu1  ;;  %v16789_v37 = vld [vmem:[#allocation2 + $0x111] sm:$0xff]  ;;  %v9719_v56 = vld [vmem:[%s20212_s3 + $0x128] sm:$0xff] }
 0x22c   :  { %2436 = vst [vmem:[#allocation2 + $0x130] sm:$0xff] %v16786_v61  ;;  %vm2276_vm12 = vcmp.ge.f32.partialorder %v2228_v15, 0.0  ;;  %v2324_v46 = vmul.f32 0.01, %v2228_v15  ;;  %v2175_v31 = vmax.f32 %v16580_v47, %v11992_v51  ;;  %v2103_v48 = vpop.f32.mrb[161].mxu1  ;;  %12050 = vmatmul.mubr.f32.gmra.mrb[38].mxu0 %v16789_v37  ;;  %v9725_v51 = vld [vmem:[%s20212_s3 + $0x158] sm:$0xff] }
 0x22d   :  { %vm2275_vm13 = vcmp.ge.f32.partialorder %v2227_v7, 0.0  ;;  %v2323_v39 = vmul.f32 0.01, %v2227_v7  ;;  %v2174_v26 = vmax.f32 %v16582_v62, %v2103_v48  ;;  %v9730_v48 = vld [vmem:[%s20212_s3 + $0x180] sm:$0xff] }
 0x22e   :  { %v2372_v41 = vsel %vm2276_vm12, %v2228_v15, %v2324_v46  ;;  %v2230_v10 = vadd.f32 %v16595_v13, %v2175_v31  ;;  %v9720_v15 = vld [vmem:[%s20212_s3 + $0x130] sm:$0xff]  ;;  %v9727_v46 = vld [vmem:[%s20212_s3 + $0x168] sm:$0xff]  ;;  %v9729_v31 = vld [vmem:[%s20212_s3 + $0x178] sm:$0xff] }
 0x22f   :  { %2440 = vst [vmem:[#allocation2 + $0x148] sm:$0xff] %v2372_v41  ;;  %v16796_v63 = vsel %vm2275_vm13, %v2227_v7, %v2323_v39  ;;  %v2229_v25 = vadd.f32 %v16595_v13, %v2174_v26  ;;  %v11995_v32 = vpop.f32.mrb[162].mxu1  ;;  %v16799_v52 = vld [vmem:[#allocation2 + $0x121] sm:$0xff]  ;;  %v9721_v7 = vld [vmem:[%s20212_s3 + $0x138] sm:$0xff]  ;;  %v9732_v41 = vld [vmem:[%s20212_s3 + $0x190] sm:$0xff] }
 0x230   :  { %2439 = vst [vmem:[#allocation2 + $0x140] sm:$0xff] %v16796_v63  ;;  %vm2278_vm14 = vcmp.ge.f32.partialorder %v2230_v10, 0.0  ;;  %v2326_v47 = vmul.f32 0.01, %v2230_v10  ;;  %v2177_v0 = vmax.f32 %v16584_v1, %v11995_v32  ;;  %v2113_v49 = vpop.f32.mrb[163].mxu1  ;;  %12052 = vmatprep.mubr.f32.mxu0 %v16799_v52  ;;  %v9716_v1 = vld [vmem:[%s20212_s3 + $0x110] sm:$0xff] }
 0x231   :  { %vm2277_vm15 = vcmp.ge.f32.partialorder %v2229_v25, 0.0  ;;  %v2325_v62 = vmul.f32 0.01, %v2229_v25  ;;  %v2176_v11 = vmax.f32 %v16586_v2, %v2113_v49  ;;  %v13555_v34 = vpack.c.bf16 %v9717_v50, %v9716_v1  ;;  %v9731_v39 = vld [vmem:[%s20212_s3 + $0x188] sm:$0xff]  ;;  %v16909_v1 = vld [vmem:[#allocation2 + $0x52] sm:$0xff]  ;;  %v9738_v50 = vld [vmem:[%s20212_s3 + $0x1c0] sm:$0xff] }
 0x232   :  { %v2374_v33 = vsel %vm2278_vm14, %v2230_v10, %v2326_v47  ;;  %v2232_v9 = vadd.f32 %v16595_v13, %v2177_v0  ;;  %v13583_v26 = vpack.c.bf16 %v9731_v39, %v9730_v48  ;;  %v9733_v10 = vld [vmem:[%s20212_s3 + $0x198] sm:$0xff]  ;;  %v9734_v0 = vld [vmem:[%s20212_s3 + $0x1a0] sm:$0xff]  ;;  %v9735_v49 = vld [vmem:[%s20212_s3 + $0x1a8] sm:$0xff] }
 0x233   :  { %2443 = vst [vmem:[#allocation2 + $0x158] sm:$0xff] %v2374_v33  ;;  %v2373_v42 = vsel %vm2277_vm15, %v2229_v25, %v2325_v62  ;;  %v2231_v55 = vadd.f32 %v16595_v13, %v2176_v11  ;;  %v11998_v8 = vpop.f32.mrb[164].mxu1  ;;  %v16807_v20 = vld [vmem:[#allocation2 + $0x131] sm:$0xff]  ;;  %v2805_v25 = vld [vmem:[#allocation2 + $0x2] sm:$0xff]  ;;  %v13587_v32 = vpack.c.bf16 %v9733_v10, %v9732_v41  ;;  %v13591_v11 = vpack.c.bf16 %v9735_v49, %v9734_v0 }
 0x234   :  { %2442 = vst [vmem:[#allocation2 + $0x150] sm:$0xff] %v2373_v42  ;;  %vm2280_vm0 = vcmp.ge.f32.partialorder %v2232_v9, 0.0  ;;  %v2328_v2 = vmul.f32 0.01, %v2232_v9  ;;  %v2179_v14 = vmax.f32 %v16588_v6, %v11998_v8  ;;  %v2123_v5 = vpop.f32.mrb[165].mxu1  ;;  %12053 = vmatmul.mubr.f32.gmra.mrb[40].mxu0 %v16807_v20  ;;  %v9718_v6 = vld [vmem:[%s20212_s3 + $0x120] sm:$0xff] }
 0x235   :  { %vm2279_vm1 = vcmp.ge.f32.partialorder %v2231_v55, 0.0  ;;  %v2327_v18 = vmul.f32 0.01, %v2231_v55  ;;  %v2178_v29 = vmax.f32 %v16590_v53, %v2123_v5  ;;  %12087 = vmatprep.mubr.f32.mxu0 %v16604_v57  ;;  %v13559_v60 = vpack.c.bf16 %v9719_v56, %v9718_v6  ;;  %v16885_v47 = vld [vmem:[#allocation2 + $0x12] sm:$0xff]  ;;  %v16894_v62 = vld [vmem:[#allocation2 + $0x22] sm:$0xff] }
 0x236   :  { %v2376_v19 = vsel %vm2280_vm0, %v2232_v9, %v2328_v2  ;;  %v2234_v27 = vadd.f32 %v16595_v13, %v2179_v14  ;;  %v16897_v33 = vld [vmem:[#allocation2 + $0x32] sm:$0xff]  ;;  %v9739_v2 = vld [vmem:[%s20212_s3 + $0x1c8] sm:$0xff]  ;;  %v9754_v0 = vld [vmem:[%s20212_s3 + $0x240] sm:$0xff] }
 0x237   :  { %2446 = vst [vmem:[#allocation2 + $0x168] sm:$0xff] %v2376_v19  ;;  %v2375_v12 = vsel %vm2279_vm1, %v2231_v55, %v2327_v18  ;;  %v2233_v35 = vadd.f32 %v16595_v13, %v2178_v29  ;;  %v9736_v9 = vld [vmem:[%s20212_s3 + $0x1b0] sm:$0xff]  ;;  %v9737_v42 = vld [vmem:[%s20212_s3 + $0x1b8] sm:$0xff]  ;;  %v16906_v55 = vld [vmem:[#allocation2 + $0x42] sm:$0xff]  ;;  %v13599_v5 = vpack.c.bf16 %v9739_v2, %v9738_v50 }
 0x238   :  { %2445 = vst [vmem:[#allocation2 + $0x160] sm:$0xff] %v2375_v12  ;;  %vm2282_vm2 = vcmp.ge.f32.partialorder %v2234_v27, 0.0  ;;  %v2330_v53 = vmul.f32 0.01, %v2234_v27  ;;  %12088 = vmatmul.mubr.f32.vlgmr.msra.gmra.mrb[26].mxu0 %v16611_v43  ;;  %v13563_v43 = vpack.c.bf16 %v9721_v7, %v9720_v15  ;;  %v13595_v8 = vpack.c.bf16 %v9737_v42, %v9736_v9  ;;  %v16918_v14 = vld [vmem:[#allocation2 + $0x62] sm:$0xff]  ;;  %v16921_v18 = vld [vmem:[#allocation2 + $0x72] sm:$0xff] }
 0x239   :  { %vm2281_vm3 = vcmp.ge.f32.partialorder %v2233_v35, 0.0  ;;  %v2329_v57 = vmul.f32 0.01, %v2233_v35  ;;  %12090 = vmatprep.mubr.f32.mxu0 %v16618_v23  ;;  %13554 = vmatpush3.bf16.msra.mxu0 %v16717_v44  ;;  %v9722_v23 = vld [vmem:[%s20212_s3 + $0x140] sm:$0xff]  ;;  %v9723_v44 = vld [vmem:[%s20212_s3 + $0x148] sm:$0xff]  ;;  %v9740_v29 = vld [vmem:[%s20212_s3 + $0x1d0] sm:$0xff] }
 0x23a   :  { %v2378_v13 = vsel %vm2282_vm2, %v2234_v27, %v2330_v53  ;;  %13556 = vmatprep.subr.bf16.mxu0 %v13555_v34  ;;  %v9741_v19 = vld [vmem:[%s20212_s3 + $0x1d8] sm:$0xff]  ;;  %v2813_v27 = vld [vmem:[#allocation2 + $0xc2] sm:$0xff] }
 0x23b   :  { %2449 = vst [vmem:[#allocation2 + $0x178] sm:$0xff] %v2378_v13  ;;  %v2377_v4 = vsel %vm2281_vm3, %v2233_v35, %v2329_v57  ;;  %v16930_v12 = vld [vmem:[#allocation2 + $0xd2] sm:$0xff]  ;;  %v9742_v35 = vld [vmem:[%s20212_s3 + $0x1e0] sm:$0xff]  ;;  %v9743_v6 = vld [vmem:[%s20212_s3 + $0x1e8] sm:$0xff] }
 0x23c   :  { %2448 = vst [vmem:[#allocation2 + $0x170] sm:$0xff] %v2377_v4  ;;  %12091 = vmatmul.mubr.f32.gmra.mrb[28].mxu0 %v16631_v17  ;;  %v13567_v17 = vpack.c.bf16 %v9723_v44, %v9722_v23  ;;  %v16939_v56 = vld [vmem:[#allocation2 + $0xe2] sm:$0xff]  ;;  %v13607_v53 = vpack.c.bf16 %v9743_v6, %v9742_v35  ;;  %v16942_v57 = vld [vmem:[#allocation2 + $0xf2] sm:$0xff] }
 0x23d   :  { %12093 = vmatprep.mubr.f32.mxu0 %v16645_v16  ;;  %13558 = vmatpush3.bf16.msra.mxu0 %v13555_v34  ;;  %v9724_v16 = vld [vmem:[%s20212_s3 + $0x150] sm:$0xff]  ;;  %v13603_v34 = vpack.c.bf16 %v9741_v19, %v9740_v29  ;;  %v16951_v4 = vld [vmem:[#allocation2 + $0x102] sm:$0xff]  ;;  %v9753_v41 = vld [vmem:[%s20212_s3 + $0x238] sm:$0xff] }
 0x23e   :  { %13560 = vmatprep.subr.bf16.mxu0 %v13559_v60  ;;  %v9744_v13 = vld [vmem:[%s20212_s3 + $0x1f0] sm:$0xff]  ;;  %v9747_v23 = vld [vmem:[%s20212_s3 + $0x208] sm:$0xff]  ;;  %v9757_v50 = vld [vmem:[%s20212_s3 + $0x258] sm:$0xff] }
 0x23f   :  { %v16954_v7 = vld [vmem:[#allocation2 + $0x112] sm:$0xff]  ;;  %v16963_v44 = vld [vmem:[#allocation2 + $0x122] sm:$0xff] }
 0x240   :  { %12094 = vmatmul.mubr.f32.gmra.mrb[30].mxu0 %v16658_v54  ;;  %v13571_v54 = vpack.c.bf16 %v9725_v51, %v9724_v16  ;;  %v16966_v16 = vld [vmem:[#allocation2 + $0x132] sm:$0xff]  ;;  %v16996_v10 = vld [vmem:[#allocation2 + $0x43] sm:$0xff] }
 0x241   :  { %12096 = vmatprep.mubr.f32.mxu0 %v16671_v59  ;;  %13562 = vmatpush3.bf16.msra.mxu0 %v13559_v60  ;;  %v9726_v59 = vld [vmem:[%s20212_s3 + $0x160] sm:$0xff]  ;;  %v9745_v60 = vld [vmem:[%s20212_s3 + $0x1f8] sm:$0xff]  ;;  %v9748_v51 = vld [vmem:[%s20212_s3 + $0x210] sm:$0xff] }
 0x242   :  { %13564 = vmatprep.subr.bf16.mxu0 %v13563_v43  ;;  %v13611_v15 = vpack.c.bf16 %v9745_v60, %v9744_v13  ;;  %v16987_v39 = vld [vmem:[#allocation2 + $0x33] sm:$0xff]  ;;  %v9755_v49 = vld [vmem:[%s20212_s3 + $0x248] sm:$0xff]  ;;  %v9758_v19 = vld [vmem:[%s20212_s3 + $0x260] sm:$0xff] }
 0x243   :  { %v13631_v9 = vpack.c.bf16 %v9755_v49, %v9754_v0  ;;  %v17011_v42 = vld [vmem:[#allocation2 + $0x73] sm:$0xff]  ;;  %v3007_v2 = vld [vmem:[#allocation2 + $0xc3] sm:$0xff] }
 0x244   :  { %12097 = vmatmul.mubr.f32.gmra.mrb[32].mxu0 %v16684_v28  ;;  %v13575_v28 = vpack.c.bf16 %v9727_v46, %v9726_v59  ;;  %v2999_v59 = vld [vmem:[#allocation2 + $0x3] sm:$0xff]  ;;  %v17020_v29 = vld [vmem:[#allocation2 + $0xd3] sm:$0xff] }
 0x245   :  { %12099 = vmatprep.mubr.f32.mxu0 %v16728_v3  ;;  %13566 = vmatpush3.bf16.msra.mxu0 %v13563_v43  ;;  %v9728_v3 = vld [vmem:[%s20212_s3 + $0x170] sm:$0xff]  ;;  %v9746_v43 = vld [vmem:[%s20212_s3 + $0x200] sm:$0xff]  ;;  %v9761_v13 = vld [vmem:[%s20212_s3 + $0x278] sm:$0xff] }
 0x246   :  { %13568 = vmatprep.subr.bf16.mxu0 %v13567_v17  ;;  %v17032_v6 = vld [vmem:[#allocation2 + $0xf3] sm:$0xff]  ;;  %v17041_v60 = vld [vmem:[#allocation2 + $0x103] sm:$0xff] }
 0x247   :  { %v17074_v0 = vld [vmem:[#allocation2 + $0x24] sm:$0xff] }
 0x248   :  { %12100 = vmatmul.mubr.f32.gmra.mrb[34].mxu0 %v16735_v36  ;;  %v13579_v36 = vpack.c.bf16 %v9729_v31, %v9728_v3  ;;  %v9750_v3 = vld [vmem:[%s20212_s3 + $0x220] sm:$0xff]  ;;  %v9751_v31 = vld [vmem:[%s20212_s3 + $0x228] sm:$0xff] }
 0x249   :  { %12102 = vmatprep.mubr.f32.mxu0 %v16742_v21  ;;  %13570 = vmatpush3.bf16.msra.mxu0 %v13567_v17  ;;  %v13615_v17 = vpack.c.bf16 %v9747_v23, %v9746_v43  ;;  %v13623_v48 = vpack.c.bf16 %v9751_v31, %v9750_v3  ;;  %v17044_v43 = vld [vmem:[#allocation2 + $0x113] sm:$0xff]  ;;  %v9762_v23 = vld [vmem:[%s20212_s3 + $0x280] sm:$0xff] }
 0x24a   :  { %13572 = vmatprep.subr.bf16.mxu0 %v13571_v54  ;;  %v9765_v3 = vld [vmem:[%s20212_s3 + $0x298] sm:$0xff]  ;;  %v3193_v31 = vld [vmem:[#allocation2 + $0x4] sm:$0xff] }
 0x24c   :  { %12103 = vmatmul.mubr.f32.gmra.mrb[36].mxu0 %v16749_v40 }
 0x24d   :  { %12105 = vmatprep.mubr.f32.mxu0 %v16756_v24  ;;  %13574 = vmatpush3.bf16.msra.mxu0 %v13571_v54  ;;  %v9749_v54 = vld [vmem:[%s20212_s3 + $0x218] sm:$0xff] }
 0x24e   :  { %13576 = vmatprep.subr.bf16.mxu0 %v13575_v28  ;;  %v13619_v46 = vpack.c.bf16 %v9749_v54, %v9748_v51  ;;  %v17053_v51 = vld [vmem:[#allocation2 + $0x123] sm:$0xff] }
 0x250   :  { %12106 = vmatmul.mubr.f32.gmra.mrb[38].mxu0 %v16766_v58 }
 0x251   :  { %12108 = vmatprep.mubr.f32.mxu0 %v16776_v22  ;;  %13578 = vmatpush3.bf16.msra.mxu0 %v13575_v28  ;;  %v16975_v28 = vld [vmem:[#allocation2 + $0x13] sm:$0xff] }
 0x252   :  { %13580 = vmatprep.subr.bf16.mxu0 %v13579_v36 }
 0x254   :  { %12109 = vmatmul.mubr.f32.gmra.mrb[40].mxu0 %v16786_v61 }
 0x255   :  { %13582 = vmatpush3.bf16.msra.mxu0 %v13579_v36  ;;  %12143 = vmatprep.mubr.f32.mxu0 %v2805_v25  ;;  %v16984_v36 = vld [vmem:[#allocation2 + $0x23] sm:$0xff] }
 0x256   :  { %13584 = vmatprep.subr.bf16.mxu0 %v13583_v26 }
 0x258   :  { %12144 = vmatmul.mubr.f32.vlgmr.msra.gmra.mrb[26].mxu0 %v16885_v47 }
 0x259   :  { %12146 = vmatprep.mubr.f32.mxu0 %v16894_v62  ;;  %13586 = vmatpush3.bf16.msra.mxu0 %v13583_v26  ;;  %v9752_v26 = vld [vmem:[%s20212_s3 + $0x230] sm:$0xff] }
 0x25a   :  { %13588 = vmatprep.subr.bf16.mxu0 %v13587_v32  ;;  %v13627_v25 = vpack.c.bf16 %v9753_v41, %v9752_v26  ;;  %v17065_v26 = vld [vmem:[#allocation2 + $0x14] sm:$0xff]  ;;  %v9766_v41 = vld [vmem:[%s20212_s3 + $0x2a0] sm:$0xff] }
 0x25c   :  { %12147 = vmatmul.mubr.f32.gmra.mrb[28].mxu0 %v16897_v33 }
 0x25d   :  { %12149 = vmatprep.mubr.f32.mxu0 %v16906_v55  ;;  %13590 = vmatpush3.bf16.msra.mxu0 %v13587_v32  ;;  %v16999_v32 = vld [vmem:[#allocation2 + $0x53] sm:$0xff] }
 0x25e   :  { %13592 = vmatprep.subr.bf16.mxu0 %v13591_v11 }
 0x260   :  { %12150 = vmatmul.mubr.f32.gmra.mrb[30].mxu0 %v16909_v1 }
 0x261   :  { %12152 = vmatprep.mubr.f32.mxu0 %v16918_v14  ;;  %13594 = vmatpush3.bf16.msra.mxu0 %v13591_v11  ;;  %v17008_v11 = vld [vmem:[#allocation2 + $0x63] sm:$0xff] }
 0x262   :  { %13596 = vmatprep.subr.bf16.mxu0 %v13595_v8 }
 0x264   :  { %12153 = vmatmul.mubr.f32.gmra.mrb[32].mxu0 %v16921_v18 }
 0x265   :  { %12155 = vmatprep.mubr.f32.mxu0 %v2813_v27  ;;  %13598 = vmatpush3.bf16.msra.mxu0 %v13595_v8  ;;  %v9756_v8 = vld [vmem:[%s20212_s3 + $0x250] sm:$0xff]  ;;  %v9759_v27 = vld [vmem:[%s20212_s3 + $0x268] sm:$0xff] }
 0x266   :  { %13600 = vmatprep.subr.bf16.mxu0 %v13599_v5  ;;  %v13639_v35 = vpack.c.bf16 %v9759_v27, %v9758_v19  ;;  %v17089_v19 = vld [vmem:[#allocation2 + $0x54] sm:$0xff]  ;;  %v9770_v27 = vld [vmem:[%s20212_s3 + $0x2c0] sm:$0xff] }
 0x268   :  { %12156 = vmatmul.mubr.f32.gmra.mrb[34].mxu0 %v16930_v12 }
 0x269   :  { %12158 = vmatprep.mubr.f32.mxu0 %v16939_v56  ;;  %13602 = vmatpush3.bf16.msra.mxu0 %v13599_v5  ;;  %v13635_v5 = vpack.c.bf16 %v9757_v50, %v9756_v8  ;;  %v9768_v8 = vld [vmem:[%s20212_s3 + $0x2b0] sm:$0xff]  ;;  %v9769_v50 = vld [vmem:[%s20212_s3 + $0x2b8] sm:$0xff] }
 0x26a   :  { %13604 = vmatprep.subr.bf16.mxu0 %v13603_v34 }
 0x26c   :  { %12159 = vmatmul.mubr.f32.gmra.mrb[36].mxu0 %v16942_v57 }
 0x26d   :  { %12161 = vmatprep.mubr.f32.mxu0 %v16951_v4  ;;  %13606 = vmatpush3.bf16.msra.mxu0 %v13603_v34  ;;  %v17029_v34 = vld [vmem:[#allocation2 + $0xe3] sm:$0xff] }
 0x26e   :  { %13608 = vmatprep.subr.bf16.mxu0 %v13607_v53 }
 0x270   :  { %12162 = vmatmul.mubr.f32.gmra.mrb[38].mxu0 %v16954_v7 }
 0x271   :  { %12164 = vmatprep.mubr.f32.mxu0 %v16963_v44  ;;  %13610 = vmatpush3.bf16.msra.mxu0 %v13607_v53  ;;  %v9760_v53 = vld [vmem:[%s20212_s3 + $0x270] sm:$0xff] }
 0x272   :  { %13612 = vmatprep.subr.bf16.mxu0 %v13611_v15 }
 0x274   :  { %12165 = vmatmul.mubr.f32.gmra.mrb[40].mxu0 %v16966_v16 }
 0x275   :  { %13614 = vmatpush3.bf16.msra.mxu0 %v13611_v15  ;;  %12199 = vmatprep.mubr.f32.mxu0 %v2999_v59  ;;  %v13643_v15 = vpack.c.bf16 %v9761_v13, %v9760_v53  ;;  %v17056_v59 = vld [vmem:[#allocation2 + $0x133] sm:$0xff]  ;;  %v17098_v53 = vld [vmem:[#allocation2 + $0x64] sm:$0xff] }
 0x276   :  { %13616 = vmatprep.subr.bf16.mxu0 %v13615_v17 }
 0x278   :  { %12200 = vmatmul.mubr.f32.vlgmr.msra.gmra.mrb[26].mxu0 %v16975_v28 }
 0x279   :  { %12202 = vmatprep.mubr.f32.mxu0 %v16984_v36  ;;  %13618 = vmatpush3.bf16.msra.mxu0 %v13615_v17  ;;  %v9763_v17 = vld [vmem:[%s20212_s3 + $0x288] sm:$0xff] }
 0x27a   :  { %13620 = vmatprep.subr.bf16.mxu0 %v13619_v46  ;;  %v13647_v54 = vpack.c.bf16 %v9763_v17, %v9762_v23  ;;  %v9772_v23 = vld [vmem:[%s20212_s3 + $0x2d0] sm:$0xff]  ;;  %v9773_v17 = vld [vmem:[%s20212_s3 + $0x2d8] sm:$0xff] }
 0x27c   :  { %12203 = vmatmul.mubr.f32.gmra.mrb[28].mxu0 %v16987_v39 }
 0x27d   :  { %12205 = vmatprep.mubr.f32.mxu0 %v16996_v10  ;;  %13622 = vmatpush3.bf16.msra.mxu0 %v13619_v46  ;;  %v9764_v46 = vld [vmem:[%s20212_s3 + $0x290] sm:$0xff] }
 0x27e   :  { %13624 = vmatprep.subr.bf16.mxu0 %v13623_v48 }
 0x280   :  { %12206 = vmatmul.mubr.f32.gmra.mrb[30].mxu0 %v16999_v32 }
 0x281   :  { %12208 = vmatprep.mubr.f32.mxu0 %v17008_v11  ;;  %13626 = vmatpush3.bf16.msra.mxu0 %v13623_v48  ;;  %v13651_v48 = vpack.c.bf16 %v9765_v3, %v9764_v46  ;;  %v13667_v46 = vpack.c.bf16 %v9773_v17, %v9772_v23  ;;  %v17110_v3 = vld [vmem:[#allocation2 + $0xd4] sm:$0xff]  ;;  %v9779_v23 = vld [vmem:[%s20212_s3 + $0x308] sm:$0xff] }
 0x282   :  { %13628 = vmatprep.subr.bf16.mxu0 %v13627_v25  ;;  %v17143_v17 = vld [vmem:[#allocation2 + $0x124] sm:$0xff] }
 0x283   :  { %20270 = vst [vmem:[#allocation7_spill] sm:$0xff] %v17143_v17 }
 0x284   :  { %12209 = vmatmul.mubr.f32.gmra.mrb[32].mxu0 %v17011_v42 }
 0x285   :  { %12211 = vmatprep.mubr.f32.mxu0 %v3007_v2  ;;  %13630 = vmatpush3.bf16.msra.mxu0 %v13627_v25  ;;  %v9767_v25 = vld [vmem:[%s20212_s3 + $0x2a8] sm:$0xff] }
 0x286   :  { %13632 = vmatprep.subr.bf16.mxu0 %v13631_v9  ;;  %v13655_v49 = vpack.c.bf16 %v9767_v25, %v9766_v41  ;;  %v17086_v2 = vld [vmem:[#allocation2 + $0x44] sm:$0xff] }
 0x287   :  { %v17119_v41 = vld [vmem:[#allocation2 + $0xe4] sm:$0xff] }
 0x288   :  { %12212 = vmatmul.mubr.f32.gmra.mrb[34].mxu0 %v17020_v29 }
 0x289   :  { %12214 = vmatprep.mubr.f32.mxu0 %v17029_v34  ;;  %13634 = vmatpush3.bf16.msra.mxu0 %v13631_v9  ;;  %v17077_v9 = vld [vmem:[#allocation2 + $0x34] sm:$0xff] }
 0x28a   :  { %13636 = vmatprep.subr.bf16.mxu0 %v13635_v5 }
 0x28c   :  { %12215 = vmatmul.mubr.f32.gmra.mrb[36].mxu0 %v17032_v6 }
 0x28d   :  { %12217 = vmatprep.mubr.f32.mxu0 %v17041_v60  ;;  %13638 = vmatpush3.bf16.msra.mxu0 %v13635_v5  ;;  %v13659_v5 = vpack.c.bf16 %v9769_v50, %v9768_v8  ;;  %v9776_v8 = vld [vmem:[%s20212_s3 + $0x2f0] sm:$0xff]  ;;  %v9777_v50 = vld [vmem:[%s20212_s3 + $0x2f8] sm:$0xff] }
 0x28e   :  { %13640 = vmatprep.subr.bf16.mxu0 %v13639_v35 }
 0x290   :  { %12218 = vmatmul.mubr.f32.gmra.mrb[38].mxu0 %v17044_v43 }
 0x291   :  { %12220 = vmatprep.mubr.f32.mxu0 %v17053_v51  ;;  %13642 = vmatpush3.bf16.msra.mxu0 %v13639_v35  ;;  %v9771_v35 = vld [vmem:[%s20212_s3 + $0x2c8] sm:$0xff] }
 0x292   :  { %13644 = vmatprep.subr.bf16.mxu0 %v13643_v15  ;;  %v13663_v13 = vpack.c.bf16 %v9771_v35, %v9770_v27  ;;  %v13675_v27 = vpack.c.bf16 %v9777_v50, %v9776_v8  ;;  %v17134_v35 = vld [vmem:[#allocation2 + $0x114] sm:$0xff] }
 0x293   :  { %v3387_v8 = vld [vmem:[#allocation2 + $0x10] sm:$0xff] }
 0x294   :  { %12221 = vmatmul.mubr.f32.gmra.mrb[40].mxu0 %v17056_v59 }
 0x295   :  { %13646 = vmatpush3.bf16.msra.mxu0 %v13643_v15  ;;  %12255 = vmatprep.mubr.f32.mxu0 %v3193_v31  ;;  %v17101_v15 = vld [vmem:[#allocation2 + $0x74] sm:$0xff]  ;;  %v9774_v31 = vld [vmem:[%s20212_s3 + $0x2e0] sm:$0xff] }
 0x296   :  { %13648 = vmatprep.subr.bf16.mxu0 %v13647_v54 }
 0x298   :  { %12256 = vmatmul.mubr.f32.vlgmr.msra.gmra.mrb[26].mxu0 %v17065_v26 }
 0x299   :  { %12258 = vmatprep.mubr.f32.mxu0 %v17074_v0  ;;  %13650 = vmatpush3.bf16.msra.mxu0 %v13647_v54  ;;  %v3201_v54 = vld [vmem:[#allocation2 + $0xc4] sm:$0xff] }
 0x29a   :  { %13652 = vmatprep.subr.bf16.mxu0 %v13651_v48 }
 0x29c   :  { %12259 = vmatmul.mubr.f32.gmra.mrb[28].mxu0 %v17077_v9 }
 0x29d   :  { %12261 = vmatprep.mubr.f32.mxu0 %v17086_v2  ;;  %13654 = vmatpush3.bf16.msra.mxu0 %v13651_v48  ;;  %v9775_v48 = vld [vmem:[%s20212_s3 + $0x2e8] sm:$0xff] }
 0x29e   :  { %13656 = vmatprep.subr.bf16.mxu0 %v13655_v49  ;;  %v13671_v25 = vpack.c.bf16 %v9775_v48, %v9774_v31  ;;  %v9780_v31 = vld [vmem:[%s20212_s3 + $0x310] sm:$0xff]  ;;  %v9781_v48 = vld [vmem:[%s20212_s3 + $0x318] sm:$0xff] }
 0x29f   :  { %v13683_v50 = vpack.c.bf16 %v9781_v48, %v9780_v31  ;;  %v17167_v31 = vld [vmem:[#allocation2 + $0x40] sm:$0xff]  ;;  %v9784_v48 = vld [vmem:[%s20212_s3 + $0x330] sm:$0xff] }
 0x2a0   :  { %12262 = vmatmul.mubr.f32.gmra.mrb[30].mxu0 %v17089_v19  ;;  %20273 = vst [vmem:[#allocation10_spill] sm:$0xff] %v17167_v31 }
 0x2a1   :  { %12264 = vmatprep.mubr.f32.mxu0 %v17098_v53  ;;  %13658 = vmatpush3.bf16.msra.mxu0 %v13655_v49  ;;  %v17122_v49 = vld [vmem:[#allocation2 + $0xf4] sm:$0xff] }
 0x2a2   :  { %13660 = vmatprep.subr.bf16.mxu0 %v13659_v5 }
 0x2a4   :  { %12265 = vmatmul.mubr.f32.gmra.mrb[32].mxu0 %v17101_v15 }
 0x2a5   :  { %12267 = vmatprep.mubr.f32.mxu0 %v3201_v54  ;;  %13662 = vmatpush3.bf16.msra.mxu0 %v13659_v5  ;;  %v17131_v5 = vld [vmem:[#allocation2 + $0x104] sm:$0xff] }
 0x2a6   :  { %13664 = vmatprep.subr.bf16.mxu0 %v13663_v13 }
 0x2a8   :  { %12268 = vmatmul.mubr.f32.gmra.mrb[34].mxu0 %v17110_v3 }
 0x2a9   :  { %12270 = vmatprep.mubr.f32.mxu0 %v17119_v41  ;;  %13666 = vmatpush3.bf16.msra.mxu0 %v13663_v13  ;;  %v9778_v13 = vld [vmem:[%s20212_s3 + $0x300] sm:$0xff] }
 0x2aa   :  { %13668 = vmatprep.subr.bf16.mxu0 %v13667_v46  ;;  %v13679_v54 = vpack.c.bf16 %v9779_v23, %v9778_v13  ;;  %v9782_v13 = vld [vmem:[%s20212_s3 + $0x320] sm:$0xff]  ;;  %v9783_v23 = vld [vmem:[%s20212_s3 + $0x328] sm:$0xff] }
 0x2ac   :  { %12271 = vmatmul.mubr.f32.gmra.mrb[36].mxu0 %v17122_v49 }
 0x2ad   :  { %12273 = vmatprep.mubr.f32.mxu0 %v17131_v5  ;;  %13670 = vmatpush3.bf16.msra.mxu0 %v13667_v46  ;;  %v17146_v46 = vld [vmem:[#allocation2 + $0x134] sm:$0xff] }
 0x2ae   :  { %13672 = vmatprep.subr.bf16.mxu0 %v13671_v25 }
 0x2b0   :  { %12274 = vmatmul.mubr.f32.gmra.mrb[38].mxu0 %v17134_v35 }
 0x2b1   :  { %12276 = vmatprep.mubr.f32.mxu0 %v17143_v17  ;;  %13674 = vmatpush3.bf16.msra.mxu0 %v13671_v25  ;;  %v17155_v25 = vld [vmem:[#allocation2 + $0x20] sm:$0xff]  ;;  %v17164_v17 = vld [vmem:[#allocation2 + $0x30] sm:$0xff] }
 0x2b2   :  { %13676 = vmatprep.subr.bf16.mxu0 %v13675_v27  ;;  %20271 = vst [vmem:[#allocation8_spill] sm:$0xff] %v17155_v25  ;;  %20272 = vst [vmem:[#allocation9_spill] sm:$0xff] %v17164_v17 }
 0x2b4   :  { %12277 = vmatmul.mubr.f32.gmra.mrb[40].mxu0 %v17146_v46 }
 0x2b5   :  { %13678 = vmatpush3.bf16.msra.mxu0 %v13675_v27  ;;  %12311 = vmatprep.mubr.f32.mxu0 %v3387_v8  ;;  %v13687_v27 = vpack.c.bf16 %v9783_v23, %v9782_v13  ;;  %v9785_v8 = vld [vmem:[%s20212_s3 + $0x338] sm:$0xff]  ;;  %v17179_v13 = vld [vmem:[#allocation2 + $0x60] sm:$0xff] }
 0x2b6   :  { %13680 = vmatprep.subr.bf16.mxu0 %v13679_v54  ;;  %20275 = vst [vmem:[#allocation12_spill] sm:$0xff] %v17179_v13  ;;  %v9786_v23 = vld [vmem:[%s20212_s3 + $0x340] sm:$0xff] }
 0x2b8   :  { %12312 = vmatmul.mubr.f32.vlgmr.msra.gmra.mrb[26].mxu0 %v17155_v25  ;;  %v17176_v25 = vld [vmem:[#allocation2 + $0x50] sm:$0xff] }
 0x2b9   :  { %12314 = vmatprep.mubr.f32.mxu0 %v17164_v17  ;;  %13682 = vmatpush3.bf16.msra.mxu0 %v13679_v54  ;;  %20274 = vst [vmem:[#allocation11_spill] sm:$0xff] %v17176_v25  ;;  %v13691_v54 = vpack.c.bf16 %v9785_v8, %v9784_v48  ;;  %v9787_v17 = vld [vmem:[%s20212_s3 + $0x348] sm:$0xff]  ;;  %v17191_v48 = vld [vmem:[#allocation2 + $0x80] sm:$0xff]  ;;  %v9788_v8 = vld [vmem:[%s20212_s3 + $0x350] sm:$0xff] }
 0x2ba   :  { %13684 = vmatprep.subr.bf16.mxu0 %v13683_v50 }
 0x2bc   :  { %12315 = vmatmul.mubr.f32.gmra.mrb[28].mxu0 %v17167_v31  ;;  %v17188_v31 = vld [vmem:[#allocation2 + $0x70] sm:$0xff] }
 0x2bd   :  { %12317 = vmatprep.mubr.f32.mxu0 %v17176_v25  ;;  %13686 = vmatpush3.bf16.msra.mxu0 %v13683_v50  ;;  %20276 = vst [vmem:[#allocation13_spill] sm:$0xff] %v17188_v31  ;;  %v13695_v50 = vpack.c.bf16 %v9787_v17, %v9786_v23  ;;  %v9789_v25 = vld [vmem:[%s20212_s3 + $0x358] sm:$0xff]  ;;  %v9790_v17 = vld [vmem:[%s20212_s3 + $0x360] sm:$0xff] }
 0x2be   :  { %13688 = vmatprep.subr.bf16.mxu0 %v13687_v27 }
 0x2c0   :  { %12318 = vmatmul.mubr.f32.gmra.mrb[30].mxu0 %v17179_v13  ;;  %v3395_v13 = vld [vmem:[#allocation2 + $0xd0] sm:$0xff] }
 0x2c1   :  { %12320 = vmatprep.mubr.f32.mxu0 %v17188_v31  ;;  %13690 = vmatpush3.bf16.msra.mxu0 %v13687_v27  ;;  %v13699_v31 = vpack.c.bf16 %v9789_v25, %v9788_v8  ;;  %v9791_v27 = vld [vmem:[%s20212_s3 + $0x368] sm:$0xff]  ;;  %v9793_v25 = vld [vmem:[%s20212_s3 + $0x378] sm:$0xff] }
 0x2c2   :  { %13692 = vmatprep.subr.bf16.mxu0 %v13691_v54  ;;  %v13703_v23 = vpack.c.bf16 %v9791_v27, %v9790_v17  ;;  %v17231_v8 = vld [vmem:[#allocation2 + $0x21] sm:$0xff]  ;;  %v17240_v27 = vld [vmem:[#allocation2 + $0x31] sm:$0xff] }
 0x2c3   :  { %v9799_v17 = vld [vmem:[%s20212_s3 + $0x3a8] sm:$0xff] }
 0x2c4   :  { %12321 = vmatmul.mubr.f32.gmra.mrb[32].mxu0 %v17191_v48 }
 0x2c5   :  { %12323 = vmatprep.mubr.f32.mxu0 %v3395_v13  ;;  %13694 = vmatpush3.bf16.msra.mxu0 %v13691_v54  ;;  %v9792_v54 = vld [vmem:[%s20212_s3 + $0x370] sm:$0xff]  ;;  %v9795_v13 = vld [vmem:[%s20212_s3 + $0x388] sm:$0xff] }
 0x2c6   :  { %13696 = vmatprep.subr.bf16.mxu0 %v13695_v50 }
 0x2c8   :  { %12324 = vmatmul.mubr.f32.gmra.mrb[34].mxu0 %v16742_v21  ;;  %v13707_v21 = vpack.c.bf16 %v9793_v25, %v9792_v54  ;;  %v9800_v54 = vld [vmem:[%s20212_s3 + $0x3b0] sm:$0xff]  ;;  %v9801_v25 = vld [vmem:[%s20212_s3 + $0x3b8] sm:$0xff] }
 0x2c9   :  { %12326 = vmatprep.mubr.f32.mxu0 %v16749_v40  ;;  %13698 = vmatpush3.bf16.msra.mxu0 %v13695_v50  ;;  %v9794_v40 = vld [vmem:[%s20212_s3 + $0x380] sm:$0xff]  ;;  %v3581_v50 = vld [vmem:[#allocation2 + $0x11] sm:$0xff] }
 0x2ca   :  { %13700 = vmatprep.subr.bf16.mxu0 %v13699_v31 }
 0x2cc   :  { %12327 = vmatmul.mubr.f32.gmra.mrb[36].mxu0 %v16756_v24  ;;  %v13711_v24 = vpack.c.bf16 %v9795_v13, %v9794_v40  ;;  %v13723_v40 = vpack.c.bf16 %v9801_v25, %v9800_v54  ;;  %v17255_v13 = vld [vmem:[#allocation2 + $0x61] sm:$0xff]  ;;  %v3589_v54 = vld [vmem:[#allocation2 + $0xd1] sm:$0xff] }
 0x2cd   :  { %12329 = vmatprep.mubr.f32.mxu0 %v16766_v58  ;;  %13702 = vmatpush3.bf16.msra.mxu0 %v13699_v31  ;;  %v9796_v58 = vld [vmem:[%s20212_s3 + $0x390] sm:$0xff]  ;;  %v9797_v31 = vld [vmem:[%s20212_s3 + $0x398] sm:$0xff] }
 0x2ce   :  { %13704 = vmatprep.subr.bf16.mxu0 %v13703_v23 }
 0x2d0   :  { %12330 = vmatmul.mubr.f32.gmra.mrb[38].mxu0 %v16776_v22  ;;  %v13715_v22 = vpack.c.bf16 %v9797_v31, %v9796_v58  ;;  %v9803_v58 = vld [vmem:[%s20212_s3 + $0x3c8] sm:$0xff]  ;;  %v17264_v31 = vld [vmem:[#allocation2 + $0x71] sm:$0xff] }
 0x2d1   :  { %12332 = vmatprep.mubr.f32.mxu0 %v16786_v61  ;;  %13706 = vmatpush3.bf16.msra.mxu0 %v13703_v23  ;;  %v9798_v61 = vld [vmem:[%s20212_s3 + $0x3a0] sm:$0xff] }
 0x2d2   :  { %13708 = vmatprep.subr.bf16.mxu0 %v13707_v21  ;;  %v17243_v23 = vld [vmem:[#allocation2 + $0x41] sm:$0xff] }
 0x2d4   :  { %12333 = vmatmul.mubr.f32.gmra.mrb[40].mxu0 %v16796_v63  ;;  %v13719_v63 = vpack.c.bf16 %v9799_v17, %v9798_v61  ;;  %v9804_v61 = vld [vmem:[%s20212_s3 + $0x3d0] sm:$0xff]  ;;  %v9805_v17 = vld [vmem:[%s20212_s3 + $0x3d8] sm:$0xff] }
 0x2d5   :  { %13710 = vmatpush3.bf16.msra.mxu0 %v13707_v21  ;;  %12367 = vmatprep.mubr.f32.mxu0 %v3581_v50  ;;  %v17252_v21 = vld [vmem:[#allocation2 + $0x51] sm:$0xff]  ;;  %v13731_v25 = vpack.c.bf16 %v9805_v17, %v9804_v61  ;;  %v17300_v17 = vld [vmem:[#allocation2 + $0x141] sm:$0xff] }
 0x2d6   :  { %13712 = vmatprep.subr.bf16.mxu0 %v13711_v24  ;;  %v9809_v61 = vld [vmem:[%s20212_s3 + $0x3f8] sm:$0xff] }
 0x2d8   :  { %12368 = vmatmul.mubr.f32.vlgmr.msra.gmra.mrb[26].mxu0 %v17231_v8 }
 0x2d9   :  { %12370 = vmatprep.mubr.f32.mxu0 %v17240_v27  ;;  %13714 = vmatpush3.bf16.msra.mxu0 %v13711_v24  ;;  %v9802_v24 = vld [vmem:[%s20212_s3 + $0x3c0] sm:$0xff] }
 0x2da   :  { %13716 = vmatprep.subr.bf16.mxu0 %v13715_v22  ;;  %v13727_v50 = vpack.c.bf16 %v9803_v58, %v9802_v24  ;;  %v9807_v24 = vld [vmem:[%s20212_s3 + $0x3e8] sm:$0xff] }
 0x2dc   :  { %12371 = vmatmul.mubr.f32.gmra.mrb[28].mxu0 %v17243_v23 }
 0x2dd   :  { %12373 = vmatprep.mubr.f32.mxu0 %v17252_v21  ;;  %13718 = vmatpush3.bf16.msra.mxu0 %v13715_v22  ;;  %v17267_v22 = vld [vmem:[#allocation2 + $0x81] sm:$0xff] }
 0x2de   :  { %13720 = vmatprep.subr.bf16.mxu0 %v13719_v63 }
 0x2e0   :  { %12374 = vmatmul.mubr.f32.gmra.mrb[30].mxu0 %v17255_v13 }
 0x2e1   :  { %12376 = vmatprep.mubr.f32.mxu0 %v17264_v31  ;;  %13722 = vmatpush3.bf16.msra.mxu0 %v13719_v63  ;;  %v9806_v63 = vld [vmem:[%s20212_s3 + $0x3e0] sm:$0xff] }
 0x2e2   :  { %13724 = vmatprep.subr.bf16.mxu0 %v13723_v40  ;;  %v13735_v58 = vpack.c.bf16 %v9807_v24, %v9806_v63  ;;  %v9817_v24 = vld [vmem:[%s20212_s3 + $0x438] sm:$0xff] }
 0x2e4   :  { %12377 = vmatmul.mubr.f32.gmra.mrb[32].mxu0 %v17267_v22 }
 0x2e5   :  { %12379 = vmatprep.mubr.f32.mxu0 %v3589_v54  ;;  %13726 = vmatpush3.bf16.msra.mxu0 %v13723_v40  ;;  %v9808_v40 = vld [vmem:[%s20212_s3 + $0x3f0] sm:$0xff]  ;;  %v9813_v54 = vld [vmem:[%s20212_s3 + $0x418] sm:$0xff] }
 0x2e6   :  { %13728 = vmatprep.subr.bf16.mxu0 %v13727_v50 }
 0x2e8   :  { %12380 = vmatmul.mubr.f32.gmra.mrb[34].mxu0 %v16759_v30  ;;  %v13739_v30 = vpack.c.bf16 %v9809_v61, %v9808_v40  ;;  %v17334_v40 = vld [vmem:[#allocation2 + $0x82] sm:$0xff]  ;;  %v9821_v61 = vld [vmem:[%s20212_s3 + $0x458] sm:$0xff] }
 0x2e9   :  { %12382 = vmatprep.mubr.f32.mxu0 %v16769_v38  ;;  %13730 = vmatpush3.bf16.msra.mxu0 %v13727_v50  ;;  %v9810_v38 = vld [vmem:[%s20212_s3 + $0x400] sm:$0xff]  ;;  %v9811_v50 = vld [vmem:[%s20212_s3 + $0x408] sm:$0xff] }
 0x2ea   :  { %13732 = vmatprep.subr.bf16.mxu0 %v13731_v25 }
 0x2ec   :  { %12383 = vmatmul.mubr.f32.gmra.mrb[36].mxu0 %v16779_v45  ;;  %v13743_v45 = vpack.c.bf16 %v9811_v50, %v9810_v38  ;;  %v9825_v50 = vld [vmem:[%s20212_s3 + $0x478] sm:$0xff] }
 0x2ed   :  { %12385 = vmatprep.mubr.f32.mxu0 %v16789_v37  ;;  %13734 = vmatpush3.bf16.msra.mxu0 %v13731_v25  ;;  %v9812_v37 = vld [vmem:[%s20212_s3 + $0x410] sm:$0xff]  ;;  %v9815_v25 = vld [vmem:[%s20212_s3 + $0x428] sm:$0xff] }
 0x2ee   :  { %13736 = vmatprep.subr.bf16.mxu0 %v13735_v58 }
 0x2f0   :  { %12386 = vmatmul.mubr.f32.gmra.mrb[38].mxu0 %v16799_v52  ;;  %v13747_v52 = vpack.c.bf16 %v9813_v54, %v9812_v37  ;;  %v17368_v37 = vld [vmem:[#allocation2 + $0x142] sm:$0xff]  ;;  %v9829_v54 = vld [vmem:[%s20212_s3 + $0x498] sm:$0xff] }
 0x2f1   :  { %12388 = vmatprep.mubr.f32.mxu0 %v16807_v20  ;;  %13738 = vmatpush3.bf16.msra.mxu0 %v13735_v58  ;;  %v9814_v20 = vld [vmem:[%s20212_s3 + $0x420] sm:$0xff]  ;;  %v9819_v58 = vld [vmem:[%s20212_s3 + $0x448] sm:$0xff] }
 0x2f2   :  { %13740 = vmatprep.subr.bf16.mxu0 %v13739_v30  ;;  %v13751_v63 = vpack.c.bf16 %v9815_v25, %v9814_v20  ;;  %v9833_v25 = vld [vmem:[%s20212_s3 + $0x4b8] sm:$0xff] }
 0x2f4   :  { %12389 = vmatmul.mubr.f32.gmra.mrb[40].mxu0 %v17300_v17 }
 0x2f5   :  { %13742 = vmatpush3.bf16.msra.mxu0 %v13739_v30  ;;  %12423 = vmatprep.mubr.f32.mxu0 %v16885_v47  ;;  %v9816_v47 = vld [vmem:[%s20212_s3 + $0x430] sm:$0xff]  ;;  %v9823_v30 = vld [vmem:[%s20212_s3 + $0x468] sm:$0xff] }
 0x2f6   :  { %13744 = vmatprep.subr.bf16.mxu0 %v13743_v45 }
 0x2f8   :  { %12424 = vmatmul.mubr.f32.vlgmr.msra.gmra.mrb[26].mxu0 %v16894_v62  ;;  %v13755_v62 = vpack.c.bf16 %v9817_v24, %v9816_v47  ;;  %v17402_v47 = vld [vmem:[#allocation2 + $0x83] sm:$0xff]  ;;  %v9837_v24 = vld [vmem:[%s20212_s3 + $0x4d8] sm:$0xff] }
 0x2f9   :  { %12426 = vmatprep.mubr.f32.mxu0 %v16897_v33  ;;  %13746 = vmatpush3.bf16.msra.mxu0 %v13743_v45  ;;  %v9818_v33 = vld [vmem:[%s20212_s3 + $0x440] sm:$0xff]  ;;  %v9827_v45 = vld [vmem:[%s20212_s3 + $0x488] sm:$0xff] }
 0x2fa   :  { %13748 = vmatprep.subr.bf16.mxu0 %v13747_v52 }
 0x2fc   :  { %12427 = vmatmul.mubr.f32.gmra.mrb[28].mxu0 %v16906_v55  ;;  %v13759_v55 = vpack.c.bf16 %v9819_v58, %v9818_v33  ;;  %v9841_v58 = vld [vmem:[%s20212_s3 + $0x4f8] sm:$0xff] }
 0x2fd   :  { %12429 = vmatprep.mubr.f32.mxu0 %v16909_v1  ;;  %13750 = vmatpush3.bf16.msra.mxu0 %v13747_v52  ;;  %v9820_v1 = vld [vmem:[%s20212_s3 + $0x450] sm:$0xff]  ;;  %v9831_v52 = vld [vmem:[%s20212_s3 + $0x4a8] sm:$0xff] }
 0x2fe   :  { %13752 = vmatprep.subr.bf16.mxu0 %v13751_v63 }
 0x300   :  { %12430 = vmatmul.mubr.f32.gmra.mrb[30].mxu0 %v16918_v14  ;;  %v13763_v14 = vpack.c.bf16 %v9821_v61, %v9820_v1  ;;  %v17436_v1 = vld [vmem:[#allocation2 + $0x143] sm:$0xff]  ;;  %v9845_v61 = vld [vmem:[%s20212_s3 + $0x518] sm:$0xff] }
 0x301   :  { %12432 = vmatprep.mubr.f32.mxu0 %v16921_v18  ;;  %13754 = vmatpush3.bf16.msra.mxu0 %v13751_v63  ;;  %v9822_v18 = vld [vmem:[%s20212_s3 + $0x460] sm:$0xff]  ;;  %v9835_v63 = vld [vmem:[%s20212_s3 + $0x4c8] sm:$0xff] }
 0x302   :  { %13756 = vmatprep.subr.bf16.mxu0 %v13755_v62  ;;  %v13767_v38 = vpack.c.bf16 %v9823_v30, %v9822_v18  ;;  %v9849_v30 = vld [vmem:[%s20212_s3 + $0x538] sm:$0xff] }
 0x304   :  { %12433 = vmatmul.mubr.f32.gmra.mrb[32].mxu0 %v17334_v40 }
 0x305   :  { %12435 = vmatprep.mubr.f32.mxu0 %v16930_v12  ;;  %13758 = vmatpush3.bf16.msra.mxu0 %v13755_v62  ;;  %v9824_v12 = vld [vmem:[%s20212_s3 + $0x470] sm:$0xff]  ;;  %v9839_v62 = vld [vmem:[%s20212_s3 + $0x4e8] sm:$0xff] }
 0x306   :  { %13760 = vmatprep.subr.bf16.mxu0 %v13759_v55 }
 0x308   :  { %12436 = vmatmul.mubr.f32.gmra.mrb[34].mxu0 %v16939_v56  ;;  %v13771_v56 = vpack.c.bf16 %v9825_v50, %v9824_v12  ;;  %v17470_v12 = vld [vmem:[#allocation2 + $0x84] sm:$0xff]  ;;  %v9853_v50 = vld [vmem:[%s20212_s3 + $0x558] sm:$0xff] }
 0x309   :  { %12438 = vmatprep.mubr.f32.mxu0 %v16942_v57  ;;  %13762 = vmatpush3.bf16.msra.mxu0 %v13759_v55  ;;  %v9826_v57 = vld [vmem:[%s20212_s3 + $0x480] sm:$0xff]  ;;  %v9843_v55 = vld [vmem:[%s20212_s3 + $0x508] sm:$0xff] }
 0x30a   :  { %13764 = vmatprep.subr.bf16.mxu0 %v13763_v14 }
 0x30c   :  { %12439 = vmatmul.mubr.f32.gmra.mrb[36].mxu0 %v16951_v4  ;;  %v13775_v4 = vpack.c.bf16 %v9827_v45, %v9826_v57  ;;  %v9857_v45 = vld [vmem:[%s20212_s3 + $0x578] sm:$0xff] }
 0x30d   :  { %12441 = vmatprep.mubr.f32.mxu0 %v16954_v7  ;;  %13766 = vmatpush3.bf16.msra.mxu0 %v13763_v14  ;;  %v9828_v7 = vld [vmem:[%s20212_s3 + $0x490] sm:$0xff]  ;;  %v9847_v14 = vld [vmem:[%s20212_s3 + $0x528] sm:$0xff] }
 0x30e   :  { %13768 = vmatprep.subr.bf16.mxu0 %v13767_v38 }
 0x310   :  { %12442 = vmatmul.mubr.f32.gmra.mrb[38].mxu0 %v16963_v44  ;;  %v13779_v44 = vpack.c.bf16 %v9829_v54, %v9828_v7  ;;  %v20277_v7 = vld [vmem:[#allocation7_spill] sm:$0xff] }
 0x311   :  { %12444 = vmatprep.mubr.f32.mxu0 %v16966_v16  ;;  %13770 = vmatpush3.bf16.msra.mxu0 %v13767_v38  ;;  %v9830_v16 = vld [vmem:[%s20212_s3 + $0x4a0] sm:$0xff]  ;;  %v9851_v38 = vld [vmem:[%s20212_s3 + $0x548] sm:$0xff] }
 0x312   :  { %13772 = vmatprep.subr.bf16.mxu0 %v13771_v56  ;;  %v13783_v20 = vpack.c.bf16 %v9831_v52, %v9830_v16  ;;  %v17504_v54 = vld [vmem:[#allocation2 + $0x144] sm:$0xff] }
 0x313   :  { %v20278_v16 = vld [vmem:[#allocation8_spill] sm:$0xff]  ;;  %v9862_v52 = vld [vmem:[%s20212_s3 + $0x5a0] sm:$0xff] }
 0x314   :  { %12445 = vmatmul.mubr.f32.gmra.mrb[40].mxu0 %v17368_v37 }
 0x315   :  { %13774 = vmatpush3.bf16.msra.mxu0 %v13771_v56  ;;  %12479 = vmatprep.mubr.f32.mxu0 %v16975_v28  ;;  %v9832_v28 = vld [vmem:[%s20212_s3 + $0x4b0] sm:$0xff]  ;;  %v9855_v56 = vld [vmem:[%s20212_s3 + $0x568] sm:$0xff] }
 0x316   :  { %13776 = vmatprep.subr.bf16.mxu0 %v13775_v4 }
 0x318   :  { %12480 = vmatmul.mubr.f32.vlgmr.msra.gmra.mrb[26].mxu0 %v16984_v36  ;;  %v13787_v36 = vpack.c.bf16 %v9833_v25, %v9832_v28  ;;  %v20279_v28 = vld [vmem:[#allocation9_spill] sm:$0xff]  ;;  %v20280_v25 = vld [vmem:[#allocation10_spill] sm:$0xff] }
 0x319   :  { %12482 = vmatprep.mubr.f32.mxu0 %v16987_v39  ;;  %13778 = vmatpush3.bf16.msra.mxu0 %v13775_v4  ;;  %v9834_v39 = vld [vmem:[%s20212_s3 + $0x4c0] sm:$0xff]  ;;  %v9859_v4 = vld [vmem:[%s20212_s3 + $0x588] sm:$0xff] }
 0x31a   :  { %13780 = vmatprep.subr.bf16.mxu0 %v13779_v44 }
 0x31c   :  { %12483 = vmatmul.mubr.f32.gmra.mrb[28].mxu0 %v16996_v10  ;;  %v13791_v10 = vpack.c.bf16 %v9835_v63, %v9834_v39  ;;  %v9864_v39 = vld [vmem:[%s20212_s3 + $0x5b0] sm:$0xff]  ;;  %v9865_v63 = vld [vmem:[%s20212_s3 + $0x5b8] sm:$0xff] }
 0x31d   :  { %12485 = vmatprep.mubr.f32.mxu0 %v16999_v32  ;;  %13782 = vmatpush3.bf16.msra.mxu0 %v13779_v44  ;;  %v9836_v32 = vld [vmem:[%s20212_s3 + $0x4d0] sm:$0xff]  ;;  %v9861_v44 = vld [vmem:[%s20212_s3 + $0x598] sm:$0xff] }
 0x31e   :  { %13784 = vmatprep.subr.bf16.mxu0 %v13783_v20 }
 0x320   :  { %12486 = vmatmul.mubr.f32.gmra.mrb[30].mxu0 %v17008_v11  ;;  %v13795_v11 = vpack.c.bf16 %v9837_v24, %v9836_v32  ;;  %v20282_v32 = vld [vmem:[#allocation12_spill] sm:$0xff]  ;;  %v13851_v24 = vpack.c.bf16 %v9865_v63, %v9864_v39  ;;  %v9890_v63 = vld [vmem:[%s20212_s3 + $0x680] sm:$0xff] }
 0x321   :  { %12488 = vmatprep.mubr.f32.mxu0 %v17011_v42  ;;  %13786 = vmatpush3.bf16.msra.mxu0 %v13783_v20  ;;  %v9838_v42 = vld [vmem:[%s20212_s3 + $0x4e0] sm:$0xff]  ;;  %v9863_v20 = vld [vmem:[%s20212_s3 + $0x5a8] sm:$0xff]  ;;  %v17650_v39 = vld [vmem:[#allocation2 + $0x131] sm:$0xff] }
 0x322   :  { %13788 = vmatprep.subr.bf16.mxu0 %v13787_v36  ;;  %v13799_v33 = vpack.c.bf16 %v9839_v62, %v9838_v42  ;;  %v9867_v42 = vld [vmem:[%s20212_s3 + $0x5c8] sm:$0xff]  ;;  %v20283_v62 = vld [vmem:[#allocation13_spill] sm:$0xff] }
 0x324   :  { %12489 = vmatmul.mubr.f32.gmra.mrb[32].mxu0 %v17402_v47 }
 0x325   :  { %12491 = vmatprep.mubr.f32.mxu0 %v17020_v29  ;;  %13790 = vmatpush3.bf16.msra.mxu0 %v13787_v36  ;;  %v9840_v29 = vld [vmem:[%s20212_s3 + $0x4f0] sm:$0xff]  ;;  %v13847_v36 = vpack.c.bf16 %v9863_v20, %v9862_v52 }
 0x326   :  { %13792 = vmatprep.subr.bf16.mxu0 %v13791_v10  ;;  %v17638_v52 = vld [vmem:[#allocation2 + $0x111] sm:$0xff] }
 0x327   :  { %v9888_v20 = vld [vmem:[%s20212_s3 + $0x670] sm:$0xff] }
 0x328   :  { %12492 = vmatmul.mubr.f32.gmra.mrb[34].mxu0 %v17029_v34  ;;  %v13803_v34 = vpack.c.bf16 %v9841_v58, %v9840_v29  ;;  %v17538_v29 = vld [vmem:[#allocation2 + $0x90] sm:$0xff] }
 0x329   :  { %12494 = vmatprep.mubr.f32.mxu0 %v17032_v6  ;;  %13794 = vmatpush3.bf16.msra.mxu0 %v13791_v10  ;;  %v9842_v6 = vld [vmem:[%s20212_s3 + $0x500] sm:$0xff]  ;;  %v9868_v58 = vld [vmem:[%s20212_s3 + $0x5d0] sm:$0xff] }
 0x32a   :  { %13796 = vmatprep.subr.bf16.mxu0 %v13795_v11  ;;  %v20281_v10 = vld [vmem:[#allocation11_spill] sm:$0xff] }
 0x32c   :  { %12495 = vmatmul.mubr.f32.gmra.mrb[36].mxu0 %v17041_v60  ;;  %v13807_v60 = vpack.c.bf16 %v9843_v55, %v9842_v6  ;;  %v4365_v6 = vld [vmem:[#allocation2 + $0xe0] sm:$0xff]  ;;  %v17547_v55 = vld [vmem:[#allocation2 + $0xf0] sm:$0xff] }
 0x32d   :  { %12497 = vmatprep.mubr.f32.mxu0 %v17044_v43  ;;  %13798 = vmatpush3.bf16.msra.mxu0 %v13795_v11  ;;  %v9844_v43 = vld [vmem:[%s20212_s3 + $0x510] sm:$0xff]  ;;  %v9866_v11 = vld [vmem:[%s20212_s3 + $0x5c0] sm:$0xff] }
 0x32e   :  { %13800 = vmatprep.subr.bf16.mxu0 %v13799_v33 }
 0x330   :  { %12498 = vmatmul.mubr.f32.gmra.mrb[38].mxu0 %v17053_v51  ;;  %v13811_v51 = vpack.c.bf16 %v9845_v61, %v9844_v43  ;;  %v9871_v43 = vld [vmem:[%s20212_s3 + $0x5e8] sm:$0xff]  ;;  %v17556_v61 = vld [vmem:[#allocation2 + $0x100] sm:$0xff] }
 0x331   :  { %12500 = vmatprep.mubr.f32.mxu0 %v17056_v59  ;;  %13802 = vmatpush3.bf16.msra.mxu0 %v13799_v33  ;;  %v9846_v59 = vld [vmem:[%s20212_s3 + $0x520] sm:$0xff]  ;;  %v13855_v33 = vpack.c.bf16 %v9867_v42, %v9866_v11  ;;  %v9892_v11 = vld [vmem:[%s20212_s3 + $0x690] sm:$0xff]  ;;  %v9893_v42 = vld [vmem:[%s20212_s3 + $0x698] sm:$0xff] }
 0x332   :  { %13804 = vmatprep.subr.bf16.mxu0 %v13803_v34  ;;  %v13815_v18 = vpack.c.bf16 %v9847_v14, %v9846_v59  ;;  %v17559_v59 = vld [vmem:[#allocation2 + $0x110] sm:$0xff] }
 0x333   :  { %v9872_v14 = vld [vmem:[%s20212_s3 + $0x5f0] sm:$0xff] }
 0x334   :  { %12501 = vmatmul.mubr.f32.gmra.mrb[40].mxu0 %v17436_v1 }
 0x335   :  { %13806 = vmatpush3.bf16.msra.mxu0 %v13803_v34  ;;  %12535 = vmatprep.mubr.f32.mxu0 %v17065_v26  ;;  %v9848_v26 = vld [vmem:[%s20212_s3 + $0x530] sm:$0xff]  ;;  %v9869_v34 = vld [vmem:[%s20212_s3 + $0x5d8] sm:$0xff] }
 0x336   :  { %13808 = vmatprep.subr.bf16.mxu0 %v13807_v60 }
 0x338   :  { %12536 = vmatmul.mubr.f32.vlgmr.msra.gmra.mrb[26].mxu0 %v17074_v0  ;;  %v13819_v0 = vpack.c.bf16 %v9849_v30, %v9848_v26  ;;  %v17568_v26 = vld [vmem:[#allocation2 + $0x120] sm:$0xff] }
 0x339   :  { %12538 = vmatprep.mubr.f32.mxu0 %v17077_v9  ;;  %13810 = vmatpush3.bf16.msra.mxu0 %v13807_v60  ;;  %v9850_v9 = vld [vmem:[%s20212_s3 + $0x540] sm:$0xff] }
 0x33a   :  { %13812 = vmatprep.subr.bf16.mxu0 %v13811_v51  ;;  %v9870_v60 = vld [vmem:[%s20212_s3 + $0x5e0] sm:$0xff] }
 0x33c   :  { %12539 = vmatmul.mubr.f32.gmra.mrb[28].mxu0 %v17086_v2  ;;  %v13823_v2 = vpack.c.bf16 %v9851_v38, %v9850_v9  ;;  %v9874_v9 = vld [vmem:[%s20212_s3 + $0x600] sm:$0xff]  ;;  %v9875_v38 = vld [vmem:[%s20212_s3 + $0x608] sm:$0xff] }
 0x33d   :  { %12541 = vmatprep.mubr.f32.mxu0 %v17089_v19  ;;  %13814 = vmatpush3.bf16.msra.mxu0 %v13811_v51  ;;  %v9852_v19 = vld [vmem:[%s20212_s3 + $0x550] sm:$0xff]  ;;  %v13863_v51 = vpack.c.bf16 %v9871_v43, %v9870_v60 }
 0x33e   :  { %13816 = vmatprep.subr.bf16.mxu0 %v13815_v18  ;;  %v17681_v60 = vld [vmem:[#allocation2 + $0x52] sm:$0xff] }
 0x33f   :  { %v9896_v43 = vld [vmem:[%s20212_s3 + $0x6b0] sm:$0xff] }
 0x340   :  { %12542 = vmatmul.mubr.f32.gmra.mrb[30].mxu0 %v17098_v53  ;;  %v13827_v53 = vpack.c.bf16 %v9853_v50, %v9852_v19  ;;  %v13871_v19 = vpack.c.bf16 %v9875_v38, %v9874_v9  ;;  %v17583_v50 = vld [vmem:[#allocation2 + $0x150] sm:$0xff]  ;;  %v9898_v9 = vld [vmem:[%s20212_s3 + $0x6c0] sm:$0xff]  ;;  %v9899_v38 = vld [vmem:[%s20212_s3 + $0x6c8] sm:$0xff] }
 0x341   :  { %12544 = vmatprep.mubr.f32.mxu0 %v17101_v15  ;;  %13818 = vmatpush3.bf16.msra.mxu0 %v13815_v18  ;;  %v9854_v15 = vld [vmem:[%s20212_s3 + $0x560] sm:$0xff]  ;;  %v9873_v18 = vld [vmem:[%s20212_s3 + $0x5f8] sm:$0xff] }
 0x342   :  { %13820 = vmatprep.subr.bf16.mxu0 %v13819_v0  ;;  %v13831_v57 = vpack.c.bf16 %v9855_v56, %v9854_v15  ;;  %v13867_v30 = vpack.c.bf16 %v9873_v18, %v9872_v14  ;;  %v9877_v15 = vld [vmem:[%s20212_s3 + $0x618] sm:$0xff]  ;;  %v17690_v14 = vld [vmem:[#allocation2 + $0x62] sm:$0xff] }
 0x344   :  { %12545 = vmatmul.mubr.f32.gmra.mrb[32].mxu0 %v17470_v12 }
 0x345   :  { %12547 = vmatprep.mubr.f32.mxu0 %v17110_v3  ;;  %13822 = vmatpush3.bf16.msra.mxu0 %v13819_v0  ;;  %v9856_v3 = vld [vmem:[%s20212_s3 + $0x570] sm:$0xff] }
 0x346   :  { %13824 = vmatprep.subr.bf16.mxu0 %v13823_v2  ;;  %v17571_v0 = vld [vmem:[#allocation2 + $0x130] sm:$0xff] }
 0x348   :  { %12548 = vmatmul.mubr.f32.gmra.mrb[34].mxu0 %v17119_v41  ;;  %v13835_v41 = vpack.c.bf16 %v9857_v45, %v9856_v3  ;;  %v9879_v3 = vld [vmem:[%s20212_s3 + $0x628] sm:$0xff] }
 0x349   :  { %12550 = vmatprep.mubr.f32.mxu0 %v17122_v49  ;;  %13826 = vmatpush3.bf16.msra.mxu0 %v13823_v2  ;;  %v9858_v49 = vld [vmem:[%s20212_s3 + $0x580] sm:$0xff] }
 0x34a   :  { %13828 = vmatprep.subr.bf16.mxu0 %v13827_v53  ;;  %v17580_v2 = vld [vmem:[#allocation2 + $0x140] sm:$0xff] }
 0x34c   :  { %12551 = vmatmul.mubr.f32.gmra.mrb[36].mxu0 %v17131_v5  ;;  %v13839_v5 = vpack.c.bf16 %v9859_v4, %v9858_v49  ;;  %v9883_v49 = vld [vmem:[%s20212_s3 + $0x648] sm:$0xff]  ;;  %v17617_v4 = vld [vmem:[#allocation2 + $0x91] sm:$0xff] }
 0x34d   :  { %12553 = vmatprep.mubr.f32.mxu0 %v17134_v35  ;;  %13830 = vmatpush3.bf16.msra.mxu0 %v13827_v53  ;;  %v9860_v35 = vld [vmem:[%s20212_s3 + $0x590] sm:$0xff] }
 0x34e   :  { %13832 = vmatprep.subr.bf16.mxu0 %v13831_v57  ;;  %v9876_v53 = vld [vmem:[%s20212_s3 + $0x610] sm:$0xff] }
 0x34f   :  { %v13875_v56 = vpack.c.bf16 %v9877_v15, %v9876_v53  ;;  %v17703_v53 = vld [vmem:[#allocation2 + $0x92] sm:$0xff] }
 0x350   :  { %12554 = vmatmul.mubr.f32.gmra.mrb[38].mxu0 %v20277_v7  ;;  %v9885_v7 = vld [vmem:[%s20212_s3 + $0x658] sm:$0xff]  ;;  %v9900_v15 = vld [vmem:[%s20212_s3 + $0x6d0] sm:$0xff] }
 0x351   :  { %12556 = vmatprep.mubr.f32.mxu0 %v17146_v46  ;;  %13834 = vmatpush3.bf16.msra.mxu0 %v13831_v57  ;;  %v13843_v46 = vpack.c.bf16 %v9861_v44, %v9860_v35  ;;  %v9878_v57 = vld [vmem:[%s20212_s3 + $0x620] sm:$0xff]  ;;  %v9887_v44 = vld [vmem:[%s20212_s3 + $0x668] sm:$0xff] }
 0x352   :  { %13836 = vmatprep.subr.bf16.mxu0 %v13835_v41  ;;  %v13879_v45 = vpack.c.bf16 %v9879_v3, %v9878_v57  ;;  %v9886_v35 = vld [vmem:[%s20212_s3 + $0x660] sm:$0xff]  ;;  %v17712_v3 = vld [vmem:[#allocation2 + $0xf2] sm:$0xff] }
 0x353   :  { %v4753_v57 = vld [vmem:[#allocation2 + $0xe2] sm:$0xff] }
 0x354   :  { %12557 = vmatmul.mubr.f32.gmra.mrb[40].mxu0 %v17504_v54 }
 0x355   :  { %13838 = vmatpush3.bf16.msra.mxu0 %v13835_v41  ;;  %12591 = vmatprep.mubr.f32.mxu0 %v20278_v16  ;;  %v9881_v41 = vld [vmem:[%s20212_s3 + $0x638] sm:$0xff]  ;;  %v17635_v16 = vld [vmem:[#allocation2 + $0x101] sm:$0xff] }
 0x356   :  { %13840 = vmatprep.subr.bf16.mxu0 %v13839_v5 }
 0x358   :  { %12592 = vmatmul.mubr.f32.vlgmr.msra.gmra.mrb[26].mxu0 %v20279_v28  ;;  %v9889_v28 = vld [vmem:[%s20212_s3 + $0x678] sm:$0xff] }
 0x359   :  { %12594 = vmatprep.mubr.f32.mxu0 %v20280_v25  ;;  %13842 = vmatpush3.bf16.msra.mxu0 %v13839_v5  ;;  %v4559_v5 = vld [vmem:[#allocation2 + $0xe1] sm:$0xff] }
 0x35a   :  { %13844 = vmatprep.subr.bf16.mxu0 %v13843_v46  ;;  %v17647_v25 = vld [vmem:[#allocation2 + $0x121] sm:$0xff] }
 0x35c   :  { %12595 = vmatmul.mubr.f32.gmra.mrb[28].mxu0 %v20281_v10  ;;  %v9891_v10 = vld [vmem:[%s20212_s3 + $0x688] sm:$0xff] }
 0x35d   :  { %12597 = vmatprep.mubr.f32.mxu0 %v20282_v32  ;;  %13846 = vmatpush3.bf16.msra.mxu0 %v13843_v46  ;;  %v13895_v46 = vpack.c.bf16 %v9887_v44, %v9886_v35  ;;  %v13903_v32 = vpack.c.bf16 %v9891_v10, %v9890_v63  ;;  %v9907_v35 = vld [vmem:[%s20212_s3 + $0x708] sm:$0xff]  ;;  %v17755_v63 = vld [vmem:[#allocation2 + $0x33] sm:$0xff]  ;;  %v9910_v10 = vld [vmem:[%s20212_s3 + $0x720] sm:$0xff] }
 0x35e   :  { %13848 = vmatprep.subr.bf16.mxu0 %v13847_v36 }
 0x360   :  { %12598 = vmatmul.mubr.f32.gmra.mrb[30].mxu0 %v20283_v62  ;;  %v4745_v62 = vld [vmem:[#allocation2 + $0x22] sm:$0xff] }
 0x361   :  { %12600 = vmatprep.mubr.f32.mxu0 %v17191_v48  ;;  %13850 = vmatpush3.bf16.msra.mxu0 %v13847_v36  ;;  %v13859_v48 = vpack.c.bf16 %v9869_v34, %v9868_v58  ;;  %v13899_v36 = vpack.c.bf16 %v9889_v28, %v9888_v20  ;;  %v9894_v58 = vld [vmem:[%s20212_s3 + $0x6a0] sm:$0xff]  ;;  %v9895_v34 = vld [vmem:[%s20212_s3 + $0x6a8] sm:$0xff]  ;;  %v9908_v20 = vld [vmem:[%s20212_s3 + $0x710] sm:$0xff] }
 0x362   :  { %13852 = vmatprep.subr.bf16.mxu0 %v13851_v24  ;;  %v9909_v28 = vld [vmem:[%s20212_s3 + $0x718] sm:$0xff] }
 0x364   :  { %12601 = vmatmul.mubr.f32.gmra.mrb[32].mxu0 %v17538_v29 }
 0x365   :  { %12603 = vmatprep.mubr.f32.mxu0 %v4365_v6  ;;  %13854 = vmatpush3.bf16.msra.mxu0 %v13851_v24  ;;  %v17660_v24 = vld [vmem:[#allocation2 + $0x151] sm:$0xff]  ;;  %v17678_v6 = vld [vmem:[#allocation2 + $0x42] sm:$0xff] }
 0x366   :  { %13856 = vmatprep.subr.bf16.mxu0 %v13855_v33 }
 0x368   :  { %12604 = vmatmul.mubr.f32.gmra.mrb[34].mxu0 %v17547_v55 }
 0x369   :  { %12606 = vmatprep.mubr.f32.mxu0 %v17556_v61  ;;  %13858 = vmatpush3.bf16.msra.mxu0 %v13855_v33  ;;  %v17669_v33 = vld [vmem:[#allocation2 + $0x32] sm:$0xff] }
 0x36a   :  { %13860 = vmatprep.subr.bf16.mxu0 %v13859_v48 }
 0x36c   :  { %12607 = vmatmul.mubr.f32.gmra.mrb[36].mxu0 %v17559_v59 }
 0x36d   :  { %12609 = vmatprep.mubr.f32.mxu0 %v17568_v26  ;;  %13862 = vmatpush3.bf16.msra.mxu0 %v13859_v48  ;;  %v13911_v48 = vpack.c.bf16 %v9895_v34, %v9894_v58  ;;  %v9913_v58 = vld [vmem:[%s20212_s3 + $0x738] sm:$0xff]  ;;  %v17776_v34 = vld [vmem:[#allocation2 + $0x63] sm:$0xff] }
 0x36e   :  { %13864 = vmatprep.subr.bf16.mxu0 %v13863_v51 }
 0x370   :  { %12610 = vmatmul.mubr.f32.gmra.mrb[38].mxu0 %v17571_v0 }
 0x371   :  { %12612 = vmatprep.mubr.f32.mxu0 %v17580_v2  ;;  %13866 = vmatpush3.bf16.msra.mxu0 %v13863_v51  ;;  %v9897_v51 = vld [vmem:[%s20212_s3 + $0x6b8] sm:$0xff] }
 0x372   :  { %13868 = vmatprep.subr.bf16.mxu0 %v13867_v30  ;;  %v13915_v18 = vpack.c.bf16 %v9897_v51, %v9896_v43  ;;  %v17779_v43 = vld [vmem:[#allocation2 + $0x73] sm:$0xff]  ;;  %v9914_v51 = vld [vmem:[%s20212_s3 + $0x740] sm:$0xff] }
 0x374   :  { %12613 = vmatmul.mubr.f32.gmra.mrb[40].mxu0 %v17583_v50 }
 0x375   :  { %13870 = vmatpush3.bf16.msra.mxu0 %v13867_v30  ;;  %12647 = vmatprep.mubr.f32.mxu0 %v17231_v8  ;;  %v9880_v8 = vld [vmem:[%s20212_s3 + $0x630] sm:$0xff] }
 0x376   :  { %13872 = vmatprep.subr.bf16.mxu0 %v13871_v19  ;;  %v17693_v30 = vld [vmem:[#allocation2 + $0x72] sm:$0xff] }
 0x378   :  { %12648 = vmatmul.mubr.f32.vlgmr.msra.gmra.mrb[26].mxu0 %v17240_v27  ;;  %v13883_v27 = vpack.c.bf16 %v9881_v41, %v9880_v8  ;;  %v9903_v8 = vld [vmem:[%s20212_s3 + $0x6e8] sm:$0xff] }
 0x379   :  { %12650 = vmatprep.mubr.f32.mxu0 %v17243_v23  ;;  %13874 = vmatpush3.bf16.msra.mxu0 %v13871_v19  ;;  %v9882_v23 = vld [vmem:[%s20212_s3 + $0x640] sm:$0xff]  ;;  %v13919_v19 = vpack.c.bf16 %v9899_v38, %v9898_v9  ;;  %v17789_v38 = vld [vmem:[#allocation2 + $0x93] sm:$0xff] }
 0x37a   :  { %13876 = vmatprep.subr.bf16.mxu0 %v13875_v56  ;;  %v17721_v41 = vld [vmem:[#allocation2 + $0x102] sm:$0xff] }
 0x37c   :  { %12651 = vmatmul.mubr.f32.gmra.mrb[28].mxu0 %v17252_v21  ;;  %v13887_v21 = vpack.c.bf16 %v9883_v49, %v9882_v23  ;;  %v17724_v23 = vld [vmem:[#allocation2 + $0x112] sm:$0xff] }
 0x37d   :  { %12653 = vmatprep.mubr.f32.mxu0 %v17255_v13  ;;  %13878 = vmatpush3.bf16.msra.mxu0 %v13875_v56  ;;  %v9884_v13 = vld [vmem:[%s20212_s3 + $0x650] sm:$0xff]  ;;  %v9901_v56 = vld [vmem:[%s20212_s3 + $0x6d8] sm:$0xff] }
 0x37e   :  { %13880 = vmatprep.subr.bf16.mxu0 %v13879_v45  ;;  %v9904_v49 = vld [vmem:[%s20212_s3 + $0x6f0] sm:$0xff] }
 0x380   :  { %12654 = vmatmul.mubr.f32.gmra.mrb[30].mxu0 %v17264_v31  ;;  %v13891_v31 = vpack.c.bf16 %v9885_v7, %v9884_v13  ;;  %v17733_v13 = vld [vmem:[#allocation2 + $0x122] sm:$0xff] }
 0x381   :  { %12656 = vmatprep.mubr.f32.mxu0 %v17267_v22  ;;  %13882 = vmatpush3.bf16.msra.mxu0 %v13879_v45  ;;  %v17626_v22 = vld [vmem:[#allocation2 + $0xf1] sm:$0xff]  ;;  %v9902_v45 = vld [vmem:[%s20212_s3 + $0x6e0] sm:$0xff] }
 0x382   :  { %13884 = vmatprep.subr.bf16.mxu0 %v13883_v27 }
 0x384   :  { %12657 = vmatmul.mubr.f32.gmra.mrb[32].mxu0 %v17617_v4 }
 0x385   :  { %12659 = vmatprep.mubr.f32.mxu0 %v4559_v5  ;;  %13886 = vmatpush3.bf16.msra.mxu0 %v13883_v27  ;;  %v13927_v27 = vpack.c.bf16 %v9903_v8, %v9902_v45  ;;  %v17736_v5 = vld [vmem:[#allocation2 + $0x132] sm:$0xff]  ;;  %v9919_v45 = vld [vmem:[%s20212_s3 + $0x768] sm:$0xff] }
 0x386   :  { %13888 = vmatprep.subr.bf16.mxu0 %v13887_v21  ;;  %v17807_v8 = vld [vmem:[#allocation2 + $0x103] sm:$0xff] }
 0x388   :  { %12660 = vmatmul.mubr.f32.gmra.mrb[34].mxu0 %v17626_v22 }
 0x389   :  { %12662 = vmatprep.mubr.f32.mxu0 %v17635_v16  ;;  %13890 = vmatpush3.bf16.msra.mxu0 %v13887_v21  ;;  %v9905_v21 = vld [vmem:[%s20212_s3 + $0x6f8] sm:$0xff] }
 0x38a   :  { %13892 = vmatprep.subr.bf16.mxu0 %v13891_v31  ;;  %v13931_v7 = vpack.c.bf16 %v9905_v21, %v9904_v49  ;;  %v17810_v49 = vld [vmem:[#allocation2 + $0x113] sm:$0xff] }
 0x38b   :  { %v9920_v21 = vld [vmem:[%s20212_s3 + $0x770] sm:$0xff] }
 0x38c   :  { %12663 = vmatmul.mubr.f32.gmra.mrb[36].mxu0 %v17638_v52 }
 0x38d   :  { %12665 = vmatprep.mubr.f32.mxu0 %v17647_v25  ;;  %13894 = vmatpush3.bf16.msra.mxu0 %v13891_v31  ;;  %v9906_v31 = vld [vmem:[%s20212_s3 + $0x700] sm:$0xff] }
 0x38e   :  { %13896 = vmatprep.subr.bf16.mxu0 %v13895_v46  ;;  %v13935_v44 = vpack.c.bf16 %v9907_v35, %v9906_v31  ;;  %v17819_v31 = vld [vmem:[#allocation2 + $0x123] sm:$0xff] }
 0x390   :  { %12666 = vmatmul.mubr.f32.gmra.mrb[38].mxu0 %v17650_v39 }
 0x391   :  { %12668 = vmatprep.mubr.f32.mxu0 %v17300_v17  ;;  %13898 = vmatpush3.bf16.msra.mxu0 %v13895_v46  ;;  %v13907_v17 = vpack.c.bf16 %v9893_v42, %v9892_v11  ;;  %v17746_v46 = vld [vmem:[#allocation2 + $0x152] sm:$0xff]  ;;  %v17764_v11 = vld [vmem:[#allocation2 + $0x43] sm:$0xff] }
 0x392   :  { %13900 = vmatprep.subr.bf16.mxu0 %v13899_v36 }
 0x394   :  { %12669 = vmatmul.mubr.f32.gmra.mrb[40].mxu0 %v17660_v24 }
 0x395   :  { %13902 = vmatpush3.bf16.msra.mxu0 %v13899_v36  ;;  %12703 = vmatprep.mubr.f32.mxu0 %v4745_v62  ;;  %v4939_v36 = vld [vmem:[#allocation2 + $0x23] sm:$0xff]  ;;  %v17767_v62 = vld [vmem:[#allocation2 + $0x53] sm:$0xff] }
 0x396   :  { %13904 = vmatprep.subr.bf16.mxu0 %v13903_v32 }
 0x398   :  { %12704 = vmatmul.mubr.f32.vlgmr.msra.gmra.mrb[26].mxu0 %v17669_v33 }
 0x399   :  { %12706 = vmatprep.mubr.f32.mxu0 %v17678_v6  ;;  %13906 = vmatpush3.bf16.msra.mxu0 %v13903_v32  ;;  %v9911_v32 = vld [vmem:[%s20212_s3 + $0x728] sm:$0xff] }
 0x39a   :  { %13908 = vmatprep.subr.bf16.mxu0 %v13907_v17  ;;  %v13943_v42 = vpack.c.bf16 %v9911_v32, %v9910_v10  ;;  %v9924_v10 = vld [vmem:[%s20212_s3 + $0x790] sm:$0xff]  ;;  %v9925_v32 = vld [vmem:[%s20212_s3 + $0x798] sm:$0xff] }
 0x39c   :  { %12707 = vmatmul.mubr.f32.gmra.mrb[28].mxu0 %v17681_v60 }
 0x39d   :  { %12709 = vmatprep.mubr.f32.mxu0 %v17690_v14  ;;  %13910 = vmatpush3.bf16.msra.mxu0 %v13907_v17  ;;  %v9912_v17 = vld [vmem:[%s20212_s3 + $0x730] sm:$0xff] }
 0x39e   :  { %13912 = vmatprep.subr.bf16.mxu0 %v13911_v48 }
 0x3a0   :  { %12710 = vmatmul.mubr.f32.gmra.mrb[30].mxu0 %v17693_v30 }
 0x3a1   :  { %12712 = vmatprep.mubr.f32.mxu0 %v17334_v40  ;;  %13914 = vmatpush3.bf16.msra.mxu0 %v13911_v48  ;;  %v13923_v40 = vpack.c.bf16 %v9901_v56, %v9900_v15  ;;  %v13947_v48 = vpack.c.bf16 %v9913_v58, %v9912_v17  ;;  %v9917_v15 = vld [vmem:[%s20212_s3 + $0x758] sm:$0xff]  ;;  %v4947_v56 = vld [vmem:[#allocation2 + $0xe3] sm:$0xff] }
 0x3a2   :  { %13916 = vmatprep.subr.bf16.mxu0 %v13915_v18  ;;  %v17841_v17 = vld [vmem:[#allocation2 + $0x34] sm:$0xff]  ;;  %v9926_v58 = vld [vmem:[%s20212_s3 + $0x7a0] sm:$0xff] }
 0x3a4   :  { %12713 = vmatmul.mubr.f32.gmra.mrb[32].mxu0 %v17703_v53 }
 0x3a5   :  { %12715 = vmatprep.mubr.f32.mxu0 %v4753_v57  ;;  %13918 = vmatpush3.bf16.msra.mxu0 %v13915_v18  ;;  %v9915_v18 = vld [vmem:[%s20212_s3 + $0x748] sm:$0xff]  ;;  %v17798_v57 = vld [vmem:[#allocation2 + $0xf3] sm:$0xff] }
 0x3a6   :  { %13920 = vmatprep.subr.bf16.mxu0 %v13919_v19  ;;  %v13951_v9 = vpack.c.bf16 %v9915_v18, %v9914_v51  ;;  %v17850_v51 = vld [vmem:[#allocation2 + $0x44] sm:$0xff] }
 0x3a8   :  { %12716 = vmatmul.mubr.f32.gmra.mrb[34].mxu0 %v17712_v3 }
 0x3a9   :  { %12718 = vmatprep.mubr.f32.mxu0 %v17721_v41  ;;  %13922 = vmatpush3.bf16.msra.mxu0 %v13919_v19  ;;  %v9916_v19 = vld [vmem:[%s20212_s3 + $0x750] sm:$0xff] }
 0x3aa   :  { %13924 = vmatprep.subr.bf16.mxu0 %v13923_v40 }
 0x3ac   :  { %12719 = vmatmul.mubr.f32.gmra.mrb[36].mxu0 %v17724_v23 }
 0x3ad   :  { %12721 = vmatprep.mubr.f32.mxu0 %v17733_v13  ;;  %13926 = vmatpush3.bf16.msra.mxu0 %v13923_v40  ;;  %v9918_v40 = vld [vmem:[%s20212_s3 + $0x760] sm:$0xff] }
 0x3ae   :  { %13928 = vmatprep.subr.bf16.mxu0 %v13927_v27 }
 0x3b0   :  { %12722 = vmatmul.mubr.f32.gmra.mrb[38].mxu0 %v17736_v5 }
 0x3b1   :  { %12724 = vmatprep.mubr.f32.mxu0 %v17368_v37  ;;  %13930 = vmatpush3.bf16.msra.mxu0 %v13927_v27  ;;  %v13939_v37 = vpack.c.bf16 %v9909_v28, %v9908_v20  ;;  %v13959_v27 = vpack.c.bf16 %v9919_v45, %v9918_v40  ;;  %v9922_v20 = vld [vmem:[%s20212_s3 + $0x780] sm:$0xff]  ;;  %v9923_v28 = vld [vmem:[%s20212_s3 + $0x788] sm:$0xff]  ;;  %v17865_v40 = vld [vmem:[#allocation2 + $0x74] sm:$0xff] }
 0x3b2   :  { %13932 = vmatprep.subr.bf16.mxu0 %v13931_v7  ;;  %v9930_v45 = vld [vmem:[%s20212_s3 + $0x7c0] sm:$0xff] }
 0x3b4   :  { %12725 = vmatmul.mubr.f32.gmra.mrb[40].mxu0 %v17746_v46 }
 0x3b5   :  { %13934 = vmatpush3.bf16.msra.mxu0 %v13931_v7  ;;  %12759 = vmatprep.mubr.f32.mxu0 %v4939_v36  ;;  %v9921_v7 = vld [vmem:[%s20212_s3 + $0x778] sm:$0xff]  ;;  %v13967_v36 = vpack.c.bf16 %v9923_v28, %v9922_v20  ;;  %v5141_v28 = vld [vmem:[#allocation2 + $0xe4] sm:$0xff] }
 0x3b6   :  { %13936 = vmatprep.subr.bf16.mxu0 %v13935_v44  ;;  %v13963_v35 = vpack.c.bf16 %v9921_v7, %v9920_v21  ;;  %v17875_v7 = vld [vmem:[#allocation2 + $0x94] sm:$0xff] }
 0x3b7   :  { %v9933_v20 = vld [vmem:[%s20212_s3 + $0x7d8] sm:$0xff] }
 0x3b8   :  { %12760 = vmatmul.mubr.f32.vlgmr.msra.gmra.mrb[26].mxu0 %v17755_v63 }
 0x3b9   :  { %12762 = vmatprep.mubr.f32.mxu0 %v17764_v11  ;;  %13938 = vmatpush3.bf16.msra.mxu0 %v13935_v44  ;;  %v17822_v44 = vld [vmem:[#allocation2 + $0x133] sm:$0xff] }
 0x3ba   :  { %13940 = vmatprep.subr.bf16.mxu0 %v13939_v37 }
 0x3bc   :  { %12763 = vmatmul.mubr.f32.gmra.mrb[28].mxu0 %v17767_v62 }
 0x3bd   :  { %12765 = vmatprep.mubr.f32.mxu0 %v17776_v34  ;;  %13942 = vmatpush3.bf16.msra.mxu0 %v13939_v37  ;;  %v17832_v37 = vld [vmem:[#allocation2 + $0x153] sm:$0xff] }
 0x3be   :  { %13944 = vmatprep.subr.bf16.mxu0 %v13943_v42 }
 0x3c0   :  { %12766 = vmatmul.mubr.f32.gmra.mrb[30].mxu0 %v17779_v43 }
 0x3c1   :  { %12768 = vmatprep.mubr.f32.mxu0 %v17402_v47  ;;  %13946 = vmatpush3.bf16.msra.mxu0 %v13943_v42  ;;  %v13955_v47 = vpack.c.bf16 %v9917_v15, %v9916_v19  ;;  %v5133_v42 = vld [vmem:[#allocation2 + $0x24] sm:$0xff]  ;;  %v9928_v19 = vld [vmem:[%s20212_s3 + $0x7b0] sm:$0xff]  ;;  %v9929_v15 = vld [vmem:[%s20212_s3 + $0x7b8] sm:$0xff] }
 0x3c2   :  { %13948 = vmatprep.subr.bf16.mxu0 %v13947_v48 }
 0x3c4   :  { %12769 = vmatmul.mubr.f32.gmra.mrb[32].mxu0 %v17789_v38 }
 0x3c5   :  { %12771 = vmatprep.mubr.f32.mxu0 %v4947_v56  ;;  %13950 = vmatpush3.bf16.msra.mxu0 %v13947_v48  ;;  %v9927_v48 = vld [vmem:[%s20212_s3 + $0x7a8] sm:$0xff] }
 0x3c6   :  { %13952 = vmatprep.subr.bf16.mxu0 %v13951_v9  ;;  %v13975_v18 = vpack.c.bf16 %v9927_v48, %v9926_v58  ;;  %v17862_v56 = vld [vmem:[#allocation2 + $0x64] sm:$0xff]  ;;  %v17896_v58 = vld [vmem:[#allocation2 + $0x114] sm:$0xff] }
 0x3c7   :  { %v9936_v48 = vld [vmem:[%s20212_s3 + $0x7f0] sm:$0xff] }
 0x3c8   :  { %12772 = vmatmul.mubr.f32.gmra.mrb[34].mxu0 %v17798_v57 }
 0x3c9   :  { %12774 = vmatprep.mubr.f32.mxu0 %v17807_v8  ;;  %13954 = vmatpush3.bf16.msra.mxu0 %v13951_v9  ;;  %v17853_v9 = vld [vmem:[#allocation2 + $0x54] sm:$0xff] }
 0x3ca   :  { %13956 = vmatprep.subr.bf16.mxu0 %v13955_v47 }
 0x3cc   :  { %12775 = vmatmul.mubr.f32.gmra.mrb[36].mxu0 %v17810_v49 }
 0x3cd   :  { %12777 = vmatprep.mubr.f32.mxu0 %v17819_v31  ;;  %13958 = vmatpush3.bf16.msra.mxu0 %v13955_v47  ;;  %v13979_v47 = vpack.c.bf16 %v9929_v15, %v9928_v19  ;;  %v17905_v19 = vld [vmem:[#allocation2 + $0x124] sm:$0xff] }
 0x3ce   :  { %13960 = vmatprep.subr.bf16.mxu0 %v13959_v27 }
 0x3d0   :  { %12778 = vmatmul.mubr.f32.gmra.mrb[38].mxu0 %v17822_v44 }
 0x3d1   :  { %12780 = vmatprep.mubr.f32.mxu0 %v17436_v1  ;;  %13962 = vmatpush3.bf16.msra.mxu0 %v13959_v27  ;;  %v13971_v1 = vpack.c.bf16 %v9925_v32, %v9924_v10  ;;  %v9931_v27 = vld [vmem:[%s20212_s3 + $0x7c8] sm:$0xff]  ;;  %v9934_v10 = vld [vmem:[%s20212_s3 + $0x7e0] sm:$0xff] }
 0x3d2   :  { %13964 = vmatprep.subr.bf16.mxu0 %v13963_v35  ;;  %v13983_v21 = vpack.c.bf16 %v9931_v27, %v9930_v45  ;;  %v9935_v32 = vld [vmem:[%s20212_s3 + $0x7e8] sm:$0xff]  ;;  %v9938_v45 = vld [vmem:[%s20212_s3 + $0x800] sm:$0xff] }
 0x3d3   :  { %v9939_v27 = vld [vmem:[%s20212_s3 + $0x808] sm:$0xff] }
 0x3d4   :  { %12781 = vmatmul.mubr.f32.gmra.mrb[40].mxu0 %v17832_v37 }
 0x3d5   :  { %13966 = vmatpush3.bf16.msra.mxu0 %v13963_v35  ;;  %12815 = vmatprep.mubr.f32.mxu0 %v5133_v42  ;;  %v9932_v35 = vld [vmem:[%s20212_s3 + $0x7d0] sm:$0xff]  ;;  %v17893_v42 = vld [vmem:[#allocation2 + $0x104] sm:$0xff] }
 0x3d6   :  { %13968 = vmatprep.subr.bf16.mxu0 %v13967_v36 }
 0x3d8   :  { %12816 = vmatmul.mubr.f32.vlgmr.msra.gmra.mrb[26].mxu0 %v17841_v17 }
 0x3d9   :  { %12818 = vmatprep.mubr.f32.mxu0 %v17850_v51  ;;  %13970 = vmatpush3.bf16.msra.mxu0 %v13967_v36  ;;  %v17884_v36 = vld [vmem:[#allocation2 + $0xf4] sm:$0xff] }
 0x3da   :  { %13972 = vmatprep.subr.bf16.mxu0 %v13971_v1 }
 0x3dc   :  { %12819 = vmatmul.mubr.f32.gmra.mrb[28].mxu0 %v17853_v9 }
 0x3dd   :  { %12821 = vmatprep.mubr.f32.mxu0 %v17862_v56  ;;  %13974 = vmatpush3.bf16.msra.mxu0 %v13971_v1  ;;  %v13991_v1 = vpack.c.bf16 %v9935_v32, %v9934_v10  ;;  %v17927_v10 = vld [vmem:[#allocation2 + $0x40] sm:$0xff] }
 0x3de   :  { %13976 = vmatprep.subr.bf16.mxu0 %v13975_v18  ;;  %v9942_v32 = vld [vmem:[%s20212_s3 + $0x820] sm:$0xff] }
 0x3e0   :  { %12822 = vmatmul.mubr.f32.gmra.mrb[30].mxu0 %v17865_v40 }
 0x3e1   :  { %12824 = vmatprep.mubr.f32.mxu0 %v17470_v12  ;;  %13978 = vmatpush3.bf16.msra.mxu0 %v13975_v18  ;;  %v13987_v12 = vpack.c.bf16 %v9933_v20, %v9932_v35  ;;  %v9937_v18 = vld [vmem:[%s20212_s3 + $0x7f8] sm:$0xff]  ;;  %v9940_v20 = vld [vmem:[%s20212_s3 + $0x810] sm:$0xff] }
 0x3e2   :  { %13980 = vmatprep.subr.bf16.mxu0 %v13979_v47  ;;  %v13995_v15 = vpack.c.bf16 %v9937_v18, %v9936_v48  ;;  %v17918_v35 = vld [vmem:[#allocation2 + $0x154] sm:$0xff] }
 0x3e3   :  { %v17936_v48 = vld [vmem:[#allocation2 + $0x50] sm:$0xff] }
 0x3e4   :  { %12825 = vmatmul.mubr.f32.gmra.mrb[32].mxu0 %v17875_v7 }
 0x3e5   :  { %12827 = vmatprep.mubr.f32.mxu0 %v5141_v28  ;;  %13982 = vmatpush3.bf16.msra.mxu0 %v13979_v47  ;;  %v17908_v47 = vld [vmem:[#allocation2 + $0x134] sm:$0xff] }
 0x3e6   :  { %13984 = vmatprep.subr.bf16.mxu0 %v13983_v21  ;;  %v9941_v28 = vld [vmem:[%s20212_s3 + $0x818] sm:$0xff] }
 0x3e8   :  { %12828 = vmatmul.mubr.f32.gmra.mrb[34].mxu0 %v17884_v36 }
 0x3e9   :  { %12830 = vmatprep.mubr.f32.mxu0 %v17893_v42  ;;  %13986 = vmatpush3.bf16.msra.mxu0 %v13983_v21  ;;  %v13999_v21 = vpack.c.bf16 %v9939_v27, %v9938_v45  ;;  %v9944_v45 = vld [vmem:[%s20212_s3 + $0x830] sm:$0xff]  ;;  %v9945_v27 = vld [vmem:[%s20212_s3 + $0x838] sm:$0xff] }
 0x3ea   :  { %13988 = vmatprep.subr.bf16.mxu0 %v13987_v12 }
 0x3ec   :  { %12831 = vmatmul.mubr.f32.gmra.mrb[36].mxu0 %v17896_v58 }
 0x3ed   :  { %12833 = vmatprep.mubr.f32.mxu0 %v17905_v19  ;;  %13990 = vmatpush3.bf16.msra.mxu0 %v13987_v12  ;;  %v5327_v12 = vld [vmem:[#allocation2 + $0x30] sm:$0xff] }
 0x3ee   :  { %13992 = vmatprep.subr.bf16.mxu0 %v13991_v1 }
 0x3f0   :  { %12834 = vmatmul.mubr.f32.gmra.mrb[38].mxu0 %v17908_v47 }
 0x3f1   :  { %12836 = vmatprep.mubr.f32.mxu0 %v17504_v54  ;;  %13994 = vmatpush3.bf16.msra.mxu0 %v13991_v1  ;;  %v14003_v54 = vpack.c.bf16 %v9941_v28, %v9940_v20  ;;  %v9943_v1 = vld [vmem:[%s20212_s3 + $0x828] sm:$0xff]  ;;  %v17948_v20 = vld [vmem:[#allocation2 + $0x70] sm:$0xff]  ;;  %v17951_v28 = vld [vmem:[#allocation2 + $0x80] sm:$0xff] }
 0x3f2   :  { %13996 = vmatprep.subr.bf16.mxu0 %v13995_v15  ;;  %v14007_v18 = vpack.c.bf16 %v9943_v1, %v9942_v32  ;;  %v9947_v32 = vld [vmem:[%s20212_s3 + $0x848] sm:$0xff] }
 0x3f4   :  { %12837 = vmatmul.mubr.f32.gmra.mrb[40].mxu0 %v17918_v35 }
 0x3f5   :  { %13998 = vmatpush3.bf16.msra.mxu0 %v13995_v15  ;;  %12871 = vmatprep.mubr.f32.mxu0 %v5327_v12  ;;  %v17939_v15 = vld [vmem:[#allocation2 + $0x60] sm:$0xff] }
 0x3f6   :  { %14000 = vmatprep.subr.bf16.mxu0 %v13999_v21  ;;  %v9946_v12 = vld [vmem:[%s20212_s3 + $0x840] sm:$0xff] }
 0x3f7   :  { %v14015_v1 = vpack.c.bf16 %v9947_v32, %v9946_v12  ;;  %v9951_v12 = vld [vmem:[%s20212_s3 + $0x868] sm:$0xff] }
 0x3f8   :  { %12872 = vmatmul.mubr.f32.vlgmr.msra.gmra.mrb[26].mxu0 %v17927_v10 }
 0x3f9   :  { %12874 = vmatprep.mubr.f32.mxu0 %v17936_v48  ;;  %14002 = vmatpush3.bf16.msra.mxu0 %v13999_v21  ;;  %v14011_v21 = vpack.c.bf16 %v9945_v27, %v9944_v45  ;;  %v9948_v45 = vld [vmem:[%s20212_s3 + $0x850] sm:$0xff]  ;;  %v9949_v27 = vld [vmem:[%s20212_s3 + $0x858] sm:$0xff] }
 0x3fa   :  { %14004 = vmatprep.subr.bf16.mxu0 %v14003_v54 }
 0x3fc   :  { %12875 = vmatmul.mubr.f32.gmra.mrb[28].mxu0 %v17939_v15 }
 0x3fd   :  { %12877 = vmatprep.mubr.f32.mxu0 %v17948_v20  ;;  %14006 = vmatpush3.bf16.msra.mxu0 %v14003_v54  ;;  %v17961_v54 = vld [vmem:[#allocation2 + $0xa0] sm:$0xff] }
 0x3fe   :  { %14008 = vmatprep.subr.bf16.mxu0 %v14007_v18 }
 0x400   :  { %12878 = vmatmul.mubr.f32.gmra.mrb[30].mxu0 %v17951_v28 }
 0x401   :  { %12880 = vmatprep.mubr.f32.mxu0 %v17538_v29  ;;  %14010 = vmatpush3.bf16.msra.mxu0 %v14007_v18  ;;  %v14019_v29 = vpack.c.bf16 %v9949_v27, %v9948_v45  ;;  %v9950_v18 = vld [vmem:[%s20212_s3 + $0x860] sm:$0xff]  ;;  %v9957_v27 = vld [vmem:[%s20212_s3 + $0x898] sm:$0xff] }
 0x402   :  { %14012 = vmatprep.subr.bf16.mxu0 %v14011_v21  ;;  %v14023_v32 = vpack.c.bf16 %v9951_v12, %v9950_v18  ;;  %v17995_v45 = vld [vmem:[#allocation2 + $0x160] sm:$0xff]  ;;  %v9959_v12 = vld [vmem:[%s20212_s3 + $0x8a8] sm:$0xff] }
 0x403   :  { %v9958_v18 = vld [vmem:[%s20212_s3 + $0x8a0] sm:$0xff] }
 0x404   :  { %12881 = vmatmul.mubr.f32.gmra.mrb[32].mxu0 %v17961_v54 }
 0x405   :  { %12883 = vmatprep.mubr.f32.mxu0 %v17547_v55  ;;  %14014 = vmatpush3.bf16.msra.mxu0 %v14011_v21  ;;  %v9952_v55 = vld [vmem:[%s20212_s3 + $0x870] sm:$0xff]  ;;  %v9953_v21 = vld [vmem:[%s20212_s3 + $0x878] sm:$0xff] }
 0x406   :  { %14016 = vmatprep.subr.bf16.mxu0 %v14015_v1 }
 0x408   :  { %12884 = vmatmul.mubr.f32.gmra.mrb[34].mxu0 %v17556_v61  ;;  %v14027_v61 = vpack.c.bf16 %v9953_v21, %v9952_v55  ;;  %v14039_v55 = vpack.c.bf16 %v9959_v12, %v9958_v18  ;;  %v18016_v21 = vld [vmem:[#allocation2 + $0x61] sm:$0xff]  ;;  %v9964_v12 = vld [vmem:[%s20212_s3 + $0x8d0] sm:$0xff] }
 0x409   :  { %12886 = vmatprep.mubr.f32.mxu0 %v17559_v59  ;;  %14018 = vmatpush3.bf16.msra.mxu0 %v14015_v1  ;;  %v9954_v59 = vld [vmem:[%s20212_s3 + $0x880] sm:$0xff]  ;;  %v9955_v1 = vld [vmem:[%s20212_s3 + $0x888] sm:$0xff] }
 0x40a   :  { %14020 = vmatprep.subr.bf16.mxu0 %v14019_v29 }
 0x40c   :  { %12887 = vmatmul.mubr.f32.gmra.mrb[36].mxu0 %v17568_v26  ;;  %v14031_v26 = vpack.c.bf16 %v9955_v1, %v9954_v59  ;;  %v9961_v59 = vld [vmem:[%s20212_s3 + $0x8b8] sm:$0xff] }
 0x40d   :  { %12889 = vmatprep.mubr.f32.mxu0 %v17571_v0  ;;  %14022 = vmatpush3.bf16.msra.mxu0 %v14019_v29  ;;  %v9956_v0 = vld [vmem:[%s20212_s3 + $0x890] sm:$0xff] }
 0x40e   :  { %14024 = vmatprep.subr.bf16.mxu0 %v14023_v32  ;;  %v5521_v29 = vld [vmem:[#allocation2 + $0x31] sm:$0xff] }
 0x40f   :  { %v18025_v1 = vld [vmem:[#allocation2 + $0x71] sm:$0xff] }
 0x410   :  { %12890 = vmatmul.mubr.f32.gmra.mrb[38].mxu0 %v17580_v2  ;;  %v14035_v2 = vpack.c.bf16 %v9957_v27, %v9956_v0  ;;  %v18028_v0 = vld [vmem:[#allocation2 + $0x81] sm:$0xff] }
 0x411   :  { %12892 = vmatprep.mubr.f32.mxu0 %v17583_v50  ;;  %14026 = vmatpush3.bf16.msra.mxu0 %v14023_v32  ;;  %v18004_v50 = vld [vmem:[#allocation2 + $0x41] sm:$0xff]  ;;  %v18013_v32 = vld [vmem:[#allocation2 + $0x51] sm:$0xff] }
 0x412   :  { %14028 = vmatprep.subr.bf16.mxu0 %v14027_v61  ;;  %v9962_v27 = vld [vmem:[%s20212_s3 + $0x8c0] sm:$0xff] }
 0x414   :  { %12893 = vmatmul.mubr.f32.gmra.mrb[40].mxu0 %v17995_v45 }
 0x415   :  { %14030 = vmatpush3.bf16.msra.mxu0 %v14027_v61  ;;  %12927 = vmatprep.mubr.f32.mxu0 %v5521_v29  ;;  %v9960_v61 = vld [vmem:[%s20212_s3 + $0x8b0] sm:$0xff]  ;;  %v9963_v29 = vld [vmem:[%s20212_s3 + $0x8c8] sm:$0xff] }
 0x416   :  { %14032 = vmatprep.subr.bf16.mxu0 %v14031_v26  ;;  %v14047_v18 = vpack.c.bf16 %v9963_v29, %v9962_v27  ;;  %v18064_v29 = vld [vmem:[#allocation2 + $0x141] sm:$0xff] }
 0x418   :  { %12928 = vmatmul.mubr.f32.vlgmr.msra.gmra.mrb[26].mxu0 %v18004_v50 }
 0x419   :  { %12930 = vmatprep.mubr.f32.mxu0 %v18013_v32  ;;  %14034 = vmatpush3.bf16.msra.mxu0 %v14031_v26  ;;  %v14043_v26 = vpack.c.bf16 %v9961_v59, %v9960_v61  ;;  %v9965_v61 = vld [vmem:[%s20212_s3 + $0x8d8] sm:$0xff]  ;;  %v9967_v59 = vld [vmem:[%s20212_s3 + $0x8e8] sm:$0xff] }
 0x41a   :  { %14036 = vmatprep.subr.bf16.mxu0 %v14035_v2 }
 0x41c   :  { %12931 = vmatmul.mubr.f32.gmra.mrb[28].mxu0 %v18016_v21 }
 0x41d   :  { %12933 = vmatprep.mubr.f32.mxu0 %v18025_v1  ;;  %14038 = vmatpush3.bf16.msra.mxu0 %v14035_v2  ;;  %v18038_v2 = vld [vmem:[#allocation2 + $0xa1] sm:$0xff] }
 0x41e   :  { %14040 = vmatprep.subr.bf16.mxu0 %v14039_v55 }
 0x420   :  { %12934 = vmatmul.mubr.f32.gmra.mrb[30].mxu0 %v18028_v0 }
 0x421   :  { %12936 = vmatprep.mubr.f32.mxu0 %v17617_v4  ;;  %14042 = vmatpush3.bf16.msra.mxu0 %v14039_v55  ;;  %v14051_v4 = vpack.c.bf16 %v9965_v61, %v9964_v12  ;;  %v9966_v55 = vld [vmem:[%s20212_s3 + $0x8e0] sm:$0xff]  ;;  %v9972_v12 = vld [vmem:[%s20212_s3 + $0x910] sm:$0xff]  ;;  %v9973_v61 = vld [vmem:[%s20212_s3 + $0x918] sm:$0xff] }
 0x422   :  { %14044 = vmatprep.subr.bf16.mxu0 %v14043_v26  ;;  %v14055_v27 = vpack.c.bf16 %v9967_v59, %v9966_v55  ;;  %v9975_v55 = vld [vmem:[%s20212_s3 + $0x928] sm:$0xff] }
 0x424   :  { %12937 = vmatmul.mubr.f32.gmra.mrb[32].mxu0 %v18038_v2 }
 0x425   :  { %12939 = vmatprep.mubr.f32.mxu0 %v17626_v22  ;;  %14046 = vmatpush3.bf16.msra.mxu0 %v14043_v26  ;;  %v9968_v22 = vld [vmem:[%s20212_s3 + $0x8f0] sm:$0xff]  ;;  %v9969_v26 = vld [vmem:[%s20212_s3 + $0x8f8] sm:$0xff] }
 0x426   :  { %14048 = vmatprep.subr.bf16.mxu0 %v14047_v18 }
 0x428   :  { %12940 = vmatmul.mubr.f32.gmra.mrb[34].mxu0 %v17635_v16  ;;  %v14059_v16 = vpack.c.bf16 %v9969_v26, %v9968_v22  ;;  %v18100_v22 = vld [vmem:[#allocation2 + $0x82] sm:$0xff] }
 0x429   :  { %12942 = vmatprep.mubr.f32.mxu0 %v17638_v52  ;;  %14050 = vmatpush3.bf16.msra.mxu0 %v14047_v18  ;;  %v9970_v52 = vld [vmem:[%s20212_s3 + $0x900] sm:$0xff]  ;;  %v9971_v18 = vld [vmem:[%s20212_s3 + $0x908] sm:$0xff] }
 0x42a   :  { %14052 = vmatprep.subr.bf16.mxu0 %v14051_v4  ;;  %v9979_v26 = vld [vmem:[%s20212_s3 + $0x948] sm:$0xff] }
 0x42c   :  { %12943 = vmatmul.mubr.f32.gmra.mrb[36].mxu0 %v17647_v25  ;;  %v14063_v25 = vpack.c.bf16 %v9971_v18, %v9970_v52  ;;  %v9981_v52 = vld [vmem:[%s20212_s3 + $0x958] sm:$0xff]  ;;  %v9982_v18 = vld [vmem:[%s20212_s3 + $0x960] sm:$0xff] }
 0x42d   :  { %12945 = vmatprep.mubr.f32.mxu0 %v17650_v39  ;;  %14054 = vmatpush3.bf16.msra.mxu0 %v14051_v4  ;;  %v18074_v39 = vld [vmem:[#allocation2 + $0x161] sm:$0xff] }
 0x42e   :  { %14056 = vmatprep.subr.bf16.mxu0 %v14055_v27  ;;  %v9974_v4 = vld [vmem:[%s20212_s3 + $0x920] sm:$0xff] }
 0x42f   :  { %v14071_v59 = vpack.c.bf16 %v9975_v55, %v9974_v4  ;;  %v9987_v4 = vld [vmem:[%s20212_s3 + $0x988] sm:$0xff]  ;;  %v9988_v55 = vld [vmem:[%s20212_s3 + $0x990] sm:$0xff] }
 0x430   :  { %12946 = vmatmul.mubr.f32.gmra.mrb[38].mxu0 %v18064_v29 }
 0x431   :  { %12948 = vmatprep.mubr.f32.mxu0 %v17660_v24  ;;  %14058 = vmatpush3.bf16.msra.mxu0 %v14055_v27  ;;  %v14067_v24 = vpack.c.bf16 %v9973_v61, %v9972_v12  ;;  %v9977_v27 = vld [vmem:[%s20212_s3 + $0x938] sm:$0xff] }
 0x432   :  { %14060 = vmatprep.subr.bf16.mxu0 %v14059_v16  ;;  %v9985_v61 = vld [vmem:[%s20212_s3 + $0x978] sm:$0xff] }
 0x434   :  { %12949 = vmatmul.mubr.f32.gmra.mrb[40].mxu0 %v18074_v39 }
 0x435   :  { %14062 = vmatpush3.bf16.msra.mxu0 %v14059_v16  ;;  %12983 = vmatprep.mubr.f32.mxu0 %v17669_v33  ;;  %v9976_v33 = vld [vmem:[%s20212_s3 + $0x930] sm:$0xff] }
 0x436   :  { %14064 = vmatprep.subr.bf16.mxu0 %v14063_v25  ;;  %v9980_v16 = vld [vmem:[%s20212_s3 + $0x950] sm:$0xff] }
 0x438   :  { %12984 = vmatmul.mubr.f32.vlgmr.msra.gmra.mrb[26].mxu0 %v17678_v6  ;;  %v14075_v6 = vpack.c.bf16 %v9977_v27, %v9976_v33  ;;  %v9990_v33 = vld [vmem:[%s20212_s3 + $0x9a0] sm:$0xff]  ;;  %v9991_v27 = vld [vmem:[%s20212_s3 + $0x9a8] sm:$0xff] }
 0x439   :  { %12986 = vmatprep.mubr.f32.mxu0 %v17681_v60  ;;  %14066 = vmatpush3.bf16.msra.mxu0 %v14063_v25  ;;  %v9978_v60 = vld [vmem:[%s20212_s3 + $0x940] sm:$0xff]  ;;  %v9983_v25 = vld [vmem:[%s20212_s3 + $0x968] sm:$0xff] }
 0x43a   :  { %14068 = vmatprep.subr.bf16.mxu0 %v14067_v24  ;;  %v14087_v12 = vpack.c.bf16 %v9983_v25, %v9982_v18  ;;  %v9999_v18 = vld [vmem:[%s20212_s3 + $0x9e8] sm:$0xff] }
 0x43c   :  { %12987 = vmatmul.mubr.f32.gmra.mrb[28].mxu0 %v17690_v14  ;;  %v14079_v14 = vpack.c.bf16 %v9979_v26, %v9978_v60  ;;  %v9993_v60 = vld [vmem:[%s20212_s3 + $0x9b8] sm:$0xff]  ;;  %v18172_v26 = vld [vmem:[#allocation2 + $0x83] sm:$0xff] }
 0x43d   :  { %12989 = vmatprep.mubr.f32.mxu0 %v17693_v30  ;;  %14070 = vmatpush3.bf16.msra.mxu0 %v14067_v24  ;;  %v18110_v30 = vld [vmem:[#allocation2 + $0xa2] sm:$0xff] }
 0x43e   :  { %14072 = vmatprep.subr.bf16.mxu0 %v14071_v59  ;;  %v18136_v24 = vld [vmem:[#allocation2 + $0x142] sm:$0xff] }
 0x440   :  { %12990 = vmatmul.mubr.f32.gmra.mrb[30].mxu0 %v18100_v22 }
 0x441   :  { %12992 = vmatprep.mubr.f32.mxu0 %v17703_v53  ;;  %14074 = vmatpush3.bf16.msra.mxu0 %v14071_v59  ;;  %v14083_v53 = vpack.c.bf16 %v9981_v52, %v9980_v16  ;;  %v9989_v59 = vld [vmem:[%s20212_s3 + $0x998] sm:$0xff]  ;;  %v9996_v16 = vld [vmem:[%s20212_s3 + $0x9d0] sm:$0xff] }
 0x442   :  { %14076 = vmatprep.subr.bf16.mxu0 %v14075_v6  ;;  %v9997_v52 = vld [vmem:[%s20212_s3 + $0x9d8] sm:$0xff] }
 0x444   :  { %12993 = vmatmul.mubr.f32.gmra.mrb[32].mxu0 %v18110_v30 }
 0x445   :  { %12995 = vmatprep.mubr.f32.mxu0 %v17712_v3  ;;  %14078 = vmatpush3.bf16.msra.mxu0 %v14075_v6  ;;  %v9984_v3 = vld [vmem:[%s20212_s3 + $0x970] sm:$0xff]  ;;  %v14103_v6 = vpack.c.bf16 %v9991_v27, %v9990_v33  ;;  %v10011_v33 = vld [vmem:[%s20212_s3 + $0xa48] sm:$0xff] }
 0x446   :  { %14080 = vmatprep.subr.bf16.mxu0 %v14079_v14  ;;  %v10012_v27 = vld [vmem:[%s20212_s3 + $0xa50] sm:$0xff] }
 0x448   :  { %12996 = vmatmul.mubr.f32.gmra.mrb[34].mxu0 %v17721_v41  ;;  %v14091_v41 = vpack.c.bf16 %v9985_v61, %v9984_v3  ;;  %v18208_v3 = vld [vmem:[#allocation2 + $0x143] sm:$0xff] }
 0x449   :  { %12998 = vmatprep.mubr.f32.mxu0 %v17724_v23  ;;  %14082 = vmatpush3.bf16.msra.mxu0 %v14079_v14  ;;  %v9986_v23 = vld [vmem:[%s20212_s3 + $0x980] sm:$0xff]  ;;  %v9995_v14 = vld [vmem:[%s20212_s3 + $0x9c8] sm:$0xff] }
 0x44a   :  { %14084 = vmatprep.subr.bf16.mxu0 %v14083_v53  ;;  %v10003_v61 = vld [vmem:[%s20212_s3 + $0xa08] sm:$0xff] }
 0x44c   :  { %12999 = vmatmul.mubr.f32.gmra.mrb[36].mxu0 %v17733_v13  ;;  %v14095_v13 = vpack.c.bf16 %v9987_v4, %v9986_v23  ;;  %v10005_v23 = vld [vmem:[%s20212_s3 + $0xa18] sm:$0xff]  ;;  %v10006_v4 = vld [vmem:[%s20212_s3 + $0xa20] sm:$0xff] }
 0x44d   :  { %13001 = vmatprep.mubr.f32.mxu0 %v17736_v5  ;;  %14086 = vmatpush3.bf16.msra.mxu0 %v14083_v53  ;;  %v18146_v5 = vld [vmem:[#allocation2 + $0x162] sm:$0xff] }
 0x44e   :  { %14088 = vmatprep.subr.bf16.mxu0 %v14087_v12  ;;  %v9998_v53 = vld [vmem:[%s20212_s3 + $0x9e0] sm:$0xff] }
 0x44f   :  { %v14119_v25 = vpack.c.bf16 %v9999_v18, %v9998_v53  ;;  %v10023_v53 = vld [vmem:[%s20212_s3 + $0xaa8] sm:$0xff] }
 0x450   :  { %13002 = vmatmul.mubr.f32.gmra.mrb[38].mxu0 %v18136_v24 }
 0x451   :  { %13004 = vmatprep.mubr.f32.mxu0 %v17746_v46  ;;  %14090 = vmatpush3.bf16.msra.mxu0 %v14087_v12  ;;  %v14099_v46 = vpack.c.bf16 %v9989_v59, %v9988_v55  ;;  %v10001_v12 = vld [vmem:[%s20212_s3 + $0x9f8] sm:$0xff] }
 0x452   :  { %14092 = vmatprep.subr.bf16.mxu0 %v14091_v41  ;;  %v10009_v59 = vld [vmem:[%s20212_s3 + $0xa38] sm:$0xff] }
 0x454   :  { %13005 = vmatmul.mubr.f32.gmra.mrb[40].mxu0 %v18146_v5 }
 0x455   :  { %14094 = vmatpush3.bf16.msra.mxu0 %v14091_v41  ;;  %13039 = vmatprep.mubr.f32.mxu0 %v17755_v63  ;;  %v9992_v63 = vld [vmem:[%s20212_s3 + $0x9b0] sm:$0xff] }
 0x456   :  { %14096 = vmatprep.subr.bf16.mxu0 %v14095_v13  ;;  %v10004_v41 = vld [vmem:[%s20212_s3 + $0xa10] sm:$0xff] }
 0x458   :  { %13040 = vmatmul.mubr.f32.vlgmr.msra.gmra.mrb[26].mxu0 %v17764_v11  ;;  %v14107_v11 = vpack.c.bf16 %v9993_v60, %v9992_v63  ;;  %v10014_v63 = vld [vmem:[%s20212_s3 + $0xa60] sm:$0xff]  ;;  %v10015_v60 = vld [vmem:[%s20212_s3 + $0xa68] sm:$0xff] }
 0x459   :  { %13042 = vmatprep.mubr.f32.mxu0 %v17767_v62  ;;  %14098 = vmatpush3.bf16.msra.mxu0 %v14095_v13  ;;  %v9994_v62 = vld [vmem:[%s20212_s3 + $0x9c0] sm:$0xff]  ;;  %v10007_v13 = vld [vmem:[%s20212_s3 + $0xa28] sm:$0xff] }
 0x45a   :  { %14100 = vmatprep.subr.bf16.mxu0 %v14099_v46  ;;  %v14135_v55 = vpack.c.bf16 %v10007_v13, %v10006_v4  ;;  %v6308_v13 = vld [vmem:[#allocation2 + $0x130] sm:$0xff] }
 0x45c   :  { %13043 = vmatmul.mubr.f32.gmra.mrb[28].mxu0 %v17776_v34  ;;  %v14111_v34 = vpack.c.bf16 %v9995_v14, %v9994_v62  ;;  %v10017_v62 = vld [vmem:[%s20212_s3 + $0xa78] sm:$0xff]  ;;  %v18280_v14 = vld [vmem:[#allocation2 + $0x144] sm:$0xff] }
 0x45d   :  { %13045 = vmatprep.mubr.f32.mxu0 %v17779_v43  ;;  %14102 = vmatpush3.bf16.msra.mxu0 %v14099_v46  ;;  %v18182_v43 = vld [vmem:[#allocation2 + $0xa3] sm:$0xff] }
 0x45e   :  { %14104 = vmatprep.subr.bf16.mxu0 %v14103_v6  ;;  %v18244_v46 = vld [vmem:[#allocation2 + $0x84] sm:$0xff] }
 0x460   :  { %13046 = vmatmul.mubr.f32.gmra.mrb[30].mxu0 %v18172_v26 }
 0x461   :  { %13048 = vmatprep.mubr.f32.mxu0 %v17789_v38  ;;  %14106 = vmatpush3.bf16.msra.mxu0 %v14103_v6  ;;  %v14115_v38 = vpack.c.bf16 %v9997_v52, %v9996_v16  ;;  %v10013_v6 = vld [vmem:[%s20212_s3 + $0xa58] sm:$0xff]  ;;  %v10020_v16 = vld [vmem:[%s20212_s3 + $0xa90] sm:$0xff] }
 0x462   :  { %14108 = vmatprep.subr.bf16.mxu0 %v14107_v11  ;;  %v10021_v52 = vld [vmem:[%s20212_s3 + $0xa98] sm:$0xff] }
 0x464   :  { %13049 = vmatmul.mubr.f32.gmra.mrb[32].mxu0 %v18182_v43 }
 0x465   :  { %13051 = vmatprep.mubr.f32.mxu0 %v17798_v57  ;;  %14110 = vmatpush3.bf16.msra.mxu0 %v14107_v11  ;;  %v10000_v57 = vld [vmem:[%s20212_s3 + $0x9f0] sm:$0xff]  ;;  %v14151_v11 = vpack.c.bf16 %v10015_v60, %v10014_v63  ;;  %v10037_v63 = vld [vmem:[%s20212_s3 + $0xb18] sm:$0xff]  ;;  %v10084_v60 = vld [vmem:[%s20214_s5 + $0x108] sm:$0xff] }
 0x466   :  { %14112 = vmatprep.subr.bf16.mxu0 %v14111_v34 }
 0x468   :  { %13052 = vmatmul.mubr.f32.gmra.mrb[34].mxu0 %v17807_v8  ;;  %v14123_v8 = vpack.c.bf16 %v10001_v12, %v10000_v57  ;;  %v6302_v57 = vld [vmem:[#allocation2 + $0x90] sm:$0xff]  ;;  %v10027_v12 = vld [vmem:[%s20212_s3 + $0xac8] sm:$0xff] }
 0x469   :  { %13054 = vmatprep.mubr.f32.mxu0 %v17810_v49  ;;  %14114 = vmatpush3.bf16.msra.mxu0 %v14111_v34  ;;  %v10002_v49 = vld [vmem:[%s20212_s3 + $0xa00] sm:$0xff]  ;;  %v10019_v34 = vld [vmem:[%s20212_s3 + $0xa88] sm:$0xff] }
 0x46a   :  { %14116 = vmatprep.subr.bf16.mxu0 %v14115_v38 }
 0x46c   :  { %13055 = vmatmul.mubr.f32.gmra.mrb[36].mxu0 %v17819_v31  ;;  %v14127_v31 = vpack.c.bf16 %v10003_v61, %v10002_v49  ;;  %v10029_v49 = vld [vmem:[%s20212_s3 + $0xad8] sm:$0xff]  ;;  %v6305_v61 = vld [vmem:[#allocation2 + $0x100] sm:$0xff] }
 0x46d   :  { %13057 = vmatprep.mubr.f32.mxu0 %v17822_v44  ;;  %14118 = vmatpush3.bf16.msra.mxu0 %v14115_v38  ;;  %v18218_v44 = vld [vmem:[#allocation2 + $0x163] sm:$0xff] }
 0x46e   :  { %14120 = vmatprep.subr.bf16.mxu0 %v14119_v25  ;;  %v10022_v38 = vld [vmem:[%s20212_s3 + $0xaa0] sm:$0xff] }
 0x46f   :  { %v14167_v18 = vpack.c.bf16 %v10023_v53, %v10022_v38  ;;  %v10039_v38 = vld [vmem:[%s20212_s3 + $0xb28] sm:$0xff] }
 0x470   :  { %13058 = vmatmul.mubr.f32.gmra.mrb[38].mxu0 %v18208_v3  ;;  %v10092_v53 = vld [vmem:[%s20214_s5 + $0x148] sm:$0xff] }
 0x471   :  { %13060 = vmatprep.mubr.f32.mxu0 %v17832_v37  ;;  %14122 = vmatpush3.bf16.msra.mxu0 %v14119_v25  ;;  %v14131_v37 = vpack.c.bf16 %v10005_v23, %v10004_v41  ;;  %v10025_v25 = vld [vmem:[%s20212_s3 + $0xab8] sm:$0xff]  ;;  %v6306_v41 = vld [vmem:[#allocation2 + $0x110] sm:$0xff]  ;;  %v10031_v23 = vld [vmem:[%s20212_s3 + $0xae8] sm:$0xff] }
 0x472   :  { %14124 = vmatprep.subr.bf16.mxu0 %v14123_v8 }
 0x474   :  { %13061 = vmatmul.mubr.f32.gmra.mrb[40].mxu0 %v18218_v44 }
 0x475   :  { %14126 = vmatpush3.bf16.msra.mxu0 %v14123_v8  ;;  %13095 = vmatprep.mubr.f32.mxu0 %v17841_v17  ;;  %v10008_v17 = vld [vmem:[%s20212_s3 + $0xa30] sm:$0xff] }
 0x476   :  { %14128 = vmatprep.subr.bf16.mxu0 %v14127_v31  ;;  %v6304_v8 = vld [vmem:[#allocation2 + $0xb0] sm:$0xff] }
 0x478   :  { %13096 = vmatmul.mubr.f32.vlgmr.msra.gmra.mrb[26].mxu0 %v17850_v51  ;;  %v14139_v51 = vpack.c.bf16 %v10009_v59, %v10008_v17  ;;  %v10033_v17 = vld [vmem:[%s20212_s3 + $0xaf8] sm:$0xff]  ;;  %v6309_v59 = vld [vmem:[#allocation2 + $0x140] sm:$0xff] }
 0x479   :  { %13098 = vmatprep.mubr.f32.mxu0 %v17853_v9  ;;  %14130 = vmatpush3.bf16.msra.mxu0 %v14127_v31  ;;  %v10010_v9 = vld [vmem:[%s20212_s3 + $0xa40] sm:$0xff] }
 0x47a   :  { %14132 = vmatprep.subr.bf16.mxu0 %v14131_v37 }
 0x47c   :  { %13099 = vmatmul.mubr.f32.gmra.mrb[28].mxu0 %v17862_v56  ;;  %v14143_v56 = vpack.c.bf16 %v10011_v33, %v10010_v9  ;;  %v6310_v9 = vld [vmem:[#allocation2 + $0x150] sm:$0xff]  ;;  %v10034_v33 = vld [vmem:[%s20212_s3 + $0xb00] sm:$0xff] }
 0x47d   :  { %13101 = vmatprep.mubr.f32.mxu0 %v17865_v40  ;;  %14134 = vmatpush3.bf16.msra.mxu0 %v14131_v37  ;;  %v18254_v40 = vld [vmem:[#allocation2 + $0xa4] sm:$0xff] }
 0x47e   :  { %14136 = vmatprep.subr.bf16.mxu0 %v14135_v55  ;;  %v6307_v37 = vld [vmem:[#allocation2 + $0x120] sm:$0xff] }
 0x480   :  { %13102 = vmatmul.mubr.f32.gmra.mrb[30].mxu0 %v18244_v46 }
 0x481   :  { %13104 = vmatprep.mubr.f32.mxu0 %v17875_v7  ;;  %14138 = vmatpush3.bf16.msra.mxu0 %v14135_v55  ;;  %v14147_v7 = vpack.c.bf16 %v10013_v6, %v10012_v27  ;;  %v10032_v55 = vld [vmem:[%s20212_s3 + $0xaf0] sm:$0xff] }
 0x482   :  { %14140 = vmatprep.subr.bf16.mxu0 %v14139_v51  ;;  %v6312_v6 = vld [vmem:[#allocation2 + $0x170] sm:$0xff] }
 0x484   :  { %13105 = vmatmul.mubr.f32.gmra.mrb[32].mxu0 %v18254_v40 }
 0x485   :  { %13107 = vmatprep.mubr.f32.mxu0 %v17884_v36  ;;  %14142 = vmatpush3.bf16.msra.mxu0 %v14139_v51  ;;  %v10016_v36 = vld [vmem:[%s20212_s3 + $0xa70] sm:$0xff]  ;;  %v14187_v51 = vpack.c.bf16 %v10033_v17, %v10032_v55 }
 0x486   :  { %14144 = vmatprep.subr.bf16.mxu0 %v14143_v56 }
 0x488   :  { %13108 = vmatmul.mubr.f32.gmra.mrb[34].mxu0 %v17893_v42  ;;  %v14155_v42 = vpack.c.bf16 %v10017_v62, %v10016_v36  ;;  %v10085_v62 = vld [vmem:[%s20214_s5 + $0x110] sm:$0xff] }
 0x489   :  { %13110 = vmatprep.mubr.f32.mxu0 %v17896_v58  ;;  %14146 = vmatpush3.bf16.msra.mxu0 %v14143_v56  ;;  %v10018_v58 = vld [vmem:[%s20212_s3 + $0xa80] sm:$0xff]  ;;  %v10035_v56 = vld [vmem:[%s20212_s3 + $0xb08] sm:$0xff] }
 0x48a   :  { %14148 = vmatprep.subr.bf16.mxu0 %v14147_v7  ;;  %v14191_v27 = vpack.c.bf16 %v10035_v56, %v10034_v33 }
 0x48c   :  { %13111 = vmatmul.mubr.f32.gmra.mrb[36].mxu0 %v17905_v19  ;;  %v14159_v19 = vpack.c.bf16 %v10019_v34, %v10018_v58  ;;  %v10090_v58 = vld [vmem:[%s20214_s5 + $0x138] sm:$0xff] }
 0x48d   :  { %13113 = vmatprep.mubr.f32.mxu0 %v17908_v47  ;;  %14150 = vmatpush3.bf16.msra.mxu0 %v14147_v7  ;;  %v18290_v47 = vld [vmem:[#allocation2 + $0x164] sm:$0xff]  ;;  %v10036_v7 = vld [vmem:[%s20212_s3 + $0xb10] sm:$0xff] }
 0x48e   :  { %14152 = vmatprep.subr.bf16.mxu0 %v14151_v11  ;;  %v14195_v34 = vpack.c.bf16 %v10037_v63, %v10036_v7  ;;  %v10047_v7 = vld [vmem:[%s20212_s3 + $0xb68] sm:$0xff] }
 0x48f   :  { %v6501_v63 = vld [vmem:[#allocation2 + $0x121] sm:$0xff] }
 0x490   :  { %13114 = vmatmul.mubr.f32.gmra.mrb[38].mxu0 %v18280_v14 }
 0x491   :  { %13116 = vmatprep.mubr.f32.mxu0 %v17918_v35  ;;  %14154 = vmatpush3.bf16.msra.mxu0 %v14151_v11  ;;  %v14163_v35 = vpack.c.bf16 %v10021_v52, %v10020_v16  ;;  %v10083_v11 = vld [vmem:[%s20214_s5 + $0x100] sm:$0xff] }
 0x492   :  { %14156 = vmatprep.subr.bf16.mxu0 %v14155_v42  ;;  %v10087_v52 = vld [vmem:[%s20214_s5 + $0x120] sm:$0xff] }
 0x494   :  { %13117 = vmatmul.mubr.f32.gmra.mrb[40].mxu0 %v18290_v47 }
 0x495   :  { %14158 = vmatpush3.bf16.msra.mxu0 %v14155_v42  ;;  %13151 = vmatprep.mubr.f32.mxu0 %v17927_v10  ;;  %v10024_v10 = vld [vmem:[%s20212_s3 + $0xab0] sm:$0xff]  ;;  %v10088_v42 = vld [vmem:[%s20214_s5 + $0x128] sm:$0xff] }
 0x496   :  { %14160 = vmatprep.subr.bf16.mxu0 %v14159_v19  ;;  %v14291_v16 = vpack.c.bf16 %v10090_v58, %v10088_v42  ;;  %v6504_v42 = vld [vmem:[#allocation2 + $0x151] sm:$0xff]  ;;  %v10050_v58 = vld [vmem:[%s20212_s3 + $0xb80] sm:$0xff] }
 0x498   :  { %13152 = vmatmul.mubr.f32.vlgmr.msra.gmra.mrb[26].mxu0 %v17936_v48  ;;  %v14171_v48 = vpack.c.bf16 %v10025_v25, %v10024_v10  ;;  %v10091_v25 = vld [vmem:[%s20214_s5 + $0x140] sm:$0xff] }
 0x499   :  { %13154 = vmatprep.mubr.f32.mxu0 %v17939_v15  ;;  %14162 = vmatpush3.bf16.msra.mxu0 %v14159_v19  ;;  %v10026_v15 = vld [vmem:[%s20212_s3 + $0xac0] sm:$0xff] }
 0x49a   :  { %14164 = vmatprep.subr.bf16.mxu0 %v14163_v35  ;;  %v10038_v19 = vld [vmem:[%s20212_s3 + $0xb20] sm:$0xff] }
 0x49c   :  { %13155 = vmatmul.mubr.f32.gmra.mrb[28].mxu0 %v17948_v20  ;;  %v14175_v20 = vpack.c.bf16 %v10027_v12, %v10026_v15  ;;  %v10040_v15 = vld [vmem:[%s20212_s3 + $0xb30] sm:$0xff]  ;;  %v10096_v12 = vld [vmem:[%s20214_s5 + $0x168] sm:$0xff] }
 0x49d   :  { %13157 = vmatprep.mubr.f32.mxu0 %v17951_v28  ;;  %14166 = vmatpush3.bf16.msra.mxu0 %v14163_v35  ;;  %v10028_v28 = vld [vmem:[%s20212_s3 + $0xad0] sm:$0xff] }
 0x49e   :  { %14168 = vmatprep.subr.bf16.mxu0 %v14167_v18  ;;  %v14179_v31 = vpack.c.bf16 %v10029_v49, %v10028_v28  ;;  %v10089_v35 = vld [vmem:[%s20214_s5 + $0x130] sm:$0xff]  ;;  %v10095_v28 = vld [vmem:[%s20214_s5 + $0x160] sm:$0xff] }
 0x49f   :  { %v14293_v10 = vpack.c.bf16 %v10089_v35, %v10087_v52  ;;  %v10097_v49 = vld [vmem:[%s20214_s5 + $0x170] sm:$0xff]  ;;  %v6685_v52 = vld [vmem:[#allocation2 + $0x42] sm:$0xff] }
 0x4a0   :  { %13158 = vmatmul.mubr.f32.gmra.mrb[30].mxu0 %v6302_v57  ;;  %v14199_v57 = vpack.c.bf16 %v10039_v38, %v10038_v19  ;;  %v6686_v38 = vld [vmem:[#allocation2 + $0x52] sm:$0xff] }
 0x4a1   :  { %13160 = vmatprep.mubr.f32.mxu0 %v17961_v54  ;;  %14170 = vmatpush3.bf16.msra.mxu0 %v14167_v18  ;;  %v10030_v54 = vld [vmem:[%s20212_s3 + $0xae0] sm:$0xff]  ;;  %v10094_v18 = vld [vmem:[%s20214_s5 + $0x158] sm:$0xff] }
 0x4a2   :  { %14172 = vmatprep.subr.bf16.mxu0 %v14171_v48  ;;  %v14183_v4 = vpack.c.bf16 %v10031_v23, %v10030_v54  ;;  %v10100_v54 = vld [vmem:[%s20214_s5 + $0x188] sm:$0xff]  ;;  %v10102_v23 = vld [vmem:[%s20214_s5 + $0x198] sm:$0xff] }
 0x4a3   :  { %v14303_v17 = vpack.c.bf16 %v10102_v23, %v10100_v54  ;;  %v6696_v54 = vld [vmem:[#allocation2 + $0x132] sm:$0xff] }
 0x4a4   :  { %13161 = vmatmul.mubr.f32.gmra.mrb[32].mxu0 %v6304_v8  ;;  %v10064_v23 = vld [vmem:[%s20212_s3 + $0xbf0] sm:$0xff] }
 0x4a5   :  { %13163 = vmatprep.mubr.f32.mxu0 %v6305_v61  ;;  %14174 = vmatpush3.bf16.msra.mxu0 %v14171_v48  ;;  %v10093_v48 = vld [vmem:[%s20214_s5 + $0x150] sm:$0xff] }
 0x4a6   :  { %14176 = vmatprep.subr.bf16.mxu0 %v14175_v20  ;;  %v14297_v8 = vpack.c.bf16 %v10093_v48, %v10091_v25  ;;  %v6496_v61 = vld [vmem:[#allocation2 + $0x91] sm:$0xff] }
 0x4a7   :  { %v6688_v25 = vld [vmem:[#allocation2 + $0x72] sm:$0xff] }
 0x4a8   :  { %13164 = vmatmul.mubr.f32.gmra.mrb[34].mxu0 %v6306_v41  ;;  %v10056_v48 = vld [vmem:[%s20212_s3 + $0xbb0] sm:$0xff] }
 0x4a9   :  { %13166 = vmatprep.mubr.f32.mxu0 %v6307_v37  ;;  %14178 = vmatpush3.bf16.msra.mxu0 %v14175_v20  ;;  %v10098_v20 = vld [vmem:[%s20214_s5 + $0x178] sm:$0xff]  ;;  %v14301_v37 = vpack.c.bf16 %v10097_v49, %v10095_v28  ;;  %v6693_v49 = vld [vmem:[#allocation2 + $0x102] sm:$0xff] }
 0x4aa   :  { %14180 = vmatprep.subr.bf16.mxu0 %v14179_v31  ;;  %v14299_v41 = vpack.c.bf16 %v10098_v20, %v10096_v12  ;;  %v10059_v12 = vld [vmem:[%s20212_s3 + $0xbc8] sm:$0xff]  ;;  %v10061_v28 = vld [vmem:[%s20212_s3 + $0xbd8] sm:$0xff] }
 0x4ac   :  { %13167 = vmatmul.mubr.f32.gmra.mrb[36].mxu0 %v6308_v13  ;;  %v10101_v13 = vld [vmem:[%s20214_s5 + $0x190] sm:$0xff] }
 0x4ad   :  { %13169 = vmatprep.mubr.f32.mxu0 %v6309_v59  ;;  %14182 = vmatpush3.bf16.msra.mxu0 %v14179_v31  ;;  %v6498_v59 = vld [vmem:[#allocation2 + $0xb1] sm:$0xff] }
 0x4ae   :  { %14184 = vmatprep.subr.bf16.mxu0 %v14183_v4 }
 0x4b0   :  { %13170 = vmatmul.mubr.f32.gmra.mrb[38].mxu0 %v6310_v9  ;;  %v6499_v9 = vld [vmem:[#allocation2 + $0x101] sm:$0xff] }
 0x4b1   :  { %13172 = vmatprep.mubr.f32.mxu0 %v17995_v45  ;;  %14186 = vmatpush3.bf16.msra.mxu0 %v14183_v4  ;;  %v10086_v45 = vld [vmem:[%s20214_s5 + $0x118] sm:$0xff]  ;;  %v10099_v4 = vld [vmem:[%s20214_s5 + $0x180] sm:$0xff] }
 0x4b2   :  { %14188 = vmatprep.subr.bf16.mxu0 %v14187_v51  ;;  %v14287_v36 = vpack.c.bf16 %v10086_v45, %v10084_v60  ;;  %v14305_v33 = vpack.c.bf16 %v10101_v13, %v10099_v4  ;;  %v6502_v45 = vld [vmem:[#allocation2 + $0x131] sm:$0xff] }
 0x4b3   :  { %v6698_v13 = vld [vmem:[#allocation2 + $0x152] sm:$0xff] }
 0x4b4   :  { %13173 = vmatmul.mubr.f32.gmra.mrb[40].mxu0 %v6312_v6  ;;  %14288 = vmatprep.subr.bf16.mxu1 %v14287_v36  ;;  %v10046_v6 = vld [vmem:[%s20212_s3 + $0xb60] sm:$0xff]  ;;  %v10049_v36 = vld [vmem:[%s20212_s3 + $0xb78] sm:$0xff] }
 0x4b5   :  { %14190 = vmatpush3.bf16.msra.mxu0 %v14187_v51  ;;  %13207 = vmatprep.mubr.f32.mxu0 %v18004_v50  ;;  %v14289_v50 = vpack.c.bf16 %v10085_v62, %v10083_v11  ;;  %v10044_v51 = vld [vmem:[%s20212_s3 + $0xb50] sm:$0xff]  ;;  %v14215_v60 = vpack.c.bf16 %v10047_v7, %v10046_v6  ;;  %v6881_v6 = vld [vmem:[#allocation2 + $0x63] sm:$0xff] }
 0x4b6   :  { %14192 = vmatprep.subr.bf16.mxu0 %v14191_v27  ;;  %v10048_v11 = vld [vmem:[%s20212_s3 + $0xb70] sm:$0xff] }
 0x4b7   :  { %14290 = vmatpush1.bf16.msra.mxu1 %v14289_v50  ;;  %v14219_v62 = vpack.c.bf16 %v10049_v36, %v10048_v11  ;;  %v6506_v50 = vld [vmem:[#allocation2 + $0x171] sm:$0xff] }
 0x4b8   :  { %13208 = vmatmul.mubr.f32.vlgmr.msra.gmra.mrb[26].mxu0 %v18013_v32  ;;  %14292 = vmatprep.subr.bf16.mxu1 %v14291_v16  ;;  %v14295_v32 = vpack.c.bf16 %v10094_v18, %v10092_v53  ;;  %v10053_v16 = vld [vmem:[%s20212_s3 + $0xb98] sm:$0xff]  ;;  %v10055_v53 = vld [vmem:[%s20212_s3 + $0xba8] sm:$0xff] }
 0x4b9   :  { %13210 = vmatprep.mubr.f32.mxu0 %v18016_v21  ;;  %14194 = vmatpush3.bf16.msra.mxu0 %v14191_v27  ;;  %v10041_v21 = vld [vmem:[%s20212_s3 + $0xb38] sm:$0xff]  ;;  %v6687_v18 = vld [vmem:[#allocation2 + $0x62] sm:$0xff] }
 0x4ba   :  { %14196 = vmatprep.subr.bf16.mxu0 %v14195_v34  ;;  %v14203_v31 = vpack.c.bf16 %v10041_v21, %v10040_v15  ;;  %v6500_v27 = vld [vmem:[#allocation2 + $0x111] sm:$0xff]  ;;  %v10058_v21 = vld [vmem:[%s20212_s3 + $0xbc0] sm:$0xff] }
 0x4bb   :  { %14294 = vmatpush1.bf16.msra.mxu1 %v14293_v10  ;;  %v14239_v20 = vpack.c.bf16 %v10059_v12, %v10058_v21  ;;  %v6884_v36 = vld [vmem:[#allocation2 + $0x93] sm:$0xff]  ;;  %v7081_v12 = vld [vmem:[#allocation2 + $0x104] sm:$0xff] }
 0x4bc   :  { %13211 = vmatmul.mubr.f32.gmra.mrb[28].mxu0 %v18025_v1  ;;  %v10042_v1 = vld [vmem:[%s20212_s3 + $0xb40] sm:$0xff]  ;;  %14296 = vmatprep.subr.bf16.mxu1 %v14295_v32  ;;  %v6690_v32 = vld [vmem:[#allocation2 + $0x92] sm:$0xff] }
 0x4bd   :  { %13213 = vmatprep.mubr.f32.mxu0 %v18028_v0  ;;  %14198 = vmatpush3.bf16.msra.mxu0 %v14195_v34  ;;  %v10043_v0 = vld [vmem:[%s20212_s3 + $0xb48] sm:$0xff]  ;;  %v7076_v21 = vld [vmem:[#allocation2 + $0x74] sm:$0xff] }
 0x4be   :  { %14200 = vmatprep.subr.bf16.mxu0 %v14199_v57  ;;  %v14207_v55 = vpack.c.bf16 %v10043_v0, %v10042_v1  ;;  %v10051_v34 = vld [vmem:[%s20212_s3 + $0xb88] sm:$0xff] }
 0x4bf   :  { %14298 = vmatpush1.bf16.msra.mxu1 %v14297_v8  ;;  %v14223_v19 = vpack.c.bf16 %v10051_v34, %v10050_v58  ;;  %v6692_v8 = vld [vmem:[#allocation2 + $0xb2] sm:$0xff]  ;;  %v10063_v1 = vld [vmem:[%s20212_s3 + $0xbe8] sm:$0xff] }
 0x4c0   :  { %13214 = vmatmul.mubr.f32.gmra.mrb[30].mxu0 %v6496_v61  ;;  %14300 = vmatprep.subr.bf16.mxu1 %v14299_v41  ;;  %v6695_v41 = vld [vmem:[#allocation2 + $0x122] sm:$0xff]  ;;  %v6886_v34 = vld [vmem:[#allocation2 + $0xb3] sm:$0xff] }
 0x4c1   :  { %13216 = vmatprep.mubr.f32.mxu0 %v18038_v2  ;;  %14202 = vmatpush3.bf16.msra.mxu0 %v14199_v57  ;;  %v10045_v2 = vld [vmem:[%s20212_s3 + $0xb58] sm:$0xff] }
 0x4c2   :  { %14204 = vmatprep.subr.bf16.mxu0 %v14203_v31  ;;  %v14211_v56 = vpack.c.bf16 %v10045_v2, %v10044_v51  ;;  %v10057_v57 = vld [vmem:[%s20212_s3 + $0xbb8] sm:$0xff] }
 0x4c3   :  { %14302 = vmatpush1.bf16.msra.mxu1 %v14301_v37  ;;  %v14235_v15 = vpack.c.bf16 %v10057_v57, %v10056_v48  ;;  %v10065_v37 = vld [vmem:[%s20212_s3 + $0xbf8] sm:$0xff]  ;;  %v7073_v57 = vld [vmem:[#allocation2 + $0x44] sm:$0xff] }
 0x4c4   :  { %13217 = vmatmul.mubr.f32.gmra.mrb[32].mxu0 %v6498_v59  ;;  %14304 = vmatprep.subr.bf16.mxu1 %v14303_v17  ;;  %v14251_v4 = vpack.c.bf16 %v10065_v37, %v10064_v23  ;;  %v10067_v17 = vld [vmem:[%s20212_s3 + $0xc08] sm:$0xff]  ;;  %v6700_v51 = vld [vmem:[#allocation2 + $0x172] sm:$0xff] }
 0x4c5   :  { %13219 = vmatprep.mubr.f32.mxu0 %v6499_v9  ;;  %14206 = vmatpush3.bf16.msra.mxu0 %v14203_v31  ;;  %v6694_v31 = vld [vmem:[#allocation2 + $0x112] sm:$0xff]  ;;  %v6879_v9 = vld [vmem:[#allocation2 + $0x43] sm:$0xff] }
 0x4c6   :  { %14208 = vmatprep.subr.bf16.mxu0 %v14207_v55  ;;  %v10069_v2 = vld [vmem:[%s20212_s3 + $0xc18] sm:$0xff]  ;;  %v10112_v37 = vld [vmem:[%s20214_s5 + $0x1e8] sm:$0xff] }
 0x4c7   :  { %14306 = vmatpush1.bf16.msra.mxu1 %v14305_v33  ;;  %v6894_v48 = vld [vmem:[#allocation2 + $0x173] sm:$0xff] }
 0x4c8   :  { %13220 = vmatmul.mubr.f32.gmra.mrb[34].mxu0 %v6500_v27  ;;  %v10071_v27 = vld [vmem:[%s20212_s3 + $0xc28] sm:$0xff] }
 0x4c9   :  { %13222 = vmatprep.mubr.f32.mxu0 %v6501_v63  ;;  %14210 = vmatpush3.bf16.msra.mxu0 %v14207_v55  ;;  %v10066_v55 = vld [vmem:[%s20212_s3 + $0xc00] sm:$0xff]  ;;  %v6882_v63 = vld [vmem:[#allocation2 + $0x73] sm:$0xff] }
 0x4ca   :  { %14212 = vmatprep.subr.bf16.mxu0 %v14211_v56  ;;  %v14255_v59 = vpack.c.bf16 %v10067_v17, %v10066_v55  ;;  %v10113_v17 = vld [vmem:[%s20214_s5 + $0x1f0] sm:$0xff] }
 0x4cc   :  { %13223 = vmatmul.mubr.f32.gmra.mrb[36].mxu0 %v6502_v45  ;;  %v10073_v45 = vld [vmem:[%s20212_s3 + $0xc38] sm:$0xff] }
 0x4cd   :  { %13225 = vmatprep.mubr.f32.mxu0 %v18064_v29  ;;  %14214 = vmatpush3.bf16.msra.mxu0 %v14211_v56  ;;  %v10052_v29 = vld [vmem:[%s20212_s3 + $0xb90] sm:$0xff] }
 0x4ce   :  { %14216 = vmatprep.subr.bf16.mxu0 %v14215_v60  ;;  %v14227_v35 = vpack.c.bf16 %v10053_v16, %v10052_v29  ;;  %v6880_v56 = vld [vmem:[#allocation2 + $0x53] sm:$0xff] }
 0x4cf   :  { %v6888_v16 = vld [vmem:[#allocation2 + $0x113] sm:$0xff] }
 0x4d0   :  { %13226 = vmatmul.mubr.f32.gmra.mrb[38].mxu0 %v6504_v42  ;;  %v10075_v42 = vld [vmem:[%s20212_s3 + $0xc48] sm:$0xff] }
 0x4d1   :  { %13228 = vmatprep.mubr.f32.mxu0 %v18074_v39  ;;  %14218 = vmatpush3.bf16.msra.mxu0 %v14215_v60  ;;  %v10054_v39 = vld [vmem:[%s20212_s3 + $0xba0] sm:$0xff]  ;;  %v10072_v60 = vld [vmem:[%s20212_s3 + $0xc30] sm:$0xff] }
 0x4d2   :  { %14220 = vmatprep.subr.bf16.mxu0 %v14219_v62  ;;  %v14231_v10 = vpack.c.bf16 %v10055_v53, %v10054_v39  ;;  %v14267_v11 = vpack.c.bf16 %v10073_v45, %v10072_v60  ;;  %v6890_v39 = vld [vmem:[#allocation2 + $0x133] sm:$0xff] }
 0x4d3   :  { %v10080_v53 = vld [vmem:[%s20212_s3 + $0xc70] sm:$0xff] }
 0x4d4   :  { %13229 = vmatmul.mubr.f32.gmra.mrb[40].mxu0 %v6506_v50  ;;  %v6887_v50 = vld [vmem:[#allocation2 + $0x103] sm:$0xff] }
 0x4d5   :  { %14222 = vmatpush3.bf16.msra.mxu0 %v14219_v62  ;;  %13263 = vmatprep.mubr.f32.mxu0 %v6685_v52  ;;  %v10074_v62 = vld [vmem:[%s20212_s3 + $0xc40] sm:$0xff]  ;;  %v10079_v52 = vld [vmem:[%s20212_s3 + $0xc68] sm:$0xff] }
 0x4d6   :  { %14224 = vmatprep.subr.bf16.mxu0 %v14223_v19  ;;  %v14271_v58 = vpack.c.bf16 %v10075_v42, %v10074_v62 }
 0x4d8   :  { %13264 = vmatmul.mubr.f32.vlgmr.msra.gmra.mrb[26].mxu0 %v6686_v38 }
 0x4d9   :  { %13266 = vmatprep.mubr.f32.mxu0 %v6687_v18  ;;  %14226 = vmatpush3.bf16.msra.mxu0 %v14223_v19  ;;  %v10077_v19 = vld [vmem:[%s20212_s3 + $0xc58] sm:$0xff] }
 0x4da   :  { %14228 = vmatprep.subr.bf16.mxu0 %v14227_v35  ;;  %v10081_v18 = vld [vmem:[%s20212_s3 + $0xc78] sm:$0xff] }
 0x4dc   :  { %13267 = vmatmul.mubr.f32.gmra.mrb[28].mxu0 %v6688_v25  ;;  %v6892_v25 = vld [vmem:[#allocation2 + $0x153] sm:$0xff] }
 0x4dd   :  { %13269 = vmatprep.mubr.f32.mxu0 %v18100_v22  ;;  %14230 = vmatpush3.bf16.msra.mxu0 %v14227_v35  ;;  %v10060_v22 = vld [vmem:[%s20212_s3 + $0xbd0] sm:$0xff]  ;;  %v6889_v35 = vld [vmem:[#allocation2 + $0x123] sm:$0xff] }
 0x4de   :  { %14232 = vmatprep.subr.bf16.mxu0 %v14231_v10  ;;  %v14243_v61 = vpack.c.bf16 %v10061_v28, %v10060_v22  ;;  %v7084_v22 = vld [vmem:[#allocation2 + $0x134] sm:$0xff] }
 0x4df   :  { %v7086_v28 = vld [vmem:[#allocation2 + $0x154] sm:$0xff] }
 0x4e0   :  { %13270 = vmatmul.mubr.f32.gmra.mrb[30].mxu0 %v6690_v32  ;;  %v7075_v32 = vld [vmem:[#allocation2 + $0x64] sm:$0xff] }
 0x4e1   :  { %13272 = vmatprep.mubr.f32.mxu0 %v18110_v30  ;;  %14234 = vmatpush3.bf16.msra.mxu0 %v14231_v10  ;;  %v10062_v30 = vld [vmem:[%s20212_s3 + $0xbe0] sm:$0xff]  ;;  %v14283_v10 = vpack.c.bf16 %v10081_v18, %v10080_v53 }
 0x4e2   :  { %14236 = vmatprep.subr.bf16.mxu0 %v14235_v15  ;;  %v14247_v0 = vpack.c.bf16 %v10063_v1, %v10062_v30  ;;  %v10108_v30 = vld [vmem:[%s20214_s5 + $0x1c8] sm:$0xff]  ;;  %v10110_v1 = vld [vmem:[%s20214_s5 + $0x1d8] sm:$0xff] }
 0x4e4   :  { %13273 = vmatmul.mubr.f32.gmra.mrb[32].mxu0 %v6692_v8  ;;  %v7083_v8 = vld [vmem:[#allocation2 + $0x124] sm:$0xff] }
 0x4e5   :  { %13275 = vmatprep.mubr.f32.mxu0 %v6693_v49  ;;  %14238 = vmatpush3.bf16.msra.mxu0 %v14235_v15  ;;  %v7074_v15 = vld [vmem:[#allocation2 + $0x54] sm:$0xff] }
 0x4e6   :  { %14240 = vmatprep.subr.bf16.mxu0 %v14239_v20  ;;  %v10106_v49 = vld [vmem:[%s20214_s5 + $0x1b8] sm:$0xff] }
 0x4e8   :  { %13276 = vmatmul.mubr.f32.gmra.mrb[34].mxu0 %v6694_v31 }
 0x4e9   :  { %13278 = vmatprep.mubr.f32.mxu0 %v6695_v41  ;;  %14242 = vmatpush3.bf16.msra.mxu0 %v14239_v20  ;;  %v7082_v20 = vld [vmem:[#allocation2 + $0x114] sm:$0xff]  ;;  %v10107_v41 = vld [vmem:[%s20214_s5 + $0x1c0] sm:$0xff] }
 0x4ea   :  { %14244 = vmatprep.subr.bf16.mxu0 %v14243_v61 }
 0x4ec   :  { %13279 = vmatmul.mubr.f32.gmra.mrb[36].mxu0 %v6696_v54  ;;  %v10109_v54 = vld [vmem:[%s20214_s5 + $0x1d0] sm:$0xff] }
 0x4ed   :  { %13281 = vmatprep.mubr.f32.mxu0 %v18136_v24  ;;  %14246 = vmatpush3.bf16.msra.mxu0 %v14243_v61  ;;  %v10068_v24 = vld [vmem:[%s20212_s3 + $0xc10] sm:$0xff]  ;;  %v10103_v61 = vld [vmem:[%s20214_s5 + $0x1a0] sm:$0xff]  ;;  %v14313_v23 = vpack.c.bf16 %v10109_v54, %v10107_v41 }
 0x4ee   :  { %14248 = vmatprep.subr.bf16.mxu0 %v14247_v0  ;;  %v14259_v33 = vpack.c.bf16 %v10069_v2, %v10068_v24  ;;  %v7372_v24 = vld [vmem:[%s20214_s5 + $0x18] sm:$0xff]  ;;  %v15283_v2 = vmov 0.0  }
 0x4ef   :  { %7518 = vmatprep.mubr.f32.mxu1 %v15283_v2 }
 0x4f0   :  { %13282 = vmatmul.mubr.f32.gmra.mrb[38].mxu0 %v6698_v13  ;;  %v10111_v13 = vld [vmem:[%s20214_s5 + $0x1e0] sm:$0xff] }
 0x4f1   :  { %13284 = vmatprep.mubr.f32.mxu0 %v18146_v5  ;;  %14250 = vmatpush3.bf16.msra.mxu0 %v14247_v0  ;;  %v10070_v5 = vld [vmem:[%s20212_s3 + $0xc20] sm:$0xff]  ;;  %v14311_v0 = vpack.c.bf16 %v10110_v1, %v10108_v30 }
 0x4f2   :  { %14252 = vmatprep.subr.bf16.mxu0 %v14251_v4  ;;  %v14263_v7 = vpack.c.bf16 %v10071_v27, %v10070_v5 }
 0x4f4   :  { %13285 = vmatmul.mubr.f32.gmra.mrb[40].mxu0 %v6700_v51  ;;  %v7370_v51 = vld [vmem:[%s20214_s5 + $0x8] sm:$0xff] }
 0x4f5   :  { %14254 = vmatpush3.bf16.msra.mxu0 %v14251_v4  ;;  %13319 = vmatprep.mubr.f32.mxu0 %v6879_v9  ;;  %v10114_v4 = vld [vmem:[%s20214_s5 + $0x1f8] sm:$0xff]  ;;  %v14319_v9 = vpack.c.bf16 %v7372_v24, %v7370_v51 }
 0x4f6   :  { %14256 = vmatprep.subr.bf16.mxu0 %v14255_v59  ;;  %v14315_v55 = vpack.c.bf16 %v10114_v4, %v10112_v37 }
 0x4f8   :  { %13320 = vmatmul.mubr.f32.vlgmr.msra.gmra.mrb[26].mxu0 %v6880_v56 }
 0x4f9   :  { %13322 = vmatprep.mubr.f32.mxu0 %v6881_v6  ;;  %14258 = vmatpush3.bf16.msra.mxu0 %v14255_v59  ;;  %v14317_v59 = vpack.c.bf16 %v10113_v17, %v10111_v13 }
 0x4fa   :  { %14260 = vmatprep.subr.bf16.mxu0 %v14259_v33 }
 0x4fc   :  { %13323 = vmatmul.mubr.f32.gmra.mrb[28].mxu0 %v6882_v63 }
 0x4fd   :  { %13325 = vmatprep.mubr.f32.mxu0 %v18172_v26  ;;  %14262 = vmatpush3.bf16.msra.mxu0 %v14259_v33  ;;  %v10076_v26 = vld [vmem:[%s20212_s3 + $0xc50] sm:$0xff]  ;;  %v18612_v33 = vld [vmem:[%s20213_s4] ss:$0 sm:$0xff] }
 0x4fe   :  { %14264 = vmatprep.subr.bf16.mxu0 %v14263_v7  ;;  %v14275_v29 = vpack.c.bf16 %v10077_v19, %v10076_v26 }
 0x500   :  { %13326 = vmatmul.mubr.f32.gmra.mrb[30].mxu0 %v6884_v36 }
 0x501   :  { %13328 = vmatprep.mubr.f32.mxu0 %v18182_v43  ;;  %14266 = vmatpush3.bf16.msra.mxu0 %v14263_v7  ;;  %v10078_v43 = vld [vmem:[%s20212_s3 + $0xc60] sm:$0xff] }
 0x502   :  { %14268 = vmatprep.subr.bf16.mxu0 %v14267_v11  ;;  %v14279_v38 = vpack.c.bf16 %v10079_v52, %v10078_v43 }
 0x504   :  { %13329 = vmatmul.mubr.f32.gmra.mrb[32].mxu0 %v6886_v34 }
 0x505   :  { %13331 = vmatprep.mubr.f32.mxu0 %v6887_v50  ;;  %14270 = vmatpush3.bf16.msra.mxu0 %v14267_v11 }
 0x506   :  { %14272 = vmatprep.subr.bf16.mxu0 %v14271_v58 }
 0x508   :  { %13332 = vmatmul.mubr.f32.gmra.mrb[34].mxu0 %v6888_v16 }
 0x509   :  { %13334 = vmatprep.mubr.f32.mxu0 %v6889_v35  ;;  %14274 = vmatpush3.bf16.msra.mxu0 %v14271_v58 }
 0x50a   :  { %14276 = vmatprep.subr.bf16.mxu0 %v14275_v29 }
 0x50c   :  { %13335 = vmatmul.mubr.f32.gmra.mrb[36].mxu0 %v6890_v39 }
 0x50d   :  { %13337 = vmatprep.mubr.f32.mxu0 %v18208_v3  ;;  %14278 = vmatpush3.bf16.msra.mxu0 %v14275_v29  ;;  %v7078_v3 = vld [vmem:[#allocation2 + $0x94] sm:$0xff] }
 0x50e   :  { %14280 = vmatprep.subr.bf16.mxu0 %v14279_v38 }
 0x510   :  { %13338 = vmatmul.mubr.f32.gmra.mrb[38].mxu0 %v6892_v25 }
 0x511   :  { %13340 = vmatprep.mubr.f32.mxu0 %v18218_v44  ;;  %14282 = vmatpush3.bf16.msra.mxu0 %v14279_v38  ;;  %v7080_v44 = vld [vmem:[#allocation2 + $0xb4] sm:$0xff] }
 0x512   :  { %14284 = vmatprep.subr.bf16.mxu0 %v14283_v10 }
 0x514   :  { %13341 = vmatmul.mubr.f32.gmra.mrb[40].mxu0 %v6894_v48 }
 0x515   :  { %14286 = vmatpush3.bf16.msra.mxu0 %v14283_v10  ;;  %13375 = vmatprep.mubr.f32.mxu0 %v7073_v57 }
 0x518   :  { %13376 = vmatmul.mubr.f32.vlgmr.msra.gmra.mrb[26].mxu0 %v7074_v15 }
 0x519   :  { %13378 = vmatprep.mubr.f32.mxu0 %v7075_v32 }
 0x51c   :  { %13379 = vmatmul.mubr.f32.gmra.mrb[28].mxu0 %v7076_v21 }
 0x51d   :  { %13381 = vmatprep.mubr.f32.mxu0 %v18244_v46  ;;  %v7088_v46 = vld [vmem:[#allocation2 + $0x174] sm:$0xff] }
 0x520   :  { %13382 = vmatmul.mubr.f32.gmra.mrb[30].mxu0 %v7078_v3 }
 0x521   :  { %13384 = vmatprep.mubr.f32.mxu0 %v18254_v40  ;;  %v10104_v40 = vld [vmem:[%s20214_s5 + $0x1a8] sm:$0xff] }
 0x522   :  { %v14307_v31 = vpack.c.bf16 %v10106_v49, %v10104_v40 }
 0x524   :  { %13385 = vmatmul.mubr.f32.gmra.mrb[32].mxu0 %v7080_v44  ;;  %14308 = vmatprep.subr.bf16.mxu1 %v14307_v31 }
 0x525   :  { %13387 = vmatprep.mubr.f32.mxu0 %v7081_v12 }
 0x528   :  { %13388 = vmatmul.mubr.f32.gmra.mrb[34].mxu0 %v7082_v20 }
 0x529   :  { %13390 = vmatprep.mubr.f32.mxu0 %v7083_v8 }
 0x52c   :  { %13391 = vmatmul.mubr.f32.gmra.mrb[36].mxu0 %v7084_v22 }
 0x52d   :  { %13393 = vmatprep.mubr.f32.mxu0 %v18280_v14  ;;  %v10105_v14 = vld [vmem:[%s20214_s5 + $0x1b0] sm:$0xff] }
 0x530   :  { %13394 = vmatmul.mubr.f32.gmra.mrb[38].mxu0 %v7086_v28 }
 0x531   :  { %13396 = vmatprep.mubr.f32.mxu0 %v18290_v47  ;;  %v14309_v47 = vpack.c.bf16 %v10105_v14, %v10103_v61 }
 0x533   :  { %14310 = vmatpush1.bf16.msra.mxu1 %v14309_v47 }
 0x534   :  { %13397 = vmatmul.mubr.f32.gmra.mrb[40].mxu0 %v7088_v46  ;;  %14312 = vmatprep.subr.bf16.mxu1 %v14311_v0 }
 0x537   :  { %14314 = vmatpush1.bf16.msra.mxu1 %v14313_v23 }
 0x538   :  { %14316 = vmatprep.subr.bf16.mxu1 %v14315_v55 }
 0x53b   :  { %14318 = vmatpush1.bf16.msra.mxu1 %v14317_v59 }
 0x53c   :  { %14320 = vmatprep.subr.bf16.mxu1 %v14319_v9 }
 0x5eb   :  { %v13377_v56 = vpop.f32.mrb[26].mxu0 }
 0x5ec   :  { %v7275_v5 = vadd.f32 %v13377_v56, %v18612_v33  ;;  %v7172_v27 = vpop.f32.mrb[27].mxu0 }
 0x5ed   :  { %v7274_v6 = vadd.f32 %v18612_v33, %v7172_v27 }
 0x5ee   :  { %vm7291_vm4 = vcmp.ge.f32.partialorder %v7275_v5, 0.0  ;;  %v7307_v7 = vmul.f32 0.01, %v7275_v5 }
 0x5ef   :  { %vm7290_vm5 = vcmp.ge.f32.partialorder %v7274_v6, 0.0  ;;  %v7306_v63 = vmul.f32 0.01, %v7274_v6  ;;  %v13380_v60 = vpop.f32.mrb[28].mxu0 }
 0x5f0   :  { %v7323_v45 = vsel %vm7291_vm4, %v7275_v5, %v7307_v7  ;;  %v7277_v11 = vadd.f32 %v13380_v60, %v18612_v33  ;;  %v7182_v36 = vpop.f32.mrb[29].mxu0  ;;  %vm7451_vm4 = vcmask 1041409  }
 0x5f1   :  { %7339 = vst [vmem:[#allocation3 + $0x8] sm:$0xff] %v7323_v45  ;;  %v7322_v62 = vsel %vm7290_vm5, %v7274_v6, %v7306_v63  ;;  %v7276_v42 = vadd.f32 %v18612_v33, %v7182_v36 }
 0x5f2   :  { %7338 = vst [vmem:[#allocation3] sm:$0xff] %v7322_v62  ;;  %vm7293_vm6 = vcmp.ge.f32.partialorder %v7277_v11, 0.0  ;;  %v7309_v58 = vmul.f32 0.01, %v7277_v11 }
 0x5f3   :  { %vm7292_vm7 = vcmp.ge.f32.partialorder %v7276_v42, 0.0  ;;  %v7308_v34 = vmul.f32 0.01, %v7276_v42  ;;  %v13383_v26 = vpop.f32.mrb[30].mxu0 }
 0x5f4   :  { %v7325_v19 = vsel %vm7293_vm6, %v7277_v11, %v7309_v58  ;;  %v7279_v50 = vadd.f32 %v13383_v26, %v18612_v33  ;;  %v7192_v29 = vpop.f32.mrb[31].mxu0  ;;  %v7369_v58 = vld [vmem:[%s20214_s5] sm:$0xff] }
 0x5f5   :  { %7341 = vst [vmem:[#allocation3 + $0x18] sm:$0xff] %v7325_v19  ;;  %v7324_v16 = vsel %vm7292_vm7, %v7276_v42, %v7308_v34  ;;  %v7278_v43 = vadd.f32 %v18612_v33, %v7192_v29  ;;  %v7371_v34 = vld [vmem:[%s20214_s5 + $0x10] sm:$0xff]  ;;  %v7374_v19 = vld [vmem:[%s20214_s5 + $0x28] sm:$0xff] }
 0x5f6   :  { %7340 = vst [vmem:[#allocation3 + $0x10] sm:$0xff] %v7324_v16  ;;  %vm7295_vm8 = vcmp.ge.f32.partialorder %v7279_v50, 0.0  ;;  %v7311_v52 = vmul.f32 0.01, %v7279_v50 }
 0x5f7   :  { %vm7294_vm9 = vcmp.ge.f32.partialorder %v7278_v43, 0.0  ;;  %v7310_v35 = vmul.f32 0.01, %v7278_v43  ;;  %v13386_v38 = vpop.f32.mrb[32].mxu0 }
 0x5f8   :  { %v7327_v39 = vsel %vm7295_vm8, %v7279_v50, %v7311_v52  ;;  %v7281_v53 = vadd.f32 %v13386_v38, %v18612_v33  ;;  %v7202_v18 = vpop.f32.mrb[33].mxu0  ;;  %v7407_v23 = vld [vmem:[#allocation3 + $0xa] sm:$0x1]  ;;  %v7409_v37 = vld [vmem:[#allocation3 + $0xb] sm:$0x1]  ;;  %v7376_v50 = vld [vmem:[%s20214_s5 + $0x38] sm:$0xff]  ;;  %v14321_v52 = vpack.c.bf16 %v7371_v34, %v7369_v58 }
 0x5f9   :  { %7343 = vst [vmem:[#allocation3 + $0x28] sm:$0xff] %v7327_v39  ;;  %v7326_v10 = vsel %vm7294_vm9, %v7278_v43, %v7310_v35  ;;  %v7280_v25 = vadd.f32 %v18612_v33, %v7202_v18  ;;  %v7401_v13 = vld [vmem:[#allocation3 + $0x2] sm:$0x1]  ;;  %v7403_v59 = vld [vmem:[#allocation3 + $0x3] sm:$0x1]  ;;  %v7411_v60 = vmax.f32 %v7407_v23, %v7409_v37  ;;  %v14323_v35 = vpack.c.bf16 %v7376_v50, %v7374_v19  ;;  %v7375_v39 = vld [vmem:[%s20214_s5 + $0x30] sm:$0xff] }
 0x5fa   :  { %7342 = vst [vmem:[#allocation3 + $0x20] sm:$0xff] %v7326_v10  ;;  %vm7297_vm10 = vcmp.ge.f32.partialorder %v7281_v53, 0.0  ;;  %v7313_v48 = vmul.f32 0.01, %v7281_v53  ;;  %v7405_v36 = vmax.f32 %v7401_v13, %v7403_v59  ;;  %v7373_v38 = vld [vmem:[%s20214_s5 + $0x20] sm:$0xff]  ;;  %v7378_v18 = vld [vmem:[%s20214_s5 + $0x48] sm:$0xff] }
 0x5fb   :  { %vm7296_vm11 = vcmp.ge.f32.partialorder %v7280_v25, 0.0  ;;  %v7312_v57 = vmul.f32 0.01, %v7280_v25  ;;  %v13389_v15 = vpop.f32.mrb[34].mxu0  ;;  %v7380_v10 = vld [vmem:[%s20214_s5 + $0x58] sm:$0xff]  ;;  %v7395_v59 = vld [vmem:[%s20214_s5 + $0xd0] sm:$0xff] }
 0x5fc   :  { %v7329_v32 = vsel %vm7297_vm10, %v7281_v53, %v7313_v48  ;;  %v7283_v21 = vadd.f32 %v13389_v15, %v18612_v33  ;;  %v7212_v3 = vpop.f32.mrb[35].mxu0  ;;  %v7413_v16 = vmax.f32 %v7405_v36, %v7411_v60  ;;  %v14327_v48 = vpack.c.bf16 %v7380_v10, %v7378_v18  ;;  %v7379_v15 = vld [vmem:[%s20214_s5 + $0x50] sm:$0xff]  ;;  %v7356_v60 = vld [vmem:[#allocation3 + $0x1] sm:$0x1]  ;;  %v10124_v10 = vld [vmem:[%s20214_s5 + $0x248] sm:$0xff] }
 0x5fd   :  { %7345 = vst [vmem:[#allocation3 + $0x38] sm:$0xff] %v7329_v32  ;;  %v7328_v44 = vsel %vm7296_vm11, %v7280_v25, %v7312_v57  ;;  %v7282_v12 = vadd.f32 %v18612_v33, %v7212_v3  ;;  %v14325_v25 = vpack.c.bf16 %v7375_v39, %v7373_v38  ;;  %v7377_v57 = vld [vmem:[%s20214_s5 + $0x40] sm:$0xff]  ;;  %v7382_v32 = vld [vmem:[%s20214_s5 + $0x68] sm:$0xff]  ;;  %v10117_v50 = vld [vmem:[%s20214_s5 + $0x210] sm:$0xff] }
 0x5fe   :  { %7344 = vst [vmem:[#allocation3 + $0x30] sm:$0xff] %v7328_v44  ;;  %vm7299_vm12 = vcmp.ge.f32.partialorder %v7283_v21, 0.0  ;;  %v7315_v20 = vmul.f32 0.01, %v7283_v21  ;;  %v14329_v3 = vpack.c.bf16 %v7379_v15, %v7377_v57  ;;  %v10115_v19 = vld [vmem:[%s20214_s5 + $0x200] sm:$0xff] }
 0x5ff   :  { %vm7298_vm13 = vcmp.ge.f32.partialorder %v7282_v12, 0.0  ;;  %v7314_v8 = vmul.f32 0.01, %v7282_v12  ;;  %v13392_v22 = vpop.f32.mrb[36].mxu0  ;;  %v10119_v39 = vld [vmem:[%s20214_s5 + $0x220] sm:$0xff] }
 0x600   :  { %v7331_v28 = vsel %vm7299_vm12, %v7283_v21, %v7315_v20  ;;  %v7285_v46 = vadd.f32 %v13392_v22, %v18612_v33  ;;  %v7222_v40 = vpop.f32.mrb[37].mxu0  ;;  %v7384_v21 = vld [vmem:[%s20214_s5 + $0x78] sm:$0xff]  ;;  %v7383_v20 = vld [vmem:[%s20214_s5 + $0x70] sm:$0xff]  ;;  %v10123_v15 = vld [vmem:[%s20214_s5 + $0x240] sm:$0xff] }
 0x601   :  { %7347 = vst [vmem:[#allocation3 + $0x48] sm:$0xff] %v7331_v28  ;;  %v7330_v49 = vsel %vm7298_vm13, %v7282_v12, %v7314_v8  ;;  %v7284_v61 = vadd.f32 %v18612_v33, %v7222_v40  ;;  %v14331_v44 = vpack.c.bf16 %v7384_v21, %v7382_v32  ;;  %v7381_v12 = vld [vmem:[%s20214_s5 + $0x60] sm:$0xff]  ;;  %v7386_v8 = vld [vmem:[%s20214_s5 + $0x88] sm:$0xff]  ;;  %v7388_v22 = vld [vmem:[%s20214_s5 + $0x98] sm:$0xff] }
 0x602   :  { %7346 = vst [vmem:[#allocation3 + $0x40] sm:$0xff] %v7330_v49  ;;  %vm7301_vm14 = vcmp.ge.f32.partialorder %v7285_v46, 0.0  ;;  %v7317_v31 = vmul.f32 0.01, %v7285_v46  ;;  %v14333_v28 = vpack.c.bf16 %v7383_v20, %v7381_v12  ;;  %v7385_v40 = vld [vmem:[%s20214_s5 + $0x80] sm:$0xff]  ;;  %v7387_v49 = vld [vmem:[%s20214_s5 + $0x90] sm:$0xff] }
 0x603   :  { %vm7300_vm15 = vcmp.ge.f32.partialorder %v7284_v61, 0.0  ;;  %v7316_v14 = vmul.f32 0.01, %v7284_v61  ;;  %v13395_v47 = vpop.f32.mrb[38].mxu0  ;;  %v10125_v32 = vld [vmem:[%s20214_s5 + $0x250] sm:$0xff]  ;;  %v10128_v21 = vld [vmem:[%s20214_s5 + $0x268] sm:$0xff] }
 0x604   :  { %v7333_v30 = vsel %vm7301_vm14, %v7285_v46, %v7317_v31  ;;  %v7287_v1 = vadd.f32 %v13395_v47, %v18612_v33  ;;  %v7232_v41 = vpop.f32.mrb[39].mxu0  ;;  %v14335_v46 = vpack.c.bf16 %v7388_v22, %v7386_v8  ;;  %v7392_v31 = vld [vmem:[%s20214_s5 + $0xb8] sm:$0xff]  ;;  %v10127_v20 = vld [vmem:[%s20214_s5 + $0x260] sm:$0xff]  ;;  %v10129_v8 = vld [vmem:[%s20214_s5 + $0x270] sm:$0xff] }
 0x605   :  { %7349 = vst [vmem:[#allocation3 + $0x58] sm:$0xff] %v7333_v30  ;;  %v7332_v0 = vsel %vm7300_vm15, %v7284_v61, %v7316_v14  ;;  %v7286_v54 = vadd.f32 %v18612_v33, %v7232_v41  ;;  %v7390_v61 = vld [vmem:[%s20214_s5 + $0xa8] sm:$0xff]  ;;  %v14337_v14 = vpack.c.bf16 %v7387_v49, %v7385_v40  ;;  %v7389_v30 = vld [vmem:[%s20214_s5 + $0xa0] sm:$0xff] }
 0x606   :  { %7348 = vst [vmem:[#allocation3 + $0x50] sm:$0xff] %v7332_v0  ;;  %vm7303_vm0 = vcmp.ge.f32.partialorder %v7287_v1, 0.0  ;;  %v7319_v4 = vmul.f32 0.01, %v7287_v1  ;;  %v14339_v47 = vpack.c.bf16 %v7392_v31, %v7390_v61  ;;  %v7394_v41 = vld [vmem:[%s20214_s5 + $0xc8] sm:$0xff]  ;;  %v7396_v0 = vld [vmem:[%s20214_s5 + $0xd8] sm:$0xff] }
 0x607   :  { %vm7302_vm1 = vcmp.ge.f32.partialorder %v7286_v54, 0.0  ;;  %v7318_v55 = vmul.f32 0.01, %v7286_v54  ;;  %v13398_v17 = vpop.f32.mrb[40].mxu0  ;;  %v10132_v22 = vld [vmem:[%s20214_s5 + $0x288] sm:$0xff]  ;;  %v10131_v49 = vld [vmem:[%s20214_s5 + $0x280] sm:$0xff] }
 0x608   :  { %v7335_v51 = vsel %vm7303_vm0, %v7287_v1, %v7319_v4  ;;  %v7289_v24 = vadd.f32 %v13398_v17, %v18612_v33  ;;  %v7242_v9 = vpop.f32.mrb[41].mxu0  ;;  %v7408_v56 = vld [vmem:[#allocation3 + $0x4a] sm:$0x1]  ;;  %v7410_v5 = vld [vmem:[#allocation3 + $0x4b] sm:$0x1]  ;;  %v7391_v1 = vld [vmem:[%s20214_s5 + $0xb0] sm:$0xff] }
 0x609   :  { %7351 = vst [vmem:[#allocation3 + $0x68] sm:$0xff] %v7335_v51  ;;  %v7334_v27 = vsel %vm7302_vm1, %v7286_v54, %v7318_v55  ;;  %v7288_v6 = vadd.f32 %v18612_v33, %v7242_v9  ;;  %v7402_v7 = vld [vmem:[#allocation3 + $0x42] sm:$0x1]  ;;  %v7404_v63 = vld [vmem:[#allocation3 + $0x43] sm:$0x1]  ;;  %v7412_v45 = vmax.f32 %v7408_v56, %v7410_v5  ;;  %v14341_v13 = vpack.c.bf16 %v7391_v1, %v7389_v30  ;;  %v7398_v51 = vld [vmem:[%s20214_s5 + $0xe8] sm:$0xff] }
 0x60a   :  { %7350 = vst [vmem:[#allocation3 + $0x60] sm:$0xff] %v7334_v27  ;;  %vm7305_vm2 = vcmp.ge.f32.partialorder %v7289_v24, 0.0  ;;  %v7321_v11 = vmul.f32 0.01, %v7289_v24  ;;  %v7406_v62 = vmax.f32 %v7402_v7, %v7404_v63  ;;  %v7355_v54 = vld [vmem:[#allocation3 + $0x40] sm:$0x1]  ;;  %v14343_v55 = vpack.c.bf16 %v7396_v0, %v7394_v41 }
 0x60b   :  { %vm7304_vm3 = vcmp.ge.f32.partialorder %v7288_v6, 0.0  ;;  %v7320_v42 = vmul.f32 0.01, %v7288_v6  ;;  %v7357_v23 = vld [vmem:[#allocation3 + $0x41] sm:$0x1]  ;;  %v10133_v61 = vld [vmem:[%s20214_s5 + $0x290] sm:$0xff] }
 0x60c   :  { %v7337_v33 = vsel %vm7305_vm2, %v7289_v24, %v7321_v11  ;;  %v7414_v26 = vmax.f32 %v7406_v62, %v7412_v45  ;;  %v7362_v37 = vld [vmem:[#allocation3 + $0x48] sm:$0x1]  ;;  %v7364_v4 = vld [vmem:[#allocation3 + $0x49] sm:$0x1]  ;;  %v7393_v17 = vld [vmem:[%s20214_s5 + $0xc0] sm:$0xff]  ;;  %v7359_v9 = vmax.f32 %v7355_v54, %v7357_v23 }
 0x60d   :  { %7353 = vst [vmem:[#allocation3 + $0x78] sm:$0xff] %v7337_v33  ;;  %v7336_v29 = vsel %vm7304_vm3, %v7288_v6, %v7320_v42  ;;  %v7400_v24 = vld [vmem:[%s20214_s5 + $0xf8] sm:$0xff]  ;;  %v7366_v56 = vmax.f32 %v7362_v37, %v7364_v4  ;;  %v14345_v5 = vpack.c.bf16 %v7395_v59, %v7393_v17  ;;  %v7397_v27 = vld [vmem:[%s20214_s5 + $0xe0] sm:$0xff]  ;;  %v7399_v6 = vld [vmem:[%s20214_s5 + $0xf0] sm:$0xff] }
 0x60e   :  { %7352 = vst [vmem:[#allocation3 + $0x70] sm:$0xff] %v7336_v29  ;;  %v7450_v43 = vrot.slane %v7414_v26, 7  ;;  %v7354_v7 = vld [vmem:[#allocation3] sm:$0x1]  ;;  %v14347_v63 = vpack.c.bf16 %v7400_v24, %v7398_v51  ;;  %v7361_v45 = vld [vmem:[#allocation3 + $0x8] sm:$0x1]  ;;  %v14349_v58 = vpack.c.bf16 %v7399_v6, %v7397_v27 }
 0x60f   :  { %v7363_v11 = vld [vmem:[#allocation3 + $0x9] sm:$0x1]  ;;  %v7368_v36 = vmax.f32 %v7359_v9, %v7366_v56  ;;  %v10118_v42 = vld [vmem:[%s20214_s5 + $0x218] sm:$0xff]  ;;  %v7358_v34 = vmax.f32 %v7354_v7, %v7356_v60  ;;  %v10135_v1 = vld [vmem:[%s20214_s5 + $0x2a0] sm:$0xff] }
 0x610   :  { %v7452_v53 = vsel %vm7451_vm4, %v7450_v43, %v7413_v16  ;;  %v10116_v62 = vld [vmem:[%s20214_s5 + $0x208] sm:$0xff]  ;;  %v7365_v33 = vmax.f32 %v7361_v45, %v7363_v11  ;;  %v10122_v43 = vld [vmem:[%s20214_s5 + $0x238] sm:$0xff]  ;;  %v10137_v41 = vld [vmem:[%s20214_s5 + $0x2b0] sm:$0xff] }
 0x611   :  { %7519 = vmatmul.mubr.f32.vlgmr.msra.gmra.mrb[166].mxu1 %v7452_v53  ;;  %v14351_v26 = vpack.c.bf16 %v10118_v42, %v10116_v62  ;;  %v7527_v29 = vrot.slane %v7368_v36, 7  ;;  %v10120_v16 = vld [vmem:[%s20214_s5 + $0x228] sm:$0xff]  ;;  %v10121_v53 = vld [vmem:[%s20214_s5 + $0x230] sm:$0xff]  ;;  %v10142_v54 = vld [vmem:[%s20214_s5 + $0x2d8] sm:$0xff] }
 0x612   :  { %14322 = vmatpush1.bf16.msra.mxu1 %v14321_v52  ;;  %7594 = vmatprep.mubr.f32.mxu1 %v15283_v2  ;;  %v7367_v52 = vmax.f32 %v7358_v34, %v7365_v33  ;;  %v14355_v38 = vpack.c.bf16 %v10122_v43, %v10120_v16  ;;  %v10136_v31 = vld [vmem:[%s20214_s5 + $0x2a8] sm:$0xff]  ;;  %v7602_v23 = vld [vmem:[#allocation3 + $0x44] sm:$0x1]  ;;  %v7604_v37 = vld [vmem:[#allocation3 + $0x45] sm:$0x1] }
 0x613   :  { %14324 = vmatprep.subr.bf16.mxu1 %v14323_v35  ;;  %v14353_v35 = vpack.c.bf16 %v10117_v50, %v10115_v19  ;;  %v10140_v0 = vld [vmem:[%s20214_s5 + $0x2c8] sm:$0xff]  ;;  %v10139_v59 = vld [vmem:[%s20214_s5 + $0x2c0] sm:$0xff]  ;;  %v10141_v51 = vld [vmem:[%s20214_s5 + $0x2d0] sm:$0xff]  ;;  %v7606_v56 = vmax.f32 %v7602_v23, %v7604_v37 }
 0x614   :  { %v7528_v18 = vsel %vm7451_vm4, %v7527_v29, %v7367_v52  ;;  %v7608_v4 = vld [vmem:[#allocation3 + $0x4c] sm:$0x1]  ;;  %v14375_v17 = vpack.c.bf16 %v10142_v54, %v10140_v0  ;;  %v10146_v9 = vld [vmem:[%s20214_s5 + $0x2f8] sm:$0xff]  ;;  %v14377_v27 = vpack.c.bf16 %v10141_v51, %v10139_v59  ;;  %v10143_v6 = vld [vmem:[%s20214_s5 + $0x2e0] sm:$0xff] }
 0x615   :  { %v10144_v24 = vld [vmem:[%s20214_s5 + $0x2e8] sm:$0xff]  ;;  %v10145_v7 = vld [vmem:[%s20214_s5 + $0x2f0] sm:$0xff]  ;;  %v7603_v45 = vld [vmem:[#allocation3 + $0x5] sm:$0x1] }
 0x616   :  { %14326 = vmatpush1.bf16.msra.mxu1 %v14325_v25  ;;  %v10126_v25 = vld [vmem:[%s20214_s5 + $0x258] sm:$0xff]  ;;  %v14379_v60 = vpack.c.bf16 %v10146_v9, %v10144_v24  ;;  %v7607_v11 = vld [vmem:[#allocation3 + $0xc] sm:$0x1]  ;;  %v7609_v36 = vld [vmem:[#allocation3 + $0xd] sm:$0x1]  ;;  %v14381_v34 = vpack.c.bf16 %v10145_v7, %v10143_v6 }
 0x617   :  { %14328 = vmatprep.subr.bf16.mxu1 %v14327_v48  ;;  %v14357_v48 = vpack.c.bf16 %v10121_v53, %v10119_v39  ;;  %v14359_v57 = vpack.c.bf16 %v10126_v25, %v10124_v10  ;;  %v10148_v42 = vld [vmem:[%s20214_s5 + $0x308] sm:$0xff]  ;;  %v10147_v50 = vld [vmem:[%s20214_s5 + $0x300] sm:$0xff]  ;;  %v10149_v29 = vld [vmem:[%s20214_s5 + $0x310] sm:$0xff] }
 0x618   :  { %v10152_v43 = vld [vmem:[%s20214_s5 + $0x328] sm:$0xff]  ;;  %v10154_v52 = vld [vmem:[%s20214_s5 + $0x338] sm:$0xff]  ;;  %v10151_v53 = vld [vmem:[%s20214_s5 + $0x320] sm:$0xff] }
 0x619   :  { %v14387_v39 = vpack.c.bf16 %v10154_v52, %v10152_v43  ;;  %v10156_v25 = vld [vmem:[%s20214_s5 + $0x348] sm:$0xff]  ;;  %v10169_v0 = vld [vmem:[%s20214_s5 + $0x3b0] sm:$0xff]  ;;  %v10174_v23 = vld [vmem:[%s20214_s5 + $0x3d8] sm:$0xff] }
 0x61a   :  { %14330 = vmatpush1.bf16.msra.mxu1 %v14329_v3  ;;  %v10130_v3 = vld [vmem:[%s20214_s5 + $0x278] sm:$0xff]  ;;  %v10172_v54 = vld [vmem:[%s20214_s5 + $0x3c8] sm:$0xff]  ;;  %v7727_v37 = vld [vmem:[#allocation3 + $0x46] sm:$0x1] }
 0x61b   :  { %14332 = vmatprep.subr.bf16.mxu1 %v14331_v44  ;;  %v14361_v44 = vpack.c.bf16 %v10125_v32, %v10123_v15  ;;  %v14363_v12 = vpack.c.bf16 %v10130_v3, %v10128_v21  ;;  %v10155_v32 = vld [vmem:[%s20214_s5 + $0x340] sm:$0xff]  ;;  %v10157_v21 = vld [vmem:[%s20214_s5 + $0x350] sm:$0xff]  ;;  %v10160_v3 = vld [vmem:[%s20214_s5 + $0x368] sm:$0xff]  ;;  %v14407_v59 = vpack.c.bf16 %v10174_v23, %v10172_v54 }
 0x61c   :  { %v10171_v51 = vld [vmem:[%s20214_s5 + $0x3c0] sm:$0xff]  ;;  %v10173_v24 = vld [vmem:[%s20214_s5 + $0x3d0] sm:$0xff]  ;;  %v10176_v9 = vld [vmem:[%s20214_s5 + $0x3e8] sm:$0xff] }
 0x61d   :  { %v14409_v6 = vpack.c.bf16 %v10173_v24, %v10171_v51  ;;  %v10175_v7 = vld [vmem:[%s20214_s5 + $0x3e0] sm:$0xff]  ;;  %v10184_v52 = vld [vmem:[%s20214_s5 + $0x428] sm:$0xff]  ;;  %v10201_v54 = vld [vmem:[%s20214_s5 + $0x4b0] sm:$0xff] }
 0x61e   :  { %14334 = vmatpush1.bf16.msra.mxu1 %v14333_v28  ;;  %v10134_v28 = vld [vmem:[%s20214_s5 + $0x298] sm:$0xff]  ;;  %v10204_v23 = vld [vmem:[%s20214_s5 + $0x4c8] sm:$0xff]  ;;  %v10203_v24 = vld [vmem:[%s20214_s5 + $0x4c0] sm:$0xff] }
 0x61f   :  { %14336 = vmatprep.subr.bf16.mxu1 %v14335_v46  ;;  %v14365_v46 = vpack.c.bf16 %v10129_v8, %v10127_v20  ;;  %v14367_v40 = vpack.c.bf16 %v10134_v28, %v10132_v22  ;;  %v10159_v8 = vld [vmem:[%s20214_s5 + $0x360] sm:$0xff]  ;;  %v10161_v22 = vld [vmem:[%s20214_s5 + $0x370] sm:$0xff]  ;;  %v10164_v28 = vld [vmem:[%s20214_s5 + $0x388] sm:$0xff] }
 0x622   :  { %14338 = vmatpush1.bf16.msra.mxu1 %v14337_v14  ;;  %v10138_v14 = vld [vmem:[%s20214_s5 + $0x2b8] sm:$0xff] }
 0x623   :  { %14340 = vmatprep.subr.bf16.mxu1 %v14339_v47  ;;  %v14369_v47 = vpack.c.bf16 %v10133_v61, %v10131_v49  ;;  %v14371_v30 = vpack.c.bf16 %v10138_v14, %v10136_v31  ;;  %v10163_v61 = vld [vmem:[%s20214_s5 + $0x380] sm:$0xff]  ;;  %v10165_v31 = vld [vmem:[%s20214_s5 + $0x390] sm:$0xff]  ;;  %v10168_v14 = vld [vmem:[%s20214_s5 + $0x3a8] sm:$0xff] }
 0x626   :  { %14342 = vmatpush1.bf16.msra.mxu1 %v14341_v13  ;;  %v7610_v13 = vld [vmem:[#allocation3 + $0x4d] sm:$0x1] }
 0x627   :  { %14344 = vmatprep.subr.bf16.mxu1 %v14343_v55  ;;  %v14373_v55 = vpack.c.bf16 %v10137_v41, %v10135_v1  ;;  %v10167_v41 = vld [vmem:[%s20214_s5 + $0x3a0] sm:$0xff] }
 0x62a   :  { %14346 = vmatpush1.bf16.msra.mxu1 %v14345_v5  ;;  %v7612_v5 = vmax.f32 %v7608_v4, %v7610_v13  ;;  %v7729_v4 = vld [vmem:[#allocation3 + $0x47] sm:$0x1]  ;;  %v7733_v13 = vld [vmem:[#allocation3 + $0x4e] sm:$0x1] }
 0x62b   :  { %14348 = vmatprep.subr.bf16.mxu1 %v14347_v63  ;;  %v7601_v63 = vld [vmem:[#allocation3 + $0x4] sm:$0x1] }
 0x62c   :  { %v7614_v62 = vmax.f32 %v7606_v56, %v7612_v5  ;;  %v7605_v33 = vmax.f32 %v7601_v63, %v7603_v45  ;;  %v10178_v56 = vld [vmem:[%s20214_s5 + $0x3f8] sm:$0xff]  ;;  %v7731_v5 = vmax.f32 %v7727_v37, %v7729_v4  ;;  %v10177_v63 = vld [vmem:[%s20214_s5 + $0x3f0] sm:$0xff] }
 0x62d   :  { %v14411_v45 = vpack.c.bf16 %v10178_v56, %v10176_v9  ;;  %v10206_v37 = vld [vmem:[%s20214_s5 + $0x4d8] sm:$0xff]  ;;  %v7853_v4 = vld [vmem:[#allocation3 + $0x50] sm:$0x1]  ;;  %v10208_v56 = vld [vmem:[%s20214_s5 + $0x4e8] sm:$0xff] }
 0x62e   :  { %14350 = vmatpush1.bf16.msra.mxu1 %v14349_v58  ;;  %v10150_v58 = vld [vmem:[%s20214_s5 + $0x318] sm:$0xff]  ;;  %v7650_v16 = vrot.slane %v7614_v62, 7  ;;  %v7734_v62 = vld [vmem:[#allocation3 + $0xf] sm:$0x1]  ;;  %v14439_v51 = vpack.c.bf16 %v10206_v37, %v10204_v23  ;;  %v10205_v9 = vld [vmem:[%s20214_s5 + $0x4d0] sm:$0xff] }
 0x62f   :  { %14352 = vmatprep.subr.bf16.mxu1 %v14351_v26  ;;  %v7611_v26 = vmax.f32 %v7607_v11, %v7609_v36  ;;  %v14383_v19 = vpack.c.bf16 %v10150_v58, %v10148_v42  ;;  %v7728_v11 = vld [vmem:[#allocation3 + $0x7] sm:$0x1]  ;;  %v7732_v36 = vld [vmem:[#allocation3 + $0xe] sm:$0x1]  ;;  %v10233_v23 = vld [vmem:[%s20214_s5 + $0x5b0] sm:$0xff] }
 0x630   :  { %v10180_v58 = vld [vmem:[%s20214_s5 + $0x408] sm:$0xff] }
 0x631   :  { %7595 = vmatmul.mubr.f32.vlgmr.msra.gmra.mrb[166].mxu1 %v7528_v18  ;;  %v10153_v18 = vld [vmem:[%s20214_s5 + $0x330] sm:$0xff]  ;;  %v10236_v37 = vld [vmem:[%s20214_s5 + $0x5c8] sm:$0xff] }
 0x632   :  { %14354 = vmatpush1.bf16.msra.mxu1 %v14353_v35  ;;  %7717 = vmatprep.mubr.f32.mxu1 %v15283_v2  ;;  %v7613_v35 = vmax.f32 %v7605_v33, %v7611_v26  ;;  %v14413_v33 = vpack.c.bf16 %v10177_v63, %v10175_v7  ;;  %v14441_v7 = vpack.c.bf16 %v10205_v9, %v10203_v24  ;;  %v7852_v63 = vld [vmem:[#allocation3 + $0x10] sm:$0x1]  ;;  %v10235_v9 = vld [vmem:[%s20214_s5 + $0x5c0] sm:$0xff] }
 0x633   :  { %14356 = vmatprep.subr.bf16.mxu1 %v14355_v38  ;;  %v14385_v38 = vpack.c.bf16 %v10149_v29, %v10147_v50  ;;  %v10179_v29 = vld [vmem:[%s20214_s5 + $0x400] sm:$0xff] }
 0x634   :  { %v7651_v10 = vsel %vm7451_vm4, %v7650_v16, %v7613_v35  ;;  %v10181_v16 = vld [vmem:[%s20214_s5 + $0x410] sm:$0xff]  ;;  %v10186_v35 = vld [vmem:[%s20214_s5 + $0x438] sm:$0xff] }
 0x636   :  { %14358 = vmatpush1.bf16.msra.mxu1 %v14357_v48  ;;  %v10158_v48 = vld [vmem:[%s20214_s5 + $0x358] sm:$0xff] }
 0x637   :  { %14360 = vmatprep.subr.bf16.mxu1 %v14359_v57  ;;  %v14389_v57 = vpack.c.bf16 %v10153_v18, %v10151_v53  ;;  %v14391_v15 = vpack.c.bf16 %v10158_v48, %v10156_v25  ;;  %v14419_v53 = vpack.c.bf16 %v10186_v35, %v10184_v52  ;;  %v10183_v18 = vld [vmem:[%s20214_s5 + $0x420] sm:$0xff]  ;;  %v10188_v48 = vld [vmem:[%s20214_s5 + $0x448] sm:$0xff] }
 0x638   :  { %v10216_v35 = vld [vmem:[%s20214_s5 + $0x528] sm:$0xff] }
 0x63a   :  { %14362 = vmatpush1.bf16.msra.mxu1 %v14361_v44  ;;  %v10162_v44 = vld [vmem:[%s20214_s5 + $0x378] sm:$0xff] }
 0x63b   :  { %14364 = vmatprep.subr.bf16.mxu1 %v14363_v12  ;;  %v14393_v12 = vpack.c.bf16 %v10157_v21, %v10155_v32  ;;  %v14395_v20 = vpack.c.bf16 %v10162_v44, %v10160_v3  ;;  %v10187_v21 = vld [vmem:[%s20214_s5 + $0x440] sm:$0xff]  ;;  %v10189_v3 = vld [vmem:[%s20214_s5 + $0x450] sm:$0xff]  ;;  %v10192_v44 = vld [vmem:[%s20214_s5 + $0x468] sm:$0xff] }
 0x63e   :  { %14366 = vmatpush1.bf16.msra.mxu1 %v14365_v46  ;;  %v10166_v46 = vld [vmem:[%s20214_s5 + $0x398] sm:$0xff] }
 0x63f   :  { %14368 = vmatprep.subr.bf16.mxu1 %v14367_v40  ;;  %v14397_v40 = vpack.c.bf16 %v10161_v22, %v10159_v8  ;;  %v14399_v49 = vpack.c.bf16 %v10166_v46, %v10164_v28  ;;  %v10191_v22 = vld [vmem:[%s20214_s5 + $0x460] sm:$0xff]  ;;  %v10193_v28 = vld [vmem:[%s20214_s5 + $0x470] sm:$0xff]  ;;  %v10196_v46 = vld [vmem:[%s20214_s5 + $0x488] sm:$0xff] }
 0x642   :  { %14370 = vmatpush1.bf16.msra.mxu1 %v14369_v47  ;;  %v10170_v47 = vld [vmem:[%s20214_s5 + $0x3b8] sm:$0xff] }
 0x643   :  { %14372 = vmatprep.subr.bf16.mxu1 %v14371_v30  ;;  %v14401_v30 = vpack.c.bf16 %v10165_v31, %v10163_v61  ;;  %v14403_v1 = vpack.c.bf16 %v10170_v47, %v10168_v14  ;;  %v10195_v31 = vld [vmem:[%s20214_s5 + $0x480] sm:$0xff]  ;;  %v10197_v14 = vld [vmem:[%s20214_s5 + $0x490] sm:$0xff]  ;;  %v10200_v47 = vld [vmem:[%s20214_s5 + $0x4a8] sm:$0xff] }
 0x646   :  { %14374 = vmatpush1.bf16.msra.mxu1 %v14373_v55  ;;  %v7735_v55 = vld [vmem:[#allocation3 + $0x4f] sm:$0x1] }
 0x647   :  { %14376 = vmatprep.subr.bf16.mxu1 %v14375_v17  ;;  %v14405_v17 = vpack.c.bf16 %v10169_v0, %v10167_v41  ;;  %v10199_v0 = vld [vmem:[%s20214_s5 + $0x4a0] sm:$0xff] }
 0x64a   :  { %14378 = vmatpush1.bf16.msra.mxu1 %v14377_v27  ;;  %v7737_v27 = vmax.f32 %v7733_v13, %v7735_v55  ;;  %v7855_v13 = vld [vmem:[#allocation3 + $0x51] sm:$0x1]  ;;  %v7860_v55 = vld [vmem:[#allocation3 + $0x58] sm:$0x1] }
 0x64b   :  { %14380 = vmatprep.subr.bf16.mxu1 %v14379_v60  ;;  %v7726_v60 = vld [vmem:[#allocation3 + $0x6] sm:$0x1] }
 0x64c   :  { %v7739_v42 = vmax.f32 %v7731_v5, %v7737_v27  ;;  %v7730_v26 = vmax.f32 %v7726_v60, %v7728_v11  ;;  %v10210_v5 = vld [vmem:[%s20214_s5 + $0x4f8] sm:$0xff]  ;;  %v7857_v27 = vmax.f32 %v7853_v4, %v7855_v13  ;;  %v7854_v60 = vld [vmem:[#allocation3 + $0x11] sm:$0x1]  ;;  %v7979_v13 = vld [vmem:[#allocation3 + $0x52] sm:$0x1] }
 0x64d   :  { %v14443_v11 = vpack.c.bf16 %v10210_v5, %v10208_v56  ;;  %v10238_v4 = vld [vmem:[%s20214_s5 + $0x5d8] sm:$0xff]  ;;  %v10237_v56 = vld [vmem:[%s20214_s5 + $0x5d0] sm:$0xff]  ;;  %v10240_v5 = vld [vmem:[%s20214_s5 + $0x5e8] sm:$0xff] }
 0x64e   :  { %14382 = vmatpush1.bf16.msra.mxu1 %v14381_v34  ;;  %v10182_v34 = vld [vmem:[%s20214_s5 + $0x418] sm:$0xff]  ;;  %v7775_v43 = vrot.slane %v7739_v42, 7  ;;  %v14471_v24 = vpack.c.bf16 %v10238_v4, %v10236_v37  ;;  %v10265_v37 = vld [vmem:[%s20214_s5 + $0x6b0] sm:$0xff]  ;;  %v10268_v4 = vld [vmem:[%s20214_s5 + $0x6c8] sm:$0xff] }
 0x64f   :  { %14384 = vmatprep.subr.bf16.mxu1 %v14383_v19  ;;  %v7736_v19 = vmax.f32 %v7732_v36, %v7734_v62  ;;  %v14415_v50 = vpack.c.bf16 %v10182_v34, %v10180_v58  ;;  %v10207_v36 = vld [vmem:[%s20214_s5 + $0x4e0] sm:$0xff]  ;;  %v10209_v62 = vld [vmem:[%s20214_s5 + $0x4f0] sm:$0xff]  ;;  %v7861_v42 = vld [vmem:[#allocation3 + $0x19] sm:$0x1] }
 0x650   :  { %v10212_v34 = vld [vmem:[%s20214_s5 + $0x508] sm:$0xff] }
 0x651   :  { %7718 = vmatmul.mubr.f32.vlgmr.msra.gmra.mrb[166].mxu1 %v7651_v10  ;;  %v10185_v10 = vld [vmem:[%s20214_s5 + $0x430] sm:$0xff] }
 0x652   :  { %14386 = vmatpush1.bf16.msra.mxu1 %v14385_v38  ;;  %7842 = vmatprep.mubr.f32.mxu1 %v15283_v2  ;;  %v7738_v38 = vmax.f32 %v7730_v26, %v7736_v19  ;;  %v14445_v26 = vpack.c.bf16 %v10209_v62, %v10207_v36  ;;  %v7856_v19 = vmax.f32 %v7852_v63, %v7854_v60  ;;  %v7978_v60 = vld [vmem:[#allocation3 + $0x12] sm:$0x1]  ;;  %v10239_v62 = vld [vmem:[%s20214_s5 + $0x5e0] sm:$0xff] }
 0x653   :  { %14388 = vmatprep.subr.bf16.mxu1 %v14387_v39  ;;  %v14417_v39 = vpack.c.bf16 %v10181_v16, %v10179_v29  ;;  %v10211_v16 = vld [vmem:[%s20214_s5 + $0x500] sm:$0xff]  ;;  %v14473_v63 = vpack.c.bf16 %v10237_v56, %v10235_v9 }
 0x654   :  { %v7776_v25 = vsel %vm7451_vm4, %v7775_v43, %v7738_v38  ;;  %v10213_v43 = vld [vmem:[%s20214_s5 + $0x510] sm:$0xff]  ;;  %v10218_v38 = vld [vmem:[%s20214_s5 + $0x538] sm:$0xff]  ;;  %v10267_v56 = vld [vmem:[%s20214_s5 + $0x6c0] sm:$0xff] }
 0x656   :  { %14390 = vmatpush1.bf16.msra.mxu1 %v14389_v57  ;;  %v10190_v57 = vld [vmem:[%s20214_s5 + $0x458] sm:$0xff] }
 0x657   :  { %14392 = vmatprep.subr.bf16.mxu1 %v14391_v15  ;;  %v14421_v15 = vpack.c.bf16 %v10185_v10, %v10183_v18  ;;  %v14423_v32 = vpack.c.bf16 %v10190_v57, %v10188_v48  ;;  %v14451_v18 = vpack.c.bf16 %v10218_v38, %v10216_v35  ;;  %v10215_v10 = vld [vmem:[%s20214_s5 + $0x520] sm:$0xff]  ;;  %v10220_v57 = vld [vmem:[%s20214_s5 + $0x548] sm:$0xff] }
 0x658   :  { %v10248_v38 = vld [vmem:[%s20214_s5 + $0x628] sm:$0xff] }
 0x65a   :  { %14394 = vmatpush1.bf16.msra.mxu1 %v14393_v12  ;;  %v10194_v12 = vld [vmem:[%s20214_s5 + $0x478] sm:$0xff] }
 0x65b   :  { %14396 = vmatprep.subr.bf16.mxu1 %v14395_v20  ;;  %v14425_v20 = vpack.c.bf16 %v10189_v3, %v10187_v21  ;;  %v14427_v8 = vpack.c.bf16 %v10194_v12, %v10192_v44  ;;  %v10219_v3 = vld [vmem:[%s20214_s5 + $0x540] sm:$0xff]  ;;  %v10221_v44 = vld [vmem:[%s20214_s5 + $0x550] sm:$0xff]  ;;  %v10224_v12 = vld [vmem:[%s20214_s5 + $0x568] sm:$0xff] }
 0x65e   :  { %14398 = vmatpush1.bf16.msra.mxu1 %v14397_v40  ;;  %v10198_v40 = vld [vmem:[%s20214_s5 + $0x498] sm:$0xff] }
 0x65f   :  { %14400 = vmatprep.subr.bf16.mxu1 %v14399_v49  ;;  %v14429_v49 = vpack.c.bf16 %v10193_v28, %v10191_v22  ;;  %v14431_v61 = vpack.c.bf16 %v10198_v40, %v10196_v46  ;;  %v10223_v28 = vld [vmem:[%s20214_s5 + $0x560] sm:$0xff]  ;;  %v10225_v46 = vld [vmem:[%s20214_s5 + $0x570] sm:$0xff]  ;;  %v10228_v40 = vld [vmem:[%s20214_s5 + $0x588] sm:$0xff] }
 0x662   :  { %14402 = vmatpush1.bf16.msra.mxu1 %v14401_v30  ;;  %v10202_v30 = vld [vmem:[%s20214_s5 + $0x4b8] sm:$0xff] }
 0x663   :  { %14404 = vmatprep.subr.bf16.mxu1 %v14403_v1  ;;  %v14433_v1 = vpack.c.bf16 %v10197_v14, %v10195_v31  ;;  %v14435_v41 = vpack.c.bf16 %v10202_v30, %v10200_v47  ;;  %v10227_v14 = vld [vmem:[%s20214_s5 + $0x580] sm:$0xff]  ;;  %v10229_v47 = vld [vmem:[%s20214_s5 + $0x590] sm:$0xff]  ;;  %v10232_v30 = vld [vmem:[%s20214_s5 + $0x5a8] sm:$0xff] }
 0x666   :  { %14406 = vmatpush1.bf16.msra.mxu1 %v14405_v17  ;;  %v7862_v17 = vld [vmem:[#allocation3 + $0x59] sm:$0x1] }
 0x667   :  { %14408 = vmatprep.subr.bf16.mxu1 %v14407_v59  ;;  %v14437_v59 = vpack.c.bf16 %v10201_v54, %v10199_v0  ;;  %v10231_v54 = vld [vmem:[%s20214_s5 + $0x5a0] sm:$0xff] }
 0x66a   :  { %14410 = vmatpush1.bf16.msra.mxu1 %v14409_v6  ;;  %v7864_v6 = vmax.f32 %v7860_v55, %v7862_v17  ;;  %v7981_v55 = vld [vmem:[#allocation3 + $0x53] sm:$0x1]  ;;  %v7985_v17 = vld [vmem:[#allocation3 + $0x5a] sm:$0x1] }
 0x66b   :  { %14412 = vmatprep.subr.bf16.mxu1 %v14411_v45  ;;  %v7859_v45 = vld [vmem:[#allocation3 + $0x18] sm:$0x1] }
 0x66c   :  { %v7866_v58 = vmax.f32 %v7857_v27, %v7864_v6  ;;  %v10242_v27 = vld [vmem:[%s20214_s5 + $0x5f8] sm:$0xff]  ;;  %v7983_v6 = vmax.f32 %v7979_v13, %v7981_v55  ;;  %v8104_v55 = vld [vmem:[#allocation3 + $0x54] sm:$0x1] }
 0x66d   :  { %v14475_v36 = vpack.c.bf16 %v10242_v27, %v10240_v5  ;;  %v10270_v13 = vld [vmem:[%s20214_s5 + $0x6d8] sm:$0xff]  ;;  %v10269_v5 = vld [vmem:[%s20214_s5 + $0x6d0] sm:$0xff]  ;;  %v10272_v27 = vld [vmem:[%s20214_s5 + $0x6e8] sm:$0xff] }
 0x66e   :  { %14414 = vmatpush1.bf16.msra.mxu1 %v14413_v33  ;;  %v10214_v33 = vld [vmem:[%s20214_s5 + $0x518] sm:$0xff]  ;;  %v7902_v52 = vrot.slane %v7866_v58, 7  ;;  %v14503_v9 = vpack.c.bf16 %v10270_v13, %v10268_v4  ;;  %v10297_v4 = vld [vmem:[%s20214_s5 + $0x7b0] sm:$0xff]  ;;  %v10300_v13 = vld [vmem:[%s20214_s5 + $0x7c8] sm:$0xff] }
 0x66f   :  { %14416 = vmatprep.subr.bf16.mxu1 %v14415_v50  ;;  %v7863_v50 = vmax.f32 %v7859_v45, %v7861_v42  ;;  %v14447_v29 = vpack.c.bf16 %v10214_v33, %v10212_v34  ;;  %v7980_v45 = vld [vmem:[#allocation3 + $0x13] sm:$0x1]  ;;  %v7986_v58 = vld [vmem:[#allocation3 + $0x1b] sm:$0x1]  ;;  %v10244_v33 = vld [vmem:[%s20214_s5 + $0x608] sm:$0xff] }
 0x670   :  { %v10241_v42 = vld [vmem:[%s20214_s5 + $0x5f0] sm:$0xff] }
 0x671   :  { %7843 = vmatmul.mubr.f32.vlgmr.msra.gmra.mrb[166].mxu1 %v7776_v25  ;;  %v10217_v25 = vld [vmem:[%s20214_s5 + $0x530] sm:$0xff] }
 0x672   :  { %14418 = vmatpush1.bf16.msra.mxu1 %v14417_v39  ;;  %7969 = vmatprep.mubr.f32.mxu1 %v15283_v2  ;;  %v7865_v39 = vmax.f32 %v7856_v19, %v7863_v50  ;;  %v14477_v19 = vpack.c.bf16 %v10241_v42, %v10239_v62  ;;  %v7982_v50 = vmax.f32 %v7978_v60, %v7980_v45  ;;  %v8103_v45 = vld [vmem:[#allocation3 + $0x14] sm:$0x1]  ;;  %v10271_v42 = vld [vmem:[%s20214_s5 + $0x6e0] sm:$0xff] }
 0x673   :  { %14420 = vmatprep.subr.bf16.mxu1 %v14419_v53  ;;  %v14449_v53 = vpack.c.bf16 %v10213_v43, %v10211_v16  ;;  %v10243_v43 = vld [vmem:[%s20214_s5 + $0x600] sm:$0xff]  ;;  %v14505_v60 = vpack.c.bf16 %v10269_v5, %v10267_v56 }
 0x674   :  { %v7903_v48 = vsel %vm7451_vm4, %v7902_v52, %v7865_v39  ;;  %v10245_v52 = vld [vmem:[%s20214_s5 + $0x610] sm:$0xff]  ;;  %v10250_v39 = vld [vmem:[%s20214_s5 + $0x638] sm:$0xff]  ;;  %v10299_v5 = vld [vmem:[%s20214_s5 + $0x7c0] sm:$0xff] }
 0x676   :  { %14422 = vmatpush1.bf16.msra.mxu1 %v14421_v15  ;;  %v10222_v15 = vld [vmem:[%s20214_s5 + $0x558] sm:$0xff] }
 0x677   :  { %14424 = vmatprep.subr.bf16.mxu1 %v14423_v32  ;;  %v14453_v32 = vpack.c.bf16 %v10217_v25, %v10215_v10  ;;  %v14455_v21 = vpack.c.bf16 %v10222_v15, %v10220_v57  ;;  %v14483_v10 = vpack.c.bf16 %v10250_v39, %v10248_v38  ;;  %v10247_v25 = vld [vmem:[%s20214_s5 + $0x620] sm:$0xff]  ;;  %v10252_v15 = vld [vmem:[%s20214_s5 + $0x648] sm:$0xff] }
 0x678   :  { %v10280_v39 = vld [vmem:[%s20214_s5 + $0x728] sm:$0xff] }
 0x67a   :  { %14426 = vmatpush1.bf16.msra.mxu1 %v14425_v20  ;;  %v10226_v20 = vld [vmem:[%s20214_s5 + $0x578] sm:$0xff] }
 0x67b   :  { %14428 = vmatprep.subr.bf16.mxu1 %v14427_v8  ;;  %v14457_v8 = vpack.c.bf16 %v10221_v44, %v10219_v3  ;;  %v14459_v22 = vpack.c.bf16 %v10226_v20, %v10224_v12  ;;  %v10251_v44 = vld [vmem:[%s20214_s5 + $0x640] sm:$0xff]  ;;  %v10253_v12 = vld [vmem:[%s20214_s5 + $0x650] sm:$0xff]  ;;  %v10256_v20 = vld [vmem:[%s20214_s5 + $0x668] sm:$0xff] }
 0x67e   :  { %14430 = vmatpush1.bf16.msra.mxu1 %v14429_v49  ;;  %v10230_v49 = vld [vmem:[%s20214_s5 + $0x598] sm:$0xff] }
 0x67f   :  { %14432 = vmatprep.subr.bf16.mxu1 %v14431_v61  ;;  %v14461_v61 = vpack.c.bf16 %v10225_v46, %v10223_v28  ;;  %v14463_v31 = vpack.c.bf16 %v10230_v49, %v10228_v40  ;;  %v10255_v46 = vld [vmem:[%s20214_s5 + $0x660] sm:$0xff]  ;;  %v10257_v40 = vld [vmem:[%s20214_s5 + $0x670] sm:$0xff]  ;;  %v10260_v49 = vld [vmem:[%s20214_s5 + $0x688] sm:$0xff] }
 0x682   :  { %14434 = vmatpush1.bf16.msra.mxu1 %v14433_v1  ;;  %v10234_v1 = vld [vmem:[%s20214_s5 + $0x5b8] sm:$0xff] }
 0x683   :  { %14436 = vmatprep.subr.bf16.mxu1 %v14435_v41  ;;  %v14465_v41 = vpack.c.bf16 %v10229_v47, %v10227_v14  ;;  %v14467_v0 = vpack.c.bf16 %v10234_v1, %v10232_v30  ;;  %v10259_v47 = vld [vmem:[%s20214_s5 + $0x680] sm:$0xff]  ;;  %v10261_v30 = vld [vmem:[%s20214_s5 + $0x690] sm:$0xff]  ;;  %v10264_v1 = vld [vmem:[%s20214_s5 + $0x6a8] sm:$0xff] }
 0x686   :  { %14438 = vmatpush1.bf16.msra.mxu1 %v14437_v59  ;;  %v7987_v59 = vld [vmem:[#allocation3 + $0x5b] sm:$0x1] }
 0x687   :  { %14440 = vmatprep.subr.bf16.mxu1 %v14439_v51  ;;  %v14469_v51 = vpack.c.bf16 %v10233_v23, %v10231_v54  ;;  %v10263_v23 = vld [vmem:[%s20214_s5 + $0x6a0] sm:$0xff] }
 0x68a   :  { %14442 = vmatpush1.bf16.msra.mxu1 %v14441_v7  ;;  %v7989_v7 = vmax.f32 %v7985_v17, %v7987_v59  ;;  %v8106_v17 = vld [vmem:[#allocation3 + $0x55] sm:$0x1]  ;;  %v8110_v59 = vld [vmem:[#allocation3 + $0x5c] sm:$0x1] }
 0x68b   :  { %14444 = vmatprep.subr.bf16.mxu1 %v14443_v11  ;;  %v7984_v11 = vld [vmem:[#allocation3 + $0x1a] sm:$0x1] }
 0x68c   :  { %v7991_v34 = vmax.f32 %v7983_v6, %v7989_v7  ;;  %v10274_v6 = vld [vmem:[%s20214_s5 + $0x6f8] sm:$0xff]  ;;  %v8108_v7 = vmax.f32 %v8104_v55, %v8106_v17  ;;  %v8229_v17 = vld [vmem:[#allocation3 + $0x56] sm:$0x1] }
 0x68d   :  { %v14507_v62 = vpack.c.bf16 %v10274_v6, %v10272_v27  ;;  %v10302_v55 = vld [vmem:[%s20214_s5 + $0x7d8] sm:$0xff]  ;;  %v10301_v27 = vld [vmem:[%s20214_s5 + $0x7d0] sm:$0xff]  ;;  %v10304_v6 = vld [vmem:[%s20214_s5 + $0x7e8] sm:$0xff] }
 0x68e   :  { %14446 = vmatpush1.bf16.msra.mxu1 %v14445_v26  ;;  %v10246_v26 = vld [vmem:[%s20214_s5 + $0x618] sm:$0xff]  ;;  %v8027_v35 = vrot.slane %v7991_v34, 7  ;;  %v14535_v56 = vpack.c.bf16 %v10302_v55, %v10300_v13  ;;  %v10329_v13 = vld [vmem:[%s20214_s5 + $0x8b0] sm:$0xff]  ;;  %v10332_v55 = vld [vmem:[%s20214_s5 + $0x8c8] sm:$0xff] }
 0x68f   :  { %14448 = vmatprep.subr.bf16.mxu1 %v14447_v29  ;;  %v7988_v29 = vmax.f32 %v7984_v11, %v7986_v58  ;;  %v14479_v16 = vpack.c.bf16 %v10246_v26, %v10244_v33  ;;  %v8105_v11 = vld [vmem:[#allocation3 + $0x15] sm:$0x1]  ;;  %v8111_v34 = vld [vmem:[#allocation3 + $0x1d] sm:$0x1]  ;;  %v10276_v26 = vld [vmem:[%s20214_s5 + $0x708] sm:$0xff] }
 0x690   :  { %v10273_v58 = vld [vmem:[%s20214_s5 + $0x6f0] sm:$0xff] }
 0x691   :  { %7970 = vmatmul.mubr.f32.vlgmr.msra.gmra.mrb[166].mxu1 %v7903_v48  ;;  %v10249_v48 = vld [vmem:[%s20214_s5 + $0x630] sm:$0xff] }
 0x692   :  { %14450 = vmatpush1.bf16.msra.mxu1 %v14449_v53  ;;  %8094 = vmatprep.mubr.f32.mxu1 %v15283_v2  ;;  %v7990_v53 = vmax.f32 %v7982_v50, %v7988_v29  ;;  %v14509_v50 = vpack.c.bf16 %v10273_v58, %v10271_v42  ;;  %v8107_v29 = vmax.f32 %v8103_v45, %v8105_v11  ;;  %v8228_v11 = vld [vmem:[#allocation3 + $0x16] sm:$0x1]  ;;  %v10303_v58 = vld [vmem:[%s20214_s5 + $0x7e0] sm:$0xff] }
 0x693   :  { %14452 = vmatprep.subr.bf16.mxu1 %v14451_v18  ;;  %v14481_v18 = vpack.c.bf16 %v10245_v52, %v10243_v43  ;;  %v10275_v52 = vld [vmem:[%s20214_s5 + $0x700] sm:$0xff]  ;;  %v14537_v45 = vpack.c.bf16 %v10301_v27, %v10299_v5 }
 0x694   :  { %v8028_v57 = vsel %vm7451_vm4, %v8027_v35, %v7990_v53  ;;  %v10277_v35 = vld [vmem:[%s20214_s5 + $0x710] sm:$0xff]  ;;  %v10282_v53 = vld [vmem:[%s20214_s5 + $0x738] sm:$0xff]  ;;  %v10331_v27 = vld [vmem:[%s20214_s5 + $0x8c0] sm:$0xff] }
 0x696   :  { %14454 = vmatpush1.bf16.msra.mxu1 %v14453_v32  ;;  %v10254_v32 = vld [vmem:[%s20214_s5 + $0x658] sm:$0xff] }
 0x697   :  { %14456 = vmatprep.subr.bf16.mxu1 %v14455_v21  ;;  %v14485_v21 = vpack.c.bf16 %v10249_v48, %v10247_v25  ;;  %v14487_v3 = vpack.c.bf16 %v10254_v32, %v10252_v15  ;;  %v14515_v25 = vpack.c.bf16 %v10282_v53, %v10280_v39  ;;  %v10279_v48 = vld [vmem:[%s20214_s5 + $0x720] sm:$0xff]  ;;  %v10284_v32 = vld [vmem:[%s20214_s5 + $0x748] sm:$0xff] }
 0x698   :  { %v10312_v53 = vld [vmem:[%s20214_s5 + $0x828] sm:$0xff] }
 0x69a   :  { %14458 = vmatpush1.bf16.msra.mxu1 %v14457_v8  ;;  %v10258_v8 = vld [vmem:[%s20214_s5 + $0x678] sm:$0xff] }
 0x69b   :  { %14460 = vmatprep.subr.bf16.mxu1 %v14459_v22  ;;  %v14489_v22 = vpack.c.bf16 %v10253_v12, %v10251_v44  ;;  %v14491_v28 = vpack.c.bf16 %v10258_v8, %v10256_v20  ;;  %v10283_v12 = vld [vmem:[%s20214_s5 + $0x740] sm:$0xff]  ;;  %v10285_v20 = vld [vmem:[%s20214_s5 + $0x750] sm:$0xff]  ;;  %v10288_v8 = vld [vmem:[%s20214_s5 + $0x768] sm:$0xff] }
 0x69e   :  { %14462 = vmatpush1.bf16.msra.mxu1 %v14461_v61  ;;  %v10262_v61 = vld [vmem:[%s20214_s5 + $0x698] sm:$0xff] }
 0x69f   :  { %14464 = vmatprep.subr.bf16.mxu1 %v14463_v31  ;;  %v14493_v31 = vpack.c.bf16 %v10257_v40, %v10255_v46  ;;  %v14495_v14 = vpack.c.bf16 %v10262_v61, %v10260_v49  ;;  %v10287_v40 = vld [vmem:[%s20214_s5 + $0x760] sm:$0xff]  ;;  %v10289_v49 = vld [vmem:[%s20214_s5 + $0x770] sm:$0xff]  ;;  %v10292_v61 = vld [vmem:[%s20214_s5 + $0x788] sm:$0xff] }
 0x6a2   :  { %14466 = vmatpush1.bf16.msra.mxu1 %v14465_v41  ;;  %v10266_v41 = vld [vmem:[%s20214_s5 + $0x6b8] sm:$0xff] }
 0x6a3   :  { %14468 = vmatprep.subr.bf16.mxu1 %v14467_v0  ;;  %v14497_v0 = vpack.c.bf16 %v10261_v30, %v10259_v47  ;;  %v14499_v54 = vpack.c.bf16 %v10266_v41, %v10264_v1  ;;  %v10291_v30 = vld [vmem:[%s20214_s5 + $0x780] sm:$0xff]  ;;  %v10293_v1 = vld [vmem:[%s20214_s5 + $0x790] sm:$0xff]  ;;  %v10296_v41 = vld [vmem:[%s20214_s5 + $0x7a8] sm:$0xff] }
 0x6a6   :  { %14470 = vmatpush1.bf16.msra.mxu1 %v14469_v51  ;;  %v8112_v51 = vld [vmem:[#allocation3 + $0x5d] sm:$0x1] }
 0x6a7   :  { %14472 = vmatprep.subr.bf16.mxu1 %v14471_v24  ;;  %v14501_v24 = vpack.c.bf16 %v10265_v37, %v10263_v23  ;;  %v10295_v37 = vld [vmem:[%s20214_s5 + $0x7a0] sm:$0xff] }
 0x6aa   :  { %14474 = vmatpush1.bf16.msra.mxu1 %v14473_v63  ;;  %v8114_v63 = vmax.f32 %v8110_v59, %v8112_v51  ;;  %v8231_v59 = vld [vmem:[#allocation3 + $0x57] sm:$0x1]  ;;  %v8235_v51 = vld [vmem:[#allocation3 + $0x5e] sm:$0x1] }
 0x6ab   :  { %14476 = vmatprep.subr.bf16.mxu1 %v14475_v36  ;;  %v8109_v36 = vld [vmem:[#allocation3 + $0x1c] sm:$0x1] }
 0x6ac   :  { %v8116_v33 = vmax.f32 %v8108_v7, %v8114_v63  ;;  %v10306_v7 = vld [vmem:[%s20214_s5 + $0x7f8] sm:$0xff]  ;;  %v8233_v63 = vmax.f32 %v8229_v17, %v8231_v59  ;;  %v8355_v59 = vld [vmem:[#allocation3 + $0x60] sm:$0x1] }
 0x6ad   :  { %v14539_v42 = vpack.c.bf16 %v10306_v7, %v10304_v6  ;;  %v10334_v17 = vld [vmem:[%s20214_s5 + $0x8d8] sm:$0xff]  ;;  %v10333_v6 = vld [vmem:[%s20214_s5 + $0x8d0] sm:$0xff]  ;;  %v10336_v7 = vld [vmem:[%s20214_s5 + $0x8e8] sm:$0xff] }
 0x6ae   :  { %14478 = vmatpush1.bf16.msra.mxu1 %v14477_v19  ;;  %v10278_v19 = vld [vmem:[%s20214_s5 + $0x718] sm:$0xff]  ;;  %v8152_v38 = vrot.slane %v8116_v33, 7  ;;  %v14567_v5 = vpack.c.bf16 %v10334_v17, %v10332_v55  ;;  %v10361_v55 = vld [vmem:[%s20214_s5 + $0x9b0] sm:$0xff]  ;;  %v10364_v17 = vld [vmem:[%s20214_s5 + $0x9c8] sm:$0xff] }
 0x6af   :  { %14480 = vmatprep.subr.bf16.mxu1 %v14479_v16  ;;  %v8113_v16 = vmax.f32 %v8109_v36, %v8111_v34  ;;  %v14511_v43 = vpack.c.bf16 %v10278_v19, %v10276_v26  ;;  %v8230_v36 = vld [vmem:[#allocation3 + $0x17] sm:$0x1]  ;;  %v8236_v33 = vld [vmem:[#allocation3 + $0x1f] sm:$0x1]  ;;  %v10308_v19 = vld [vmem:[%s20214_s5 + $0x808] sm:$0xff] }
 0x6b0   :  { %v10305_v34 = vld [vmem:[%s20214_s5 + $0x7f0] sm:$0xff] }
 0x6b1   :  { %8095 = vmatmul.mubr.f32.vlgmr.msra.gmra.mrb[166].mxu1 %v8028_v57  ;;  %v10281_v57 = vld [vmem:[%s20214_s5 + $0x730] sm:$0xff] }
 0x6b2   :  { %14482 = vmatpush1.bf16.msra.mxu1 %v14481_v18  ;;  %8219 = vmatprep.mubr.f32.mxu1 %v15283_v2  ;;  %v8115_v18 = vmax.f32 %v8107_v29, %v8113_v16  ;;  %v14541_v29 = vpack.c.bf16 %v10305_v34, %v10303_v58  ;;  %v8232_v16 = vmax.f32 %v8228_v11, %v8230_v36  ;;  %v8354_v36 = vld [vmem:[#allocation3 + $0x20] sm:$0x1] }
 0x6b3   :  { %14484 = vmatprep.subr.bf16.mxu1 %v14483_v10  ;;  %v14513_v10 = vpack.c.bf16 %v10277_v35, %v10275_v52  ;;  %v10307_v35 = vld [vmem:[%s20214_s5 + $0x800] sm:$0xff]  ;;  %v14569_v11 = vpack.c.bf16 %v10333_v6, %v10331_v27 }
 0x6b4   :  { %v8153_v15 = vsel %vm7451_vm4, %v8152_v38, %v8115_v18  ;;  %v10309_v38 = vld [vmem:[%s20214_s5 + $0x810] sm:$0xff]  ;;  %v10314_v18 = vld [vmem:[%s20214_s5 + $0x838] sm:$0xff]  ;;  %v10335_v34 = vld [vmem:[%s20214_s5 + $0x8e0] sm:$0xff] }
 0x6b5   :  { %v10363_v6 = vld [vmem:[%s20214_s5 + $0x9c0] sm:$0xff] }
 0x6b6   :  { %14486 = vmatpush1.bf16.msra.mxu1 %v14485_v21  ;;  %v10286_v21 = vld [vmem:[%s20214_s5 + $0x758] sm:$0xff] }
 0x6b7   :  { %14488 = vmatprep.subr.bf16.mxu1 %v14487_v3  ;;  %v14517_v3 = vpack.c.bf16 %v10281_v57, %v10279_v48  ;;  %v14519_v44 = vpack.c.bf16 %v10286_v21, %v10284_v32  ;;  %v14547_v48 = vpack.c.bf16 %v10314_v18, %v10312_v53  ;;  %v10311_v57 = vld [vmem:[%s20214_s5 + $0x820] sm:$0xff]  ;;  %v10316_v21 = vld [vmem:[%s20214_s5 + $0x848] sm:$0xff] }
 0x6b8   :  { %v10344_v18 = vld [vmem:[%s20214_s5 + $0x928] sm:$0xff] }
 0x6ba   :  { %14490 = vmatpush1.bf16.msra.mxu1 %v14489_v22  ;;  %v10290_v22 = vld [vmem:[%s20214_s5 + $0x778] sm:$0xff] }
 0x6bb   :  { %14492 = vmatprep.subr.bf16.mxu1 %v14491_v28  ;;  %v14521_v28 = vpack.c.bf16 %v10285_v20, %v10283_v12  ;;  %v14523_v46 = vpack.c.bf16 %v10290_v22, %v10288_v8  ;;  %v10315_v20 = vld [vmem:[%s20214_s5 + $0x840] sm:$0xff]  ;;  %v10317_v8 = vld [vmem:[%s20214_s5 + $0x850] sm:$0xff]  ;;  %v10320_v22 = vld [vmem:[%s20214_s5 + $0x868] sm:$0xff] }
 0x6be   :  { %14494 = vmatpush1.bf16.msra.mxu1 %v14493_v31  ;;  %v10294_v31 = vld [vmem:[%s20214_s5 + $0x798] sm:$0xff] }
 0x6bf   :  { %14496 = vmatprep.subr.bf16.mxu1 %v14495_v14  ;;  %v14525_v14 = vpack.c.bf16 %v10289_v49, %v10287_v40  ;;  %v14527_v47 = vpack.c.bf16 %v10294_v31, %v10292_v61  ;;  %v10319_v49 = vld [vmem:[%s20214_s5 + $0x860] sm:$0xff]  ;;  %v10321_v61 = vld [vmem:[%s20214_s5 + $0x870] sm:$0xff]  ;;  %v10324_v31 = vld [vmem:[%s20214_s5 + $0x888] sm:$0xff] }
 0x6c2   :  { %14498 = vmatpush1.bf16.msra.mxu1 %v14497_v0  ;;  %v10298_v0 = vld [vmem:[%s20214_s5 + $0x7b8] sm:$0xff] }
 0x6c3   :  { %14500 = vmatprep.subr.bf16.mxu1 %v14499_v54  ;;  %v14529_v54 = vpack.c.bf16 %v10293_v1, %v10291_v30  ;;  %v14531_v23 = vpack.c.bf16 %v10298_v0, %v10296_v41  ;;  %v10323_v1 = vld [vmem:[%s20214_s5 + $0x880] sm:$0xff]  ;;  %v10325_v41 = vld [vmem:[%s20214_s5 + $0x890] sm:$0xff]  ;;  %v10328_v0 = vld [vmem:[%s20214_s5 + $0x8a8] sm:$0xff] }
 0x6c6   :  { %14502 = vmatpush1.bf16.msra.mxu1 %v14501_v24  ;;  %v8237_v24 = vld [vmem:[#allocation3 + $0x5f] sm:$0x1] }
 0x6c7   :  { %14504 = vmatprep.subr.bf16.mxu1 %v14503_v9  ;;  %v14533_v9 = vpack.c.bf16 %v10297_v4, %v10295_v37  ;;  %v10327_v4 = vld [vmem:[%s20214_s5 + $0x8a0] sm:$0xff] }
 0x6ca   :  { %14506 = vmatpush1.bf16.msra.mxu1 %v14505_v60  ;;  %v8239_v60 = vmax.f32 %v8235_v51, %v8237_v24  ;;  %v8357_v51 = vld [vmem:[#allocation3 + $0x61] sm:$0x1]  ;;  %v8362_v24 = vld [vmem:[#allocation3 + $0x68] sm:$0x1] }
 0x6cb   :  { %14508 = vmatprep.subr.bf16.mxu1 %v14507_v62  ;;  %v8234_v62 = vld [vmem:[#allocation3 + $0x1e] sm:$0x1] }
 0x6cc   :  { %v8241_v26 = vmax.f32 %v8233_v63, %v8239_v60  ;;  %v10338_v63 = vld [vmem:[%s20214_s5 + $0x8f8] sm:$0xff]  ;;  %v8359_v60 = vmax.f32 %v8355_v59, %v8357_v51  ;;  %v8481_v51 = vld [vmem:[#allocation3 + $0x62] sm:$0x1] }
 0x6cd   :  { %v14571_v58 = vpack.c.bf16 %v10338_v63, %v10336_v7  ;;  %v10366_v59 = vld [vmem:[%s20214_s5 + $0x9d8] sm:$0xff]  ;;  %v10365_v7 = vld [vmem:[%s20214_s5 + $0x9d0] sm:$0xff]  ;;  %v10368_v63 = vld [vmem:[%s20214_s5 + $0x9e8] sm:$0xff] }
 0x6ce   :  { %14510 = vmatpush1.bf16.msra.mxu1 %v14509_v50  ;;  %v10310_v50 = vld [vmem:[%s20214_s5 + $0x818] sm:$0xff]  ;;  %v8277_v39 = vrot.slane %v8241_v26, 7  ;;  %v8363_v26 = vld [vmem:[#allocation3 + $0x29] sm:$0x1]  ;;  %v14599_v27 = vpack.c.bf16 %v10366_v59, %v10364_v17  ;;  %v10393_v17 = vld [vmem:[%s20214_s5 + $0xab0] sm:$0xff] }
 0x6cf   :  { %14512 = vmatprep.subr.bf16.mxu1 %v14511_v43  ;;  %v8238_v43 = vmax.f32 %v8234_v62, %v8236_v33  ;;  %v14543_v52 = vpack.c.bf16 %v10310_v50, %v10308_v19  ;;  %v8356_v62 = vld [vmem:[#allocation3 + $0x21] sm:$0x1]  ;;  %v10337_v33 = vld [vmem:[%s20214_s5 + $0x8f0] sm:$0xff]  ;;  %v10340_v50 = vld [vmem:[%s20214_s5 + $0x908] sm:$0xff] }
 0x6d0   :  { %v10396_v59 = vld [vmem:[%s20214_s5 + $0xac8] sm:$0xff] }
 0x6d1   :  { %8220 = vmatmul.mubr.f32.vlgmr.msra.gmra.mrb[166].mxu1 %v8153_v15  ;;  %v10313_v15 = vld [vmem:[%s20214_s5 + $0x830] sm:$0xff] }
 0x6d2   :  { %14514 = vmatpush1.bf16.msra.mxu1 %v14513_v10  ;;  %8344 = vmatprep.mubr.f32.mxu1 %v15283_v2  ;;  %v8240_v10 = vmax.f32 %v8232_v16, %v8238_v43  ;;  %v14573_v16 = vpack.c.bf16 %v10337_v33, %v10335_v34  ;;  %v8358_v43 = vmax.f32 %v8354_v36, %v8356_v62  ;;  %v8480_v62 = vld [vmem:[#allocation3 + $0x22] sm:$0x1] }
 0x6d3   :  { %14516 = vmatprep.subr.bf16.mxu1 %v14515_v25  ;;  %v14545_v25 = vpack.c.bf16 %v10309_v38, %v10307_v35  ;;  %v10339_v38 = vld [vmem:[%s20214_s5 + $0x900] sm:$0xff]  ;;  %v14601_v36 = vpack.c.bf16 %v10365_v7, %v10363_v6 }
 0x6d4   :  { %v8278_v32 = vsel %vm7451_vm4, %v8277_v39, %v8240_v10  ;;  %v10341_v39 = vld [vmem:[%s20214_s5 + $0x910] sm:$0xff]  ;;  %v10346_v10 = vld [vmem:[%s20214_s5 + $0x938] sm:$0xff]  ;;  %v10367_v33 = vld [vmem:[%s20214_s5 + $0x9e0] sm:$0xff] }
 0x6d5   :  { %v10395_v7 = vld [vmem:[%s20214_s5 + $0xac0] sm:$0xff] }
 0x6d6   :  { %14518 = vmatpush1.bf16.msra.mxu1 %v14517_v3  ;;  %v10318_v3 = vld [vmem:[%s20214_s5 + $0x858] sm:$0xff] }
 0x6d7   :  { %14520 = vmatprep.subr.bf16.mxu1 %v14519_v44  ;;  %v14549_v44 = vpack.c.bf16 %v10313_v15, %v10311_v57  ;;  %v14551_v12 = vpack.c.bf16 %v10318_v3, %v10316_v21  ;;  %v14579_v57 = vpack.c.bf16 %v10346_v10, %v10344_v18  ;;  %v10343_v15 = vld [vmem:[%s20214_s5 + $0x920] sm:$0xff]  ;;  %v10348_v3 = vld [vmem:[%s20214_s5 + $0x948] sm:$0xff] }
 0x6d8   :  { %v10376_v10 = vld [vmem:[%s20214_s5 + $0xa28] sm:$0xff] }
 0x6da   :  { %14522 = vmatpush1.bf16.msra.mxu1 %v14521_v28  ;;  %v10322_v28 = vld [vmem:[%s20214_s5 + $0x878] sm:$0xff] }
 0x6db   :  { %14524 = vmatprep.subr.bf16.mxu1 %v14523_v46  ;;  %v14553_v46 = vpack.c.bf16 %v10317_v8, %v10315_v20  ;;  %v14555_v40 = vpack.c.bf16 %v10322_v28, %v10320_v22  ;;  %v10347_v8 = vld [vmem:[%s20214_s5 + $0x940] sm:$0xff]  ;;  %v10349_v22 = vld [vmem:[%s20214_s5 + $0x950] sm:$0xff]  ;;  %v10352_v28 = vld [vmem:[%s20214_s5 + $0x968] sm:$0xff] }
 0x6de   :  { %14526 = vmatpush1.bf16.msra.mxu1 %v14525_v14  ;;  %v10326_v14 = vld [vmem:[%s20214_s5 + $0x898] sm:$0xff] }
 0x6df   :  { %14528 = vmatprep.subr.bf16.mxu1 %v14527_v47  ;;  %v14557_v47 = vpack.c.bf16 %v10321_v61, %v10319_v49  ;;  %v14559_v30 = vpack.c.bf16 %v10326_v14, %v10324_v31  ;;  %v10351_v61 = vld [vmem:[%s20214_s5 + $0x960] sm:$0xff]  ;;  %v10353_v31 = vld [vmem:[%s20214_s5 + $0x970] sm:$0xff]  ;;  %v10356_v14 = vld [vmem:[%s20214_s5 + $0x988] sm:$0xff] }
 0x6e2   :  { %14530 = vmatpush1.bf16.msra.mxu1 %v14529_v54  ;;  %v10330_v54 = vld [vmem:[%s20214_s5 + $0x8b8] sm:$0xff] }
 0x6e3   :  { %14532 = vmatprep.subr.bf16.mxu1 %v14531_v23  ;;  %v14561_v23 = vpack.c.bf16 %v10325_v41, %v10323_v1  ;;  %v14563_v37 = vpack.c.bf16 %v10330_v54, %v10328_v0  ;;  %v10355_v41 = vld [vmem:[%s20214_s5 + $0x980] sm:$0xff]  ;;  %v10357_v0 = vld [vmem:[%s20214_s5 + $0x990] sm:$0xff]  ;;  %v10360_v54 = vld [vmem:[%s20214_s5 + $0x9a8] sm:$0xff] }
 0x6e6   :  { %14534 = vmatpush1.bf16.msra.mxu1 %v14533_v9  ;;  %v8364_v9 = vld [vmem:[#allocation3 + $0x69] sm:$0x1] }
 0x6e7   :  { %14536 = vmatprep.subr.bf16.mxu1 %v14535_v56  ;;  %v14565_v56 = vpack.c.bf16 %v10329_v13, %v10327_v4  ;;  %v10359_v13 = vld [vmem:[%s20214_s5 + $0x9a0] sm:$0xff] }
 0x6ea   :  { %14538 = vmatpush1.bf16.msra.mxu1 %v14537_v45  ;;  %v8366_v45 = vmax.f32 %v8362_v24, %v8364_v9  ;;  %v8483_v24 = vld [vmem:[#allocation3 + $0x63] sm:$0x1]  ;;  %v8487_v9 = vld [vmem:[#allocation3 + $0x6a] sm:$0x1] }
 0x6eb   :  { %14540 = vmatprep.subr.bf16.mxu1 %v14539_v42  ;;  %v8361_v42 = vld [vmem:[#allocation3 + $0x28] sm:$0x1] }
 0x6ec   :  { %v8368_v19 = vmax.f32 %v8359_v60, %v8366_v45  ;;  %v10370_v60 = vld [vmem:[%s20214_s5 + $0x9f8] sm:$0xff]  ;;  %v8485_v45 = vmax.f32 %v8481_v51, %v8483_v24  ;;  %v8606_v24 = vld [vmem:[#allocation3 + $0x64] sm:$0x1] }
 0x6ed   :  { %v14603_v34 = vpack.c.bf16 %v10370_v60, %v10368_v63  ;;  %v10398_v51 = vld [vmem:[%s20214_s5 + $0xad8] sm:$0xff]  ;;  %v10397_v63 = vld [vmem:[%s20214_s5 + $0xad0] sm:$0xff]  ;;  %v10400_v60 = vld [vmem:[%s20214_s5 + $0xae8] sm:$0xff] }
 0x6ee   :  { %14542 = vmatpush1.bf16.msra.mxu1 %v14541_v29  ;;  %v10342_v29 = vld [vmem:[%s20214_s5 + $0x918] sm:$0xff]  ;;  %v8404_v53 = vrot.slane %v8368_v19, 7  ;;  %v8488_v19 = vld [vmem:[#allocation3 + $0x2b] sm:$0x1]  ;;  %v14631_v6 = vpack.c.bf16 %v10398_v51, %v10396_v59  ;;  %v10425_v59 = vld [vmem:[%s20214_s5 + $0xbb0] sm:$0xff] }
 0x6ef   :  { %14544 = vmatprep.subr.bf16.mxu1 %v14543_v52  ;;  %v8365_v52 = vmax.f32 %v8361_v42, %v8363_v26  ;;  %v14575_v35 = vpack.c.bf16 %v10342_v29, %v10340_v50  ;;  %v8482_v42 = vld [vmem:[#allocation3 + $0x23] sm:$0x1]  ;;  %v10369_v26 = vld [vmem:[%s20214_s5 + $0x9f0] sm:$0xff]  ;;  %v10372_v29 = vld [vmem:[%s20214_s5 + $0xa08] sm:$0xff] }
 0x6f0   :  { %v10428_v51 = vld [vmem:[%s20214_s5 + $0xbc8] sm:$0xff] }
 0x6f1   :  { %8345 = vmatmul.mubr.f32.vlgmr.msra.gmra.mrb[166].mxu1 %v8278_v32  ;;  %v10345_v32 = vld [vmem:[%s20214_s5 + $0x930] sm:$0xff] }
 0x6f2   :  { %14546 = vmatpush1.bf16.msra.mxu1 %v14545_v25  ;;  %8471 = vmatprep.mubr.f32.mxu1 %v15283_v2  ;;  %v8367_v25 = vmax.f32 %v8358_v43, %v8365_v52  ;;  %v14605_v43 = vpack.c.bf16 %v10369_v26, %v10367_v33  ;;  %v8484_v52 = vmax.f32 %v8480_v62, %v8482_v42  ;;  %v8605_v42 = vld [vmem:[#allocation3 + $0x24] sm:$0x1] }
 0x6f3   :  { %14548 = vmatprep.subr.bf16.mxu1 %v14547_v48  ;;  %v14577_v48 = vpack.c.bf16 %v10341_v39, %v10339_v38  ;;  %v10371_v39 = vld [vmem:[%s20214_s5 + $0xa00] sm:$0xff]  ;;  %v14633_v62 = vpack.c.bf16 %v10397_v63, %v10395_v7 }
 0x6f4   :  { %v8405_v21 = vsel %vm7451_vm4, %v8404_v53, %v8367_v25  ;;  %v10373_v53 = vld [vmem:[%s20214_s5 + $0xa10] sm:$0xff]  ;;  %v10378_v25 = vld [vmem:[%s20214_s5 + $0xa38] sm:$0xff]  ;;  %v10399_v26 = vld [vmem:[%s20214_s5 + $0xae0] sm:$0xff] }
 0x6f5   :  { %v10427_v63 = vld [vmem:[%s20214_s5 + $0xbc0] sm:$0xff] }
 0x6f6   :  { %14550 = vmatpush1.bf16.msra.mxu1 %v14549_v44  ;;  %v10350_v44 = vld [vmem:[%s20214_s5 + $0x958] sm:$0xff] }
 0x6f7   :  { %14552 = vmatprep.subr.bf16.mxu1 %v14551_v12  ;;  %v14581_v12 = vpack.c.bf16 %v10345_v32, %v10343_v15  ;;  %v14583_v20 = vpack.c.bf16 %v10350_v44, %v10348_v3  ;;  %v14611_v15 = vpack.c.bf16 %v10378_v25, %v10376_v10  ;;  %v10375_v32 = vld [vmem:[%s20214_s5 + $0xa20] sm:$0xff]  ;;  %v10380_v44 = vld [vmem:[%s20214_s5 + $0xa48] sm:$0xff] }
 0x6f8   :  { %v10408_v25 = vld [vmem:[%s20214_s5 + $0xb28] sm:$0xff] }
 0x6fa   :  { %14554 = vmatpush1.bf16.msra.mxu1 %v14553_v46  ;;  %v10354_v46 = vld [vmem:[%s20214_s5 + $0x978] sm:$0xff] }
 0x6fb   :  { %14556 = vmatprep.subr.bf16.mxu1 %v14555_v40  ;;  %v14585_v40 = vpack.c.bf16 %v10349_v22, %v10347_v8  ;;  %v14587_v49 = vpack.c.bf16 %v10354_v46, %v10352_v28  ;;  %v10379_v22 = vld [vmem:[%s20214_s5 + $0xa40] sm:$0xff]  ;;  %v10381_v28 = vld [vmem:[%s20214_s5 + $0xa50] sm:$0xff]  ;;  %v10384_v46 = vld [vmem:[%s20214_s5 + $0xa68] sm:$0xff] }
 0x6fe   :  { %14558 = vmatpush1.bf16.msra.mxu1 %v14557_v47  ;;  %v10358_v47 = vld [vmem:[%s20214_s5 + $0x998] sm:$0xff] }
 0x6ff   :  { %14560 = vmatprep.subr.bf16.mxu1 %v14559_v30  ;;  %v14589_v30 = vpack.c.bf16 %v10353_v31, %v10351_v61  ;;  %v14591_v1 = vpack.c.bf16 %v10358_v47, %v10356_v14  ;;  %v10383_v31 = vld [vmem:[%s20214_s5 + $0xa60] sm:$0xff]  ;;  %v10385_v14 = vld [vmem:[%s20214_s5 + $0xa70] sm:$0xff]  ;;  %v10388_v47 = vld [vmem:[%s20214_s5 + $0xa88] sm:$0xff] }
 0x702   :  { %14562 = vmatpush1.bf16.msra.mxu1 %v14561_v23  ;;  %v10362_v23 = vld [vmem:[%s20214_s5 + $0x9b8] sm:$0xff] }
 0x703   :  { %14564 = vmatprep.subr.bf16.mxu1 %v14563_v37  ;;  %v14593_v37 = vpack.c.bf16 %v10357_v0, %v10355_v41  ;;  %v14595_v4 = vpack.c.bf16 %v10362_v23, %v10360_v54  ;;  %v10387_v0 = vld [vmem:[%s20214_s5 + $0xa80] sm:$0xff]  ;;  %v10389_v54 = vld [vmem:[%s20214_s5 + $0xa90] sm:$0xff]  ;;  %v10392_v23 = vld [vmem:[%s20214_s5 + $0xaa8] sm:$0xff] }
 0x706   :  { %14566 = vmatpush1.bf16.msra.mxu1 %v14565_v56  ;;  %v8489_v56 = vld [vmem:[#allocation3 + $0x6b] sm:$0x1] }
 0x707   :  { %14568 = vmatprep.subr.bf16.mxu1 %v14567_v5  ;;  %v14597_v5 = vpack.c.bf16 %v10361_v55, %v10359_v13  ;;  %v10391_v55 = vld [vmem:[%s20214_s5 + $0xaa0] sm:$0xff] }
 0x70a   :  { %14570 = vmatpush1.bf16.msra.mxu1 %v14569_v11  ;;  %v8491_v11 = vmax.f32 %v8487_v9, %v8489_v56  ;;  %v8608_v9 = vld [vmem:[#allocation3 + $0x65] sm:$0x1]  ;;  %v8612_v56 = vld [vmem:[#allocation3 + $0x6c] sm:$0x1] }
 0x70b   :  { %14572 = vmatprep.subr.bf16.mxu1 %v14571_v58  ;;  %v8486_v58 = vld [vmem:[#allocation3 + $0x2a] sm:$0x1] }
 0x70c   :  { %v8493_v50 = vmax.f32 %v8485_v45, %v8491_v11  ;;  %v10402_v45 = vld [vmem:[%s20214_s5 + $0xaf8] sm:$0xff]  ;;  %v8610_v11 = vmax.f32 %v8606_v24, %v8608_v9  ;;  %v8731_v9 = vld [vmem:[#allocation3 + $0x66] sm:$0x1] }
 0x70d   :  { %v14635_v33 = vpack.c.bf16 %v10402_v45, %v10400_v60  ;;  %v10430_v24 = vld [vmem:[%s20214_s5 + $0xbd8] sm:$0xff]  ;;  %v10429_v60 = vld [vmem:[%s20214_s5 + $0xbd0] sm:$0xff]  ;;  %v10432_v45 = vld [vmem:[%s20214_s5 + $0xbe8] sm:$0xff] }
 0x70e   :  { %14574 = vmatpush1.bf16.msra.mxu1 %v14573_v16  ;;  %v10374_v16 = vld [vmem:[%s20214_s5 + $0xa18] sm:$0xff]  ;;  %v8529_v18 = vrot.slane %v8493_v50, 7  ;;  %v8613_v50 = vld [vmem:[#allocation3 + $0x2d] sm:$0x1]  ;;  %v14663_v7 = vpack.c.bf16 %v10430_v24, %v10428_v51  ;;  %v10457_v51 = vld [vmem:[%s20214_s5 + $0xcb0] sm:$0xff] }
 0x70f   :  { %14576 = vmatprep.subr.bf16.mxu1 %v14575_v35  ;;  %v8490_v35 = vmax.f32 %v8486_v58, %v8488_v19  ;;  %v14607_v38 = vpack.c.bf16 %v10374_v16, %v10372_v29  ;;  %v8607_v58 = vld [vmem:[#allocation3 + $0x25] sm:$0x1]  ;;  %v10401_v19 = vld [vmem:[%s20214_s5 + $0xaf0] sm:$0xff]  ;;  %v10404_v16 = vld [vmem:[%s20214_s5 + $0xb08] sm:$0xff] }
 0x710   :  { %v10460_v24 = vld [vmem:[%s20214_s5 + $0xcc8] sm:$0xff] }
 0x711   :  { %8472 = vmatmul.mubr.f32.vlgmr.msra.gmra.mrb[166].mxu1 %v8405_v21  ;;  %v10377_v21 = vld [vmem:[%s20214_s5 + $0xa30] sm:$0xff] }
 0x712   :  { %14578 = vmatpush1.bf16.msra.mxu1 %v14577_v48  ;;  %8596 = vmatprep.mubr.f32.mxu1 %v15283_v2  ;;  %v8492_v48 = vmax.f32 %v8484_v52, %v8490_v35  ;;  %v14637_v52 = vpack.c.bf16 %v10401_v19, %v10399_v26  ;;  %v8609_v35 = vmax.f32 %v8605_v42, %v8607_v58  ;;  %v8730_v58 = vld [vmem:[#allocation3 + $0x26] sm:$0x1] }
 0x713   :  { %14580 = vmatprep.subr.bf16.mxu1 %v14579_v57  ;;  %v14609_v57 = vpack.c.bf16 %v10373_v53, %v10371_v39  ;;  %v10403_v53 = vld [vmem:[%s20214_s5 + $0xb00] sm:$0xff]  ;;  %v14665_v42 = vpack.c.bf16 %v10429_v60, %v10427_v63 }
 0x714   :  { %v8530_v3 = vsel %vm7451_vm4, %v8529_v18, %v8492_v48  ;;  %v10405_v18 = vld [vmem:[%s20214_s5 + $0xb10] sm:$0xff]  ;;  %v10410_v48 = vld [vmem:[%s20214_s5 + $0xb38] sm:$0xff]  ;;  %v10431_v19 = vld [vmem:[%s20214_s5 + $0xbe0] sm:$0xff] }
 0x715   :  { %v10459_v60 = vld [vmem:[%s20214_s5 + $0xcc0] sm:$0xff] }
 0x716   :  { %14582 = vmatpush1.bf16.msra.mxu1 %v14581_v12  ;;  %v10382_v12 = vld [vmem:[%s20214_s5 + $0xa58] sm:$0xff] }
 0x717   :  { %14584 = vmatprep.subr.bf16.mxu1 %v14583_v20  ;;  %v14613_v20 = vpack.c.bf16 %v10377_v21, %v10375_v32  ;;  %v14615_v8 = vpack.c.bf16 %v10382_v12, %v10380_v44  ;;  %v14643_v32 = vpack.c.bf16 %v10410_v48, %v10408_v25  ;;  %v10407_v21 = vld [vmem:[%s20214_s5 + $0xb20] sm:$0xff]  ;;  %v10412_v12 = vld [vmem:[%s20214_s5 + $0xb48] sm:$0xff] }
 0x718   :  { %v10440_v48 = vld [vmem:[%s20214_s5 + $0xc28] sm:$0xff] }
 0x71a   :  { %14586 = vmatpush1.bf16.msra.mxu1 %v14585_v40  ;;  %v10386_v40 = vld [vmem:[%s20214_s5 + $0xa78] sm:$0xff] }
 0x71b   :  { %14588 = vmatprep.subr.bf16.mxu1 %v14587_v49  ;;  %v14617_v49 = vpack.c.bf16 %v10381_v28, %v10379_v22  ;;  %v14619_v61 = vpack.c.bf16 %v10386_v40, %v10384_v46  ;;  %v10411_v28 = vld [vmem:[%s20214_s5 + $0xb40] sm:$0xff]  ;;  %v10413_v46 = vld [vmem:[%s20214_s5 + $0xb50] sm:$0xff]  ;;  %v10416_v40 = vld [vmem:[%s20214_s5 + $0xb68] sm:$0xff] }
 0x71e   :  { %14590 = vmatpush1.bf16.msra.mxu1 %v14589_v30  ;;  %v10390_v30 = vld [vmem:[%s20214_s5 + $0xa98] sm:$0xff] }
 0x71f   :  { %14592 = vmatprep.subr.bf16.mxu1 %v14591_v1  ;;  %v14621_v1 = vpack.c.bf16 %v10385_v14, %v10383_v31  ;;  %v14623_v41 = vpack.c.bf16 %v10390_v30, %v10388_v47  ;;  %v10415_v14 = vld [vmem:[%s20214_s5 + $0xb60] sm:$0xff]  ;;  %v10417_v47 = vld [vmem:[%s20214_s5 + $0xb70] sm:$0xff]  ;;  %v10420_v30 = vld [vmem:[%s20214_s5 + $0xb88] sm:$0xff] }
 0x722   :  { %14594 = vmatpush1.bf16.msra.mxu1 %v14593_v37  ;;  %v10394_v37 = vld [vmem:[%s20214_s5 + $0xab8] sm:$0xff] }
 0x723   :  { %14596 = vmatprep.subr.bf16.mxu1 %v14595_v4  ;;  %v14625_v4 = vpack.c.bf16 %v10389_v54, %v10387_v0  ;;  %v14627_v13 = vpack.c.bf16 %v10394_v37, %v10392_v23  ;;  %v10419_v54 = vld [vmem:[%s20214_s5 + $0xb80] sm:$0xff]  ;;  %v10421_v23 = vld [vmem:[%s20214_s5 + $0xb90] sm:$0xff]  ;;  %v10424_v37 = vld [vmem:[%s20214_s5 + $0xba8] sm:$0xff] }
 0x726   :  { %14598 = vmatpush1.bf16.msra.mxu1 %v14597_v5  ;;  %v8614_v5 = vld [vmem:[#allocation3 + $0x6d] sm:$0x1] }
 0x727   :  { %14600 = vmatprep.subr.bf16.mxu1 %v14599_v27  ;;  %v14629_v27 = vpack.c.bf16 %v10393_v17, %v10391_v55  ;;  %v10423_v17 = vld [vmem:[%s20214_s5 + $0xba0] sm:$0xff] }
 0x72a   :  { %14602 = vmatpush1.bf16.msra.mxu1 %v14601_v36  ;;  %v8616_v36 = vmax.f32 %v8612_v56, %v8614_v5  ;;  %v8733_v56 = vld [vmem:[#allocation3 + $0x67] sm:$0x1]  ;;  %v8737_v5 = vld [vmem:[#allocation3 + $0x6e] sm:$0x1] }
 0x72b   :  { %14604 = vmatprep.subr.bf16.mxu1 %v14603_v34  ;;  %v8611_v34 = vld [vmem:[#allocation3 + $0x2c] sm:$0x1] }
 0x72c   :  { %v8618_v29 = vmax.f32 %v8610_v11, %v8616_v36  ;;  %v10434_v11 = vld [vmem:[%s20214_s5 + $0xbf8] sm:$0xff]  ;;  %v8735_v36 = vmax.f32 %v8731_v9, %v8733_v56  ;;  %v8857_v56 = vld [vmem:[#allocation3 + $0x70] sm:$0x1] }
 0x72d   :  { %v14667_v26 = vpack.c.bf16 %v10434_v11, %v10432_v45  ;;  %v10462_v9 = vld [vmem:[%s20214_s5 + $0xcd8] sm:$0xff]  ;;  %v10461_v45 = vld [vmem:[%s20214_s5 + $0xcd0] sm:$0xff]  ;;  %v10464_v11 = vld [vmem:[%s20214_s5 + $0xce8] sm:$0xff] }
 0x72e   :  { %14606 = vmatpush1.bf16.msra.mxu1 %v14605_v43  ;;  %v10406_v43 = vld [vmem:[%s20214_s5 + $0xb18] sm:$0xff]  ;;  %v8654_v10 = vrot.slane %v8618_v29, 7  ;;  %v8738_v29 = vld [vmem:[#allocation3 + $0x2f] sm:$0x1]  ;;  %v14695_v63 = vpack.c.bf16 %v10462_v9, %v10460_v24  ;;  %v10489_v24 = vld [vmem:[%s20214_s5 + $0xdb0] sm:$0xff] }
 0x72f   :  { %14608 = vmatprep.subr.bf16.mxu1 %v14607_v38  ;;  %v8615_v38 = vmax.f32 %v8611_v34, %v8613_v50  ;;  %v14639_v39 = vpack.c.bf16 %v10406_v43, %v10404_v16  ;;  %v8732_v34 = vld [vmem:[#allocation3 + $0x27] sm:$0x1]  ;;  %v10433_v50 = vld [vmem:[%s20214_s5 + $0xbf0] sm:$0xff]  ;;  %v10436_v43 = vld [vmem:[%s20214_s5 + $0xc08] sm:$0xff] }
 0x730   :  { %v10492_v9 = vld [vmem:[%s20214_s5 + $0xdc8] sm:$0xff] }
 0x731   :  { %8597 = vmatmul.mubr.f32.vlgmr.msra.gmra.mrb[166].mxu1 %v8530_v3  ;;  %v10409_v3 = vld [vmem:[%s20214_s5 + $0xb30] sm:$0xff] }
 0x732   :  { %14610 = vmatpush1.bf16.msra.mxu1 %v14609_v57  ;;  %8721 = vmatprep.mubr.f32.mxu1 %v15283_v2  ;;  %v8617_v57 = vmax.f32 %v8609_v35, %v8615_v38  ;;  %v14669_v35 = vpack.c.bf16 %v10433_v50, %v10431_v19  ;;  %v8734_v38 = vmax.f32 %v8730_v58, %v8732_v34  ;;  %v8856_v34 = vld [vmem:[#allocation3 + $0x30] sm:$0x1]  ;;  %v10463_v50 = vld [vmem:[%s20214_s5 + $0xce0] sm:$0xff] }
 0x733   :  { %14612 = vmatprep.subr.bf16.mxu1 %v14611_v15  ;;  %v14641_v15 = vpack.c.bf16 %v10405_v18, %v10403_v53  ;;  %v10435_v18 = vld [vmem:[%s20214_s5 + $0xc00] sm:$0xff]  ;;  %v14697_v58 = vpack.c.bf16 %v10461_v45, %v10459_v60 }
 0x734   :  { %v8655_v44 = vsel %vm7451_vm4, %v8654_v10, %v8617_v57  ;;  %v10437_v10 = vld [vmem:[%s20214_s5 + $0xc10] sm:$0xff]  ;;  %v10442_v57 = vld [vmem:[%s20214_s5 + $0xc38] sm:$0xff]  ;;  %v10491_v45 = vld [vmem:[%s20214_s5 + $0xdc0] sm:$0xff] }
 0x736   :  { %14614 = vmatpush1.bf16.msra.mxu1 %v14613_v20  ;;  %v10414_v20 = vld [vmem:[%s20214_s5 + $0xb58] sm:$0xff] }
 0x737   :  { %14616 = vmatprep.subr.bf16.mxu1 %v14615_v8  ;;  %v14645_v8 = vpack.c.bf16 %v10409_v3, %v10407_v21  ;;  %v14647_v22 = vpack.c.bf16 %v10414_v20, %v10412_v12  ;;  %v14675_v21 = vpack.c.bf16 %v10442_v57, %v10440_v48  ;;  %v10439_v3 = vld [vmem:[%s20214_s5 + $0xc20] sm:$0xff]  ;;  %v10444_v20 = vld [vmem:[%s20214_s5 + $0xc48] sm:$0xff] }
 0x738   :  { %v10472_v57 = vld [vmem:[%s20214_s5 + $0xd28] sm:$0xff] }
 0x73a   :  { %14618 = vmatpush1.bf16.msra.mxu1 %v14617_v49  ;;  %v10418_v49 = vld [vmem:[%s20214_s5 + $0xb78] sm:$0xff] }
 0x73b   :  { %14620 = vmatprep.subr.bf16.mxu1 %v14619_v61  ;;  %v14649_v61 = vpack.c.bf16 %v10413_v46, %v10411_v28  ;;  %v14651_v31 = vpack.c.bf16 %v10418_v49, %v10416_v40  ;;  %v10443_v46 = vld [vmem:[%s20214_s5 + $0xc40] sm:$0xff]  ;;  %v10445_v40 = vld [vmem:[%s20214_s5 + $0xc50] sm:$0xff]  ;;  %v10448_v49 = vld [vmem:[%s20214_s5 + $0xc68] sm:$0xff] }
 0x73e   :  { %14622 = vmatpush1.bf16.msra.mxu1 %v14621_v1  ;;  %v10422_v1 = vld [vmem:[%s20214_s5 + $0xb98] sm:$0xff] }
 0x73f   :  { %14624 = vmatprep.subr.bf16.mxu1 %v14623_v41  ;;  %v14653_v41 = vpack.c.bf16 %v10417_v47, %v10415_v14  ;;  %v14655_v0 = vpack.c.bf16 %v10422_v1, %v10420_v30  ;;  %v10447_v47 = vld [vmem:[%s20214_s5 + $0xc60] sm:$0xff]  ;;  %v10449_v30 = vld [vmem:[%s20214_s5 + $0xc70] sm:$0xff]  ;;  %v10452_v1 = vld [vmem:[%s20214_s5 + $0xc88] sm:$0xff] }
 0x742   :  { %14626 = vmatpush1.bf16.msra.mxu1 %v14625_v4  ;;  %v10426_v4 = vld [vmem:[%s20214_s5 + $0xbb8] sm:$0xff] }
 0x743   :  { %14628 = vmatprep.subr.bf16.mxu1 %v14627_v13  ;;  %v14657_v13 = vpack.c.bf16 %v10421_v23, %v10419_v54  ;;  %v14659_v55 = vpack.c.bf16 %v10426_v4, %v10424_v37  ;;  %v10451_v23 = vld [vmem:[%s20214_s5 + $0xc80] sm:$0xff]  ;;  %v10453_v37 = vld [vmem:[%s20214_s5 + $0xc90] sm:$0xff]  ;;  %v10456_v4 = vld [vmem:[%s20214_s5 + $0xca8] sm:$0xff] }
 0x746   :  { %14630 = vmatpush1.bf16.msra.mxu1 %v14629_v27  ;;  %v8739_v27 = vld [vmem:[#allocation3 + $0x6f] sm:$0x1] }
 0x747   :  { %14632 = vmatprep.subr.bf16.mxu1 %v14631_v6  ;;  %v14661_v6 = vpack.c.bf16 %v10425_v59, %v10423_v17  ;;  %v10455_v59 = vld [vmem:[%s20214_s5 + $0xca0] sm:$0xff] }
 0x74a   :  { %14634 = vmatpush1.bf16.msra.mxu1 %v14633_v62  ;;  %v8741_v62 = vmax.f32 %v8737_v5, %v8739_v27  ;;  %v8859_v5 = vld [vmem:[#allocation3 + $0x71] sm:$0x1]  ;;  %v8864_v27 = vld [vmem:[#allocation3 + $0x78] sm:$0x1] }
 0x74b   :  { %14636 = vmatprep.subr.bf16.mxu1 %v14635_v33  ;;  %v8736_v33 = vld [vmem:[#allocation3 + $0x2e] sm:$0x1] }
 0x74c   :  { %v8743_v16 = vmax.f32 %v8735_v36, %v8741_v62  ;;  %v10466_v36 = vld [vmem:[%s20214_s5 + $0xcf8] sm:$0xff]  ;;  %v8861_v62 = vmax.f32 %v8857_v56, %v8859_v5  ;;  %v8983_v5 = vld [vmem:[#allocation3 + $0x72] sm:$0x1] }
 0x74d   :  { %v14699_v19 = vpack.c.bf16 %v10466_v36, %v10464_v11  ;;  %v10494_v56 = vld [vmem:[%s20214_s5 + $0xdd8] sm:$0xff]  ;;  %v10493_v11 = vld [vmem:[%s20214_s5 + $0xdd0] sm:$0xff]  ;;  %v10496_v36 = vld [vmem:[%s20214_s5 + $0xde8] sm:$0xff] }
 0x74e   :  { %14638 = vmatpush1.bf16.msra.mxu1 %v14637_v52  ;;  %v10438_v52 = vld [vmem:[%s20214_s5 + $0xc18] sm:$0xff]  ;;  %v8779_v25 = vrot.slane %v8743_v16, 7  ;;  %v14727_v60 = vpack.c.bf16 %v10494_v56, %v10492_v9  ;;  %v10521_v9 = vld [vmem:[%s20214_s5 + $0xeb0] sm:$0xff]  ;;  %v10524_v56 = vld [vmem:[%s20214_s5 + $0xec8] sm:$0xff] }
 0x74f   :  { %14640 = vmatprep.subr.bf16.mxu1 %v14639_v39  ;;  %v8740_v39 = vmax.f32 %v8736_v33, %v8738_v29  ;;  %v14671_v53 = vpack.c.bf16 %v10438_v52, %v10436_v43  ;;  %v8858_v33 = vld [vmem:[#allocation3 + $0x31] sm:$0x1]  ;;  %v8865_v16 = vld [vmem:[#allocation3 + $0x39] sm:$0x1]  ;;  %v10468_v52 = vld [vmem:[%s20214_s5 + $0xd08] sm:$0xff] }
 0x750   :  { %v10465_v29 = vld [vmem:[%s20214_s5 + $0xcf0] sm:$0xff] }
 0x751   :  { %8722 = vmatmul.mubr.f32.vlgmr.msra.gmra.mrb[166].mxu1 %v8655_v44  ;;  %v10441_v44 = vld [vmem:[%s20214_s5 + $0xc30] sm:$0xff] }
 0x752   :  { %14642 = vmatpush1.bf16.msra.mxu1 %v14641_v15  ;;  %8846 = vmatprep.mubr.f32.mxu1 %v15283_v2  ;;  %v8742_v15 = vmax.f32 %v8734_v38, %v8740_v39  ;;  %v14701_v38 = vpack.c.bf16 %v10465_v29, %v10463_v50  ;;  %v8860_v39 = vmax.f32 %v8856_v34, %v8858_v33  ;;  %v8982_v33 = vld [vmem:[#allocation3 + $0x32] sm:$0x1]  ;;  %v10495_v29 = vld [vmem:[%s20214_s5 + $0xde0] sm:$0xff] }
 0x753   :  { %14644 = vmatprep.subr.bf16.mxu1 %v14643_v32  ;;  %v14673_v32 = vpack.c.bf16 %v10437_v10, %v10435_v18  ;;  %v10467_v10 = vld [vmem:[%s20214_s5 + $0xd00] sm:$0xff]  ;;  %v14729_v34 = vpack.c.bf16 %v10493_v11, %v10491_v45 }
 0x754   :  { %v8780_v12 = vsel %vm7451_vm4, %v8779_v25, %v8742_v15  ;;  %v10469_v25 = vld [vmem:[%s20214_s5 + $0xd10] sm:$0xff]  ;;  %v10474_v15 = vld [vmem:[%s20214_s5 + $0xd38] sm:$0xff]  ;;  %v10523_v11 = vld [vmem:[%s20214_s5 + $0xec0] sm:$0xff] }
 0x756   :  { %14646 = vmatpush1.bf16.msra.mxu1 %v14645_v8  ;;  %v10446_v8 = vld [vmem:[%s20214_s5 + $0xc58] sm:$0xff] }
 0x757   :  { %14648 = vmatprep.subr.bf16.mxu1 %v14647_v22  ;;  %v14677_v22 = vpack.c.bf16 %v10441_v44, %v10439_v3  ;;  %v14679_v28 = vpack.c.bf16 %v10446_v8, %v10444_v20  ;;  %v14707_v3 = vpack.c.bf16 %v10474_v15, %v10472_v57  ;;  %v10471_v44 = vld [vmem:[%s20214_s5 + $0xd20] sm:$0xff]  ;;  %v10476_v8 = vld [vmem:[%s20214_s5 + $0xd48] sm:$0xff] }
 0x758   :  { %v10504_v15 = vld [vmem:[%s20214_s5 + $0xe28] sm:$0xff] }
 0x75a   :  { %14650 = vmatpush1.bf16.msra.mxu1 %v14649_v61  ;;  %v10450_v61 = vld [vmem:[%s20214_s5 + $0xc78] sm:$0xff] }
 0x75b   :  { %14652 = vmatprep.subr.bf16.mxu1 %v14651_v31  ;;  %v14681_v31 = vpack.c.bf16 %v10445_v40, %v10443_v46  ;;  %v14683_v14 = vpack.c.bf16 %v10450_v61, %v10448_v49  ;;  %v10475_v40 = vld [vmem:[%s20214_s5 + $0xd40] sm:$0xff]  ;;  %v10477_v49 = vld [vmem:[%s20214_s5 + $0xd50] sm:$0xff]  ;;  %v10480_v61 = vld [vmem:[%s20214_s5 + $0xd68] sm:$0xff] }
 0x75e   :  { %14654 = vmatpush1.bf16.msra.mxu1 %v14653_v41  ;;  %v10454_v41 = vld [vmem:[%s20214_s5 + $0xc98] sm:$0xff] }
 0x75f   :  { %14656 = vmatprep.subr.bf16.mxu1 %v14655_v0  ;;  %v14685_v0 = vpack.c.bf16 %v10449_v30, %v10447_v47  ;;  %v14687_v54 = vpack.c.bf16 %v10454_v41, %v10452_v1  ;;  %v10479_v30 = vld [vmem:[%s20214_s5 + $0xd60] sm:$0xff]  ;;  %v10481_v1 = vld [vmem:[%s20214_s5 + $0xd70] sm:$0xff]  ;;  %v10484_v41 = vld [vmem:[%s20214_s5 + $0xd88] sm:$0xff] }
 0x762   :  { %14658 = vmatpush1.bf16.msra.mxu1 %v14657_v13  ;;  %v10458_v13 = vld [vmem:[%s20214_s5 + $0xcb8] sm:$0xff] }
 0x763   :  { %14660 = vmatprep.subr.bf16.mxu1 %v14659_v55  ;;  %v14689_v55 = vpack.c.bf16 %v10453_v37, %v10451_v23  ;;  %v14691_v17 = vpack.c.bf16 %v10458_v13, %v10456_v4  ;;  %v10483_v37 = vld [vmem:[%s20214_s5 + $0xd80] sm:$0xff]  ;;  %v10485_v4 = vld [vmem:[%s20214_s5 + $0xd90] sm:$0xff]  ;;  %v10488_v13 = vld [vmem:[%s20214_s5 + $0xda8] sm:$0xff] }
 0x766   :  { %14662 = vmatpush1.bf16.msra.mxu1 %v14661_v6  ;;  %v8866_v6 = vld [vmem:[#allocation3 + $0x79] sm:$0x1] }
 0x767   :  { %14664 = vmatprep.subr.bf16.mxu1 %v14663_v7  ;;  %v14693_v7 = vpack.c.bf16 %v10457_v51, %v10455_v59  ;;  %v10487_v51 = vld [vmem:[%s20214_s5 + $0xda0] sm:$0xff] }
 0x76a   :  { %14666 = vmatpush1.bf16.msra.mxu1 %v14665_v42  ;;  %v8868_v42 = vmax.f32 %v8864_v27, %v8866_v6  ;;  %v8985_v27 = vld [vmem:[#allocation3 + $0x73] sm:$0x1]  ;;  %v8989_v6 = vld [vmem:[#allocation3 + $0x7a] sm:$0x1] }
 0x76b   :  { %14668 = vmatprep.subr.bf16.mxu1 %v14667_v26  ;;  %v8863_v26 = vld [vmem:[#allocation3 + $0x38] sm:$0x1] }
 0x76c   :  { %v8870_v43 = vmax.f32 %v8861_v62, %v8868_v42  ;;  %v10498_v62 = vld [vmem:[%s20214_s5 + $0xdf8] sm:$0xff]  ;;  %v8987_v42 = vmax.f32 %v8983_v5, %v8985_v27  ;;  %v9108_v27 = vld [vmem:[#allocation3 + $0x74] sm:$0x1] }
 0x76d   :  { %v14731_v50 = vpack.c.bf16 %v10498_v62, %v10496_v36  ;;  %v10526_v5 = vld [vmem:[%s20214_s5 + $0xed8] sm:$0xff]  ;;  %v10525_v36 = vld [vmem:[%s20214_s5 + $0xed0] sm:$0xff]  ;;  %v10528_v62 = vld [vmem:[%s20214_s5 + $0xee8] sm:$0xff] }
 0x76e   :  { %14670 = vmatpush1.bf16.msra.mxu1 %v14669_v35  ;;  %v10470_v35 = vld [vmem:[%s20214_s5 + $0xd18] sm:$0xff]  ;;  %v8906_v48 = vrot.slane %v8870_v43, 7  ;;  %v14759_v45 = vpack.c.bf16 %v10526_v5, %v10524_v56  ;;  %v10556_v56 = vld [vmem:[%s20214_s5 + $0xfc8] sm:$0xff] }
 0x76f   :  { %14672 = vmatprep.subr.bf16.mxu1 %v14671_v53  ;;  %v8867_v53 = vmax.f32 %v8863_v26, %v8865_v16  ;;  %v14703_v18 = vpack.c.bf16 %v10470_v35, %v10468_v52  ;;  %v8984_v26 = vld [vmem:[#allocation3 + $0x33] sm:$0x1]  ;;  %v8990_v43 = vld [vmem:[#allocation3 + $0x3b] sm:$0x1]  ;;  %v10500_v35 = vld [vmem:[%s20214_s5 + $0xe08] sm:$0xff] }
 0x770   :  { %v10497_v16 = vld [vmem:[%s20214_s5 + $0xdf0] sm:$0xff]  ;;  %v10558_v5 = vld [vmem:[%s20214_s5 + $0xfd8] sm:$0xff] }
 0x771   :  { %8847 = vmatmul.mubr.f32.vlgmr.msra.gmra.mrb[166].mxu1 %v8780_v12  ;;  %v10473_v12 = vld [vmem:[%s20214_s5 + $0xd30] sm:$0xff] }
 0x772   :  { %14674 = vmatpush1.bf16.msra.mxu1 %v14673_v32  ;;  %8973 = vmatprep.mubr.f32.mxu1 %v15283_v2  ;;  %v8869_v32 = vmax.f32 %v8860_v39, %v8867_v53  ;;  %v14733_v39 = vpack.c.bf16 %v10497_v16, %v10495_v29  ;;  %v8986_v53 = vmax.f32 %v8982_v33, %v8984_v26  ;;  %v9107_v26 = vld [vmem:[#allocation3 + $0x34] sm:$0x1]  ;;  %v10527_v16 = vld [vmem:[%s20214_s5 + $0xee0] sm:$0xff] }
 0x773   :  { %14676 = vmatprep.subr.bf16.mxu1 %v14675_v21  ;;  %v14705_v21 = vpack.c.bf16 %v10469_v25, %v10467_v10  ;;  %v10499_v25 = vld [vmem:[%s20214_s5 + $0xe00] sm:$0xff]  ;;  %v14761_v33 = vpack.c.bf16 %v10525_v36, %v10523_v11  ;;  %v10557_v36 = vld [vmem:[%s20214_s5 + $0xfd0] sm:$0xff] }
 0x774   :  { %v8907_v20 = vsel %vm7451_vm4, %v8906_v48, %v8869_v32  ;;  %v10501_v48 = vld [vmem:[%s20214_s5 + $0xe10] sm:$0xff]  ;;  %v10506_v32 = vld [vmem:[%s20214_s5 + $0xe38] sm:$0xff]  ;;  %v10555_v11 = vld [vmem:[%s20214_s5 + $0xfc0] sm:$0xff] }
 0x776   :  { %14678 = vmatpush1.bf16.msra.mxu1 %v14677_v22  ;;  %v10478_v22 = vld [vmem:[%s20214_s5 + $0xd58] sm:$0xff] }
 0x777   :  { %14680 = vmatprep.subr.bf16.mxu1 %v14679_v28  ;;  %v14709_v28 = vpack.c.bf16 %v10473_v12, %v10471_v44  ;;  %v14711_v46 = vpack.c.bf16 %v10478_v22, %v10476_v8  ;;  %v14739_v44 = vpack.c.bf16 %v10506_v32, %v10504_v15  ;;  %v10503_v12 = vld [vmem:[%s20214_s5 + $0xe20] sm:$0xff]  ;;  %v10508_v22 = vld [vmem:[%s20214_s5 + $0xe48] sm:$0xff] }
 0x778   :  { %v10536_v32 = vld [vmem:[%s20214_s5 + $0xf28] sm:$0xff] }
 0x77a   :  { %14682 = vmatpush1.bf16.msra.mxu1 %v14681_v31  ;;  %v10482_v31 = vld [vmem:[%s20214_s5 + $0xd78] sm:$0xff] }
 0x77b   :  { %14684 = vmatprep.subr.bf16.mxu1 %v14683_v14  ;;  %v14713_v14 = vpack.c.bf16 %v10477_v49, %v10475_v40  ;;  %v14715_v47 = vpack.c.bf16 %v10482_v31, %v10480_v61  ;;  %v10507_v49 = vld [vmem:[%s20214_s5 + $0xe40] sm:$0xff]  ;;  %v10509_v61 = vld [vmem:[%s20214_s5 + $0xe50] sm:$0xff]  ;;  %v10512_v31 = vld [vmem:[%s20214_s5 + $0xe68] sm:$0xff] }
 0x77e   :  { %14686 = vmatpush1.bf16.msra.mxu1 %v14685_v0  ;;  %v10486_v0 = vld [vmem:[%s20214_s5 + $0xd98] sm:$0xff] }
 0x77f   :  { %14688 = vmatprep.subr.bf16.mxu1 %v14687_v54  ;;  %v14717_v54 = vpack.c.bf16 %v10481_v1, %v10479_v30  ;;  %v14719_v23 = vpack.c.bf16 %v10486_v0, %v10484_v41  ;;  %v10511_v1 = vld [vmem:[%s20214_s5 + $0xe60] sm:$0xff]  ;;  %v10513_v41 = vld [vmem:[%s20214_s5 + $0xe70] sm:$0xff]  ;;  %v10516_v0 = vld [vmem:[%s20214_s5 + $0xe88] sm:$0xff] }
 0x782   :  { %14690 = vmatpush1.bf16.msra.mxu1 %v14689_v55  ;;  %v10490_v55 = vld [vmem:[%s20214_s5 + $0xdb8] sm:$0xff] }
 0x783   :  { %14692 = vmatprep.subr.bf16.mxu1 %v14691_v17  ;;  %v14721_v17 = vpack.c.bf16 %v10485_v4, %v10483_v37  ;;  %v14723_v59 = vpack.c.bf16 %v10490_v55, %v10488_v13  ;;  %v10515_v4 = vld [vmem:[%s20214_s5 + $0xe80] sm:$0xff]  ;;  %v10517_v13 = vld [vmem:[%s20214_s5 + $0xe90] sm:$0xff]  ;;  %v10520_v55 = vld [vmem:[%s20214_s5 + $0xea8] sm:$0xff] }
 0x786   :  { %14694 = vmatpush1.bf16.msra.mxu1 %v14693_v7  ;;  %v8991_v7 = vld [vmem:[#allocation3 + $0x7b] sm:$0x1] }
 0x787   :  { %14696 = vmatprep.subr.bf16.mxu1 %v14695_v63  ;;  %v14725_v63 = vpack.c.bf16 %v10489_v24, %v10487_v51  ;;  %v10519_v24 = vld [vmem:[%s20214_s5 + $0xea0] sm:$0xff] }
 0x78a   :  { %14698 = vmatpush1.bf16.msra.mxu1 %v14697_v58  ;;  %v8993_v58 = vmax.f32 %v8989_v6, %v8991_v7  ;;  %v9110_v6 = vld [vmem:[#allocation3 + $0x75] sm:$0x1]  ;;  %v9114_v7 = vld [vmem:[#allocation3 + $0x7c] sm:$0x1] }
 0x78b   :  { %14700 = vmatprep.subr.bf16.mxu1 %v14699_v19  ;;  %v8988_v19 = vld [vmem:[#allocation3 + $0x3a] sm:$0x1] }
 0x78c   :  { %v8995_v52 = vmax.f32 %v8987_v42, %v8993_v58  ;;  %v10530_v42 = vld [vmem:[%s20214_s5 + $0xef8] sm:$0xff]  ;;  %v9112_v58 = vmax.f32 %v9108_v27, %v9110_v6  ;;  %v9233_v27 = vld [vmem:[#allocation3 + $0x76] sm:$0x1]  ;;  %v9235_v6 = vld [vmem:[#allocation3 + $0x77] sm:$0x1] }
 0x78d   :  { %v14763_v29 = vpack.c.bf16 %v10530_v42, %v10528_v62  ;;  %v10560_v62 = vld [vmem:[%s20214_s5 + $0xfe8] sm:$0xff]  ;;  %v10562_v42 = vld [vmem:[%s20214_s5 + $0xff8] sm:$0xff] }
 0x78e   :  { %14702 = vmatpush1.bf16.msra.mxu1 %v14701_v38  ;;  %v10502_v38 = vld [vmem:[%s20214_s5 + $0xe18] sm:$0xff]  ;;  %v9031_v57 = vrot.slane %v8995_v52, 7 }
 0x78f   :  { %14704 = vmatprep.subr.bf16.mxu1 %v14703_v18  ;;  %v8992_v18 = vmax.f32 %v8988_v19, %v8990_v43  ;;  %v14735_v10 = vpack.c.bf16 %v10502_v38, %v10500_v35  ;;  %v9109_v19 = vld [vmem:[#allocation3 + $0x35] sm:$0x1]  ;;  %v9115_v52 = vld [vmem:[#allocation3 + $0x3d] sm:$0x1]  ;;  %v10532_v38 = vld [vmem:[%s20214_s5 + $0xf08] sm:$0xff] }
 0x790   :  { %v10529_v43 = vld [vmem:[%s20214_s5 + $0xef0] sm:$0xff] }
 0x791   :  { %8974 = vmatmul.mubr.f32.vlgmr.msra.gmra.mrb[166].mxu1 %v8907_v20  ;;  %v10505_v20 = vld [vmem:[%s20214_s5 + $0xe30] sm:$0xff] }
 0x792   :  { %14706 = vmatpush1.bf16.msra.mxu1 %v14705_v21  ;;  %9098 = vmatprep.mubr.f32.mxu1 %v15283_v2  ;;  %v8994_v21 = vmax.f32 %v8986_v53, %v8992_v18  ;;  %v14765_v53 = vpack.c.bf16 %v10529_v43, %v10527_v16  ;;  %v9111_v18 = vmax.f32 %v9107_v26, %v9109_v19  ;;  %v9232_v26 = vld [vmem:[#allocation3 + $0x36] sm:$0x1]  ;;  %v9234_v19 = vld [vmem:[#allocation3 + $0x37] sm:$0x1]  ;;  %v10559_v16 = vld [vmem:[%s20214_s5 + $0xfe0] sm:$0xff] }
 0x793   :  { %14708 = vmatprep.subr.bf16.mxu1 %v14707_v3  ;;  %v14737_v3 = vpack.c.bf16 %v10501_v48, %v10499_v25  ;;  %v10531_v48 = vld [vmem:[%s20214_s5 + $0xf00] sm:$0xff]  ;;  %v10561_v43 = vld [vmem:[%s20214_s5 + $0xff0] sm:$0xff] }
 0x794   :  { %v9032_v8 = vsel %vm7451_vm4, %v9031_v57, %v8994_v21  ;;  %v10533_v57 = vld [vmem:[%s20214_s5 + $0xf10] sm:$0xff]  ;;  %v10538_v21 = vld [vmem:[%s20214_s5 + $0xf38] sm:$0xff] }
 0x796   :  { %14710 = vmatpush1.bf16.msra.mxu1 %v14709_v28  ;;  %v10510_v28 = vld [vmem:[%s20214_s5 + $0xe58] sm:$0xff] }
 0x797   :  { %14712 = vmatprep.subr.bf16.mxu1 %v14711_v46  ;;  %v14741_v46 = vpack.c.bf16 %v10505_v20, %v10503_v12  ;;  %v14743_v40 = vpack.c.bf16 %v10510_v28, %v10508_v22  ;;  %v14771_v12 = vpack.c.bf16 %v10538_v21, %v10536_v32  ;;  %v10535_v20 = vld [vmem:[%s20214_s5 + $0xf20] sm:$0xff]  ;;  %v10540_v28 = vld [vmem:[%s20214_s5 + $0xf48] sm:$0xff]  ;;  %v9395_v32 = vld [vmem:[%s20216_s7 + $0x90] sm:$0xff] }
 0x798   :  { %v9396_v21 = vld [vmem:[%s20216_s7 + $0x98] sm:$0xff] }
 0x79a   :  { %14714 = vmatpush1.bf16.msra.mxu1 %v14713_v14  ;;  %v10514_v14 = vld [vmem:[%s20214_s5 + $0xe78] sm:$0xff] }
 0x79b   :  { %14716 = vmatprep.subr.bf16.mxu1 %v14715_v47  ;;  %v14745_v47 = vpack.c.bf16 %v10509_v61, %v10507_v49  ;;  %v14747_v30 = vpack.c.bf16 %v10514_v14, %v10512_v31  ;;  %v10539_v61 = vld [vmem:[%s20214_s5 + $0xf40] sm:$0xff]  ;;  %v10541_v31 = vld [vmem:[%s20214_s5 + $0xf50] sm:$0xff]  ;;  %v10544_v14 = vld [vmem:[%s20214_s5 + $0xf68] sm:$0xff] }
 0x79e   :  { %14718 = vmatpush1.bf16.msra.mxu1 %v14717_v54  ;;  %v10518_v54 = vld [vmem:[%s20214_s5 + $0xe98] sm:$0xff] }
 0x79f   :  { %14720 = vmatprep.subr.bf16.mxu1 %v14719_v23  ;;  %v14749_v23 = vpack.c.bf16 %v10513_v41, %v10511_v1  ;;  %v14751_v37 = vpack.c.bf16 %v10518_v54, %v10516_v0  ;;  %v10543_v1 = vld [vmem:[%s20214_s5 + $0xf60] sm:$0xff]  ;;  %v10545_v41 = vld [vmem:[%s20214_s5 + $0xf70] sm:$0xff]  ;;  %v10548_v0 = vld [vmem:[%s20214_s5 + $0xf88] sm:$0xff] }
 0x7a0   :  { %v10550_v54 = vld [vmem:[%s20214_s5 + $0xf98] sm:$0xff] }
 0x7a2   :  { %14722 = vmatpush1.bf16.msra.mxu1 %v14721_v17  ;;  %v10522_v17 = vld [vmem:[%s20214_s5 + $0xeb8] sm:$0xff] }
 0x7a3   :  { %14724 = vmatprep.subr.bf16.mxu1 %v14723_v59  ;;  %v14753_v59 = vpack.c.bf16 %v10517_v13, %v10515_v4  ;;  %v14755_v51 = vpack.c.bf16 %v10522_v17, %v10520_v55  ;;  %v10547_v4 = vld [vmem:[%s20214_s5 + $0xf80] sm:$0xff]  ;;  %v10549_v13 = vld [vmem:[%s20214_s5 + $0xf90] sm:$0xff]  ;;  %v10552_v55 = vld [vmem:[%s20214_s5 + $0xfa8] sm:$0xff] }
 0x7a4   :  { %v10554_v17 = vld [vmem:[%s20214_s5 + $0xfb8] sm:$0xff] }
 0x7a6   :  { %14726 = vmatpush1.bf16.msra.mxu1 %v14725_v63  ;;  %v9116_v63 = vld [vmem:[#allocation3 + $0x7d] sm:$0x1] }
 0x7a7   :  { %14728 = vmatprep.subr.bf16.mxu1 %v14727_v60  ;;  %v14757_v60 = vpack.c.bf16 %v10521_v9, %v10519_v24  ;;  %v10551_v24 = vld [vmem:[%s20214_s5 + $0xfa0] sm:$0xff]  ;;  %v10553_v9 = vld [vmem:[%s20214_s5 + $0xfb0] sm:$0xff] }
 0x7aa   :  { %14730 = vmatpush1.bf16.msra.mxu1 %v14729_v34  ;;  %v9118_v34 = vmax.f32 %v9114_v7, %v9116_v63  ;;  %v9239_v7 = vld [vmem:[#allocation3 + $0x7e] sm:$0x1]  ;;  %v9241_v63 = vld [vmem:[#allocation3 + $0x7f] sm:$0x1] }
 0x7ab   :  { %14732 = vmatprep.subr.bf16.mxu1 %v14731_v50  ;;  %v9113_v50 = vld [vmem:[#allocation3 + $0x3c] sm:$0x1] }
 0x7ac   :  { %v9120_v35 = vmax.f32 %v9112_v58, %v9118_v34  ;;  %v9237_v58 = vmax.f32 %v9233_v27, %v9235_v6  ;;  %v9243_v34 = vmax.f32 %v9239_v7, %v9241_v63  ;;  %v9406_v27 = vld [vmem:[%s20216_s7 + $0xe8] sm:$0xff]  ;;  %v9389_v7 = vld [vmem:[%s20216_s7 + $0x60] sm:$0xff] }
 0x7ad   :  { %v9390_v63 = vld [vmem:[%s20216_s7 + $0x68] sm:$0xff] }
 0x7ae   :  { %14734 = vmatpush1.bf16.msra.mxu1 %v14733_v39  ;;  %v10534_v39 = vld [vmem:[%s20214_s5 + $0xf18] sm:$0xff]  ;;  %v9156_v15 = vrot.slane %v9120_v35, 7  ;;  %v9245_v35 = vmax.f32 %v9237_v58, %v9243_v34  ;;  %v9359_v34 = vlaneseq }
 0x7af   :  { %14736 = vmatprep.subr.bf16.mxu1 %v14735_v10  ;;  %v9117_v10 = vmax.f32 %v9113_v50, %v9115_v52  ;;  %v14767_v25 = vpack.c.bf16 %v10534_v39, %v10532_v38  ;;  %v9238_v50 = vld [vmem:[#allocation3 + $0x3e] sm:$0x1]  ;;  %v9240_v52 = vld [vmem:[#allocation3 + $0x3f] sm:$0x1]  ;;  %v9393_v38 = vld [vmem:[%s20216_s7 + $0x80] sm:$0xff] }
 0x7b0   :  { %v9394_v39 = vld [vmem:[%s20216_s7 + $0x88] sm:$0xff] }
 0x7b1   :  { %9099 = vmatmul.mubr.f32.vlgmr.msra.gmra.mrb[166].mxu1 %v9032_v8  ;;  %v10537_v8 = vld [vmem:[%s20214_s5 + $0xf30] sm:$0xff] }
 0x7b2   :  { %14738 = vmatpush1.bf16.msra.mxu1 %v14737_v3  ;;  %9223 = vmatprep.mubr.f32.mxu1 %v15283_v2  ;;  %v9119_v3 = vmax.f32 %v9111_v18, %v9117_v10  ;;  %v9236_v18 = vmax.f32 %v9232_v26, %v9234_v19  ;;  %v9242_v10 = vmax.f32 %v9238_v50, %v9240_v52  ;;  %v9357_v19 = vld [vmem:[%s20215_s6] sm:$0x3]  ;;  %s15284_s6 = smov [#allocation4]  }
 0x7b3   :  { %14740 = vmatprep.subr.bf16.mxu1 %v14739_v44  ;;  %v14769_v44 = vpack.c.bf16 %v10533_v57, %v10531_v48  ;;  %v9377_v48 = vld [vmem:[%s20216_s7] sm:$0xff]  ;;  %v9378_v57 = vld [vmem:[%s20216_s7 + $0x8] sm:$0xff]  ;;  %s9493_s29 = sshll.u32 %s15284_s6, 4  ;;  %s9494_s29 = int_to_ptr.vmem [resolvable:$true] %s9493_s29 }
 0x7b4   :  { %v9157_v22 = vsel %vm7451_vm4, %v9156_v15, %v9119_v3  ;;  %v9281_v15 = vrot.slane %v9245_v35, 7  ;;  %v9244_v3 = vmax.f32 %v9236_v18, %v9242_v10  ;;  %s15258_s30 = scalar_lea.vmem %s9494_s29, 32  ;;  %p15263_p1 = scmp.lt.s32.totalorder %s9494_s29, %s9494_s29 }
 0x7b5   :  { %p15259_p0 = scmp.ne.s32.totalorder %s9494_s29, %s15258_s30  ;;  %p15264_p2 = scmp.lt.s32.totalorder %s15258_s30, %s15258_s30 }
 0x7b6   :  { %14742 = vmatpush1.bf16.msra.mxu1 %v14741_v46  ;;  %v10542_v46 = vld [vmem:[%s20214_s5 + $0xf58] sm:$0xff] }
 0x7b7   :  { %14744 = vmatprep.subr.bf16.mxu1 %v14743_v40  ;;  %v14773_v40 = vpack.c.bf16 %v10537_v8, %v10535_v20  ;;  %v14775_v49 = vpack.c.bf16 %v10542_v46, %v10540_v28  ;;  %v9379_v20 = vld [vmem:[%s20216_s7 + $0x10] sm:$0xff]  ;;  %v9380_v8 = vld [vmem:[%s20216_s7 + $0x18] sm:$0xff]  ;;  %v9397_v28 = vld [vmem:[%s20216_s7 + $0xa0] sm:$0xff]  ;;  %p15265_p3 = por %p15264_p2, %p15263_p1 }
 0x7b8   :  { %v9398_v46 = vld [vmem:[%s20216_s7 + $0xa8] sm:$0xff] }
 0x7b9   :  { %p15266_p4 = pnand %p15265_p3, %p15259_p0 }
 0x7ba   :  { %14746 = vmatpush1.bf16.msra.mxu1 %v14745_v47  ;;  %v10546_v47 = vld [vmem:[%s20214_s5 + $0xf78] sm:$0xff] }
 0x7bb   :  { %14748 = vmatprep.subr.bf16.mxu1 %v14747_v30  ;;  %v14779_v30 = vpack.c.bf16 %v10546_v47, %v10544_v14  ;;  %v9399_v14 = vld [vmem:[%s20216_s7 + $0xb0] sm:$0xff]  ;;  %v9400_v47 = vld [vmem:[%s20216_s7 + $0xb8] sm:$0xff] }
 0x7be   :  { %14750 = vmatpush1.bf16.msra.mxu1 %v14749_v23  ;;  %v14781_v23 = vpack.c.bf16 %v10545_v41, %v10543_v1  ;;  %v9383_v1 = vld [vmem:[%s20216_s7 + $0x30] sm:$0xff]  ;;  %v9384_v41 = vld [vmem:[%s20216_s7 + $0x38] sm:$0xff] }
 0x7bf   :  { %14752 = vmatprep.subr.bf16.mxu1 %v14751_v37  ;;  %v14783_v37 = vpack.c.bf16 %v10550_v54, %v10548_v0  ;;  %v9401_v0 = vld [vmem:[%s20216_s7 + $0xc0] sm:$0xff]  ;;  %v9402_v54 = vld [vmem:[%s20216_s7 + $0xc8] sm:$0xff] }
 0x7c2   :  { %14754 = vmatpush1.bf16.msra.mxu1 %v14753_v59  ;;  %v14785_v59 = vpack.c.bf16 %v10549_v13, %v10547_v4  ;;  %v9385_v4 = vld [vmem:[%s20216_s7 + $0x40] sm:$0xff]  ;;  %v9386_v13 = vld [vmem:[%s20216_s7 + $0x48] sm:$0xff] }
 0x7c3   :  { %14756 = vmatprep.subr.bf16.mxu1 %v14755_v51  ;;  %v14787_v51 = vpack.c.bf16 %v10554_v17, %v10552_v55  ;;  %v9403_v55 = vld [vmem:[%s20216_s7 + $0xd0] sm:$0xff]  ;;  %v9404_v17 = vld [vmem:[%s20216_s7 + $0xd8] sm:$0xff] }
 0x7c6   :  { %14758 = vmatpush1.bf16.msra.mxu1 %v14757_v60  ;;  %v14789_v60 = vpack.c.bf16 %v10553_v9, %v10551_v24  ;;  %v9387_v24 = vld [vmem:[%s20216_s7 + $0x50] sm:$0xff]  ;;  %v9388_v9 = vld [vmem:[%s20216_s7 + $0x58] sm:$0xff] }
 0x7c7   :  { %14760 = vmatprep.subr.bf16.mxu1 %v14759_v45  ;;  %v14791_v45 = vpack.c.bf16 %v10558_v5, %v10556_v56  ;;  %v14821_v56 = vpack.c.bf16 %v9388_v9, %v9387_v24  ;;  %v9405_v5 = vld [vmem:[%s20216_s7 + $0xe0] sm:$0xff] }
 0x7c8   :  { %v14823_v6 = vpack.c.bf16 %v9406_v27, %v9405_v5 }
 0x7ca   :  { %14762 = vmatpush1.bf16.msra.mxu1 %v14761_v33  ;;  %v14793_v33 = vpack.c.bf16 %v10557_v36, %v10555_v11  ;;  %v9408_v11 = vld [vmem:[%s20216_s7 + $0xf8] sm:$0xff]  ;;  %v9391_v36 = vld [vmem:[%s20216_s7 + $0x70] sm:$0xff] }
 0x7cb   :  { %14764 = vmatprep.subr.bf16.mxu1 %v14763_v29  ;;  %v14795_v29 = vpack.c.bf16 %v10562_v42, %v10560_v62  ;;  %v9392_v62 = vld [vmem:[%s20216_s7 + $0x78] sm:$0xff] }
 0x7cc   :  { %v14829_v58 = vpack.c.bf16 %v9392_v62, %v9391_v36 }
 0x7ce   :  { %14766 = vmatpush1.bf16.msra.mxu1 %v14765_v53  ;;  %v14797_v53 = vpack.c.bf16 %v10561_v43, %v10559_v16 }
 0x7cf   :  { %14768 = vmatprep.subr.bf16.mxu1 %v14767_v25  ;;  %v14799_v25 = vpack.c.bf16 %v9394_v39, %v9393_v38 }
 0x7d1   :  { %9224 = vmatmul.mubr.f32.vlgmr.msra.gmra.mrb[166].mxu1 %v9157_v22  ;;  %v9282_v22 = vsel %vm7451_vm4, %v9281_v15, %v9244_v3 }
 0x7d2   :  { %14770 = vmatpush1.bf16.msra.mxu1 %v14769_v44  ;;  %9348 = vmatprep.mubr.f32.mxu1 %v15283_v2  ;;  %v14777_v2 = vpack.c.bf16 %v10541_v31, %v10539_v61  ;;  %v14801_v44 = vpack.c.bf16 %v9378_v57, %v9377_v48  ;;  %v9381_v61 = vld [vmem:[%s20216_s7 + $0x20] sm:$0xff]  ;;  %v9382_v31 = vld [vmem:[%s20216_s7 + $0x28] sm:$0xff] }
 0x7d3   :  { %14772 = vmatprep.subr.bf16.mxu1 %v14771_v12  ;;  %v14803_v12 = vpack.c.bf16 %v9396_v21, %v9395_v32  ;;  %v10563_v57 = vld [vmem:[%s20217_s8] ss:$0 sm:$0xff] }
 0x7d6   :  { %14774 = vmatpush1.bf16.msra.mxu1 %v14773_v40  ;;  %v14805_v40 = vpack.c.bf16 %v9380_v8, %v9379_v20 }
 0x7d7   :  { %14776 = vmatprep.subr.bf16.mxu1 %v14775_v49  ;;  %v14807_v49 = vpack.c.bf16 %v9398_v46, %v9397_v28 }
 0x7da   :  { %14778 = vmatpush1.bf16.msra.mxu1 %v14777_v2  ;;  %v14809_v2 = vpack.c.bf16 %v9382_v31, %v9381_v61 }
 0x7db   :  { %14780 = vmatprep.subr.bf16.mxu1 %v14779_v30  ;;  %v14811_v30 = vpack.c.bf16 %v9400_v47, %v9399_v14 }
 0x7de   :  { %14782 = vmatpush1.bf16.msra.mxu1 %v14781_v23  ;;  %v14813_v23 = vpack.c.bf16 %v9384_v41, %v9383_v1 }
 0x7df   :  { %14784 = vmatprep.subr.bf16.mxu1 %v14783_v37  ;;  %v14815_v37 = vpack.c.bf16 %v9402_v54, %v9401_v0 }
 0x7e2   :  { %14786 = vmatpush1.bf16.msra.mxu1 %v14785_v59  ;;  %v14817_v59 = vpack.c.bf16 %v9386_v13, %v9385_v4 }
 0x7e3   :  { %14788 = vmatprep.subr.bf16.mxu1 %v14787_v51  ;;  %v14819_v51 = vpack.c.bf16 %v9404_v17, %v9403_v55 }
 0x7e6   :  { %14790 = vmatpush1.bf16.msra.mxu1 %v14789_v60  ;;  %v9407_v60 = vld [vmem:[%s20216_s7 + $0xf0] sm:$0xff] }
 0x7e7   :  { %14792 = vmatprep.subr.bf16.mxu1 %v14791_v45  ;;  %v14825_v45 = vpack.c.bf16 %v9390_v63, %v9389_v7  ;;  %v14827_v42 = vpack.c.bf16 %v9408_v11, %v9407_v60 }
 0x7ea   :  { %14794 = vmatpush1.bf16.msra.mxu1 %v14793_v33  ;;  %v9360_v33 = vshrl.u32 %v9359_v34, 7 }
 0x7eb   :  { %14796 = vmatprep.subr.bf16.mxu1 %v14795_v29 }
 0x7ec   :  { %v9361_v26 = vsub.s32 0, %v9360_v33  ;;  %v9365_v50 = vsub.s32 1, %v9360_v33 }
 0x7ee   :  { %14798 = vmatpush1.bf16.msra.mxu1 %v14797_v53  ;;  %v9362_v29 = vrot.slane %v9357_v19, %v9361_v26  ;;  %v9366_v16 = vrot.slane %v9357_v19, %v9365_v50 }
 0x7ef   :  { %14800 = vmatprep.subr.bf16.mxu1 %v14799_v25 }
 0x7f1   :  { %9349 = vmatmul.mubr.f32.vlgmr.msra.gmra.mrb[166].mxu1 %v9282_v22 }
 0x7f2   :  { %14802 = vmatpush3.bf16.msra.mxu1 %v14801_v44 }
 0x7f3   :  { %14804 = vmatprep.subr.bf16.mxu1 %v14803_v12 }
 0x7f6   :  { %14806 = vmatpush3.bf16.msra.mxu1 %v14805_v40 }
 0x7f7   :  { %14808 = vmatprep.subr.bf16.mxu1 %v14807_v49 }
 0x7fa   :  { %14810 = vmatpush3.bf16.msra.mxu1 %v14809_v2 }
 0x7fb   :  { %14812 = vmatprep.subr.bf16.mxu1 %v14811_v30 }
 0x7fe   :  { %14814 = vmatpush3.bf16.msra.mxu1 %v14813_v23 }
 0x7ff   :  { %14816 = vmatprep.subr.bf16.mxu1 %v14815_v37 }
 0x802   :  { %14818 = vmatpush3.bf16.msra.mxu1 %v14817_v59 }
 0x803   :  { %14820 = vmatprep.subr.bf16.mxu1 %v14819_v51 }
 0x806   :  { %14822 = vmatpush3.bf16.msra.mxu1 %v14821_v56 }
 0x807   :  { %14824 = vmatprep.subr.bf16.mxu1 %v14823_v6 }
 0x80a   :  { %14826 = vmatpush3.bf16.msra.mxu1 %v14825_v45 }
 0x80b   :  { %14828 = vmatprep.subr.bf16.mxu1 %v14827_v42 }
 0x80e   :  { %14830 = vmatpush3.bf16.msra.mxu1 %v14829_v58 }
 0x8c4   :  { %v9350_v43 = vpop.f32.mrb[166].mxu1 }
 0x8c5   :  { %v9369_v52 = vadd.f32 %v9362_v29, %v9350_v43  ;;  %v9352_v35 = vpop.f32.mrb[167].mxu1 }
 0x8c6   :  { %v9370_v38 = vadd.f32 %v9366_v16, %v9352_v35 }
 0x8c7   :  { %v9373_v39 = vmul.f32 0.01, %v9369_v52  ;;  %vm9371_vm5 = vcmp.ge.f32.partialorder %v9369_v52, 0.0 }
 0x8c8   :  { %v9374_v53 = vmul.f32 0.01, %v9370_v38  ;;  %vm9372_vm6 = vcmp.ge.f32.partialorder %v9370_v38, 0.0 }
 0x8c9   :  { %v9375_v10 = vsel %vm9371_vm5, %v9369_v52, %v9373_v39 }
 0x8ca   :  { %v9376_v18 = vsel %vm9372_vm6, %v9370_v38, %v9374_v53 }
 0x8cb   :  { %9480 = vmatprep.mubr.f32.mxu1 %v9376_v18 }
 0x8cc   :  { %9481 = vmatmul.mubr.f32.vlgmr.msra.gmra.mrb[168].mxu1 %v9375_v10 }
 0x99f   :  { %v11628_v25 = vpop.f32.mrb[168].mxu1 }
 0x9a0   :  { %v11629_v48 = vpop.f32.mrb[169].mxu1 }
 0x9a1   :  { %v11630_v15 = vadd.f32 %v11629_v48, %v11628_v25 }
 0x9a3   :  { %v9483_v32 = vadd.f32 %v11630_v15, %v10563_v57 }
 0x9a5   :  { %9486 = vst [vmem:[#allocation4] sm:$0x3] %v9483_v32 }
 0x9a6   :  { %15269 = shalt.err (!%p15266_p4)
}
 0x9a7   :  { %s15270_s10 = scalar_lea.hbm %s20218_s9, 32 }
 0x9a8   :  { %p15271_p5 = scmp.ne.s32.totalorder %s20218_s9, %s15270_s10  ;;  %p15274_p6 = scmp.lt.u32.totalorder %s15270_s10, %s20218_s9 }
 0x9aa   :  { %p15276_p7 = pnand %p15274_p6, %p15271_p5 }
 0x9ac   :  { %15279 = shalt.err (!%p15276_p7)
}
 0x9ad   :  { %9496 = dma.vmem_to_hbm [thread:$0]  %s9494_s29, 32, %s20218_s9, [#allocation5]  }
 0x9ae   :  { %15280 = dma.done.wait [#allocation5], 32  }
 0x9af   :  { %15281 = vsyncadd [#allocation5], 4294967264 }
 0x9b0   :  { %9500 = vsyncpa [#allocation5], 1 }

</bundles_post_ra>
